<compile_context>
chip_gen: v5e
topology: v5e:2x2
jax: 0.10.0
libtpu: 0.0.40
codegen_flags: <defaults>
</compile_context>

<pallas_src>
from functools import partial

import numpy as np
import jax
import jax.numpy as jnp
from jax.experimental import pallas as pl
from jax.experimental.pallas import tpu as pltpu


# ----------------------------------------------------------------------------
# small helpers
# ----------------------------------------------------------------------------
def _round_up(n, m):
    return int(pl.cdiv(int(n), m)) * m


def _pick_tile(npad):
    """Largest lane tile in {512, 256, 128} dividing npad (npad % 128 == 0)."""
    for t in (512, 256, 128):
        if npad % t == 0:
            return t
    return int(npad)


# ----------------------------------------------------------------------------
# Pallas kernels
# ----------------------------------------------------------------------------
def _spconv_bn_act_kernel(nbr_ref, tbl_ref, w_ref, scale_ref, shift_ref, o_ref,
                          *, n_out, n_taps, apply_relu):
    """Fused sparse conv + folded BN (+ReLU) for one lane-tile of output points.

    nbr_ref   : (K, 1, TM) int32   rulebook: input column per tap (index >= n_in
                                   selects nothing -> zero contribution)
    tbl_ref   : (Cin, Npad_in) bf16  full input feature table (VMEM resident)
    w_ref     : (K, Cout, Cin) bf16  conv weights (VMEM resident)
    scale_ref : (Cout, 1) f32        folded BN scale
    shift_ref : (Cout, 1) f32        folded BN shift (+ folded conv bias)
    o_ref     : (Cout, TM) f32       output tile (lane-dense single store)
    """
    cout, tm = o_ref.shape
    tbl = tbl_ref[...]                                    # (Cin, Npad_in) bf16
    npad_in = tbl.shape[1]
    row_ids = jax.lax.broadcasted_iota(jnp.int32, (npad_in, tm), 0)

    acc = jnp.zeros((cout, tm), jnp.float32)
    # Static unroll over taps (K = 27 or 3).  Gather is done as a one-hot
    # matmul on the MXU (tables here are <= ~1k columns, so this is cheap and
    # guaranteed to lower).
    # TODO(synk): for large point clouds swap the one-hot gather for a
    # jnp.take / DMA gather of the VMEM-resident table.
    for k in range(n_taps):
        idx = nbr_ref[k]                                  # (1, TM) int32
        onehot = jnp.where(row_ids == idx, 1.0, 0.0).astype(jnp.bfloat16)
        gathered = jnp.dot(tbl, onehot,                   # (Cin, TM) MXU gather
                           preferred_element_type=jnp.float32)
        acc = acc + jnp.dot(w_ref[k], gathered.astype(jnp.bfloat16),
                            preferred_element_type=jnp.float32)

    y = acc * scale_ref[...] + shift_ref[...]             # folded BN (+ bias)
    if apply_relu:
        y = jnp.maximum(y, 0.0)
    # Keep padded output columns exactly zero so later layers can treat them as
    # "no tap" gather targets.
    col = pl.program_id(0) * tm + jax.lax.broadcasted_iota(jnp.int32, (cout, tm), 1)
    o_ref[...] = jnp.where(col < n_out, y, 0.0)


def _se_residual_relu_kernel(x_ref, gate_ref, id_ref, o_ref):
    """out = relu(x * se_gate + identity); all blocks (C, TM), lane-dense."""
    o_ref[...] = jnp.maximum(x_ref[...] * gate_ref[...] + id_ref[...], 0.0)


# ----------------------------------------------------------------------------
# Pallas wrappers
# ----------------------------------------------------------------------------
def spconv_layer(table_cn, rbt, prm, n_out, apply_relu):
    """One fused sparse conv block.  table_cn: (Cin, Npad_in) f32."""
    w, scale, shift = prm['w'], prm['scale'], prm['shift']
    k, cout, cin = w.shape
    npad_in = table_cn.shape[1]
    npad_out = rbt.shape[2]
    assert table_cn.shape[0] == cin
    tm = _pick_tile(npad_out)
    kernel = partial(_spconv_bn_act_kernel, n_out=int(n_out), n_taps=int(k),
                     apply_relu=bool(apply_relu))
    return pl.pallas_call(
        kernel,
        out_shape=jax.ShapeDtypeStruct((cout, npad_out), jnp.float32),
        grid=(npad_out // tm,),
        in_specs=[
            pl.BlockSpec((k, 1, tm), lambda i: (0, 0, i)),      # rulebook tile
            pl.BlockSpec((cin, npad_in), lambda i: (0, 0)),     # resident table
            pl.BlockSpec((k, cout, cin), lambda i: (0, 0, 0)),  # resident weights
            pl.BlockSpec((cout, 1), lambda i: (0, 0)),
            pl.BlockSpec((cout, 1), lambda i: (0, 0)),
        ],
        out_specs=pl.BlockSpec((cout, tm), lambda i: (0, i)),
        compiler_params=pltpu.CompilerParams(
            dimension_semantics=("parallel",)),
    )(rbt,
      table_cn.astype(jnp.bfloat16),            # bf16 at the call boundary
      w.astype(jnp.bfloat16),
      scale.reshape(cout, 1).astype(jnp.float32),
      shift.reshape(cout, 1).astype(jnp.float32))


def pallas_se_residual_relu(x_cn, gate_cn, identity_cn):
    c, npad = x_cn.shape
    tm = _pick_tile(npad)
    return pl.pallas_call(
        _se_residual_relu_kernel,
        out_shape=jax.ShapeDtypeStruct((c, npad), jnp.float32),
        grid=(npad // tm,),
        in_specs=[pl.BlockSpec((c, tm), lambda i: (0, i)) for _ in range(3)],
        out_specs=pl.BlockSpec((c, tm), lambda i: (0, i)),
        compiler_params=pltpu.CompilerParams(
            dimension_semantics=("parallel",)),
    )(x_cn.astype(jnp.float32), gate_cn.astype(jnp.float32),
      identity_cn.astype(jnp.float32))


# ----------------------------------------------------------------------------
# Host-side sparse structure (rulebooks) — spconv indice-generation equivalent
# ----------------------------------------------------------------------------
def conv_out_shape(in_shape, k, s, p):
    return tuple((d + 2 * pp - kk) // ss + 1
                 for d, kk, ss, pp in zip(in_shape, k, s, p))


def downsample_coords(in_coords, out_shape, kernel, stride, pad):
    """Active output sites of a (non-submanifold) SparseConv3d."""
    kd_, kh_, kw_ = kernel
    sd, sh, sw = stride
    pd, ph, pw = pad
    Do, Ho, Wo = out_shape
    out_set = set()
    for b, z, y, x in in_coords.tolist():
        for kd in range(kd_):
            t = z + pd - kd
            if t % sd or not (0 <= t // sd < Do):
                continue
            for kh in range(kh_):
                u = y + ph - kh
                if u % sh or not (0 <= u // sh < Ho):
                    continue
                for kw in range(kw_):
                    v = x + pw - kw
                    if v % sw or not (0 <= v // sw < Wo):
                        continue
                    out_set.add((b, t // sd, u // sh, v // sw))
    return np.array(sorted(out_set), dtype=np.int32)


def build_rulebook(in_coords, out_coords, kernel, stride, pad):
    """nbr[o, k] = input row for tap k of output o (sentinel = N_in => no tap)."""
    kd_, kh_, kw_ = kernel
    sd, sh, sw = stride
    pd, ph, pw = pad
    cmap = {tuple(c): i for i, c in enumerate(in_coords.tolist())}
    n_in = in_coords.shape[0]
    K = kd_ * kh_ * kw_
    nbr = np.full((out_coords.shape[0], K), n_in, dtype=np.int32)
    for o, (b, z, y, x) in enumerate(out_coords.tolist()):
        kidx = 0
        for kd in range(kd_):
            zi = z * sd - pd + kd
            for kh in range(kh_):
                yi = y * sh - ph + kh
                for kw in range(kw_):
                    xi = x * sw - pw + kw
                    hit = cmap.get((b, zi, yi, xi))
                    if hit is not None:
                        nbr[o, kidx] = hit
                    kidx += 1
    return nbr


def pack_rulebook(rb, n_in):
    """(N_out, K) -> (K, 1, Npad_out) int32, padded with the 'no tap' sentinel."""
    n_out, k = rb.shape
    npad = _round_up(max(n_out, 1), 128)
    packed = np.full((k, 1, npad), n_in, dtype=np.int32)
    packed[:, 0, :n_out] = rb.T
    return jnp.asarray(packed), n_out, npad


def batch_segments(coords, batch_size):
    """Coords are sorted by batch -> contiguous per-batch column ranges."""
    bid = coords[:, 0]
    segs, start = [], 0
    for b in range(batch_size):
        cnt = int(np.sum(bid == b))
        segs.append((start, start + cnt))
        start += cnt
    return segs, bid.astype(np.int32)


# ----------------------------------------------------------------------------
# SparseSEBasicBlock
# ----------------------------------------------------------------------------
def se_basic_block(x_cn, rbt, n_pts, segs, batch_ids, prm):
    """conv1+bn1+relu -> conv2+bn2 -> SE gate -> +identity -> relu."""
    y1 = spconv_layer(
        x_cn, rbt,
        {'w': prm['w1'], 'scale': prm['scale1'], 'shift': prm['shift1']},
        n_pts, apply_relu=True)
    y2 = spconv_layer(
        y1, rbt,
        {'w': prm['w2'], 'scale': prm['scale2'], 'shift': prm['shift2']},
        n_pts, apply_relu=False)

    # SE squeeze-excitation: per-batch global average pool + tiny MLP (plain
    # JAX glue; C -> C/16 -> C matrices are far below MXU tile size).
    means = jnp.stack([jnp.mean(y2[:, s:e], axis=1) for s, e in segs], axis=0)  # (B, C)
    hid = jax.nn.relu(means @ prm['se_fc1'].T)
    gate = jax.nn.sigmoid(hid @ prm['se_fc2'].T)                                # (B, C)

    c, npad = x_cn.shape
    gate_cn = jnp.zeros((c, npad), jnp.float32).at[:, :n_pts].set(
        gate.T[:, batch_ids])
    return pallas_se_residual_relu(y2, gate_cn, x_cn)


# ----------------------------------------------------------------------------
# Parameters (deterministic, synthetic; BN folded in eval mode, eps=1e-3)
# ----------------------------------------------------------------------------
def init_params(key):
    keys = iter(jax.random.split(key, 256))

    def nk():
        return next(keys)

    def conv_w(kvol, cin, cout):
        # channels-first conv weight: (K, Cout, Cin)
        return (jax.random.normal(nk(), (kvol, cout, cin), jnp.float32)
                / np.sqrt(kvol * cin))

    def bn_stats(c):
        gamma = 1.0 + 0.05 * jax.random.normal(nk(), (c,), jnp.float32)
        beta = 0.05 * jax.random.normal(nk(), (c,), jnp.float32)
        mean = 0.05 * jax.random.normal(nk(), (c,), jnp.float32)
        var = 1.0 + 0.1 * jnp.abs(jax.random.normal(nk(), (c,), jnp.float32))
        return gamma, beta, mean, var

    def fold_bn(gamma, beta, mean, var, conv_bias=None, eps=1e-3):
        scale = gamma / jnp.sqrt(var + eps)
        shift = beta - scale * mean
        if conv_bias is not None:            # BN(conv + b) = scale*conv + (shift + scale*b)
            shift = shift + scale * conv_bias
        return scale, shift

    def conv_block(kvol, cin, cout):          # conv (bias=False) + BN
        w = conv_w(kvol, cin, cout)
        scale, shift = fold_bn(*bn_stats(cout))
        return {'w': w, 'scale': scale, 'shift': shift}

    def se_block(c, reduction=16):            # SparseSEBasicBlock (convs have bias)
        cr = max(c // reduction, 1)
        w1 = conv_w(27, c, c)
        b1 = 0.05 * jax.random.normal(nk(), (c,), jnp.float32)
        s1, sh1 = fold_bn(*bn_stats(c), conv_bias=b1)
        w2 = conv_w(27, c, c)
        b2 = 0.05 * jax.random.normal(nk(), (c,), jnp.float32)
        s2, sh2 = fold_bn(*bn_stats(c), conv_bias=b2)
        fc1 = jax.random.normal(nk(), (cr, c), jnp.float32) / np.sqrt(c)
        fc2 = jax.random.normal(nk(), (c, cr), jnp.float32) / np.sqrt(cr)
        return {'w1': w1, 'scale1': s1, 'shift1': sh1,
                'w2': w2, 'scale2': s2, 'shift2': sh2,
                'se_fc1': fc1, 'se_fc2': fc2}

    p = {}
    ci = conv_block(27, 4, 16)
    # pad the 4 input channels to 8 with zero weights (8-aligned sublane dim)
    ci['w'] = jnp.pad(ci['w'], ((0, 0), (0, 0), (0, 4)))
    p['conv_input'] = ci
    p['res1_0'], p['res1_1'] = se_block(16), se_block(16)
    p['down2'] = conv_block(27, 16, 32)
    p['res2_0'], p['res2_1'] = se_block(32), se_block(32)
    p['down3'] = conv_block(27, 32, 64)
    p['res3_0'], p['res3_1'] = se_block(64), se_block(64)
    p['down4'] = conv_block(27, 64, 128)
    p['res4_0'], p['res4_1'] = se_block(128), se_block(128)
    p['conv_out'] = conv_block(3, 128, 128)
    return p


# ----------------------------------------------------------------------------
# Full forward (VoxelSEResBackBone8x)
# ----------------------------------------------------------------------------
def voxel_se_res_backbone_forward(voxel_features, voxel_coords, batch_size,
                                  sparse_shape, params):
    P = params
    coords1 = np.asarray(voxel_coords, np.int32)
    K3, S1, P1 = (3, 3, 3), (1, 1, 1), (1, 1, 1)

    # ---- host-side indice generation (spconv rulebooks) ----------------------
    shape1 = tuple(sparse_shape)
    shape2 = conv_out_shape(shape1, K3, (2, 2, 2), (1, 1, 1))
    shape3 = conv_out_shape(shape2, K3, (2, 2, 2), (1, 1, 1))
    shape4 = conv_out_shape(shape3, K3, (2, 2, 2), (0, 1, 1))
    shape_o = conv_out_shape(shape4, (3, 1, 1), (2, 1, 1), (0, 0, 0))

    coords2 = downsample_coords(coords1, shape2, K3, (2, 2, 2), (1, 1, 1))
    coords3 = downsample_coords(coords2, shape3, K3, (2, 2, 2), (1, 1, 1))
    coords4 = downsample_coords(coords3, shape4, K3, (2, 2, 2), (0, 1, 1))
    coords_o = downsample_coords(coords4, shape_o, (3, 1, 1), (2, 1, 1), (0, 0, 0))

    n1, n2, n3, n4, no = (c.shape[0] for c in (coords1, coords2, coords3,
                                               coords4, coords_o))

    rbt1, _, npad1 = pack_rulebook(build_rulebook(coords1, coords1, K3, S1, P1), n1)
    rbt_d2, _, _ = pack_rulebook(
        build_rulebook(coords1, coords2, K3, (2, 2, 2), (1, 1, 1)), n1)
    rbt2, _, _ = pack_rulebook(build_rulebook(coords2, coords2, K3, S1, P1), n2)
    rbt_d3, _, _ = pack_rulebook(
        build_rulebook(coords2, coords3, K3, (2, 2, 2), (1, 1, 1)), n2)
    rbt3, _, _ = pack_rulebook(build_rulebook(coords3, coords3, K3, S1, P1), n3)
    rbt_d4, _, _ = pack_rulebook(
        build_rulebook(coords3, coords4, K3, (2, 2, 2), (0, 1, 1)), n3)
    rbt4, _, _ = pack_rulebook(build_rulebook(coords4, coords4, K3, S1, P1), n4)
    rbt_o, _, _ = pack_rulebook(
        build_rulebook(coords4, coords_o, (3, 1, 1), (2, 1, 1), (0, 0, 0)), n4)

    seg1, bid1 = batch_segments(coords1, batch_size)
    seg2, bid2 = batch_segments(coords2, batch_size)
    seg3, bid3 = batch_segments(coords3, batch_size)
    seg4, bid4 = batch_segments(coords4, batch_size)

    # ---- input feature table: channels-first, zero-padded --------------------
    feats = jnp.asarray(voxel_features, jnp.float32)
    table1 = jnp.zeros((8, npad1), jnp.float32).at[:feats.shape[1], :n1].set(feats.T)

    # ---- network --------------------------------------------------------------
    x = spconv_layer(table1, rbt1, P['conv_input'], n1, apply_relu=True)        # (16, .)
    x = se_basic_block(x, rbt1, n1, seg1, bid1, P['res1_0'])
    x_conv1 = se_basic_block(x, rbt1, n1, seg1, bid1, P['res1_1'])

    t = spconv_layer(x_conv1, rbt_d2, P['down2'], n2, apply_relu=True)          # (32, .)
    t = se_basic_block(t, rbt2, n2, seg2, bid2, P['res2_0'])
    x_conv2 = se_basic_block(t, rbt2, n2, seg2, bid2, P['res2_1'])

    t = spconv_layer(x_conv2, rbt_d3, P['down3'], n3, apply_relu=True)          # (64, .)
    t = se_basic_block(t, rbt3, n3, seg3, bid3, P['res3_0'])
    x_conv3 = se_basic_block(t, rbt3, n3, seg3, bid3, P['res3_1'])

    t = spconv_layer(x_conv3, rbt_d4, P['down4'], n4, apply_relu=True)          # (128, .)
    t = se_basic_block(t, rbt4, n4, seg4, bid4, P['res4_0'])
    x_conv4 = se_basic_block(t, rbt4, n4, seg4, bid4, P['res4_1'])

    out = spconv_layer(x_conv4, rbt_o, P['conv_out'], no, apply_relu=True)      # (128, .)

    def rows(cn, n):                          # back to spconv's (N, C) at the boundary
        return cn[:, :n].T

    return {
        'encoded_spconv_tensor': {
            'features': rows(out, no),
            'indices': jnp.asarray(coords_o, jnp.int32),
        },
        'encoded_spconv_tensor_stride': 8,
        'multi_scale_3d_features': {
            'x_conv1': {'features': rows(x_conv1, n1), 'indices': jnp.asarray(coords1)},
            'x_conv2': {'features': rows(x_conv2, n2), 'indices': jnp.asarray(coords2)},
            'x_conv3': {'features': rows(x_conv3, n3), 'indices': jnp.asarray(coords3)},
            'x_conv4': {'features': rows(x_conv4, n4), 'indices': jnp.asarray(coords4)},
        },
        'multi_scale_3d_strides': {'x_conv1': 1, 'x_conv2': 2,
                                   'x_conv3': 4, 'x_conv4': 8},
    }


# ----------------------------------------------------------------------------
# Main
# ----------------------------------------------------------------------------
if __name__ == "__main__":
    BATCH = 2
    VOXELS_PER_BATCH = 80
    IN_CH = 4
    VOXEL_SIZE = np.array([0.1, 0.1, 0.2])
    PC_RANGE = np.array([0.0, -0.8, -2.4, 1.6, 0.8, 2.4])
    GRID_SIZE = np.round((PC_RANGE[3:] - PC_RANGE[:3]) / VOXEL_SIZE).astype(int)   # [16,16,24]
    SPARSE_SHAPE = tuple(int(v) for v in (GRID_SIZE[::-1] + np.array([1, 0, 0])))  # (25,16,16)

    key = jax.random.PRNGKey(0)
    key, kc, kf, kp = jax.random.split(key, 4)

    X, Y, Z = int(GRID_SIZE[0]), int(GRID_SIZE[1]), int(GRID_SIZE[2])
    coords_list = []
    for b in range(BATCH):
        kb = jax.random.fold_in(kc, b)
        flat = np.sort(np.array(jax.random.permutation(kb, Z * Y * X))[:VOXELS_PER_BATCH])
        z = flat // (Y * X)
        y = (flat // X) % Y
        x = flat % X
        coords_list.append(np.stack([np.full_like(z, b), z, y, x], axis=1))
    voxel_coords = np.concatenate(coords_list).astype(np.int32)     # (N, 4) [b,z,y,x]
    N_total = voxel_coords.shape[0]
    voxel_features = jax.random.normal(kf, (N_total, IN_CH), dtype=jnp.float32)

    params = init_params(kp)

    out = voxel_se_res_backbone_forward(voxel_features, voxel_coords, BATCH,
                                        SPARSE_SHAPE, params)
    jax.block_until_ready(out['encoded_spconv_tensor']['features'])
    print("KERNEL_OK")
</pallas_src>

<mosaic_0001>
module attributes {stable_mosaic.version = 11 : i64} {
  func.func @_spconv_bn_act_kernel(%arg0: i32, %arg1: memref<27x1x256xi32, #tpu.memory_space<vmem>>, %arg2: memref<8x256xbf16, #tpu.memory_space<vmem>>, %arg3: memref<27x16x8xbf16, #tpu.memory_space<vmem>>, %arg4: memref<16x1xf32, #tpu.memory_space<vmem>>, %arg5: memref<16x1xf32, #tpu.memory_space<vmem>>, %arg6: memref<16x256xf32, #tpu.memory_space<vmem>>) attributes {dimension_semantics = [#tpu.dimension_semantics<parallel>], iteration_bounds = array<i64: 1>, scalar_prefetch = 0 : i64, scratch_operands = 0 : i64, tpu.core_type = #tpu.core_type<tc>, window_params = [{transform_indices = @transform_0, window_bounds = array<i64: 27, 1, 256>}, {pipeline_mode = #tpu.pipeline_mode<synchronous>, transform_indices = @transform_1, window_bounds = array<i64: 8, 256>}, {pipeline_mode = #tpu.pipeline_mode<synchronous>, transform_indices = @transform_2, window_bounds = array<i64: 27, 16, 8>}, {pipeline_mode = #tpu.pipeline_mode<synchronous>, transform_indices = @transform_3, window_bounds = array<i64: 16, 1>}, {pipeline_mode = #tpu.pipeline_mode<synchronous>, transform_indices = @transform_4, window_bounds = array<i64: 16, 1>}, {transform_indices = @transform_5, window_bounds = array<i64: 16, 256>}]} {
    %c0 = arith.constant 0 : index
    %c0_0 = arith.constant 0 : index
    %0 = vector.load %arg2[%c0, %c0_0] : memref<8x256xbf16, #tpu.memory_space<vmem>>, vector<8x256xbf16>
    %1 = tpu.iota {dimensions = array<i32: 0>} : vector<256x256xi32>
    %cst = arith.constant 0.000000e+00 : f32
    %2 = vector.broadcast %cst : f32 to vector<16x256xf32>
    %c0_1 = arith.constant 0 : index
    %c0_2 = arith.constant 0 : index
    %c0_3 = arith.constant 0 : index
    %3 = vector.load %arg1[%c0_1, %c0_2, %c0_3] : memref<27x1x256xi32, #tpu.memory_space<vmem>>, vector<1x1x256xi32>
    %4 = vector.shape_cast %3 : vector<1x1x256xi32> to vector<1x256xi32>
    %5 = vector.broadcast %4 : vector<1x256xi32> to vector<256x256xi32>
    %6 = arith.cmpi eq, %1, %5 : vector<256x256xi32>
    %cst_4 = arith.constant 1.000000e+00 : f32
    %cst_5 = arith.constant 0.000000e+00 : f32
    %7 = vector.broadcast %cst_4 : f32 to vector<256x256xf32>
    %8 = vector.broadcast %cst_5 : f32 to vector<256x256xf32>
    %9 = arith.select %6, %7, %8 : vector<256x256xi1>, vector<256x256xf32>
    %10 = arith.truncf %9 : vector<256x256xf32> to vector<256x256xbf16>
    %cst_6 = arith.constant dense<0.000000e+00> : vector<8x256xf32>
    %11 = tpu.matmul %0, %10, %cst_6 {dimension_numbers = #tpu.dot_dimension_numbers<[1], [0], [0], [1], [0, 0, 1, 1], [], []>} : vector<8x256xbf16>, vector<256x256xbf16>, vector<8x256xf32> -> vector<8x256xf32>
    %c0_7 = arith.constant 0 : index
    %c0_8 = arith.constant 0 : index
    %c0_9 = arith.constant 0 : index
    %12 = vector.load %arg3[%c0_7, %c0_8, %c0_9] : memref<27x16x8xbf16, #tpu.memory_space<vmem>>, vector<1x16x8xbf16>
    %13 = vector.shape_cast %12 : vector<1x16x8xbf16> to vector<16x8xbf16>
    %14 = arith.truncf %11 : vector<8x256xf32> to vector<8x256xbf16>
    %cst_10 = arith.constant dense<0.000000e+00> : vector<16x256xf32>
    %15 = tpu.matmul %13, %14, %cst_10 {dimension_numbers = #tpu.dot_dimension_numbers<[1], [0], [0], [1], [0, 0, 1, 1], [], []>} : vector<16x8xbf16>, vector<8x256xbf16>, vector<16x256xf32> -> vector<16x256xf32>
    %16 = arith.addf %2, %15 : vector<16x256xf32>
    %c1 = arith.constant 1 : index
    %c0_11 = arith.constant 0 : index
    %c0_12 = arith.constant 0 : index
    %17 = vector.load %arg1[%c1, %c0_11, %c0_12] : memref<27x1x256xi32, #tpu.memory_space<vmem>>, vector<1x1x256xi32>
    %18 = vector.shape_cast %17 : vector<1x1x256xi32> to vector<1x256xi32>
    %19 = vector.broadcast %18 : vector<1x256xi32> to vector<256x256xi32>
    %20 = arith.cmpi eq, %1, %19 : vector<256x256xi32>
    %cst_13 = arith.constant 1.000000e+00 : f32
    %cst_14 = arith.constant 0.000000e+00 : f32
    %21 = vector.broadcast %cst_13 : f32 to vector<256x256xf32>
    %22 = vector.broadcast %cst_14 : f32 to vector<256x256xf32>
    %23 = arith.select %20, %21, %22 : vector<256x256xi1>, vector<256x256xf32>
    %24 = arith.truncf %23 : vector<256x256xf32> to vector<256x256xbf16>
    %cst_15 = arith.constant dense<0.000000e+00> : vector<8x256xf32>
    %25 = tpu.matmul %0, %24, %cst_15 {dimension_numbers = #tpu.dot_dimension_numbers<[1], [0], [0], [1], [0, 0, 1, 1], [], []>} : vector<8x256xbf16>, vector<256x256xbf16>, vector<8x256xf32> -> vector<8x256xf32>
    %c1_16 = arith.constant 1 : index
    %c0_17 = arith.constant 0 : index
    %c0_18 = arith.constant 0 : index
    %26 = vector.load %arg3[%c1_16, %c0_17, %c0_18] : memref<27x16x8xbf16, #tpu.memory_space<vmem>>, vector<1x16x8xbf16>
    %27 = vector.shape_cast %26 : vector<1x16x8xbf16> to vector<16x8xbf16>
    %28 = arith.truncf %25 : vector<8x256xf32> to vector<8x256xbf16>
    %cst_19 = arith.constant dense<0.000000e+00> : vector<16x256xf32>
    %29 = tpu.matmul %27, %28, %cst_19 {dimension_numbers = #tpu.dot_dimension_numbers<[1], [0], [0], [1], [0, 0, 1, 1], [], []>} : vector<16x8xbf16>, vector<8x256xbf16>, vector<16x256xf32> -> vector<16x256xf32>
    %30 = arith.addf %16, %29 : vector<16x256xf32>
    %c2 = arith.constant 2 : index
    %c0_20 = arith.constant 0 : index
    %c0_21 = arith.constant 0 : index
    %31 = vector.load %arg1[%c2, %c0_20, %c0_21] : memref<27x1x256xi32, #tpu.memory_space<vmem>>, vector<1x1x256xi32>
    %32 = vector.shape_cast %31 : vector<1x1x256xi32> to vector<1x256xi32>
    %33 = vector.broadcast %32 : vector<1x256xi32> to vector<256x256xi32>
    %34 = arith.cmpi eq, %1, %33 : vector<256x256xi32>
    %cst_22 = arith.constant 1.000000e+00 : f32
    %cst_23 = arith.constant 0.000000e+00 : f32
    %35 = vector.broadcast %cst_22 : f32 to vector<256x256xf32>
    %36 = vector.broadcast %cst_23 : f32 to vector<256x256xf32>
    %37 = arith.select %34, %35, %36 : vector<256x256xi1>, vector<256x256xf32>
    %38 = arith.truncf %37 : vector<256x256xf32> to vector<256x256xbf16>
    %cst_24 = arith.constant dense<0.000000e+00> : vector<8x256xf32>
    %39 = tpu.matmul %0, %38, %cst_24 {dimension_numbers = #tpu.dot_dimension_numbers<[1], [0], [0], [1], [0, 0, 1, 1], [], []>} : vector<8x256xbf16>, vector<256x256xbf16>, vector<8x256xf32> -> vector<8x256xf32>
    %c2_25 = arith.constant 2 : index
    %c0_26 = arith.constant 0 : index
    %c0_27 = arith.constant 0 : index
    %40 = vector.load %arg3[%c2_25, %c0_26, %c0_27] : memref<27x16x8xbf16, #tpu.memory_space<vmem>>, vector<1x16x8xbf16>
    %41 = vector.shape_cast %40 : vector<1x16x8xbf16> to vector<16x8xbf16>
    %42 = arith.truncf %39 : vector<8x256xf32> to vector<8x256xbf16>
    %cst_28 = arith.constant dense<0.000000e+00> : vector<16x256xf32>
    %43 = tpu.matmul %41, %42, %cst_28 {dimension_numbers = #tpu.dot_dimension_numbers<[1], [0], [0], [1], [0, 0, 1, 1], [], []>} : vector<16x8xbf16>, vector<8x256xbf16>, vector<16x256xf32> -> vector<16x256xf32>
    %44 = arith.addf %30, %43 : vector<16x256xf32>
    %c3 = arith.constant 3 : index
    %c0_29 = arith.constant 0 : index
    %c0_30 = arith.constant 0 : index
    %45 = vector.load %arg1[%c3, %c0_29, %c0_30] : memref<27x1x256xi32, #tpu.memory_space<vmem>>, vector<1x1x256xi32>
    %46 = vector.shape_cast %45 : vector<1x1x256xi32> to vector<1x256xi32>
    %47 = vector.broadcast %46 : vector<1x256xi32> to vector<256x256xi32>
    %48 = arith.cmpi eq, %1, %47 : vector<256x256xi32>
    %cst_31 = arith.constant 1.000000e+00 : f32
    %cst_32 = arith.constant 0.000000e+00 : f32
    %49 = vector.broadcast %cst_31 : f32 to vector<256x256xf32>
    %50 = vector.broadcast %cst_32 : f32 to vector<256x256xf32>
    %51 = arith.select %48, %49, %50 : vector<256x256xi1>, vector<256x256xf32>
    %52 = arith.truncf %51 : vector<256x256xf32> to vector<256x256xbf16>
    %cst_33 = arith.constant dense<0.000000e+00> : vector<8x256xf32>
    %53 = tpu.matmul %0, %52, %cst_33 {dimension_numbers = #tpu.dot_dimension_numbers<[1], [0], [0], [1], [0, 0, 1, 1], [], []>} : vector<8x256xbf16>, vector<256x256xbf16>, vector<8x256xf32> -> vector<8x256xf32>
    %c3_34 = arith.constant 3 : index
    %c0_35 = arith.constant 0 : index
    %c0_36 = arith.constant 0 : index
    %54 = vector.load %arg3[%c3_34, %c0_35, %c0_36] : memref<27x16x8xbf16, #tpu.memory_space<vmem>>, vector<1x16x8xbf16>
    %55 = vector.shape_cast %54 : vector<1x16x8xbf16> to vector<16x8xbf16>
    %56 = arith.truncf %53 : vector<8x256xf32> to vector<8x256xbf16>
    %cst_37 = arith.constant dense<0.000000e+00> : vector<16x256xf32>
    %57 = tpu.matmul %55, %56, %cst_37 {dimension_numbers = #tpu.dot_dimension_numbers<[1], [0], [0], [1], [0, 0, 1, 1], [], []>} : vector<16x8xbf16>, vector<8x256xbf16>, vector<16x256xf32> -> vector<16x256xf32>
    %58 = arith.addf %44, %57 : vector<16x256xf32>
    %c4 = arith.constant 4 : index
    %c0_38 = arith.constant 0 : index
    %c0_39 = arith.constant 0 : index
    %59 = vector.load %arg1[%c4, %c0_38, %c0_39] : memref<27x1x256xi32, #tpu.memory_space<vmem>>, vector<1x1x256xi32>
    %60 = vector.shape_cast %59 : vector<1x1x256xi32> to vector<1x256xi32>
    %61 = vector.broadcast %60 : vector<1x256xi32> to vector<256x256xi32>
    %62 = arith.cmpi eq, %1, %61 : vector<256x256xi32>
    %cst_40 = arith.constant 1.000000e+00 : f32
    %cst_41 = arith.constant 0.000000e+00 : f32
    %63 = vector.broadcast %cst_40 : f32 to vector<256x256xf32>
    %64 = vector.broadcast %cst_41 : f32 to vector<256x256xf32>
    %65 = arith.select %62, %63, %64 : vector<256x256xi1>, vector<256x256xf32>
    %66 = arith.truncf %65 : vector<256x256xf32> to vector<256x256xbf16>
    %cst_42 = arith.constant dense<0.000000e+00> : vector<8x256xf32>
    %67 = tpu.matmul %0, %66, %cst_42 {dimension_numbers = #tpu.dot_dimension_numbers<[1], [0], [0], [1], [0, 0, 1, 1], [], []>} : vector<8x256xbf16>, vector<256x256xbf16>, vector<8x256xf32> -> vector<8x256xf32>
    %c4_43 = arith.constant 4 : index
    %c0_44 = arith.constant 0 : index
    %c0_45 = arith.constant 0 : index
    %68 = vector.load %arg3[%c4_43, %c0_44, %c0_45] : memref<27x16x8xbf16, #tpu.memory_space<vmem>>, vector<1x16x8xbf16>
    %69 = vector.shape_cast %68 : vector<1x16x8xbf16> to vector<16x8xbf16>
    %70 = arith.truncf %67 : vector<8x256xf32> to vector<8x256xbf16>
    %cst_46 = arith.constant dense<0.000000e+00> : vector<16x256xf32>
    %71 = tpu.matmul %69, %70, %cst_46 {dimension_numbers = #tpu.dot_dimension_numbers<[1], [0], [0], [1], [0, 0, 1, 1], [], []>} : vector<16x8xbf16>, vector<8x256xbf16>, vector<16x256xf32> -> vector<16x256xf32>
    %72 = arith.addf %58, %71 : vector<16x256xf32>
    %c5 = arith.constant 5 : index
    %c0_47 = arith.constant 0 : index
    %c0_48 = arith.constant 0 : index
    %73 = vector.load %arg1[%c5, %c0_47, %c0_48] : memref<27x1x256xi32, #tpu.memory_space<vmem>>, vector<1x1x256xi32>
    %74 = vector.shape_cast %73 : vector<1x1x256xi32> to vector<1x256xi32>
    %75 = vector.broadcast %74 : vector<1x256xi32> to vector<256x256xi32>
    %76 = arith.cmpi eq, %1, %75 : vector<256x256xi32>
    %cst_49 = arith.constant 1.000000e+00 : f32
    %cst_50 = arith.constant 0.000000e+00 : f32
    %77 = vector.broadcast %cst_49 : f32 to vector<256x256xf32>
    %78 = vector.broadcast %cst_50 : f32 to vector<256x256xf32>
    %79 = arith.select %76, %77, %78 : vector<256x256xi1>, vector<256x256xf32>
    %80 = arith.truncf %79 : vector<256x256xf32> to vector<256x256xbf16>
    %cst_51 = arith.constant dense<0.000000e+00> : vector<8x256xf32>
    %81 = tpu.matmul %0, %80, %cst_51 {dimension_numbers = #tpu.dot_dimension_numbers<[1], [0], [0], [1], [0, 0, 1, 1], [], []>} : vector<8x256xbf16>, vector<256x256xbf16>, vector<8x256xf32> -> vector<8x256xf32>
    %c5_52 = arith.constant 5 : index
    %c0_53 = arith.constant 0 : index
    %c0_54 = arith.constant 0 : index
    %82 = vector.load %arg3[%c5_52, %c0_53, %c0_54] : memref<27x16x8xbf16, #tpu.memory_space<vmem>>, vector<1x16x8xbf16>
    %83 = vector.shape_cast %82 : vector<1x16x8xbf16> to vector<16x8xbf16>
    %84 = arith.truncf %81 : vector<8x256xf32> to vector<8x256xbf16>
    %cst_55 = arith.constant dense<0.000000e+00> : vector<16x256xf32>
    %85 = tpu.matmul %83, %84, %cst_55 {dimension_numbers = #tpu.dot_dimension_numbers<[1], [0], [0], [1], [0, 0, 1, 1], [], []>} : vector<16x8xbf16>, vector<8x256xbf16>, vector<16x256xf32> -> vector<16x256xf32>
    %86 = arith.addf %72, %85 : vector<16x256xf32>
    %c6 = arith.constant 6 : index
    %c0_56 = arith.constant 0 : index
    %c0_57 = arith.constant 0 : index
    %87 = vector.load %arg1[%c6, %c0_56, %c0_57] : memref<27x1x256xi32, #tpu.memory_space<vmem>>, vector<1x1x256xi32>
    %88 = vector.shape_cast %87 : vector<1x1x256xi32> to vector<1x256xi32>
    %89 = vector.broadcast %88 : vector<1x256xi32> to vector<256x256xi32>
    %90 = arith.cmpi eq, %1, %89 : vector<256x256xi32>
    %cst_58 = arith.constant 1.000000e+00 : f32
    %cst_59 = arith.constant 0.000000e+00 : f32
    %91 = vector.broadcast %cst_58 : f32 to vector<256x256xf32>
    %92 = vector.broadcast %cst_59 : f32 to vector<256x256xf32>
    %93 = arith.select %90, %91, %92 : vector<256x256xi1>, vector<256x256xf32>
    %94 = arith.truncf %93 : vector<256x256xf32> to vector<256x256xbf16>
    %cst_60 = arith.constant dense<0.000000e+00> : vector<8x256xf32>
    %95 = tpu.matmul %0, %94, %cst_60 {dimension_numbers = #tpu.dot_dimension_numbers<[1], [0], [0], [1], [0, 0, 1, 1], [], []>} : vector<8x256xbf16>, vector<256x256xbf16>, vector<8x256xf32> -> vector<8x256xf32>
    %c6_61 = arith.constant 6 : index
    %c0_62 = arith.constant 0 : index
    %c0_63 = arith.constant 0 : index
    %96 = vector.load %arg3[%c6_61, %c0_62, %c0_63] : memref<27x16x8xbf16, #tpu.memory_space<vmem>>, vector<1x16x8xbf16>
    %97 = vector.shape_cast %96 : vector<1x16x8xbf16> to vector<16x8xbf16>
    %98 = arith.truncf %95 : vector<8x256xf32> to vector<8x256xbf16>
    %cst_64 = arith.constant dense<0.000000e+00> : vector<16x256xf32>
    %99 = tpu.matmul %97, %98, %cst_64 {dimension_numbers = #tpu.dot_dimension_numbers<[1], [0], [0], [1], [0, 0, 1, 1], [], []>} : vector<16x8xbf16>, vector<8x256xbf16>, vector<16x256xf32> -> vector<16x256xf32>
    %100 = arith.addf %86, %99 : vector<16x256xf32>
    %c7 = arith.constant 7 : index
    %c0_65 = arith.constant 0 : index
    %c0_66 = arith.constant 0 : index
    %101 = vector.load %arg1[%c7, %c0_65, %c0_66] : memref<27x1x256xi32, #tpu.memory_space<vmem>>, vector<1x1x256xi32>
    %102 = vector.shape_cast %101 : vector<1x1x256xi32> to vector<1x256xi32>
    %103 = vector.broadcast %102 : vector<1x256xi32> to vector<256x256xi32>
    %104 = arith.cmpi eq, %1, %103 : vector<256x256xi32>
    %cst_67 = arith.constant 1.000000e+00 : f32
    %cst_68 = arith.constant 0.000000e+00 : f32
    %105 = vector.broadcast %cst_67 : f32 to vector<256x256xf32>
    %106 = vector.broadcast %cst_68 : f32 to vector<256x256xf32>
    %107 = arith.select %104, %105, %106 : vector<256x256xi1>, vector<256x256xf32>
    %108 = arith.truncf %107 : vector<256x256xf32> to vector<256x256xbf16>
    %cst_69 = arith.constant dense<0.000000e+00> : vector<8x256xf32>
    %109 = tpu.matmul %0, %108, %cst_69 {dimension_numbers = #tpu.dot_dimension_numbers<[1], [0], [0], [1], [0, 0, 1, 1], [], []>} : vector<8x256xbf16>, vector<256x256xbf16>, vector<8x256xf32> -> vector<8x256xf32>
    %c7_70 = arith.constant 7 : index
    %c0_71 = arith.constant 0 : index
    %c0_72 = arith.constant 0 : index
    %110 = vector.load %arg3[%c7_70, %c0_71, %c0_72] : memref<27x16x8xbf16, #tpu.memory_space<vmem>>, vector<1x16x8xbf16>
    %111 = vector.shape_cast %110 : vector<1x16x8xbf16> to vector<16x8xbf16>
    %112 = arith.truncf %109 : vector<8x256xf32> to vector<8x256xbf16>
    %cst_73 = arith.constant dense<0.000000e+00> : vector<16x256xf32>
    %113 = tpu.matmul %111, %112, %cst_73 {dimension_numbers = #tpu.dot_dimension_numbers<[1], [0], [0], [1], [0, 0, 1, 1], [], []>} : vector<16x8xbf16>, vector<8x256xbf16>, vector<16x256xf32> -> vector<16x256xf32>
    %114 = arith.addf %100, %113 : vector<16x256xf32>
    %c8 = arith.constant 8 : index
    %c0_74 = arith.constant 0 : index
    %c0_75 = arith.constant 0 : index
    %115 = vector.load %arg1[%c8, %c0_74, %c0_75] : memref<27x1x256xi32, #tpu.memory_space<vmem>>, vector<1x1x256xi32>
    %116 = vector.shape_cast %115 : vector<1x1x256xi32> to vector<1x256xi32>
    %117 = vector.broadcast %116 : vector<1x256xi32> to vector<256x256xi32>
    %118 = arith.cmpi eq, %1, %117 : vector<256x256xi32>
    %cst_76 = arith.constant 1.000000e+00 : f32
    %cst_77 = arith.constant 0.000000e+00 : f32
    %119 = vector.broadcast %cst_76 : f32 to vector<256x256xf32>
    %120 = vector.broadcast %cst_77 : f32 to vector<256x256xf32>
    %121 = arith.select %118, %119, %120 : vector<256x256xi1>, vector<256x256xf32>
    %122 = arith.truncf %121 : vector<256x256xf32> to vector<256x256xbf16>
    %cst_78 = arith.constant dense<0.000000e+00> : vector<8x256xf32>
    %123 = tpu.matmul %0, %122, %cst_78 {dimension_numbers = #tpu.dot_dimension_numbers<[1], [0], [0], [1], [0, 0, 1, 1], [], []>} : vector<8x256xbf16>, vector<256x256xbf16>, vector<8x256xf32> -> vector<8x256xf32>
    %c8_79 = arith.constant 8 : index
    %c0_80 = arith.constant 0 : index
    %c0_81 = arith.constant 0 : index
    %124 = vector.load %arg3[%c8_79, %c0_80, %c0_81] : memref<27x16x8xbf16, #tpu.memory_space<vmem>>, vector<1x16x8xbf16>
    %125 = vector.shape_cast %124 : vector<1x16x8xbf16> to vector<16x8xbf16>
    %126 = arith.truncf %123 : vector<8x256xf32> to vector<8x256xbf16>
    %cst_82 = arith.constant dense<0.000000e+00> : vector<16x256xf32>
    %127 = tpu.matmul %125, %126, %cst_82 {dimension_numbers = #tpu.dot_dimension_numbers<[1], [0], [0], [1], [0, 0, 1, 1], [], []>} : vector<16x8xbf16>, vector<8x256xbf16>, vector<16x256xf32> -> vector<16x256xf32>
    %128 = arith.addf %114, %127 : vector<16x256xf32>
    %c9 = arith.constant 9 : index
    %c0_83 = arith.constant 0 : index
    %c0_84 = arith.constant 0 : index
    %129 = vector.load %arg1[%c9, %c0_83, %c0_84] : memref<27x1x256xi32, #tpu.memory_space<vmem>>, vector<1x1x256xi32>
    %130 = vector.shape_cast %129 : vector<1x1x256xi32> to vector<1x256xi32>
    %131 = vector.broadcast %130 : vector<1x256xi32> to vector<256x256xi32>
    %132 = arith.cmpi eq, %1, %131 : vector<256x256xi32>
    %cst_85 = arith.constant 1.000000e+00 : f32
    %cst_86 = arith.constant 0.000000e+00 : f32
    %133 = vector.broadcast %cst_85 : f32 to vector<256x256xf32>
    %134 = vector.broadcast %cst_86 : f32 to vector<256x256xf32>
    %135 = arith.select %132, %133, %134 : vector<256x256xi1>, vector<256x256xf32>
    %136 = arith.truncf %135 : vector<256x256xf32> to vector<256x256xbf16>
    %cst_87 = arith.constant dense<0.000000e+00> : vector<8x256xf32>
    %137 = tpu.matmul %0, %136, %cst_87 {dimension_numbers = #tpu.dot_dimension_numbers<[1], [0], [0], [1], [0, 0, 1, 1], [], []>} : vector<8x256xbf16>, vector<256x256xbf16>, vector<8x256xf32> -> vector<8x256xf32>
    %c9_88 = arith.constant 9 : index
    %c0_89 = arith.constant 0 : index
    %c0_90 = arith.constant 0 : index
    %138 = vector.load %arg3[%c9_88, %c0_89, %c0_90] : memref<27x16x8xbf16, #tpu.memory_space<vmem>>, vector<1x16x8xbf16>
    %139 = vector.shape_cast %138 : vector<1x16x8xbf16> to vector<16x8xbf16>
    %140 = arith.truncf %137 : vector<8x256xf32> to vector<8x256xbf16>
    %cst_91 = arith.constant dense<0.000000e+00> : vector<16x256xf32>
    %141 = tpu.matmul %139, %140, %cst_91 {dimension_numbers = #tpu.dot_dimension_numbers<[1], [0], [0], [1], [0, 0, 1, 1], [], []>} : vector<16x8xbf16>, vector<8x256xbf16>, vector<16x256xf32> -> vector<16x256xf32>
    %142 = arith.addf %128, %141 : vector<16x256xf32>
    %c10 = arith.constant 10 : index
    %c0_92 = arith.constant 0 : index
    %c0_93 = arith.constant 0 : index
    %143 = vector.load %arg1[%c10, %c0_92, %c0_93] : memref<27x1x256xi32, #tpu.memory_space<vmem>>, vector<1x1x256xi32>
    %144 = vector.shape_cast %143 : vector<1x1x256xi32> to vector<1x256xi32>
    %145 = vector.broadcast %144 : vector<1x256xi32> to vector<256x256xi32>
    %146 = arith.cmpi eq, %1, %145 : vector<256x256xi32>
    %cst_94 = arith.constant 1.000000e+00 : f32
    %cst_95 = arith.constant 0.000000e+00 : f32
    %147 = vector.broadcast %cst_94 : f32 to vector<256x256xf32>
    %148 = vector.broadcast %cst_95 : f32 to vector<256x256xf32>
    %149 = arith.select %146, %147, %148 : vector<256x256xi1>, vector<256x256xf32>
    %150 = arith.truncf %149 : vector<256x256xf32> to vector<256x256xbf16>
    %cst_96 = arith.constant dense<0.000000e+00> : vector<8x256xf32>
    %151 = tpu.matmul %0, %150, %cst_96 {dimension_numbers = #tpu.dot_dimension_numbers<[1], [0], [0], [1], [0, 0, 1, 1], [], []>} : vector<8x256xbf16>, vector<256x256xbf16>, vector<8x256xf32> -> vector<8x256xf32>
    %c10_97 = arith.constant 10 : index
    %c0_98 = arith.constant 0 : index
    %c0_99 = arith.constant 0 : index
    %152 = vector.load %arg3[%c10_97, %c0_98, %c0_99] : memref<27x16x8xbf16, #tpu.memory_space<vmem>>, vector<1x16x8xbf16>
    %153 = vector.shape_cast %152 : vector<1x16x8xbf16> to vector<16x8xbf16>
    %154 = arith.truncf %151 : vector<8x256xf32> to vector<8x256xbf16>
    %cst_100 = arith.constant dense<0.000000e+00> : vector<16x256xf32>
    %155 = tpu.matmul %153, %154, %cst_100 {dimension_numbers = #tpu.dot_dimension_numbers<[1], [0], [0], [1], [0, 0, 1, 1], [], []>} : vector<16x8xbf16>, vector<8x256xbf16>, vector<16x256xf32> -> vector<16x256xf32>
    %156 = arith.addf %142, %155 : vector<16x256xf32>
    %c11 = arith.constant 11 : index
    %c0_101 = arith.constant 0 : index
    %c0_102 = arith.constant 0 : index
    %157 = vector.load %arg1[%c11, %c0_101, %c0_102] : memref<27x1x256xi32, #tpu.memory_space<vmem>>, vector<1x1x256xi32>
    %158 = vector.shape_cast %157 : vector<1x1x256xi32> to vector<1x256xi32>
    %159 = vector.broadcast %158 : vector<1x256xi32> to vector<256x256xi32>
    %160 = arith.cmpi eq, %1, %159 : vector<256x256xi32>
    %cst_103 = arith.constant 1.000000e+00 : f32
    %cst_104 = arith.constant 0.000000e+00 : f32
    %161 = vector.broadcast %cst_103 : f32 to vector<256x256xf32>
    %162 = vector.broadcast %cst_104 : f32 to vector<256x256xf32>
    %163 = arith.select %160, %161, %162 : vector<256x256xi1>, vector<256x256xf32>
    %164 = arith.truncf %163 : vector<256x256xf32> to vector<256x256xbf16>
    %cst_105 = arith.constant dense<0.000000e+00> : vector<8x256xf32>
    %165 = tpu.matmul %0, %164, %cst_105 {dimension_numbers = #tpu.dot_dimension_numbers<[1], [0], [0], [1], [0, 0, 1, 1], [], []>} : vector<8x256xbf16>, vector<256x256xbf16>, vector<8x256xf32> -> vector<8x256xf32>
    %c11_106 = arith.constant 11 : index
    %c0_107 = arith.constant 0 : index
    %c0_108 = arith.constant 0 : index
    %166 = vector.load %arg3[%c11_106, %c0_107, %c0_108] : memref<27x16x8xbf16, #tpu.memory_space<vmem>>, vector<1x16x8xbf16>
    %167 = vector.shape_cast %166 : vector<1x16x8xbf16> to vector<16x8xbf16>
    %168 = arith.truncf %165 : vector<8x256xf32> to vector<8x256xbf16>
    %cst_109 = arith.constant dense<0.000000e+00> : vector<16x256xf32>
    %169 = tpu.matmul %167, %168, %cst_109 {dimension_numbers = #tpu.dot_dimension_numbers<[1], [0], [0], [1], [0, 0, 1, 1], [], []>} : vector<16x8xbf16>, vector<8x256xbf16>, vector<16x256xf32> -> vector<16x256xf32>
    %170 = arith.addf %156, %169 : vector<16x256xf32>
    %c12 = arith.constant 12 : index
    %c0_110 = arith.constant 0 : index
    %c0_111 = arith.constant 0 : index
    %171 = vector.load %arg1[%c12, %c0_110, %c0_111] : memref<27x1x256xi32, #tpu.memory_space<vmem>>, vector<1x1x256xi32>
    %172 = vector.shape_cast %171 : vector<1x1x256xi32> to vector<1x256xi32>
    %173 = vector.broadcast %172 : vector<1x256xi32> to vector<256x256xi32>
    %174 = arith.cmpi eq, %1, %173 : vector<256x256xi32>
    %cst_112 = arith.constant 1.000000e+00 : f32
    %cst_113 = arith.constant 0.000000e+00 : f32
    %175 = vector.broadcast %cst_112 : f32 to vector<256x256xf32>
    %176 = vector.broadcast %cst_113 : f32 to vector<256x256xf32>
    %177 = arith.select %174, %175, %176 : vector<256x256xi1>, vector<256x256xf32>
    %178 = arith.truncf %177 : vector<256x256xf32> to vector<256x256xbf16>
    %cst_114 = arith.constant dense<0.000000e+00> : vector<8x256xf32>
    %179 = tpu.matmul %0, %178, %cst_114 {dimension_numbers = #tpu.dot_dimension_numbers<[1], [0], [0], [1], [0, 0, 1, 1], [], []>} : vector<8x256xbf16>, vector<256x256xbf16>, vector<8x256xf32> -> vector<8x256xf32>
    %c12_115 = arith.constant 12 : index
    %c0_116 = arith.constant 0 : index
    %c0_117 = arith.constant 0 : index
    %180 = vector.load %arg3[%c12_115, %c0_116, %c0_117] : memref<27x16x8xbf16, #tpu.memory_space<vmem>>, vector<1x16x8xbf16>
    %181 = vector.shape_cast %180 : vector<1x16x8xbf16> to vector<16x8xbf16>
    %182 = arith.truncf %179 : vector<8x256xf32> to vector<8x256xbf16>
    %cst_118 = arith.constant dense<0.000000e+00> : vector<16x256xf32>
    %183 = tpu.matmul %181, %182, %cst_118 {dimension_numbers = #tpu.dot_dimension_numbers<[1], [0], [0], [1], [0, 0, 1, 1], [], []>} : vector<16x8xbf16>, vector<8x256xbf16>, vector<16x256xf32> -> vector<16x256xf32>
    %184 = arith.addf %170, %183 : vector<16x256xf32>
    %c13 = arith.constant 13 : index
    %c0_119 = arith.constant 0 : index
    %c0_120 = arith.constant 0 : index
    %185 = vector.load %arg1[%c13, %c0_119, %c0_120] : memref<27x1x256xi32, #tpu.memory_space<vmem>>, vector<1x1x256xi32>
    %186 = vector.shape_cast %185 : vector<1x1x256xi32> to vector<1x256xi32>
    %187 = vector.broadcast %186 : vector<1x256xi32> to vector<256x256xi32>
    %188 = arith.cmpi eq, %1, %187 : vector<256x256xi32>
    %cst_121 = arith.constant 1.000000e+00 : f32
    %cst_122 = arith.constant 0.000000e+00 : f32
    %189 = vector.broadcast %cst_121 : f32 to vector<256x256xf32>
    %190 = vector.broadcast %cst_122 : f32 to vector<256x256xf32>
    %191 = arith.select %188, %189, %190 : vector<256x256xi1>, vector<256x256xf32>
    %192 = arith.truncf %191 : vector<256x256xf32> to vector<256x256xbf16>
    %cst_123 = arith.constant dense<0.000000e+00> : vector<8x256xf32>
    %193 = tpu.matmul %0, %192, %cst_123 {dimension_numbers = #tpu.dot_dimension_numbers<[1], [0], [0], [1], [0, 0, 1, 1], [], []>} : vector<8x256xbf16>, vector<256x256xbf16>, vector<8x256xf32> -> vector<8x256xf32>
    %c13_124 = arith.constant 13 : index
    %c0_125 = arith.constant 0 : index
    %c0_126 = arith.constant 0 : index
    %194 = vector.load %arg3[%c13_124, %c0_125, %c0_126] : memref<27x16x8xbf16, #tpu.memory_space<vmem>>, vector<1x16x8xbf16>
    %195 = vector.shape_cast %194 : vector<1x16x8xbf16> to vector<16x8xbf16>
    %196 = arith.truncf %193 : vector<8x256xf32> to vector<8x256xbf16>
    %cst_127 = arith.constant dense<0.000000e+00> : vector<16x256xf32>
    %197 = tpu.matmul %195, %196, %cst_127 {dimension_numbers = #tpu.dot_dimension_numbers<[1], [0], [0], [1], [0, 0, 1, 1], [], []>} : vector<16x8xbf16>, vector<8x256xbf16>, vector<16x256xf32> -> vector<16x256xf32>
    %198 = arith.addf %184, %197 : vector<16x256xf32>
    %c14 = arith.constant 14 : index
    %c0_128 = arith.constant 0 : index
    %c0_129 = arith.constant 0 : index
    %199 = vector.load %arg1[%c14, %c0_128, %c0_129] : memref<27x1x256xi32, #tpu.memory_space<vmem>>, vector<1x1x256xi32>
    %200 = vector.shape_cast %199 : vector<1x1x256xi32> to vector<1x256xi32>
    %201 = vector.broadcast %200 : vector<1x256xi32> to vector<256x256xi32>
    %202 = arith.cmpi eq, %1, %201 : vector<256x256xi32>
    %cst_130 = arith.constant 1.000000e+00 : f32
    %cst_131 = arith.constant 0.000000e+00 : f32
    %203 = vector.broadcast %cst_130 : f32 to vector<256x256xf32>
    %204 = vector.broadcast %cst_131 : f32 to vector<256x256xf32>
    %205 = arith.select %202, %203, %204 : vector<256x256xi1>, vector<256x256xf32>
    %206 = arith.truncf %205 : vector<256x256xf32> to vector<256x256xbf16>
    %cst_132 = arith.constant dense<0.000000e+00> : vector<8x256xf32>
    %207 = tpu.matmul %0, %206, %cst_132 {dimension_numbers = #tpu.dot_dimension_numbers<[1], [0], [0], [1], [0, 0, 1, 1], [], []>} : vector<8x256xbf16>, vector<256x256xbf16>, vector<8x256xf32> -> vector<8x256xf32>
    %c14_133 = arith.constant 14 : index
    %c0_134 = arith.constant 0 : index
    %c0_135 = arith.constant 0 : index
    %208 = vector.load %arg3[%c14_133, %c0_134, %c0_135] : memref<27x16x8xbf16, #tpu.memory_space<vmem>>, vector<1x16x8xbf16>
    %209 = vector.shape_cast %208 : vector<1x16x8xbf16> to vector<16x8xbf16>
    %210 = arith.truncf %207 : vector<8x256xf32> to vector<8x256xbf16>
    %cst_136 = arith.constant dense<0.000000e+00> : vector<16x256xf32>
    %211 = tpu.matmul %209, %210, %cst_136 {dimension_numbers = #tpu.dot_dimension_numbers<[1], [0], [0], [1], [0, 0, 1, 1], [], []>} : vector<16x8xbf16>, vector<8x256xbf16>, vector<16x256xf32> -> vector<16x256xf32>
    %212 = arith.addf %198, %211 : vector<16x256xf32>
    %c15 = arith.constant 15 : index
    %c0_137 = arith.constant 0 : index
    %c0_138 = arith.constant 0 : index
    %213 = vector.load %arg1[%c15, %c0_137, %c0_138] : memref<27x1x256xi32, #tpu.memory_space<vmem>>, vector<1x1x256xi32>
    %214 = vector.shape_cast %213 : vector<1x1x256xi32> to vector<1x256xi32>
    %215 = vector.broadcast %214 : vector<1x256xi32> to vector<256x256xi32>
    %216 = arith.cmpi eq, %1, %215 : vector<256x256xi32>
    %cst_139 = arith.constant 1.000000e+00 : f32
    %cst_140 = arith.constant 0.000000e+00 : f32
    %217 = vector.broadcast %cst_139 : f32 to vector<256x256xf32>
    %218 = vector.broadcast %cst_140 : f32 to vector<256x256xf32>
    %219 = arith.select %216, %217, %218 : vector<256x256xi1>, vector<256x256xf32>
    %220 = arith.truncf %219 : vector<256x256xf32> to vector<256x256xbf16>
    %cst_141 = arith.constant dense<0.000000e+00> : vector<8x256xf32>
    %221 = tpu.matmul %0, %220, %cst_141 {dimension_numbers = #tpu.dot_dimension_numbers<[1], [0], [0], [1], [0, 0, 1, 1], [], []>} : vector<8x256xbf16>, vector<256x256xbf16>, vector<8x256xf32> -> vector<8x256xf32>
    %c15_142 = arith.constant 15 : index
    %c0_143 = arith.constant 0 : index
    %c0_144 = arith.constant 0 : index
    %222 = vector.load %arg3[%c15_142, %c0_143, %c0_144] : memref<27x16x8xbf16, #tpu.memory_space<vmem>>, vector<1x16x8xbf16>
    %223 = vector.shape_cast %222 : vector<1x16x8xbf16> to vector<16x8xbf16>
    %224 = arith.truncf %221 : vector<8x256xf32> to vector<8x256xbf16>
    %cst_145 = arith.constant dense<0.000000e+00> : vector<16x256xf32>
    %225 = tpu.matmul %223, %224, %cst_145 {dimension_numbers = #tpu.dot_dimension_numbers<[1], [0], [0], [1], [0, 0, 1, 1], [], []>} : vector<16x8xbf16>, vector<8x256xbf16>, vector<16x256xf32> -> vector<16x256xf32>
    %226 = arith.addf %212, %225 : vector<16x256xf32>
    %c16 = arith.constant 16 : index
    %c0_146 = arith.constant 0 : index
    %c0_147 = arith.constant 0 : index
    %227 = vector.load %arg1[%c16, %c0_146, %c0_147] : memref<27x1x256xi32, #tpu.memory_space<vmem>>, vector<1x1x256xi32>
    %228 = vector.shape_cast %227 : vector<1x1x256xi32> to vector<1x256xi32>
    %229 = vector.broadcast %228 : vector<1x256xi32> to vector<256x256xi32>
    %230 = arith.cmpi eq, %1, %229 : vector<256x256xi32>
    %cst_148 = arith.constant 1.000000e+00 : f32
    %cst_149 = arith.constant 0.000000e+00 : f32
    %231 = vector.broadcast %cst_148 : f32 to vector<256x256xf32>
    %232 = vector.broadcast %cst_149 : f32 to vector<256x256xf32>
    %233 = arith.select %230, %231, %232 : vector<256x256xi1>, vector<256x256xf32>
    %234 = arith.truncf %233 : vector<256x256xf32> to vector<256x256xbf16>
    %cst_150 = arith.constant dense<0.000000e+00> : vector<8x256xf32>
    %235 = tpu.matmul %0, %234, %cst_150 {dimension_numbers = #tpu.dot_dimension_numbers<[1], [0], [0], [1], [0, 0, 1, 1], [], []>} : vector<8x256xbf16>, vector<256x256xbf16>, vector<8x256xf32> -> vector<8x256xf32>
    %c16_151 = arith.constant 16 : index
    %c0_152 = arith.constant 0 : index
    %c0_153 = arith.constant 0 : index
    %236 = vector.load %arg3[%c16_151, %c0_152, %c0_153] : memref<27x16x8xbf16, #tpu.memory_space<vmem>>, vector<1x16x8xbf16>
    %237 = vector.shape_cast %236 : vector<1x16x8xbf16> to vector<16x8xbf16>
    %238 = arith.truncf %235 : vector<8x256xf32> to vector<8x256xbf16>
    %cst_154 = arith.constant dense<0.000000e+00> : vector<16x256xf32>
    %239 = tpu.matmul %237, %238, %cst_154 {dimension_numbers = #tpu.dot_dimension_numbers<[1], [0], [0], [1], [0, 0, 1, 1], [], []>} : vector<16x8xbf16>, vector<8x256xbf16>, vector<16x256xf32> -> vector<16x256xf32>
    %240 = arith.addf %226, %239 : vector<16x256xf32>
    %c17 = arith.constant 17 : index
    %c0_155 = arith.constant 0 : index
    %c0_156 = arith.constant 0 : index
    %241 = vector.load %arg1[%c17, %c0_155, %c0_156] : memref<27x1x256xi32, #tpu.memory_space<vmem>>, vector<1x1x256xi32>
    %242 = vector.shape_cast %241 : vector<1x1x256xi32> to vector<1x256xi32>
    %243 = vector.broadcast %242 : vector<1x256xi32> to vector<256x256xi32>
    %244 = arith.cmpi eq, %1, %243 : vector<256x256xi32>
    %cst_157 = arith.constant 1.000000e+00 : f32
    %cst_158 = arith.constant 0.000000e+00 : f32
    %245 = vector.broadcast %cst_157 : f32 to vector<256x256xf32>
    %246 = vector.broadcast %cst_158 : f32 to vector<256x256xf32>
    %247 = arith.select %244, %245, %246 : vector<256x256xi1>, vector<256x256xf32>
    %248 = arith.truncf %247 : vector<256x256xf32> to vector<256x256xbf16>
    %cst_159 = arith.constant dense<0.000000e+00> : vector<8x256xf32>
    %249 = tpu.matmul %0, %248, %cst_159 {dimension_numbers = #tpu.dot_dimension_numbers<[1], [0], [0], [1], [0, 0, 1, 1], [], []>} : vector<8x256xbf16>, vector<256x256xbf16>, vector<8x256xf32> -> vector<8x256xf32>
    %c17_160 = arith.constant 17 : index
    %c0_161 = arith.constant 0 : index
    %c0_162 = arith.constant 0 : index
    %250 = vector.load %arg3[%c17_160, %c0_161, %c0_162] : memref<27x16x8xbf16, #tpu.memory_space<vmem>>, vector<1x16x8xbf16>
    %251 = vector.shape_cast %250 : vector<1x16x8xbf16> to vector<16x8xbf16>
    %252 = arith.truncf %249 : vector<8x256xf32> to vector<8x256xbf16>
    %cst_163 = arith.constant dense<0.000000e+00> : vector<16x256xf32>
    %253 = tpu.matmul %251, %252, %cst_163 {dimension_numbers = #tpu.dot_dimension_numbers<[1], [0], [0], [1], [0, 0, 1, 1], [], []>} : vector<16x8xbf16>, vector<8x256xbf16>, vector<16x256xf32> -> vector<16x256xf32>
    %254 = arith.addf %240, %253 : vector<16x256xf32>
    %c18 = arith.constant 18 : index
    %c0_164 = arith.constant 0 : index
    %c0_165 = arith.constant 0 : index
    %255 = vector.load %arg1[%c18, %c0_164, %c0_165] : memref<27x1x256xi32, #tpu.memory_space<vmem>>, vector<1x1x256xi32>
    %256 = vector.shape_cast %255 : vector<1x1x256xi32> to vector<1x256xi32>
    %257 = vector.broadcast %256 : vector<1x256xi32> to vector<256x256xi32>
    %258 = arith.cmpi eq, %1, %257 : vector<256x256xi32>
    %cst_166 = arith.constant 1.000000e+00 : f32
    %cst_167 = arith.constant 0.000000e+00 : f32
    %259 = vector.broadcast %cst_166 : f32 to vector<256x256xf32>
    %260 = vector.broadcast %cst_167 : f32 to vector<256x256xf32>
    %261 = arith.select %258, %259, %260 : vector<256x256xi1>, vector<256x256xf32>
    %262 = arith.truncf %261 : vector<256x256xf32> to vector<256x256xbf16>
    %cst_168 = arith.constant dense<0.000000e+00> : vector<8x256xf32>
    %263 = tpu.matmul %0, %262, %cst_168 {dimension_numbers = #tpu.dot_dimension_numbers<[1], [0], [0], [1], [0, 0, 1, 1], [], []>} : vector<8x256xbf16>, vector<256x256xbf16>, vector<8x256xf32> -> vector<8x256xf32>
    %c18_169 = arith.constant 18 : index
    %c0_170 = arith.constant 0 : index
    %c0_171 = arith.constant 0 : index
    %264 = vector.load %arg3[%c18_169, %c0_170, %c0_171] : memref<27x16x8xbf16, #tpu.memory_space<vmem>>, vector<1x16x8xbf16>
    %265 = vector.shape_cast %264 : vector<1x16x8xbf16> to vector<16x8xbf16>
    %266 = arith.truncf %263 : vector<8x256xf32> to vector<8x256xbf16>
    %cst_172 = arith.constant dense<0.000000e+00> : vector<16x256xf32>
    %267 = tpu.matmul %265, %266, %cst_172 {dimension_numbers = #tpu.dot_dimension_numbers<[1], [0], [0], [1], [0, 0, 1, 1], [], []>} : vector<16x8xbf16>, vector<8x256xbf16>, vector<16x256xf32> -> vector<16x256xf32>
    %268 = arith.addf %254, %267 : vector<16x256xf32>
    %c19 = arith.constant 19 : index
    %c0_173 = arith.constant 0 : index
    %c0_174 = arith.constant 0 : index
    %269 = vector.load %arg1[%c19, %c0_173, %c0_174] : memref<27x1x256xi32, #tpu.memory_space<vmem>>, vector<1x1x256xi32>
    %270 = vector.shape_cast %269 : vector<1x1x256xi32> to vector<1x256xi32>
    %271 = vector.broadcast %270 : vector<1x256xi32> to vector<256x256xi32>
    %272 = arith.cmpi eq, %1, %271 : vector<256x256xi32>
    %cst_175 = arith.constant 1.000000e+00 : f32
    %cst_176 = arith.constant 0.000000e+00 : f32
    %273 = vector.broadcast %cst_175 : f32 to vector<256x256xf32>
    %274 = vector.broadcast %cst_176 : f32 to vector<256x256xf32>
    %275 = arith.select %272, %273, %274 : vector<256x256xi1>, vector<256x256xf32>
    %276 = arith.truncf %275 : vector<256x256xf32> to vector<256x256xbf16>
    %cst_177 = arith.constant dense<0.000000e+00> : vector<8x256xf32>
    %277 = tpu.matmul %0, %276, %cst_177 {dimension_numbers = #tpu.dot_dimension_numbers<[1], [0], [0], [1], [0, 0, 1, 1], [], []>} : vector<8x256xbf16>, vector<256x256xbf16>, vector<8x256xf32> -> vector<8x256xf32>
    %c19_178 = arith.constant 19 : index
    %c0_179 = arith.constant 0 : index
    %c0_180 = arith.constant 0 : index
    %278 = vector.load %arg3[%c19_178, %c0_179, %c0_180] : memref<27x16x8xbf16, #tpu.memory_space<vmem>>, vector<1x16x8xbf16>
    %279 = vector.shape_cast %278 : vector<1x16x8xbf16> to vector<16x8xbf16>
    %280 = arith.truncf %277 : vector<8x256xf32> to vector<8x256xbf16>
    %cst_181 = arith.constant dense<0.000000e+00> : vector<16x256xf32>
    %281 = tpu.matmul %279, %280, %cst_181 {dimension_numbers = #tpu.dot_dimension_numbers<[1], [0], [0], [1], [0, 0, 1, 1], [], []>} : vector<16x8xbf16>, vector<8x256xbf16>, vector<16x256xf32> -> vector<16x256xf32>
    %282 = arith.addf %268, %281 : vector<16x256xf32>
    %c20 = arith.constant 20 : index
    %c0_182 = arith.constant 0 : index
    %c0_183 = arith.constant 0 : index
    %283 = vector.load %arg1[%c20, %c0_182, %c0_183] : memref<27x1x256xi32, #tpu.memory_space<vmem>>, vector<1x1x256xi32>
    %284 = vector.shape_cast %283 : vector<1x1x256xi32> to vector<1x256xi32>
    %285 = vector.broadcast %284 : vector<1x256xi32> to vector<256x256xi32>
    %286 = arith.cmpi eq, %1, %285 : vector<256x256xi32>
    %cst_184 = arith.constant 1.000000e+00 : f32
    %cst_185 = arith.constant 0.000000e+00 : f32
    %287 = vector.broadcast %cst_184 : f32 to vector<256x256xf32>
    %288 = vector.broadcast %cst_185 : f32 to vector<256x256xf32>
    %289 = arith.select %286, %287, %288 : vector<256x256xi1>, vector<256x256xf32>
    %290 = arith.truncf %289 : vector<256x256xf32> to vector<256x256xbf16>
    %cst_186 = arith.constant dense<0.000000e+00> : vector<8x256xf32>
    %291 = tpu.matmul %0, %290, %cst_186 {dimension_numbers = #tpu.dot_dimension_numbers<[1], [0], [0], [1], [0, 0, 1, 1], [], []>} : vector<8x256xbf16>, vector<256x256xbf16>, vector<8x256xf32> -> vector<8x256xf32>
    %c20_187 = arith.constant 20 : index
    %c0_188 = arith.constant 0 : index
    %c0_189 = arith.constant 0 : index
    %292 = vector.load %arg3[%c20_187, %c0_188, %c0_189] : memref<27x16x8xbf16, #tpu.memory_space<vmem>>, vector<1x16x8xbf16>
    %293 = vector.shape_cast %292 : vector<1x16x8xbf16> to vector<16x8xbf16>
    %294 = arith.truncf %291 : vector<8x256xf32> to vector<8x256xbf16>
    %cst_190 = arith.constant dense<0.000000e+00> : vector<16x256xf32>
    %295 = tpu.matmul %293, %294, %cst_190 {dimension_numbers = #tpu.dot_dimension_numbers<[1], [0], [0], [1], [0, 0, 1, 1], [], []>} : vector<16x8xbf16>, vector<8x256xbf16>, vector<16x256xf32> -> vector<16x256xf32>
    %296 = arith.addf %282, %295 : vector<16x256xf32>
    %c21 = arith.constant 21 : index
    %c0_191 = arith.constant 0 : index
    %c0_192 = arith.constant 0 : index
    %297 = vector.load %arg1[%c21, %c0_191, %c0_192] : memref<27x1x256xi32, #tpu.memory_space<vmem>>, vector<1x1x256xi32>
    %298 = vector.shape_cast %297 : vector<1x1x256xi32> to vector<1x256xi32>
    %299 = vector.broadcast %298 : vector<1x256xi32> to vector<256x256xi32>
    %300 = arith.cmpi eq, %1, %299 : vector<256x256xi32>
    %cst_193 = arith.constant 1.000000e+00 : f32
    %cst_194 = arith.constant 0.000000e+00 : f32
    %301 = vector.broadcast %cst_193 : f32 to vector<256x256xf32>
    %302 = vector.broadcast %cst_194 : f32 to vector<256x256xf32>
    %303 = arith.select %300, %301, %302 : vector<256x256xi1>, vector<256x256xf32>
    %304 = arith.truncf %303 : vector<256x256xf32> to vector<256x256xbf16>
    %cst_195 = arith.constant dense<0.000000e+00> : vector<8x256xf32>
    %305 = tpu.matmul %0, %304, %cst_195 {dimension_numbers = #tpu.dot_dimension_numbers<[1], [0], [0], [1], [0, 0, 1, 1], [], []>} : vector<8x256xbf16>, vector<256x256xbf16>, vector<8x256xf32> -> vector<8x256xf32>
    %c21_196 = arith.constant 21 : index
    %c0_197 = arith.constant 0 : index
    %c0_198 = arith.constant 0 : index
    %306 = vector.load %arg3[%c21_196, %c0_197, %c0_198] : memref<27x16x8xbf16, #tpu.memory_space<vmem>>, vector<1x16x8xbf16>
    %307 = vector.shape_cast %306 : vector<1x16x8xbf16> to vector<16x8xbf16>
    %308 = arith.truncf %305 : vector<8x256xf32> to vector<8x256xbf16>
    %cst_199 = arith.constant dense<0.000000e+00> : vector<16x256xf32>
    %309 = tpu.matmul %307, %308, %cst_199 {dimension_numbers = #tpu.dot_dimension_numbers<[1], [0], [0], [1], [0, 0, 1, 1], [], []>} : vector<16x8xbf16>, vector<8x256xbf16>, vector<16x256xf32> -> vector<16x256xf32>
    %310 = arith.addf %296, %309 : vector<16x256xf32>
    %c22 = arith.constant 22 : index
    %c0_200 = arith.constant 0 : index
    %c0_201 = arith.constant 0 : index
    %311 = vector.load %arg1[%c22, %c0_200, %c0_201] : memref<27x1x256xi32, #tpu.memory_space<vmem>>, vector<1x1x256xi32>
    %312 = vector.shape_cast %311 : vector<1x1x256xi32> to vector<1x256xi32>
    %313 = vector.broadcast %312 : vector<1x256xi32> to vector<256x256xi32>
    %314 = arith.cmpi eq, %1, %313 : vector<256x256xi32>
    %cst_202 = arith.constant 1.000000e+00 : f32
    %cst_203 = arith.constant 0.000000e+00 : f32
    %315 = vector.broadcast %cst_202 : f32 to vector<256x256xf32>
    %316 = vector.broadcast %cst_203 : f32 to vector<256x256xf32>
    %317 = arith.select %314, %315, %316 : vector<256x256xi1>, vector<256x256xf32>
    %318 = arith.truncf %317 : vector<256x256xf32> to vector<256x256xbf16>
    %cst_204 = arith.constant dense<0.000000e+00> : vector<8x256xf32>
    %319 = tpu.matmul %0, %318, %cst_204 {dimension_numbers = #tpu.dot_dimension_numbers<[1], [0], [0], [1], [0, 0, 1, 1], [], []>} : vector<8x256xbf16>, vector<256x256xbf16>, vector<8x256xf32> -> vector<8x256xf32>
    %c22_205 = arith.constant 22 : index
    %c0_206 = arith.constant 0 : index
    %c0_207 = arith.constant 0 : index
    %320 = vector.load %arg3[%c22_205, %c0_206, %c0_207] : memref<27x16x8xbf16, #tpu.memory_space<vmem>>, vector<1x16x8xbf16>
    %321 = vector.shape_cast %320 : vector<1x16x8xbf16> to vector<16x8xbf16>
    %322 = arith.truncf %319 : vector<8x256xf32> to vector<8x256xbf16>
    %cst_208 = arith.constant dense<0.000000e+00> : vector<16x256xf32>
    %323 = tpu.matmul %321, %322, %cst_208 {dimension_numbers = #tpu.dot_dimension_numbers<[1], [0], [0], [1], [0, 0, 1, 1], [], []>} : vector<16x8xbf16>, vector<8x256xbf16>, vector<16x256xf32> -> vector<16x256xf32>
    %324 = arith.addf %310, %323 : vector<16x256xf32>
    %c23 = arith.constant 23 : index
    %c0_209 = arith.constant 0 : index
    %c0_210 = arith.constant 0 : index
    %325 = vector.load %arg1[%c23, %c0_209, %c0_210] : memref<27x1x256xi32, #tpu.memory_space<vmem>>, vector<1x1x256xi32>
    %326 = vector.shape_cast %325 : vector<1x1x256xi32> to vector<1x256xi32>
    %327 = vector.broadcast %326 : vector<1x256xi32> to vector<256x256xi32>
    %328 = arith.cmpi eq, %1, %327 : vector<256x256xi32>
    %cst_211 = arith.constant 1.000000e+00 : f32
    %cst_212 = arith.constant 0.000000e+00 : f32
    %329 = vector.broadcast %cst_211 : f32 to vector<256x256xf32>
    %330 = vector.broadcast %cst_212 : f32 to vector<256x256xf32>
    %331 = arith.select %328, %329, %330 : vector<256x256xi1>, vector<256x256xf32>
    %332 = arith.truncf %331 : vector<256x256xf32> to vector<256x256xbf16>
    %cst_213 = arith.constant dense<0.000000e+00> : vector<8x256xf32>
    %333 = tpu.matmul %0, %332, %cst_213 {dimension_numbers = #tpu.dot_dimension_numbers<[1], [0], [0], [1], [0, 0, 1, 1], [], []>} : vector<8x256xbf16>, vector<256x256xbf16>, vector<8x256xf32> -> vector<8x256xf32>
    %c23_214 = arith.constant 23 : index
    %c0_215 = arith.constant 0 : index
    %c0_216 = arith.constant 0 : index
    %334 = vector.load %arg3[%c23_214, %c0_215, %c0_216] : memref<27x16x8xbf16, #tpu.memory_space<vmem>>, vector<1x16x8xbf16>
    %335 = vector.shape_cast %334 : vector<1x16x8xbf16> to vector<16x8xbf16>
    %336 = arith.truncf %333 : vector<8x256xf32> to vector<8x256xbf16>
    %cst_217 = arith.constant dense<0.000000e+00> : vector<16x256xf32>
    %337 = tpu.matmul %335, %336, %cst_217 {dimension_numbers = #tpu.dot_dimension_numbers<[1], [0], [0], [1], [0, 0, 1, 1], [], []>} : vector<16x8xbf16>, vector<8x256xbf16>, vector<16x256xf32> -> vector<16x256xf32>
    %338 = arith.addf %324, %337 : vector<16x256xf32>
    %c24 = arith.constant 24 : index
    %c0_218 = arith.constant 0 : index
    %c0_219 = arith.constant 0 : index
    %339 = vector.load %arg1[%c24, %c0_218, %c0_219] : memref<27x1x256xi32, #tpu.memory_space<vmem>>, vector<1x1x256xi32>
    %340 = vector.shape_cast %339 : vector<1x1x256xi32> to vector<1x256xi32>
    %341 = vector.broadcast %340 : vector<1x256xi32> to vector<256x256xi32>
    %342 = arith.cmpi eq, %1, %341 : vector<256x256xi32>
    %cst_220 = arith.constant 1.000000e+00 : f32
    %cst_221 = arith.constant 0.000000e+00 : f32
    %343 = vector.broadcast %cst_220 : f32 to vector<256x256xf32>
    %344 = vector.broadcast %cst_221 : f32 to vector<256x256xf32>
    %345 = arith.select %342, %343, %344 : vector<256x256xi1>, vector<256x256xf32>
    %346 = arith.truncf %345 : vector<256x256xf32> to vector<256x256xbf16>
    %cst_222 = arith.constant dense<0.000000e+00> : vector<8x256xf32>
    %347 = tpu.matmul %0, %346, %cst_222 {dimension_numbers = #tpu.dot_dimension_numbers<[1], [0], [0], [1], [0, 0, 1, 1], [], []>} : vector<8x256xbf16>, vector<256x256xbf16>, vector<8x256xf32> -> vector<8x256xf32>
    %c24_223 = arith.constant 24 : index
    %c0_224 = arith.constant 0 : index
    %c0_225 = arith.constant 0 : index
    %348 = vector.load %arg3[%c24_223, %c0_224, %c0_225] : memref<27x16x8xbf16, #tpu.memory_space<vmem>>, vector<1x16x8xbf16>
    %349 = vector.shape_cast %348 : vector<1x16x8xbf16> to vector<16x8xbf16>
    %350 = arith.truncf %347 : vector<8x256xf32> to vector<8x256xbf16>
    %cst_226 = arith.constant dense<0.000000e+00> : vector<16x256xf32>
    %351 = tpu.matmul %349, %350, %cst_226 {dimension_numbers = #tpu.dot_dimension_numbers<[1], [0], [0], [1], [0, 0, 1, 1], [], []>} : vector<16x8xbf16>, vector<8x256xbf16>, vector<16x256xf32> -> vector<16x256xf32>
    %352 = arith.addf %338, %351 : vector<16x256xf32>
    %c25 = arith.constant 25 : index
    %c0_227 = arith.constant 0 : index
    %c0_228 = arith.constant 0 : index
    %353 = vector.load %arg1[%c25, %c0_227, %c0_228] : memref<27x1x256xi32, #tpu.memory_space<vmem>>, vector<1x1x256xi32>
    %354 = vector.shape_cast %353 : vector<1x1x256xi32> to vector<1x256xi32>
    %355 = vector.broadcast %354 : vector<1x256xi32> to vector<256x256xi32>
    %356 = arith.cmpi eq, %1, %355 : vector<256x256xi32>
    %cst_229 = arith.constant 1.000000e+00 : f32
    %cst_230 = arith.constant 0.000000e+00 : f32
    %357 = vector.broadcast %cst_229 : f32 to vector<256x256xf32>
    %358 = vector.broadcast %cst_230 : f32 to vector<256x256xf32>
    %359 = arith.select %356, %357, %358 : vector<256x256xi1>, vector<256x256xf32>
    %360 = arith.truncf %359 : vector<256x256xf32> to vector<256x256xbf16>
    %cst_231 = arith.constant dense<0.000000e+00> : vector<8x256xf32>
    %361 = tpu.matmul %0, %360, %cst_231 {dimension_numbers = #tpu.dot_dimension_numbers<[1], [0], [0], [1], [0, 0, 1, 1], [], []>} : vector<8x256xbf16>, vector<256x256xbf16>, vector<8x256xf32> -> vector<8x256xf32>
    %c25_232 = arith.constant 25 : index
    %c0_233 = arith.constant 0 : index
    %c0_234 = arith.constant 0 : index
    %362 = vector.load %arg3[%c25_232, %c0_233, %c0_234] : memref<27x16x8xbf16, #tpu.memory_space<vmem>>, vector<1x16x8xbf16>
    %363 = vector.shape_cast %362 : vector<1x16x8xbf16> to vector<16x8xbf16>
    %364 = arith.truncf %361 : vector<8x256xf32> to vector<8x256xbf16>
    %cst_235 = arith.constant dense<0.000000e+00> : vector<16x256xf32>
    %365 = tpu.matmul %363, %364, %cst_235 {dimension_numbers = #tpu.dot_dimension_numbers<[1], [0], [0], [1], [0, 0, 1, 1], [], []>} : vector<16x8xbf16>, vector<8x256xbf16>, vector<16x256xf32> -> vector<16x256xf32>
    %366 = arith.addf %352, %365 : vector<16x256xf32>
    %c26 = arith.constant 26 : index
    %c0_236 = arith.constant 0 : index
    %c0_237 = arith.constant 0 : index
    %367 = vector.load %arg1[%c26, %c0_236, %c0_237] : memref<27x1x256xi32, #tpu.memory_space<vmem>>, vector<1x1x256xi32>
    %368 = vector.shape_cast %367 : vector<1x1x256xi32> to vector<1x256xi32>
    %369 = vector.broadcast %368 : vector<1x256xi32> to vector<256x256xi32>
    %370 = arith.cmpi eq, %1, %369 : vector<256x256xi32>
    %cst_238 = arith.constant 1.000000e+00 : f32
    %cst_239 = arith.constant 0.000000e+00 : f32
    %371 = vector.broadcast %cst_238 : f32 to vector<256x256xf32>
    %372 = vector.broadcast %cst_239 : f32 to vector<256x256xf32>
    %373 = arith.select %370, %371, %372 : vector<256x256xi1>, vector<256x256xf32>
    %374 = arith.truncf %373 : vector<256x256xf32> to vector<256x256xbf16>
    %cst_240 = arith.constant dense<0.000000e+00> : vector<8x256xf32>
    %375 = tpu.matmul %0, %374, %cst_240 {dimension_numbers = #tpu.dot_dimension_numbers<[1], [0], [0], [1], [0, 0, 1, 1], [], []>} : vector<8x256xbf16>, vector<256x256xbf16>, vector<8x256xf32> -> vector<8x256xf32>
    %c26_241 = arith.constant 26 : index
    %c0_242 = arith.constant 0 : index
    %c0_243 = arith.constant 0 : index
    %376 = vector.load %arg3[%c26_241, %c0_242, %c0_243] : memref<27x16x8xbf16, #tpu.memory_space<vmem>>, vector<1x16x8xbf16>
    %377 = vector.shape_cast %376 : vector<1x16x8xbf16> to vector<16x8xbf16>
    %378 = arith.truncf %375 : vector<8x256xf32> to vector<8x256xbf16>
    %cst_244 = arith.constant dense<0.000000e+00> : vector<16x256xf32>
    %379 = tpu.matmul %377, %378, %cst_244 {dimension_numbers = #tpu.dot_dimension_numbers<[1], [0], [0], [1], [0, 0, 1, 1], [], []>} : vector<16x8xbf16>, vector<8x256xbf16>, vector<16x256xf32> -> vector<16x256xf32>
    %380 = arith.addf %366, %379 : vector<16x256xf32>
    %c0_245 = arith.constant 0 : index
    %c0_246 = arith.constant 0 : index
    %381 = vector.load %arg4[%c0_245, %c0_246] : memref<16x1xf32, #tpu.memory_space<vmem>>, vector<16x1xf32>
    %382 = vector.broadcast %381 : vector<16x1xf32> to vector<16x256xf32>
    %383 = arith.mulf %380, %382 : vector<16x256xf32>
    %c0_247 = arith.constant 0 : index
    %c0_248 = arith.constant 0 : index
    %384 = vector.load %arg5[%c0_247, %c0_248] : memref<16x1xf32, #tpu.memory_space<vmem>>, vector<16x1xf32>
    %385 = vector.broadcast %384 : vector<16x1xf32> to vector<16x256xf32>
    %386 = arith.addf %383, %385 : vector<16x256xf32>
    %cst_249 = arith.constant 0.000000e+00 : f32
    %387 = vector.broadcast %cst_249 : f32 to vector<16x256xf32>
    %388 = arith.maximumf %386, %387 : vector<16x256xf32>
    %c256_i32 = arith.constant 256 : i32
    %389 = arith.muli %arg0, %c256_i32 : i32
    %390 = tpu.iota {dimensions = array<i32: 1>} : vector<16x256xi32>
    %391 = vector.broadcast %389 : i32 to vector<16x256xi32>
    %392 = arith.addi %391, %390 : vector<16x256xi32>
    %c160_i32 = arith.constant 160 : i32
    %393 = vector.broadcast %c160_i32 : i32 to vector<16x256xi32>
    %394 = arith.cmpi slt, %392, %393 : vector<16x256xi32>
    %cst_250 = arith.constant 0.000000e+00 : f32
    %395 = vector.broadcast %cst_250 : f32 to vector<16x256xf32>
    %396 = arith.select %394, %388, %395 : vector<16x256xi1>, vector<16x256xf32>
    %c0_251 = arith.constant 0 : index
    %c0_252 = arith.constant 0 : index
    %397 = vector.load %arg6[%c0_251, %c0_252] : memref<16x256xf32, #tpu.memory_space<vmem>>, vector<16x256xf32>
    tpu.vector_store %arg6[%c0_251, %c0_252], %396 {strides = array<i32>} : memref<16x256xf32, #tpu.memory_space<vmem>>, vector<16x256xf32>,
    return
  }
  func.func @transform_0(%arg0: i32) -> (i32, i32, i32) {
    %c0_i32 = arith.constant 0 : i32
    %c0_i32_0 = arith.constant 0 : i32
    %c0_i32_1 = arith.constant 0 : i32
    return %c0_i32, %c0_i32_0, %arg0 : i32, i32, i32
  }
  func.func @transform_1(%arg0: i32) -> (i32, i32) {
    %c0_i32 = arith.constant 0 : i32
    %c0_i32_0 = arith.constant 0 : i32
    %c0_i32_1 = arith.constant 0 : i32
    return %c0_i32, %c0_i32_0 : i32, i32
  }
  func.func @transform_2(%arg0: i32) -> (i32, i32, i32) {
    %c0_i32 = arith.constant 0 : i32
    %c0_i32_0 = arith.constant 0 : i32
    %c0_i32_1 = arith.constant 0 : i32
    %c0_i32_2 = arith.constant 0 : i32
    return %c0_i32, %c0_i32_0, %c0_i32_1 : i32, i32, i32
  }
  func.func @transform_3(%arg0: i32) -> (i32, i32) {
    %c0_i32 = arith.constant 0 : i32
    %c0_i32_0 = arith.constant 0 : i32
    %c0_i32_1 = arith.constant 0 : i32
    return %c0_i32, %c0_i32_0 : i32, i32
  }
  func.func @transform_4(%arg0: i32) -> (i32, i32) {
    %c0_i32 = arith.constant 0 : i32
    %c0_i32_0 = arith.constant 0 : i32
    %c0_i32_1 = arith.constant 0 : i32
    return %c0_i32, %c0_i32_0 : i32, i32
  }
  func.func @transform_5(%arg0: i32) -> (i32, i32) {
    %c0_i32 = arith.constant 0 : i32
    %c0_i32_0 = arith.constant 0 : i32
    return %c0_i32, %arg0 : i32, i32
  }
}

</mosaic_0001>

<bundles_post_ra>
// kernel: tpu_custom_call.1
= control target key start
LH: loop header
LB: loop body
LE: loop exit
PB: predicated region body
PF: predicated region fallthrough
CT: control target
= control target key end

     0   :  { %v15070_v0 = vlaneseq  ;;  %s15062_s0 = inlined_call_operand.vmem [shape: s32[27,1,256], index: 0, kind: input, shape index: {}]   ;;  %s15063_s1 = inlined_call_operand.vmem [shape: bf16[8,256], index: 1, kind: input, shape index: {}]   ;;  %s15064_s2 = inlined_call_operand.vmem [shape: bf16[27,16,8], index: 2, kind: input, shape index: {}]   ;;  %s15065_s3 = inlined_call_operand.vmem [shape: f32[16,1], index: 3, kind: input, shape index: {}]   ;;  %s15066_s4 = inlined_call_operand.vmem [shape: f32[16,1], index: 4, kind: input, shape index: {}]   ;;  %s15067_s5 = inlined_call_operand.hbm [shape: f32[16,256], index: 5, kind: output, shape index: {}]  }
   0x1   :  { %v56_v1 = vld [vmem:[%s15062_s0] sm:$0x3] }
   0x2   :  { %10 = vsyncpa [#allocation3], 0  ;;  %v9402_v2 = vshrl.u32 %v15070_v0, 7  ;;  %v9404_v3 = vperm.slane %v56_v1, 0  ;;  %v9406_v4 = vperm.slane %v56_v1, 1  ;;  %v22_v38 = vld [vmem:[%s15063_s1] sm:$0xff] }
   0x3   :  { %v15071_v13 = vmov 1.0|1.0   ;;  %v7399_v37 = vld [vmem:[%s15062_s0 + $0x2] sm:$0x3]  ;;  %v220_v40 = vunpack.c.l.b16 %v22_v38  ;;  %v221_v42 = vunpack.c.h.b16 %v22_v38  ;;  %v9897_v45 = vld [vmem:[%s15062_s0 + $0x4] sm:$0x3] }
   0x4   :  { %v9409_v5 = vadd.s32 112, %v9402_v2  ;;  %v9412_v6 = vadd.s32 120, %v9402_v2  ;;  %v9415_v7 = vadd.s32 240, %v9402_v2  ;;  %v9418_v8 = vadd.s32 248, %v9402_v2  ;;  %v9303_v52 = vld [vmem:[%s15064_s2] sm:$0xff]  ;;  %s7323_s6 = sshll.u32 %s15067_s5, 4  ;;  %s7324_s6 = int_to_ptr.hbm [resolvable:$true] %s7323_s6 }
   0x5   :  { %v9421_v9 = vadd.s32 96, %v9402_v2  ;;  %v9424_v10 = vadd.s32 104, %v9402_v2  ;;  %v9427_v11 = vadd.s32 224, %v9402_v2  ;;  %v9430_v12 = vadd.s32 232, %v9402_v2  ;;  %v9960_v62 = vld [vmem:[%s15062_s0 + $0x6] sm:$0x3] }
   0x6   :  { %vm87_vm0 = vcmp.eq.s32.totalorder %v9409_v5, %v9404_v3  ;;  %vm89_vm1 = vcmp.eq.s32.totalorder %v9412_v6, %v9404_v3  ;;  %vm119_vm2 = vcmp.eq.s32.totalorder %v9415_v7, %v9404_v3  ;;  %vm121_vm3 = vcmp.eq.s32.totalorder %v9418_v8, %v9404_v3  ;;  %s9366_s7 = smov 256   ;;  %s9367_s8 = smov 16  }
   0x7   :  { %vm7335_vm4 = vmpackc.low %vm89_vm1, %vm87_vm0  ;;  %vm88_vm5 = vcmp.eq.s32.totalorder %v9409_v5, %v9406_v4  ;;  %vm90_vm6 = vcmp.eq.s32.totalorder %v9412_v6, %v9406_v4  ;;  %vm120_vm7 = vcmp.eq.s32.totalorder %v9415_v7, %v9406_v4  ;;  %vm122_vm8 = vcmp.eq.s32.totalorder %v9418_v8, %v9406_v4 }
   0x8   :  { %7336 = vmatpush.bf16.msk.msra.mxu0 %vm7335_vm4, %v15071_v13  ;;  %vm7351_vm9 = vmpackc.low %vm121_vm3, %vm119_vm2  ;;  %vm83_vm10 = vcmp.eq.s32.totalorder %v9421_v9, %v9404_v3  ;;  %vm85_vm11 = vcmp.eq.s32.totalorder %v9424_v10, %v9404_v3  ;;  %vm115_vm13 = vcmp.eq.s32.totalorder %v9427_v11, %v9404_v3  ;;  %vm117_vm14 = vcmp.eq.s32.totalorder %v9430_v12, %v9404_v3 }
   0x9   :  { %7352 = vmatpush.bf16.msk.msra.mxu1 %vm7351_vm9, %v15071_v13  ;;  %vm7367_vm12 = vmpackc.low %vm90_vm6, %vm88_vm5  ;;  %vm84_vm15 = vcmp.eq.s32.totalorder %v9421_v9, %v9406_v4  ;;  %vm86_vm0 = vcmp.eq.s32.totalorder %v9424_v10, %v9406_v4  ;;  %v9464_v14 = vadd.s32 80, %v9402_v2  ;;  %v9467_v15 = vadd.s32 88, %v9402_v2 }
   0xa   :  { %7368 = vmatpush.bf16.msk.msra.mxu2 %vm7367_vm12, %v15071_v13  ;;  %vm7383_vm1 = vmpackc.low %vm122_vm8, %vm120_vm7  ;;  %v9470_v16 = vadd.s32 208, %v9402_v2  ;;  %v9473_v17 = vadd.s32 216, %v9402_v2  ;;  %vm116_vm3 = vcmp.eq.s32.totalorder %v9427_v11, %v9406_v4  ;;  %vm118_vm4 = vcmp.eq.s32.totalorder %v9430_v12, %v9406_v4 }
   0xb   :  { %7384 = vmatpush.bf16.msk.msra.mxu3 %vm7383_vm1, %v15071_v13  ;;  %vm7337_vm2 = vmpackc.low %vm85_vm11, %vm83_vm10  ;;  %vm79_vm6 = vcmp.eq.s32.totalorder %v9464_v14, %v9404_v3  ;;  %vm81_vm7 = vcmp.eq.s32.totalorder %v9467_v15, %v9404_v3  ;;  %v9492_v18 = vadd.s32 64, %v9402_v2  ;;  %v9495_v19 = vadd.s32 72, %v9402_v2 }
   0xc   :  { %7338 = vmatpush.bf16.msk.msra.mxu0 %vm7337_vm2, %v15071_v13  ;;  %vm7353_vm5 = vmpackc.low %vm117_vm14, %vm115_vm13  ;;  %vm111_vm9 = vcmp.eq.s32.totalorder %v9470_v16, %v9404_v3  ;;  %vm113_vm10 = vcmp.eq.s32.totalorder %v9473_v17, %v9404_v3  ;;  %v9509_v20 = vadd.s32 192, %v9402_v2  ;;  %v9512_v21 = vadd.s32 200, %v9402_v2 }
   0xd   :  { %7354 = vmatpush.bf16.msk.msra.mxu1 %vm7353_vm5, %v15071_v13  ;;  %vm7369_vm8 = vmpackc.low %vm86_vm0, %vm84_vm15  ;;  %vm80_vm12 = vcmp.eq.s32.totalorder %v9464_v14, %v9406_v4  ;;  %vm82_vm13 = vcmp.eq.s32.totalorder %v9467_v15, %v9406_v4  ;;  %vm112_vm15 = vcmp.eq.s32.totalorder %v9470_v16, %v9406_v4  ;;  %vm114_vm0 = vcmp.eq.s32.totalorder %v9473_v17, %v9406_v4 }
   0xe   :  { %7370 = vmatpush.bf16.msk.msra.mxu2 %vm7369_vm8, %v15071_v13  ;;  %vm7385_vm11 = vmpackc.low %vm118_vm4, %vm116_vm3  ;;  %vm75_vm2 = vcmp.eq.s32.totalorder %v9492_v18, %v9404_v3  ;;  %vm77_vm3 = vcmp.eq.s32.totalorder %v9495_v19, %v9404_v3  ;;  %v9536_v22 = vadd.s32 48, %v9402_v2  ;;  %v9539_v23 = vadd.s32 56, %v9402_v2 }
   0xf   :  { %7386 = vmatpush.bf16.msk.msra.mxu3 %vm7385_vm11, %v15071_v13  ;;  %vm7339_vm14 = vmpackc.low %vm81_vm7, %vm79_vm6  ;;  %vm107_vm5 = vcmp.eq.s32.totalorder %v9509_v20, %v9404_v3  ;;  %vm109_vm6 = vcmp.eq.s32.totalorder %v9512_v21, %v9404_v3  ;;  %v9547_v24 = vadd.s32 176, %v9402_v2  ;;  %v9550_v25 = vadd.s32 184, %v9402_v2 }
  0x10   :  { %7340 = vmatpush.bf16.msk.msra.mxu0 %vm7339_vm14, %v15071_v13  ;;  %vm7355_vm1 = vmpackc.low %vm113_vm10, %vm111_vm9  ;;  %vm76_vm8 = vcmp.eq.s32.totalorder %v9492_v18, %v9406_v4  ;;  %vm78_vm9 = vcmp.eq.s32.totalorder %v9495_v19, %v9406_v4  ;;  %vm108_vm11 = vcmp.eq.s32.totalorder %v9509_v20, %v9406_v4  ;;  %vm71_vm14 = vcmp.eq.s32.totalorder %v9536_v22, %v9404_v3 }
  0x11   :  { %7356 = vmatpush.bf16.msk.msra.mxu1 %vm7355_vm1, %v15071_v13  ;;  %vm7371_vm4 = vmpackc.low %vm82_vm13, %vm80_vm12  ;;  %vm110_vm12 = vcmp.eq.s32.totalorder %v9512_v21, %v9406_v4  ;;  %v9574_v26 = vadd.s32 32, %v9402_v2  ;;  %v9577_v27 = vadd.s32 40, %v9402_v2  ;;  %vm103_vm1 = vcmp.eq.s32.totalorder %v9547_v24, %v9404_v3 }
  0x12   :  { %7372 = vmatpush.bf16.msk.msra.mxu2 %vm7371_vm4, %v15071_v13  ;;  %vm7387_vm7 = vmpackc.low %vm114_vm0, %vm112_vm15  ;;  %vm73_vm15 = vcmp.eq.s32.totalorder %v9539_v23, %v9404_v3  ;;  %v9585_v28 = vadd.s32 160, %v9402_v2  ;;  %v9588_v29 = vadd.s32 168, %v9402_v2  ;;  %vm72_vm4 = vcmp.eq.s32.totalorder %v9536_v22, %v9406_v4 }
  0x13   :  { %7388 = vmatpush.bf16.msk.msra.mxu3 %vm7387_vm7, %v15071_v13  ;;  %vm7341_vm10 = vmpackc.low %vm77_vm3, %vm75_vm2  ;;  %vm105_vm2 = vcmp.eq.s32.totalorder %v9550_v25, %v9404_v3  ;;  %vm104_vm7 = vcmp.eq.s32.totalorder %v9547_v24, %v9406_v4  ;;  %v9612_v30 = vadd.s32 16, %v9402_v2  ;;  %v9615_v31 = vadd.s32 24, %v9402_v2 }
  0x14   :  { %7342 = vmatpush.bf16.msk.msra.mxu0 %vm7341_vm10, %v15071_v13  ;;  %vm7357_vm13 = vmpackc.low %vm109_vm6, %vm107_vm5  ;;  %vm74_vm5 = vcmp.eq.s32.totalorder %v9539_v23, %v9406_v4  ;;  %vm67_vm10 = vcmp.eq.s32.totalorder %v9574_v26, %v9404_v3  ;;  %v9623_v32 = vadd.s32 144, %v9402_v2  ;;  %v9626_v33 = vadd.s32 152, %v9402_v2 }
  0x15   :  { %7358 = vmatpush.bf16.msk.msra.mxu1 %vm7357_vm13, %v15071_v13  ;;  %vm7373_vm0 = vmpackc.low %vm78_vm9, %vm76_vm8  ;;  %vm106_vm8 = vcmp.eq.s32.totalorder %v9550_v25, %v9406_v4  ;;  %vm99_vm13 = vcmp.eq.s32.totalorder %v9585_v28, %v9404_v3  ;;  %v9650_v34 = vadd.s32 8, %v9402_v2  ;;  %v9658_v35 = vadd.s32 128, %v9402_v2 }
  0x16   :  { %7374 = vmatpush.bf16.msk.msra.mxu2 %vm7373_vm0, %v15071_v13  ;;  %vm7389_vm3 = vmpackc.low %vm110_vm12, %vm108_vm11  ;;  %vm69_vm11 = vcmp.eq.s32.totalorder %v9577_v27, %v9404_v3  ;;  %vm68_vm0 = vcmp.eq.s32.totalorder %v9574_v26, %v9406_v4  ;;  %v9661_v36 = vadd.s32 136, %v9402_v2  ;;  %v9696_v39 = vperm.slane %v7399_v37, 0 }
  0x17   :  { %7390 = vmatpush.bf16.msk.msra.mxu3 %vm7389_vm3, %v15071_v13  ;;  %vm7343_vm6 = vmpackc.low %vm73_vm15, %vm71_vm14  ;;  %vm101_vm14 = vcmp.eq.s32.totalorder %v9588_v29, %v9404_v3  ;;  %vm100_vm3 = vcmp.eq.s32.totalorder %v9585_v28, %v9406_v4  ;;  %v9708_v41 = vperm.slane %v7399_v37, 1  ;;  %v9728_v43 = vpack.c.b16 %v220_v40, %v220_v40 }
  0x18   :  { %7344 = vmatpush.bf16.msk.msra.mxu0 %vm7343_vm6, %v15071_v13  ;;  %vm7359_vm9 = vmpackc.low %vm105_vm2, %vm103_vm1  ;;  %vm70_vm1 = vcmp.eq.s32.totalorder %v9577_v27, %v9406_v4  ;;  %vm63_vm6 = vcmp.eq.s32.totalorder %v9612_v30, %v9404_v3  ;;  %v9735_v44 = vpack.c.b16 %v221_v42, %v221_v42  ;;  %v9900_v46 = vperm.slane %v9897_v45, 1 }
  0x19   :  { %7360 = vmatpush.bf16.msk.msra.mxu1 %vm7359_vm9, %v15071_v13  ;;  %vm7375_vm12 = vmpackc.low %vm74_vm5, %vm72_vm4  ;;  %vm102_vm4 = vcmp.eq.s32.totalorder %v9588_v29, %v9406_v4  ;;  %vm95_vm9 = vcmp.eq.s32.totalorder %v9623_v32, %v9404_v3  ;;  %v9971_v63 = vperm.slane %v9960_v62, 0  ;;  %v9980_v1 = vperm.slane %v9897_v45, 0  ;;  %v9304_v45 = vld [vmem:[%s15064_s2 + $0x8] sm:$0xff] }
  0x1a   :  { %7376 = vmatpush.bf16.msk.msra.mxu2 %vm7375_vm12, %v15071_v13  ;;  %vm7391_vm15 = vmpackc.low %vm106_vm8, %vm104_vm7  ;;  %vm65_vm7 = vcmp.eq.s32.totalorder %v9615_v31, %v9404_v3  ;;  %vm64_vm12 = vcmp.eq.s32.totalorder %v9612_v30, %v9406_v4  ;;  %v15107_v40 = vmov 0 }
  0x1b   :  { %7392 = vmatpush.bf16.msk.msra.mxu3 %vm7391_vm15, %v15071_v13  ;;  %vm7345_vm2 = vmpackc.low %vm69_vm11, %vm67_vm10  ;;  %vm97_vm10 = vcmp.eq.s32.totalorder %v9626_v33, %v9404_v3  ;;  %vm96_vm15 = vcmp.eq.s32.totalorder %v9623_v32, %v9406_v4 }
  0x1c   :  { %7346 = vmatpush.bf16.msk.msra.mxu0 %vm7345_vm2, %v15071_v13  ;;  %vm7361_vm5 = vmpackc.low %vm101_vm14, %vm99_vm13  ;;  %vm66_vm13 = vcmp.eq.s32.totalorder %v9615_v31, %v9406_v4  ;;  %vm59_vm2 = vcmp.eq.s32.totalorder %v9402_v2, %v9404_v3 }
  0x1d   :  { %7362 = vmatpush.bf16.msk.msra.mxu1 %vm7361_vm5, %v15071_v13  ;;  %vm7377_vm8 = vmpackc.low %vm70_vm1, %vm68_vm0  ;;  %vm98_vm0 = vcmp.eq.s32.totalorder %v9626_v33, %v9406_v4  ;;  %vm91_vm5 = vcmp.eq.s32.totalorder %v9658_v35, %v9404_v3 }
  0x1e   :  { %7378 = vmatpush.bf16.msk.msra.mxu2 %vm7377_vm8, %v15071_v13  ;;  %vm7393_vm11 = vmpackc.low %vm102_vm4, %vm100_vm3  ;;  %vm61_vm3 = vcmp.eq.s32.totalorder %v9650_v34, %v9404_v3  ;;  %vm60_vm8 = vcmp.eq.s32.totalorder %v9402_v2, %v9406_v4 }
  0x1f   :  { %7394 = vmatpush.bf16.msk.msra.mxu3 %vm7393_vm11, %v15071_v13  ;;  %vm7347_vm14 = vmpackc.low %vm65_vm7, %vm63_vm6  ;;  %vm93_vm6 = vcmp.eq.s32.totalorder %v9661_v36, %v9404_v3  ;;  %vm92_vm11 = vcmp.eq.s32.totalorder %v9658_v35, %v9406_v4 }
  0x20   :  { %7348 = vmatpush.bf16.msk.msra.mxu0 %vm7347_vm14, %v15071_v13  ;;  %vm7363_vm1 = vmpackc.low %vm97_vm10, %vm95_vm9  ;;  %vm62_vm9 = vcmp.eq.s32.totalorder %v9650_v34, %v9406_v4  ;;  %vm314_vm14 = vcmp.eq.s32.totalorder %v9409_v5, %v9696_v39 }
  0x21   :  { %7364 = vmatpush.bf16.msk.msra.mxu1 %vm7363_vm1, %v15071_v13  ;;  %vm7379_vm4 = vmpackc.low %vm66_vm13, %vm64_vm12  ;;  %vm94_vm12 = vcmp.eq.s32.totalorder %v9661_v36, %v9406_v4  ;;  %vm346_vm1 = vcmp.eq.s32.totalorder %v9415_v7, %v9696_v39 }
  0x22   :  { %7380 = vmatpush.bf16.msk.msra.mxu2 %vm7379_vm4, %v15071_v13  ;;  %vm7395_vm7 = vmpackc.low %vm98_vm0, %vm96_vm15  ;;  %vm316_vm15 = vcmp.eq.s32.totalorder %v9412_v6, %v9696_v39  ;;  %vm315_vm4 = vcmp.eq.s32.totalorder %v9409_v5, %v9708_v41 }
  0x23   :  { %7396 = vmatpush.bf16.msk.msra.mxu3 %vm7395_vm7, %v15071_v13  ;;  %vm7349_vm10 = vmpackc.low %vm61_vm3, %vm59_vm2  ;;  %vm348_vm2 = vcmp.eq.s32.totalorder %v9418_v8, %v9696_v39  ;;  %vm347_vm7 = vcmp.eq.s32.totalorder %v9415_v7, %v9708_v41 }
  0x24   :  { %7350 = vmatpush.bf16.msk.msra.mxu0 %vm7349_vm10, %v15071_v13  ;;  %vm7365_vm13 = vmpackc.low %vm93_vm6, %vm91_vm5  ;;  %vm317_vm5 = vcmp.eq.s32.totalorder %v9412_v6, %v9708_v41  ;;  %vm310_vm10 = vcmp.eq.s32.totalorder %v9421_v9, %v9696_v39 }
  0x25   :  { %7366 = vmatpush.bf16.msk.msra.mxu1 %vm7365_vm13, %v15071_v13  ;;  %vm7381_vm0 = vmpackc.low %vm62_vm9, %vm60_vm8  ;;  %vm349_vm8 = vcmp.eq.s32.totalorder %v9418_v8, %v9708_v41  ;;  %vm342_vm13 = vcmp.eq.s32.totalorder %v9427_v11, %v9696_v39 }
  0x26   :  { %7382 = vmatpush.bf16.msk.msra.mxu2 %vm7381_vm0, %v15071_v13  ;;  %vm7397_vm3 = vmpackc.low %vm94_vm12, %vm92_vm11  ;;  %vm312_vm11 = vcmp.eq.s32.totalorder %v9424_v10, %v9696_v39  ;;  %vm311_vm0 = vcmp.eq.s32.totalorder %v9421_v9, %v9708_v41 }
  0x27   :  { %7398 = vmatpush.bf16.msk.msra.mxu3 %vm7397_vm3, %v15071_v13  ;;  %vm7400_vm6 = vmpackc.low %vm316_vm15, %vm314_vm14  ;;  %234 = vmatmul.bf16.vlgmr.msra.gmra.mxu0 %v9728_v43  ;;  %vm344_vm14 = vcmp.eq.s32.totalorder %v9430_v12, %v9696_v39  ;;  %vm343_vm3 = vcmp.eq.s32.totalorder %v9427_v11, %v9708_v41 }
  0x28   :  { %7401 = vmatpush.bf16.msk.msrb.mxu0 %vm7400_vm6, %v15071_v13  ;;  %vm7416_vm9 = vmpackc.low %vm348_vm2, %vm346_vm1  ;;  %247 = vmatmul.bf16.vlgmr.msra.gmra.mxu1 %v9735_v44  ;;  %vm313_vm1 = vcmp.eq.s32.totalorder %v9424_v10, %v9708_v41  ;;  %vm306_vm6 = vcmp.eq.s32.totalorder %v9464_v14, %v9696_v39 }
  0x29   :  { %7417 = vmatpush.bf16.msk.msrb.mxu1 %vm7416_vm9, %v15071_v13  ;;  %vm7432_vm12 = vmpackc.low %vm317_vm5, %vm315_vm4  ;;  %260 = vmatmul.bf16.vlgmr.msra.gmra.mxu2 %v9728_v43  ;;  %vm345_vm4 = vcmp.eq.s32.totalorder %v9430_v12, %v9708_v41  ;;  %vm338_vm9 = vcmp.eq.s32.totalorder %v9470_v16, %v9696_v39 }
  0x2a   :  { %7433 = vmatpush.bf16.msk.msrb.mxu2 %vm7432_vm12, %v15071_v13  ;;  %vm7448_vm15 = vmpackc.low %vm349_vm8, %vm347_vm7  ;;  %273 = vmatmul.bf16.vlgmr.msra.gmra.mxu3 %v9735_v44  ;;  %vm308_vm7 = vcmp.eq.s32.totalorder %v9467_v15, %v9696_v39  ;;  %vm307_vm12 = vcmp.eq.s32.totalorder %v9464_v14, %v9708_v41 }
  0x2b   :  { %7449 = vmatpush.bf16.msk.msrb.mxu3 %vm7448_vm15, %v15071_v13  ;;  %vm7402_vm2 = vmpackc.low %vm312_vm11, %vm310_vm10  ;;  %vm340_vm10 = vcmp.eq.s32.totalorder %v9473_v17, %v9696_v39  ;;  %vm339_vm15 = vcmp.eq.s32.totalorder %v9470_v16, %v9708_v41 }
  0x2c   :  { %7403 = vmatpush.bf16.msk.msrb.mxu0 %vm7402_vm2, %v15071_v13  ;;  %vm7418_vm5 = vmpackc.low %vm344_vm14, %vm342_vm13  ;;  %vm309_vm13 = vcmp.eq.s32.totalorder %v9467_v15, %v9708_v41  ;;  %vm302_vm2 = vcmp.eq.s32.totalorder %v9492_v18, %v9696_v39 }
  0x2d   :  { %7419 = vmatpush.bf16.msk.msrb.mxu1 %vm7418_vm5, %v15071_v13  ;;  %vm7434_vm8 = vmpackc.low %vm313_vm1, %vm311_vm0  ;;  %vm341_vm0 = vcmp.eq.s32.totalorder %v9473_v17, %v9708_v41  ;;  %vm334_vm5 = vcmp.eq.s32.totalorder %v9509_v20, %v9696_v39 }
  0x2e   :  { %7435 = vmatpush.bf16.msk.msrb.mxu2 %vm7434_vm8, %v15071_v13  ;;  %vm7450_vm11 = vmpackc.low %vm345_vm4, %vm343_vm3  ;;  %vm304_vm3 = vcmp.eq.s32.totalorder %v9495_v19, %v9696_v39  ;;  %vm303_vm8 = vcmp.eq.s32.totalorder %v9492_v18, %v9708_v41 }
  0x2f   :  { %7451 = vmatpush.bf16.msk.msrb.mxu3 %vm7450_vm11, %v15071_v13  ;;  %vm7404_vm14 = vmpackc.low %vm308_vm7, %vm306_vm6  ;;  %vm336_vm6 = vcmp.eq.s32.totalorder %v9512_v21, %v9696_v39  ;;  %vm335_vm11 = vcmp.eq.s32.totalorder %v9509_v20, %v9708_v41 }
  0x30   :  { %7405 = vmatpush.bf16.msk.msrb.mxu0 %vm7404_vm14, %v15071_v13  ;;  %vm7420_vm1 = vmpackc.low %vm340_vm10, %vm338_vm9  ;;  %vm305_vm9 = vcmp.eq.s32.totalorder %v9495_v19, %v9708_v41  ;;  %vm298_vm14 = vcmp.eq.s32.totalorder %v9536_v22, %v9696_v39 }
  0x31   :  { %7421 = vmatpush.bf16.msk.msrb.mxu1 %vm7420_vm1, %v15071_v13  ;;  %vm7436_vm4 = vmpackc.low %vm309_vm13, %vm307_vm12  ;;  %vm337_vm12 = vcmp.eq.s32.totalorder %v9512_v21, %v9708_v41  ;;  %vm330_vm1 = vcmp.eq.s32.totalorder %v9547_v24, %v9696_v39 }
  0x32   :  { %7437 = vmatpush.bf16.msk.msrb.mxu2 %vm7436_vm4, %v15071_v13  ;;  %vm7452_vm7 = vmpackc.low %vm341_vm0, %vm339_vm15  ;;  %vm300_vm15 = vcmp.eq.s32.totalorder %v9539_v23, %v9696_v39  ;;  %vm299_vm4 = vcmp.eq.s32.totalorder %v9536_v22, %v9708_v41 }
  0x33   :  { %7453 = vmatpush.bf16.msk.msrb.mxu3 %vm7452_vm7, %v15071_v13  ;;  %vm7406_vm10 = vmpackc.low %vm304_vm3, %vm302_vm2  ;;  %vm332_vm2 = vcmp.eq.s32.totalorder %v9550_v25, %v9696_v39  ;;  %vm331_vm7 = vcmp.eq.s32.totalorder %v9547_v24, %v9708_v41 }
  0x34   :  { %7407 = vmatpush.bf16.msk.msrb.mxu0 %vm7406_vm10, %v15071_v13  ;;  %vm7422_vm13 = vmpackc.low %vm336_vm6, %vm334_vm5  ;;  %vm301_vm5 = vcmp.eq.s32.totalorder %v9539_v23, %v9708_v41  ;;  %vm294_vm10 = vcmp.eq.s32.totalorder %v9574_v26, %v9696_v39 }
  0x35   :  { %7423 = vmatpush.bf16.msk.msrb.mxu1 %vm7422_vm13, %v15071_v13  ;;  %vm7438_vm0 = vmpackc.low %vm305_vm9, %vm303_vm8  ;;  %vm333_vm8 = vcmp.eq.s32.totalorder %v9550_v25, %v9708_v41  ;;  %vm326_vm13 = vcmp.eq.s32.totalorder %v9585_v28, %v9696_v39 }
  0x36   :  { %7439 = vmatpush.bf16.msk.msrb.mxu2 %vm7438_vm0, %v15071_v13  ;;  %vm7454_vm3 = vmpackc.low %vm337_vm12, %vm335_vm11  ;;  %vm296_vm11 = vcmp.eq.s32.totalorder %v9577_v27, %v9696_v39  ;;  %vm295_vm0 = vcmp.eq.s32.totalorder %v9574_v26, %v9708_v41 }
  0x37   :  { %7455 = vmatpush.bf16.msk.msrb.mxu3 %vm7454_vm3, %v15071_v13  ;;  %vm7408_vm6 = vmpackc.low %vm300_vm15, %vm298_vm14  ;;  %vm328_vm14 = vcmp.eq.s32.totalorder %v9588_v29, %v9696_v39  ;;  %vm327_vm3 = vcmp.eq.s32.totalorder %v9585_v28, %v9708_v41 }
  0x38   :  { %7409 = vmatpush.bf16.msk.msrb.mxu0 %vm7408_vm6, %v15071_v13  ;;  %vm7424_vm9 = vmpackc.low %vm332_vm2, %vm330_vm1  ;;  %vm297_vm1 = vcmp.eq.s32.totalorder %v9577_v27, %v9708_v41  ;;  %vm290_vm6 = vcmp.eq.s32.totalorder %v9612_v30, %v9696_v39 }
  0x39   :  { %7425 = vmatpush.bf16.msk.msrb.mxu1 %vm7424_vm9, %v15071_v13  ;;  %vm7440_vm12 = vmpackc.low %vm301_vm5, %vm299_vm4  ;;  %vm329_vm4 = vcmp.eq.s32.totalorder %v9588_v29, %v9708_v41  ;;  %vm322_vm9 = vcmp.eq.s32.totalorder %v9623_v32, %v9696_v39 }
  0x3a   :  { %7441 = vmatpush.bf16.msk.msrb.mxu2 %vm7440_vm12, %v15071_v13  ;;  %vm7456_vm15 = vmpackc.low %vm333_vm8, %vm331_vm7  ;;  %vm292_vm7 = vcmp.eq.s32.totalorder %v9615_v31, %v9696_v39  ;;  %vm291_vm12 = vcmp.eq.s32.totalorder %v9612_v30, %v9708_v41 }
  0x3b   :  { %7457 = vmatpush.bf16.msk.msrb.mxu3 %vm7456_vm15, %v15071_v13  ;;  %vm7410_vm2 = vmpackc.low %vm296_vm11, %vm294_vm10  ;;  %vm324_vm10 = vcmp.eq.s32.totalorder %v9626_v33, %v9696_v39  ;;  %vm323_vm15 = vcmp.eq.s32.totalorder %v9623_v32, %v9708_v41 }
  0x3c   :  { %7411 = vmatpush.bf16.msk.msrb.mxu0 %vm7410_vm2, %v15071_v13  ;;  %vm7426_vm5 = vmpackc.low %vm328_vm14, %vm326_vm13  ;;  %vm293_vm13 = vcmp.eq.s32.totalorder %v9615_v31, %v9708_v41  ;;  %vm286_vm2 = vcmp.eq.s32.totalorder %v9402_v2, %v9696_v39 }
  0x3d   :  { %7427 = vmatpush.bf16.msk.msrb.mxu1 %vm7426_vm5, %v15071_v13  ;;  %vm7442_vm8 = vmpackc.low %vm297_vm1, %vm295_vm0  ;;  %vm325_vm0 = vcmp.eq.s32.totalorder %v9626_v33, %v9708_v41  ;;  %vm318_vm5 = vcmp.eq.s32.totalorder %v9658_v35, %v9696_v39 }
  0x3e   :  { %7443 = vmatpush.bf16.msk.msrb.mxu2 %vm7442_vm8, %v15071_v13  ;;  %vm7458_vm11 = vmpackc.low %vm329_vm4, %vm327_vm3  ;;  %vm288_vm3 = vcmp.eq.s32.totalorder %v9650_v34, %v9696_v39  ;;  %vm287_vm8 = vcmp.eq.s32.totalorder %v9402_v2, %v9708_v41 }
  0x3f   :  { %7459 = vmatpush.bf16.msk.msrb.mxu3 %vm7458_vm11, %v15071_v13  ;;  %vm7412_vm14 = vmpackc.low %vm292_vm7, %vm290_vm6  ;;  %vm320_vm6 = vcmp.eq.s32.totalorder %v9661_v36, %v9696_v39  ;;  %vm319_vm11 = vcmp.eq.s32.totalorder %v9658_v35, %v9708_v41  ;;  %v15104_v39 = vmov 0 }
  0x40   :  { %7413 = vmatpush.bf16.msk.msrb.mxu0 %vm7412_vm14, %v15071_v13  ;;  %vm7428_vm1 = vmpackc.low %vm324_vm10, %vm322_vm9  ;;  %vm289_vm9 = vcmp.eq.s32.totalorder %v9650_v34, %v9708_v41 }
  0x41   :  { %7429 = vmatpush.bf16.msk.msrb.mxu1 %vm7428_vm1, %v15071_v13  ;;  %vm7444_vm4 = vmpackc.low %vm293_vm13, %vm291_vm12  ;;  %vm321_vm12 = vcmp.eq.s32.totalorder %v9661_v36, %v9708_v41  ;;  %vm624_vm1 = vcmp.eq.s32.totalorder %v9412_v6, %v9900_v46 }
  0x42   :  { %7445 = vmatpush.bf16.msk.msrb.mxu2 %vm7444_vm4, %v15071_v13  ;;  %vm7460_vm7 = vmpackc.low %vm325_vm0, %vm323_vm15  ;;  %vm622_vm0 = vcmp.eq.s32.totalorder %v9409_v5, %v9900_v46  ;;  %vm618_vm4 = vcmp.eq.s32.totalorder %v9421_v9, %v9900_v46 }
  0x43   :  { %7461 = vmatpush.bf16.msk.msrb.mxu3 %vm7460_vm7, %v15071_v13  ;;  %vm7414_vm10 = vmpackc.low %vm288_vm3, %vm286_vm2  ;;  %vm15069_vm2 = vcmask 1043456   ;;  %vm654_vm7 = vcmp.eq.s32.totalorder %v9415_v7, %v9900_v46 }
  0x44   :  { %7415 = vmatpush.bf16.msk.msrb.mxu0 %vm7414_vm10, %v15071_v13  ;;  %vm7430_vm13 = vmpackc.low %vm320_vm6, %vm318_vm5  ;;  %vm620_vm5 = vcmp.eq.s32.totalorder %v9424_v10, %v9900_v46  ;;  %vm15068_vm6 = vcmask 64512   ;;  %vm614_vm10 = vcmp.eq.s32.totalorder %v9464_v14, %v9900_v46 }
  0x45   :  { %7431 = vmatpush.bf16.msk.msrb.mxu1 %vm7430_vm13, %v15071_v13  ;;  %vm7446_vm14 = vmpackc.low %vm289_vm9, %vm287_vm8  ;;  %vm656_vm8 = vcmp.eq.s32.totalorder %v9418_v8, %v9900_v46  ;;  %vm650_vm13 = vcmp.eq.s32.totalorder %v9427_v11, %v9900_v46 }
  0x46   :  { %7447 = vmatpush.bf16.msk.msrb.mxu2 %vm7446_vm14, %v15071_v13  ;;  %vm7462_vm15 = vmpackc.low %vm321_vm12, %vm319_vm11  ;;  %vm616_vm11 = vcmp.eq.s32.totalorder %v9467_v15, %v9900_v46  ;;  %vm652_vm14 = vcmp.eq.s32.totalorder %v9430_v12, %v9900_v46 }
  0x47   :  { %7463 = vmatpush.bf16.msk.msrb.mxu3 %vm7462_vm15, %v15071_v13  ;;  %454 = vmatmul.bf16.vlgmr.msrb.gmra.mxu0 %v9728_v43  ;;  %vm7511_vm3 = vmpackc.low %vm624_vm1, %vm622_vm0  ;;  %vm610_vm0 = vcmp.eq.s32.totalorder %v9492_v18, %v9900_v46  ;;  %vm612_vm1 = vcmp.eq.s32.totalorder %v9495_v19, %v9900_v46 }
  0x48   :  { %467 = vmatmul.bf16.vlgmr.msrb.gmra.mxu1 %v9735_v44  ;;  %vm7513_vm9 = vmpackc.low %vm620_vm5, %vm618_vm4  ;;  %vm646_vm4 = vcmp.eq.s32.totalorder %v9470_v16, %v9900_v46  ;;  %vm648_vm5 = vcmp.eq.s32.totalorder %v9473_v17, %v9900_v46 }
  0x49   :  { %480 = vmatmul.bf16.vlgmr.msrb.gmra.mxu2 %v9728_v43  ;;  %vm7527_vm12 = vmpackc.low %vm656_vm8, %vm654_vm7  ;;  %vm606_vm8 = vcmp.eq.s32.totalorder %v9536_v22, %v9900_v46 }
  0x4a   :  { %493 = vmatmul.bf16.vlgmr.msrb.gmra.mxu3 %v9735_v44  ;;  %vm7515_vm15 = vmpackc.low %vm616_vm11, %vm614_vm10  ;;  %vm642_vm11 = vcmp.eq.s32.totalorder %v9509_v20, %v9900_v46 }
  0x4b   :  { %vm7517_vm7 = vmpackc.low %vm612_vm1, %vm610_vm0  ;;  %vm638_vm1 = vcmp.eq.s32.totalorder %v9547_v24, %v9900_v46 }
  0x4c   :  { %vm7531_vm10 = vmpackc.low %vm648_vm5, %vm646_vm4  ;;  %vm598_vm5 = vcmp.eq.s32.totalorder %v9612_v30, %v9900_v46 }
  0xa4   :  { %v235_v47 = vpop.f32.mrf.mxu0 }
  0xa5   :  { %v248_v48 = vpop.f32.mrf.mxu1 }
  0xa6   :  { %v249_v49 = vadd.f32 %v248_v48, %v235_v47 }
  0xa8   :  { %v280_v50 = vpack.c.bf16 %v249_v49, %v249_v49 }
  0xaa   :  { %v556_v51 = vsel %vm15069_vm2, %v280_v50, 0  ;;  %v10318_v50 = vperm.slane %v9960_v62, 1  ;;  %v10330_v62 = vld [vmem:[%s15064_s2 + $0x10] sm:$0xff] }
  0xab   :  { %568 = vmatpush.bf16.msra.mxu2 %v556_v51 }
  0xac   :  { %v261_v53 = vpop.f32.mrf.mxu2  ;;  %v237_v54 = vpop.f32.mrf.mxu0 }
  0xad   :  { %v274_v55 = vpop.f32.mrf.mxu3  ;;  %v250_v56 = vpop.f32.mrf.mxu1 }
  0xae   :  { %v275_v57 = vadd.f32 %v274_v55, %v261_v53  ;;  %7476 = vmatmul.msk.bf16.vlgmr.msra.gmra.mxu2 %vm15068_vm6, %v9303_v52 }
  0xaf   :  { %7512 = vmatpush.bf16.msk.msrb.mxu2 %vm7511_vm3, %v15071_v13  ;;  %vm7529_vm3 = vmpackc.low %vm652_vm14, %vm650_vm13  ;;  %vm602_vm14 = vcmp.eq.s32.totalorder %v9574_v26, %v9900_v46 }
  0xb0   :  { %v281_v58 = vpack.c.bf16 %v275_v57, %v275_v57 }
  0xb2   :  { %v559_v59 = vsel %vm15069_vm2, %v281_v58, 0 }
  0xb3   :  { %7514 = vmatpush.bf16.msk.msrb.mxu2 %vm7513_vm9, %v15071_v13  ;;  %582 = vmatpush.bf16.msra.mxu3 %v559_v59  ;;  %vm608_vm9 = vcmp.eq.s32.totalorder %v9539_v23, %v9900_v46 }
  0xb4   :  { %v263_v60 = vpop.f32.mrf.mxu2  ;;  %vm7519_vm13 = vmpackc.low %vm608_vm9, %vm606_vm8  ;;  %vm634_vm9 = vcmp.eq.s32.totalorder %v9585_v28, %v9900_v46 }
  0xb5   :  { %v276_v61 = vpop.f32.mrf.mxu3 }
  0xb6   :  { %7477 = vmatmul.msk.bf16.vlgmr.msra.gmra.mxu3 %vm15068_vm6, %v9303_v52 }
  0xb7   :  { %7528 = vmatpush.bf16.msk.msrb.mxu3 %vm7527_vm12, %v15071_v13  ;;  %7516 = vmatpush.bf16.msk.msrb.mxu2 %vm7515_vm15, %v15071_v13  ;;  %vm644_vm12 = vcmp.eq.s32.totalorder %v9512_v21, %v9900_v46  ;;  %vm604_vm15 = vcmp.eq.s32.totalorder %v9577_v27, %v9900_v46 }
  0xb8   :  { %vm7533_vm0 = vmpackc.low %vm644_vm12, %vm642_vm11  ;;  %vm594_vm12 = vcmp.eq.s32.totalorder %v9402_v2, %v9900_v46 }
  0xb9   :  { %vm7521_vm4 = vmpackc.low %vm604_vm15, %vm602_vm14  ;;  %vm888_vm14 = vcmp.eq.s32.totalorder %v9409_v5, %v9971_v63  ;;  %vm890_vm15 = vcmp.eq.s32.totalorder %v9412_v6, %v9971_v63 }
  0xba   :  { %vm7552_vm6 = vmpackc.low %vm890_vm15, %vm888_vm14  ;;  %vm626_vm14 = vcmp.eq.s32.totalorder %v9658_v35, %v9900_v46  ;;  %vm628_vm15 = vcmp.eq.s32.totalorder %v9661_v36, %v9900_v46 }
  0xbb   :  { %7530 = vmatpush.bf16.msk.msrb.mxu3 %vm7529_vm3, %v15071_v13  ;;  %7518 = vmatpush.bf16.msk.msrb.mxu2 %vm7517_vm7, %v15071_v13  ;;  %vm640_vm3 = vcmp.eq.s32.totalorder %v9550_v25, %v9900_v46  ;;  %vm600_vm7 = vcmp.eq.s32.totalorder %v9615_v31, %v9900_v46 }
  0xbc   :  { %vm7535_vm8 = vmpackc.low %vm640_vm3, %vm638_vm1  ;;  %vm621_vm1 = vcmp.eq.s32.totalorder %v9409_v5, %v9980_v1  ;;  %vm623_vm3 = vcmp.eq.s32.totalorder %v9412_v6, %v9980_v1 }
  0xbd   :  { %vm7523_vm11 = vmpackc.low %vm600_vm7, %vm598_vm5  ;;  %vm630_vm5 = vcmp.eq.s32.totalorder %v9623_v32, %v9900_v46  ;;  %vm632_vm7 = vcmp.eq.s32.totalorder %v9626_v33, %v9900_v46 }
  0xbf   :  { %7532 = vmatpush.bf16.msk.msrb.mxu3 %vm7531_vm10, %v15071_v13  ;;  %7520 = vmatpush.bf16.msk.msrb.mxu2 %vm7519_vm13, %v15071_v13  ;;  %vm636_vm10 = vcmp.eq.s32.totalorder %v9588_v29, %v9900_v46  ;;  %vm596_vm13 = vcmp.eq.s32.totalorder %v9650_v34, %v9900_v46 }
  0xc3   :  { %7534 = vmatpush.bf16.msk.msrb.mxu3 %vm7533_vm0, %v15071_v13  ;;  %7522 = vmatpush.bf16.msk.msrb.mxu2 %vm7521_vm4, %v15071_v13  ;;  %vm7537_vm0 = vmpackc.low %vm636_vm10, %vm634_vm9  ;;  %vm886_vm9 = vcmp.eq.s32.totalorder %v9424_v10, %v9971_v63 }
  0xc4   :  { %v455_v3 = vpop.f32.mrf.mxu0  ;;  %vm7525_vm4 = vmpackc.low %vm596_vm13, %vm594_vm12  ;;  %vm619_vm12 = vcmp.eq.s32.totalorder %v9424_v10, %v9980_v1 }
  0xc5   :  { %v468_v4 = vpop.f32.mrf.mxu1  ;;  %vm10005_vm10 = vmpackc.low %vm623_vm3, %vm621_vm1  ;;  %vm922_vm1 = vcmp.eq.s32.totalorder %v9418_v8, %v9971_v63 }
  0xc6   :  { %v469_v37 = vadd.f32 %v468_v4, %v455_v3  ;;  %vm10014_vm13 = vmpackc.low %vm632_vm7, %vm630_vm5  ;;  %vm882_vm5 = vcmp.eq.s32.totalorder %v9467_v15, %v9971_v63 }
  0xc7   :  { %7536 = vmatpush.bf16.msk.msrb.mxu3 %vm7535_vm8, %v15071_v13  ;;  %7524 = vmatpush.bf16.msk.msrb.mxu2 %vm7523_vm11, %v15071_v13  ;;  %vm884_vm8 = vcmp.eq.s32.totalorder %v9421_v9, %v9971_v63  ;;  %vm617_vm11 = vcmp.eq.s32.totalorder %v9421_v9, %v9980_v1  ;;  %vm10059_vm7 = vmpackc.low %vm628_vm15, %vm626_vm14  ;;  %vm918_vm14 = vcmp.eq.s32.totalorder %v9430_v12, %v9971_v63  ;;  %vm15085_vm15 = vcmask 64512  }
  0xc8   :  { %v501_v38 = vpack.c.bf16 %v469_v37, %v469_v37  ;;  %vm10031_vm3 = vmpackc.low %vm886_vm9, %vm884_vm8  ;;  %vm653_vm8 = vcmp.eq.s32.totalorder %v9415_v7, %v9980_v1  ;;  %vm655_vm9 = vcmp.eq.s32.totalorder %v9418_v8, %v9980_v1 }
  0xca   :  { %v514_v41 = vsel %vm15069_vm2, %v501_v38, 0  ;;  %vm878_vm2 = vcmp.eq.s32.totalorder %v9495_v19, %v9971_v63  ;;  %v15102_v38 = vmov 0 }
  0xcb   :  { %7538 = vmatpush.bf16.msk.msrb.mxu3 %vm7537_vm0, %v15071_v13  ;;  %7526 = vmatpush.bf16.msk.msrb.mxu2 %vm7525_vm4, %v15071_v13  ;;  %vm920_vm0 = vcmp.eq.s32.totalorder %v9415_v7, %v9971_v63  ;;  %vm880_vm4 = vcmp.eq.s32.totalorder %v9464_v14, %v9971_v63 }
  0xcc   :  { %526 = vmatpush.bf16.msra.mxu0 %v514_v41  ;;  %v481_v48 = vpop.f32.mrf.mxu2  ;;  %v457_v49 = vpop.f32.mrf.mxu0 }
  0xcd   :  { %v494_v51 = vpop.f32.mrf.mxu3  ;;  %v470_v52 = vpop.f32.mrf.mxu1 }
  0xce   :  { %787 = vmatmul.bf16.vlgmr.msrb.gmra.mxu2 %v9728_v43  ;;  %v495_v53 = vadd.f32 %v494_v51, %v481_v48 }
  0xcf   :  { %7553 = vmatpush.bf16.msk.msra.mxu2 %vm7552_vm6, %v15071_v13  ;;  %vm10038_vm6 = vmpackc.low %vm619_vm12, %vm617_vm11  ;;  %7540 = vmatpush.bf16.msk.msrb.mxu3 %vm10014_vm13, %v15071_v13  ;;  %vm613_vm11 = vcmp.eq.s32.totalorder %v9464_v14, %v9980_v1  ;;  %vm615_vm12 = vcmp.eq.s32.totalorder %v9467_v15, %v9980_v1  ;;  %vm916_vm13 = vcmp.eq.s32.totalorder %v9427_v11, %v9971_v63 }
  0xd0   :  { %7480 = vmatpush.bf16.msk.msrb.mxu0 %vm10005_vm10, %v15071_v13  ;;  %vm10073_vm10 = vmpackc.low %vm922_vm1, %vm920_vm0  ;;  %v502_v55 = vpack.c.bf16 %v495_v53, %v495_v53 }
  0xd1   :  { %7470 = vmatmul.msk.bf16.vlgmr.msra.gmra.mxu0 %vm15085_vm15, %v9304_v45  ;;  %vm7556_vm0 = vmpackc.low %vm882_vm5, %vm880_vm4  ;;  %vm649_vm5 = vcmp.eq.s32.totalorder %v9427_v11, %v9980_v1  ;;  %vm872_vm15 = vcmp.eq.s32.totalorder %v9536_v22, %v9971_v63 }
  0xd2   :  { %vm10095_vm1 = vmpackc.low %vm655_vm9, %vm653_vm8  ;;  %vm651_vm8 = vcmp.eq.s32.totalorder %v9430_v12, %v9980_v1 }
  0xd3   :  { %7555 = vmatpush.bf16.msk.msra.mxu2 %vm10031_vm3, %v15071_v13  ;;  %vm876_vm3 = vcmp.eq.s32.totalorder %v9492_v18, %v9971_v63  ;;  %7542 = vmatpush.bf16.msk.msrb.mxu3 %vm10059_vm7, %v15071_v13  ;;  %vm10109_vm4 = vmpackc.low %vm615_vm12, %vm613_vm11  ;;  %vm611_vm7 = vcmp.eq.s32.totalorder %v9495_v19, %v9980_v1  ;;  %vm15092_vm11 = vcmask 1043456   ;;  %vm912_vm12 = vcmp.eq.s32.totalorder %v9470_v16, %v9971_v63 }
  0xd4   :  { %7482 = vmatpush.bf16.msk.msrb.mxu0 %vm10038_vm6, %v15071_v13  ;;  %vm10120_vm9 = vmpackc.low %vm918_vm14, %vm916_vm13  ;;  %vm609_vm6 = vcmp.eq.s32.totalorder %v9492_v18, %v9980_v1  ;;  %v517_v58 = vsel %vm15092_vm11, %v502_v55, 0  ;;  %v483_v61 = vpop.f32.mrf.mxu2 }
  0xd5   :  { %vm10140_vm13 = vmpackc.low %vm878_vm2, %vm876_vm3  ;;  %540 = vmatpush.bf16.msra.mxu1 %v517_v58  ;;  %vm645_vm3 = vcmp.eq.s32.totalorder %v9470_v16, %v9980_v1  ;;  %v496_v4 = vpop.f32.mrf.mxu3  ;;  %v10370_v61 = vld [vmem:[%s15062_s0 + $0x8] sm:$0x3] }
  0xd6   :  { %800 = vmatmul.bf16.vlgmr.msrb.gmra.mxu3 %v9735_v44  ;;  %vm10145_vm14 = vmpackc.low %vm651_vm8, %vm649_vm5  ;;  %vm647_vm5 = vcmp.eq.s32.totalorder %v9473_v17, %v9980_v1  ;;  %vm607_vm8 = vcmp.eq.s32.totalorder %v9539_v23, %v9980_v1 }
  0xd7   :  { %7569 = vmatpush.bf16.msk.msra.mxu3 %vm10073_vm10, %v15071_v13  ;;  %7557 = vmatpush.bf16.msk.msra.mxu2 %vm7556_vm0, %v15071_v13  ;;  %vm914_vm10 = vcmp.eq.s32.totalorder %v9473_v17, %v9971_v63  ;;  %vm874_vm0 = vcmp.eq.s32.totalorder %v9539_v23, %v9971_v63  ;;  %vm10162_vm2 = vmpackc.low %vm611_vm7, %vm609_vm6  ;;  %vm908_vm6 = vcmp.eq.s32.totalorder %v9509_v20, %v9971_v63 }
  0xd8   :  { %7484 = vmatpush.bf16.msk.msrb.mxu0 %vm10109_vm4, %v15071_v13  ;;  %vm605_vm4 = vcmp.eq.s32.totalorder %v9536_v22, %v9980_v1  ;;  %vm910_vm7 = vcmp.eq.s32.totalorder %v9512_v21, %v9971_v63  ;;  %vm7560_vm11 = vmpackc.low %vm874_vm0, %vm872_vm15  ;;  %vm641_vm15 = vcmp.eq.s32.totalorder %v9509_v20, %v9980_v1  ;;  %vm643_vm0 = vcmp.eq.s32.totalorder %v9512_v21, %v9980_v1 }
  0xd9   :  { %7496 = vmatpush.bf16.msk.msrb.mxu1 %vm10095_vm1, %v15071_v13  ;;  %vm10179_vm1 = vmpackc.low %vm914_vm10, %vm912_vm12  ;;  %vm868_vm10 = vcmp.eq.s32.totalorder %v9574_v26, %v9971_v63 }
  0xda   :  { %vm10201_vm12 = vmpackc.low %vm647_vm5, %vm645_vm3  ;;  %vm601_vm5 = vcmp.eq.s32.totalorder %v9574_v26, %v9980_v1 }
  0xdb   :  { %7571 = vmatpush.bf16.msk.msra.mxu3 %vm10120_vm9, %v15071_v13  ;;  %7559 = vmatpush.bf16.msk.msra.mxu2 %vm10140_vm13, %v15071_v13  ;;  %vm15101_vm9 = vcmask 64512   ;;  %v15103_v38 = vsel %vm10201_vm12, 4294967295, %v15102_v38  ;;  %vm870_vm13 = vcmp.eq.s32.totalorder %v9577_v27, %v9971_v63  ;;  %vm7574_vm3 = vmpackc.low %vm910_vm7, %vm908_vm6  ;;  %vm866_vm6 = vcmp.eq.s32.totalorder %v9615_v31, %v9971_v63 }
  0xdc   :  { %7471 = vmatmul.msk.bf16.vlgmr.msra.gmra.mxu1 %vm15101_vm9, %v9304_v45  ;;  %7486 = vmatpush.bf16.msk.msrb.mxu0 %vm10162_vm2, %v15071_v13  ;;  %vm7487_vm9 = vmpackc.low %vm607_vm8, %vm605_vm4  ;;  %vm904_vm2 = vcmp.eq.s32.totalorder %v9547_v24, %v9971_v63  ;;  %vm906_vm4 = vcmp.eq.s32.totalorder %v9550_v25, %v9971_v63  ;;  %vm15106_vm7 = vnez %v15103_v38  ;;  %v10378_v38 = vperm.slane %v10370_v61, 0 }
  0xdd   :  { %7498 = vmatpush.bf16.msk.msrb.mxu1 %vm10145_vm14, %v15071_v13  ;;  %vm603_vm14 = vcmp.eq.s32.totalorder %v9577_v27, %v9980_v1  ;;  %vm7562_vm8 = vmpackc.low %vm870_vm13, %vm868_vm10  ;;  %vm637_vm10 = vcmp.eq.s32.totalorder %v9547_v24, %v9980_v1  ;;  %vm639_vm13 = vcmp.eq.s32.totalorder %v9550_v25, %v9980_v1 }
  0xde   :  { %vm10231_vm12 = vmpackc.low %vm643_vm0, %vm641_vm15  ;;  %vm597_vm0 = vcmp.eq.s32.totalorder %v9612_v30, %v9980_v1 }
  0xdf   :  { %7573 = vmatpush.bf16.msk.msra.mxu3 %vm10179_vm1, %v15071_v13  ;;  %7561 = vmatpush.bf16.msk.msra.mxu2 %vm7560_vm11, %v15071_v13  ;;  %v15105_v39 = vsel %vm10231_vm12, 4294967295, %v15104_v39  ;;  %vm864_vm1 = vcmp.eq.s32.totalorder %v9612_v30, %v9971_v63  ;;  %vm7489_vm11 = vmpackc.low %vm603_vm14, %vm601_vm5  ;;  %vm599_vm12 = vcmp.eq.s32.totalorder %v9615_v31, %v9980_v1  ;;  %vm902_vm5 = vcmp.eq.s32.totalorder %v9588_v29, %v9971_v63 }
  0xe0   :  { %7488 = vmatpush.bf16.msk.msrb.mxu0 %vm7487_vm9, %v15071_v13  ;;  %vm7576_vm15 = vmpackc.low %vm906_vm4, %vm904_vm2  ;;  %vm900_vm9 = vcmp.eq.s32.totalorder %v9585_v28, %v9971_v63  ;;  %vm862_vm2 = vcmp.eq.s32.totalorder %v9650_v34, %v9971_v63  ;;  %vm15109_vm4 = vnez %v15105_v39 }
  0xe1   :  { %7500 = vmatpush.bf16.msk.msrb.mxu1 %vm15106_vm7, %v15071_v13  ;;  %vm7564_vm14 = vmpackc.low %vm866_vm6, %vm864_vm1  ;;  %vm633_vm1 = vcmp.eq.s32.totalorder %v9585_v28, %v9980_v1  ;;  %vm635_vm6 = vcmp.eq.s32.totalorder %v9588_v29, %v9980_v1 }
  0xe2   :  { %vm10257_vm7 = vmpackc.low %vm639_vm13, %vm637_vm10  ;;  %vm593_vm13 = vcmp.eq.s32.totalorder %v9402_v2, %v9980_v1 }
  0xe3   :  { %7575 = vmatpush.bf16.msk.msra.mxu3 %vm7574_vm3, %v15071_v13  ;;  %7563 = vmatpush.bf16.msk.msra.mxu2 %vm7562_vm8, %v15071_v13  ;;  %v15108_v40 = vsel %vm10257_vm7, 4294967295, %v15107_v40  ;;  %vm860_vm3 = vcmp.eq.s32.totalorder %v9402_v2, %v9971_v63  ;;  %vm7491_vm8 = vmpackc.low %vm599_vm12, %vm597_vm0  ;;  %vm896_vm12 = vcmp.eq.s32.totalorder %v9623_v32, %v9971_v63 }
  0xe4   :  { %7490 = vmatpush.bf16.msk.msrb.mxu0 %vm7489_vm11, %v15071_v13  ;;  %vm7578_vm10 = vmpackc.low %vm902_vm5, %vm900_vm9  ;;  %vm898_vm11 = vcmp.eq.s32.totalorder %v9626_v33, %v9971_v63  ;;  %vm629_vm5 = vcmp.eq.s32.totalorder %v9623_v32, %v9980_v1 }
  0xe5   :  { %7502 = vmatpush.bf16.msk.msrb.mxu1 %vm15109_vm4, %v15071_v13  ;;  %vm595_vm4 = vcmp.eq.s32.totalorder %v9650_v34, %v9980_v1  ;;  %vm7566_vm7 = vmpackc.low %vm862_vm2, %vm860_vm3  ;;  %vm892_vm2 = vcmp.eq.s32.totalorder %v9658_v35, %v9971_v63 }
  0xe6   :  { %vm7505_vm0 = vmpackc.low %vm635_vm6, %vm633_vm1  ;;  %vm627_vm1 = vcmp.eq.s32.totalorder %v9661_v36, %v9980_v1 }
  0xe7   :  { %7577 = vmatpush.bf16.msk.msra.mxu3 %vm7576_vm15, %v15071_v13  ;;  %7565 = vmatpush.bf16.msk.msra.mxu2 %vm7564_vm14, %v15071_v13  ;;  %vm15110_vm15 = vnez %v15108_v40  ;;  %vm7493_vm9 = vmpackc.low %vm595_vm4, %vm593_vm13  ;;  %vm631_vm14 = vcmp.eq.s32.totalorder %v9626_v33, %v9980_v1  ;;  %vm921_vm13 = vcmp.eq.s32.totalorder %v9415_v7, %v10318_v50  ;;  %vm923_vm4 = vcmp.eq.s32.totalorder %v9418_v8, %v10318_v50 }
  0xe8   :  { %7492 = vmatpush.bf16.msk.msrb.mxu0 %vm7491_vm8, %v15071_v13  ;;  %vm7580_vm3 = vmpackc.low %vm898_vm11, %vm896_vm12  ;;  %vm15112_vm11 = vcmask 1043456  }
  0xe9   :  { %7504 = vmatpush.bf16.msk.msrb.mxu1 %vm15110_vm15, %v15071_v13  ;;  %vm894_vm15 = vcmp.eq.s32.totalorder %v9661_v36, %v9971_v63  ;;  %vm7507_vm8 = vmpackc.low %vm631_vm14, %vm629_vm5  ;;  %vm15113_vm14 = vcmask 64512  }
  0xea   :  { %vm7582_vm6 = vmpackc.low %vm894_vm15, %vm892_vm2  ;;  %vm915_vm2 = vcmp.eq.s32.totalorder %v9473_v17, %v10318_v50 }
  0xeb   :  { %7579 = vmatpush.bf16.msk.msra.mxu3 %vm7578_vm10, %v15071_v13  ;;  %7567 = vmatpush.bf16.msk.msra.mxu2 %vm7566_vm7, %v15071_v13  ;;  %vm625_vm7 = vcmp.eq.s32.totalorder %v9658_v35, %v9980_v1  ;;  %vm7600_vm12 = vmpackc.low %vm923_vm4, %vm921_vm13  ;;  %vm901_vm4 = vcmp.eq.s32.totalorder %v9585_v28, %v10318_v50 }
  0xec   :  { %7494 = vmatpush.bf16.msk.msrb.mxu0 %vm7493_vm9, %v15071_v13  ;;  %vm7509_vm10 = vmpackc.low %vm627_vm1, %vm625_vm7  ;;  %vm919_vm9 = vcmp.eq.s32.totalorder %v9430_v12, %v10318_v50  ;;  %vm911_vm7 = vcmp.eq.s32.totalorder %v9512_v21, %v10318_v50 }
  0xed   :  { %7506 = vmatpush.bf16.msk.msrb.mxu1 %vm7505_vm0, %v15071_v13  ;;  %vm917_vm0 = vcmp.eq.s32.totalorder %v9427_v11, %v10318_v50 }
  0xee   :  { %1028 = vmatmul.bf16.vlgmr.msra.gmra.mxu2 %v9728_v43  ;;  %vm7602_vm5 = vmpackc.low %vm919_vm9, %vm917_vm0  ;;  %vm897_vm0 = vcmp.eq.s32.totalorder %v9623_v32, %v10318_v50  ;;  %vm899_vm9 = vcmp.eq.s32.totalorder %v9626_v33, %v10318_v50 }
  0xef   :  { %7581 = vmatpush.bf16.msk.msra.mxu3 %vm7580_vm3, %v15071_v13  ;;  %761 = vmatmul.bf16.vlgmr.msrb.gmra.mxu0 %v9728_v43  ;;  %vm913_vm3 = vcmp.eq.s32.totalorder %v9470_v16, %v10318_v50 }
  0xf0   :  { %vm7604_vm15 = vmpackc.low %vm915_vm2, %vm913_vm3  ;;  %vm885_vm2 = vcmp.eq.s32.totalorder %v9421_v9, %v10318_v50 }
  0xf1   :  { %7508 = vmatpush.bf16.msk.msrb.mxu1 %vm7507_vm8, %v15071_v13  ;;  %vm909_vm8 = vcmp.eq.s32.totalorder %v9509_v20, %v10318_v50  ;;  %vm7612_vm3 = vmpackc.low %vm899_vm9, %vm897_vm0  ;;  %vm881_vm0 = vcmp.eq.s32.totalorder %v9464_v14, %v10318_v50  ;;  %vm883_vm9 = vcmp.eq.s32.totalorder %v9467_v15, %v10318_v50 }
  0xf2   :  { %vm7606_vm1 = vmpackc.low %vm911_vm7, %vm909_vm8  ;;  %vm893_vm7 = vcmp.eq.s32.totalorder %v9658_v35, %v10318_v50 }
  0xf3   :  { %7583 = vmatpush.bf16.msk.msra.mxu3 %vm7582_vm6, %v15071_v13  ;;  %vm905_vm6 = vcmp.eq.s32.totalorder %v9547_v24, %v10318_v50 }
  0xf5   :  { %7510 = vmatpush.bf16.msk.msrb.mxu1 %vm7509_vm10, %v15071_v13  ;;  %vm907_vm10 = vcmp.eq.s32.totalorder %v9550_v25, %v10318_v50 }
  0xf6   :  { %1041 = vmatmul.bf16.vlgmr.msra.gmra.mxu3 %v9735_v44  ;;  %vm7608_vm13 = vmpackc.low %vm907_vm10, %vm905_vm6  ;;  %vm15115_vm6 = vcmask 1043456   ;;  %vm1187_vm10 = vcmp.eq.s32.totalorder %v9415_v7, %v10378_v38 }
  0xf8   :  { %774 = vmatmul.bf16.vlgmr.msrb.gmra.mxu1 %v9735_v44 }
 0x131   :  { %v570_v63 = vpop.f32.mrf.mxu2 }
 0x139   :  { %v584_v41 = vpop.f32.mrf.mxu3  ;;  %v10311_v42 = vpop.f32.mrf.mxu2 }
 0x13a   :  { %15111 = vst [vmem:[#allocation5_spill] sm:$0xff] %v10311_v42 }
 0x141   :  { %v10313_v1 = vpop.f32.mrf.mxu3 }
 0x14e   :  { %v528_v45 = vpop.f32.mrf.mxu0 }
 0x14f   :  { %v10315_v47 = vadd.f32 %v570_v63, %v528_v45 }
 0x151   :  { %v788_v48 = vpop.f32.mrf.mxu2 }
 0x156   :  { %v10343_v57 = vpop.f32.mrf.mxu0 }
 0x157   :  { %15114 = vst [vmem:[#allocation6_spill] sm:$0xff] %v10343_v57 }
 0x159   :  { %v542_v49 = vpop.f32.mrf.mxu1  ;;  %v801_v52 = vpop.f32.mrf.mxu3 }
 0x15a   :  { %v10320_v51 = vadd.f32 %v584_v41, %v542_v49  ;;  %v790_v46 = vpop.f32.mrf.mxu2  ;;  %v802_v53 = vadd.f32 %v801_v52, %v788_v48 }
 0x15b   :  { %v10403_v46 = vld [vmem:[%s15064_s2 + $0x18] sm:$0xff] }
 0x15c   :  { %v809_v54 = vpack.c.bf16 %v802_v53, %v802_v53 }
 0x15e   :  { %v822_v55 = vsel %vm15112_vm11, %v809_v54, 0 }
 0x15f   :  { %845 = vmatpush.bf16.msra.mxu1 %v822_v55  ;;  %v10521_v55 = vperm.slane %v10370_v61, 1 }
 0x161   :  { %v803_v56 = vpop.f32.mrf.mxu3  ;;  %v10355_v58 = vpop.f32.mrf.mxu1 }
 0x162   :  { %7550 = vmatmul.msk.bf16.vlgmr.msra.gmra.mxu1 %vm15113_vm14, %v10330_v62  ;;  %vm891_vm14 = vcmp.eq.s32.totalorder %v9412_v6, %v10318_v50 }
 0x163   :  { %7601 = vmatpush.bf16.msk.msrb.mxu1 %vm7600_vm12, %v15071_v13  ;;  %vm903_vm12 = vcmp.eq.s32.totalorder %v9588_v29, %v10318_v50 }
 0x164   :  { %vm7610_vm11 = vmpackc.low %vm903_vm12, %vm901_vm4 }
 0x167   :  { %7603 = vmatpush.bf16.msk.msrb.mxu1 %vm7602_vm5, %v15071_v13  ;;  %vm889_vm5 = vcmp.eq.s32.totalorder %v9409_v5, %v10318_v50 }
 0x168   :  { %vm7584_vm8 = vmpackc.low %vm891_vm14, %vm889_vm5  ;;  %vm15117_vm14 = vcmask 64512  }
 0x16b   :  { %7605 = vmatpush.bf16.msk.msrb.mxu1 %vm7604_vm15, %v15071_v13  ;;  %vm887_vm15 = vcmp.eq.s32.totalorder %v9424_v10, %v10318_v50 }
 0x16c   :  { %v762_v59 = vpop.f32.mrf.mxu0  ;;  %vm7586_vm4 = vmpackc.low %vm887_vm15, %vm885_vm2  ;;  %vm1185_vm2 = vcmp.eq.s32.totalorder %v9430_v12, %v10378_v38 }
 0x16d   :  { %vm7588_vm15 = vmpackc.low %vm883_vm9, %vm881_vm0  ;;  %vm1175_vm9 = vcmp.eq.s32.totalorder %v9509_v20, %v10378_v38 }
 0x16f   :  { %7607 = vmatpush.bf16.msk.msrb.mxu1 %vm7606_vm1, %v15071_v13  ;;  %vm895_vm1 = vcmp.eq.s32.totalorder %v9661_v36, %v10318_v50 }
 0x170   :  { %vm7614_vm12 = vmpackc.low %vm895_vm1, %vm893_vm7  ;;  %vm877_vm7 = vcmp.eq.s32.totalorder %v9492_v18, %v10318_v50  ;;  %vm879_vm1 = vcmp.eq.s32.totalorder %v9495_v19, %v10318_v50 }
 0x171   :  { %v1029_v60 = vpop.f32.mrf.mxu2 }
 0x173   :  { %7609 = vmatpush.bf16.msk.msrb.mxu1 %vm7608_vm13, %v15071_v13  ;;  %vm1189_vm13 = vcmp.eq.s32.totalorder %v9418_v8, %v10378_v38 }
 0x174   :  { %v764_v4 = vpop.f32.mrf.mxu0  ;;  %vm7641_vm5 = vmpackc.low %vm1189_vm13, %vm1187_vm10  ;;  %vm1179_vm10 = vcmp.eq.s32.totalorder %v9470_v16, %v10378_v38  ;;  %vm1181_vm13 = vcmp.eq.s32.totalorder %v9473_v17, %v10378_v38 }
 0x175   :  { %v775_v3 = vpop.f32.mrf.mxu1  ;;  %vm7645_vm0 = vmpackc.low %vm1181_vm13, %vm1179_vm10  ;;  %vm867_vm10 = vcmp.eq.s32.totalorder %v9615_v31, %v10318_v50  ;;  %v10574_v4 = vld [vmem:[%s15062_s0 + $0xa] sm:$0x3] }
 0x176   :  { %v776_v37 = vadd.f32 %v775_v3, %v762_v59 }
 0x177   :  { %7611 = vmatpush.bf16.msk.msrb.mxu1 %vm7610_vm11, %v15071_v13  ;;  %vm15116_vm11 = vmmov %vm15115_vm6 }
 0x178   :  { %v808_v39 = vpack.c.bf16 %v776_v37, %v776_v37 }
 0x179   :  { %v1042_v40 = vpop.f32.mrf.mxu3  ;;  %v1031_v41 = vpop.f32.mrf.mxu2 }
 0x17a   :  { %v1043_v63 = vadd.f32 %v1042_v40, %v1029_v60  ;;  %v819_v45 = vsel %vm15115_vm6, %v808_v39, 0 }
 0x17b   :  { %7613 = vmatpush.bf16.msk.msrb.mxu1 %vm7612_vm3, %v15071_v13  ;;  %831 = vmatpush.bf16.msra.mxu0 %v819_v45  ;;  %vm1183_vm3 = vcmp.eq.s32.totalorder %v9427_v11, %v10378_v38 }
 0x17c   :  { %v1075_v48 = vpack.c.bf16 %v1043_v63, %v1043_v63  ;;  %vm7643_vm6 = vmpackc.low %vm1185_vm2, %vm1183_vm3  ;;  %vm869_vm3 = vcmp.eq.s32.totalorder %v9574_v26, %v10318_v50  ;;  %vm871_vm2 = vcmp.eq.s32.totalorder %v9577_v27, %v10318_v50 }
 0x17d   :  { %v777_v52 = vpop.f32.mrf.mxu1 }
 0x17e   :  { %v1086_v49 = vsel %vm15116_vm11, %v1075_v48, 0  ;;  %7549 = vmatmul.msk.bf16.vlgmr.msra.gmra.mxu0 %vm15117_vm14, %v10330_v62  ;;  %vm875_vm11 = vcmp.eq.s32.totalorder %v9539_v23, %v10318_v50 }
 0x17f   :  { %7585 = vmatpush.bf16.msk.msrb.mxu0 %vm7584_vm8, %v15071_v13  ;;  %1098 = vmatpush.bf16.msrb.mxu2 %v1086_v49  ;;  %vm15118_vm8 = vmmov %vm15117_vm14 }
 0x180   :  { %7615 = vmatpush.bf16.msk.msrb.mxu1 %vm7614_vm12, %v15071_v13  ;;  %vm873_vm12 = vcmp.eq.s32.totalorder %v9536_v22, %v10318_v50 }
 0x181   :  { %v1044_v53 = vpop.f32.mrf.mxu3  ;;  %vm7592_vm14 = vmpackc.low %vm875_vm11, %vm873_vm12  ;;  %vm1169_vm12 = vcmp.eq.s32.totalorder %v9588_v29, %v10378_v38 }
 0x182   :  { %7622 = vmatmul.msk.bf16.vlgmr.msrb.gmra.mxu2 %vm15118_vm8, %v10403_v46  ;;  %vm1171_vm8 = vcmp.eq.s32.totalorder %v9547_v24, %v10378_v38 }
 0x183   :  { %7587 = vmatpush.bf16.msk.msrb.mxu0 %vm7586_vm4, %v15071_v13  ;;  %1067 = vmatmul.bf16.vlgmr.msrb.gmra.mxu1 %v9735_v44  ;;  %vm7590_vm4 = vmpackc.low %vm879_vm1, %vm877_vm7  ;;  %vm1173_vm7 = vcmp.eq.s32.totalorder %v9550_v25, %v10378_v38 }
 0x184   :  { %7642 = vmatpush.bf16.msk.msra.mxu1 %vm7641_vm5, %v15071_v13  ;;  %vm1177_vm5 = vcmp.eq.s32.totalorder %v9512_v21, %v10378_v38  ;;  %vm7594_vm1 = vmpackc.low %vm871_vm2, %vm869_vm3  ;;  %vm1165_vm3 = vcmp.eq.s32.totalorder %v9626_v33, %v10378_v38  ;;  %vm1155_vm2 = vcmp.eq.s32.totalorder %v9409_v5, %v10378_v38 }
 0x185   :  { %vm7649_vm13 = vmpackc.low %vm1173_vm7, %vm1171_vm8 }
 0x187   :  { %7589 = vmatpush.bf16.msk.msrb.mxu0 %vm7588_vm15, %v15071_v13  ;;  %vm7647_vm15 = vmpackc.low %vm1177_vm5, %vm1175_vm9  ;;  %vm863_vm9 = vcmp.eq.s32.totalorder %v9650_v34, %v10318_v50 }
 0x188   :  { %7644 = vmatpush.bf16.msk.msra.mxu1 %vm7643_vm6, %v15071_v13  ;;  %vm865_vm6 = vcmp.eq.s32.totalorder %v9612_v30, %v10318_v50 }
 0x189   :  { %vm7596_vm11 = vmpackc.low %vm867_vm10, %vm865_vm6  ;;  %vm1159_vm6 = vcmp.eq.s32.totalorder %v9658_v35, %v10378_v38  ;;  %vm1161_vm10 = vcmp.eq.s32.totalorder %v9661_v36, %v10378_v38 }
 0x18b   :  { %7591 = vmatpush.bf16.msk.msrb.mxu0 %vm7590_vm4, %v15071_v13  ;;  %vm1167_vm4 = vcmp.eq.s32.totalorder %v9585_v28, %v10378_v38 }
 0x18c   :  { %7646 = vmatpush.bf16.msk.msra.mxu1 %vm7645_vm0, %v15071_v13  ;;  %vm861_vm0 = vcmp.eq.s32.totalorder %v9402_v2, %v10318_v50  ;;  %vm7651_vm5 = vmpackc.low %vm1169_vm12, %vm1167_vm4  ;;  %vm1153_vm4 = vcmp.eq.s32.totalorder %v9424_v10, %v10378_v38 }
 0x18d   :  { %vm7598_vm8 = vmpackc.low %vm863_vm9, %vm861_vm0  ;;  %vm1147_vm0 = vcmp.eq.s32.totalorder %v9464_v14, %v10378_v38  ;;  %vm1149_vm9 = vcmp.eq.s32.totalorder %v9467_v15, %v10378_v38 }
 0x18e   :  { %vm7655_vm12 = vmpackc.low %vm1161_vm10, %vm1159_vm6  ;;  %vm1137_vm6 = vcmp.eq.s32.totalorder %v9577_v27, %v10378_v38 }
 0x18f   :  { %7593 = vmatpush.bf16.msk.msrb.mxu0 %vm7592_vm14, %v15071_v13  ;;  %vm1163_vm14 = vcmp.eq.s32.totalorder %v9623_v32, %v10378_v38 }
 0x190   :  { %7648 = vmatpush.bf16.msk.msra.mxu1 %vm7647_vm15, %v15071_v13  ;;  %vm1157_vm15 = vcmp.eq.s32.totalorder %v9412_v6, %v10378_v38  ;;  %vm7653_vm7 = vmpackc.low %vm1165_vm3, %vm1163_vm14  ;;  %vm1143_vm14 = vcmp.eq.s32.totalorder %v9492_v18, %v10378_v38  ;;  %vm1145_vm3 = vcmp.eq.s32.totalorder %v9495_v19, %v10378_v38 }
 0x193   :  { %7595 = vmatpush.bf16.msk.msrb.mxu0 %vm7594_vm1, %v15071_v13  ;;  %vm7625_vm1 = vmpackc.low %vm1157_vm15, %vm1155_vm2  ;;  %vm1139_vm15 = vcmp.eq.s32.totalorder %v9536_v22, %v10378_v38 }
 0x194   :  { %7650 = vmatpush.bf16.msk.msra.mxu1 %vm7649_vm13, %v15071_v13  ;;  %vm1151_vm13 = vcmp.eq.s32.totalorder %v9421_v9, %v10378_v38  ;;  %vm7631_vm2 = vmpackc.low %vm1145_vm3, %vm1143_vm14  ;;  %vm1158_vm14 = vcmp.eq.s32.totalorder %v9412_v6, %v10521_v55 }
 0x197   :  { %7597 = vmatpush.bf16.msk.msrb.mxu0 %vm7596_vm11, %v15071_v13  ;;  %vm7627_vm11 = vmpackc.low %vm1153_vm4, %vm1151_vm13  ;;  %vm1131_vm13 = vcmp.eq.s32.totalorder %v9612_v30, %v10378_v38  ;;  %vm1133_vm4 = vcmp.eq.s32.totalorder %v9615_v31, %v10378_v38 }
 0x198   :  { %7652 = vmatpush.bf16.msk.msra.mxu1 %vm7651_vm5, %v15071_v13  ;;  %vm7629_vm5 = vmpackc.low %vm1149_vm9, %vm1147_vm0  ;;  %vm1129_vm0 = vcmp.eq.s32.totalorder %v9650_v34, %v10378_v38 }
 0x19b   :  { %7599 = vmatpush.bf16.msk.msrb.mxu0 %vm7598_vm8, %v15071_v13  ;;  %vm1141_vm8 = vcmp.eq.s32.totalorder %v9539_v23, %v10378_v38 }
 0x19c   :  { %7654 = vmatpush.bf16.msk.msra.mxu1 %vm7653_vm7, %v15071_v13  ;;  %vm7633_vm7 = vmpackc.low %vm1141_vm8, %vm1139_vm15  ;;  %vm1154_vm15 = vcmp.eq.s32.totalorder %v9424_v10, %v10521_v55 }
 0x19e   :  { %1054 = vmatmul.bf16.vlgmr.msrb.gmra.mxu0 %v9728_v43 }
 0x19f   :  { %7626 = vmatpush.bf16.msk.msra.mxu0 %vm7625_vm1, %v15071_v13  ;;  %vm1135_vm1 = vcmp.eq.s32.totalorder %v9574_v26, %v10378_v38 }
 0x1a0   :  { %7656 = vmatpush.bf16.msk.msra.mxu1 %vm7655_vm12, %v15071_v13  ;;  %vm7635_vm10 = vmpackc.low %vm1137_vm6, %vm1135_vm1  ;;  %vm1150_vm1 = vcmp.eq.s32.totalorder %v9467_v15, %v10521_v55 }
 0x1a1   :  { %vm7637_vm12 = vmpackc.low %vm1133_vm4, %vm1131_vm13  ;;  %vm1146_vm13 = vcmp.eq.s32.totalorder %v9495_v19, %v10521_v55 }
 0x1a3   :  { %7628 = vmatpush.bf16.msk.msra.mxu0 %vm7627_vm11, %v15071_v13  ;;  %1308 = vmatmul.bf16.vlgmr.msra.gmra.mxu1 %v9735_v44  ;;  %vm1127_vm11 = vcmp.eq.s32.totalorder %v9402_v2, %v10378_v38  ;;  %v10577_v38 = vperm.slane %v10574_v4, 0 }
 0x1a4   :  { %vm7639_vm9 = vmpackc.low %vm1129_vm0, %vm1127_vm11  ;;  %vm1142_vm11 = vcmp.eq.s32.totalorder %v9539_v23, %v10521_v55 }
 0x1a7   :  { %7630 = vmatpush.bf16.msk.msra.mxu0 %vm7629_vm5, %v15071_v13  ;;  %vm1156_vm5 = vcmp.eq.s32.totalorder %v9409_v5, %v10521_v55 }
 0x1a8   :  { %vm7657_vm3 = vmpackc.low %vm1158_vm14, %vm1156_vm5  ;;  %vm1138_vm5 = vcmp.eq.s32.totalorder %v9577_v27, %v10521_v55 }
 0x1a9   :  { %7658 = vmatpush.bf16.msk.msra.mxu2 %vm7657_vm3, %v15071_v13  ;;  %vm1132_vm3 = vcmp.eq.s32.totalorder %v9612_v30, %v10521_v55 }
 0x1ab   :  { %7632 = vmatpush.bf16.msk.msra.mxu0 %vm7631_vm2, %v15071_v13  ;;  %vm1152_vm2 = vcmp.eq.s32.totalorder %v9421_v9, %v10521_v55 }
 0x1ac   :  { %vm7659_vm8 = vmpackc.low %vm1154_vm15, %vm1152_vm2  ;;  %vm1134_vm2 = vcmp.eq.s32.totalorder %v9615_v31, %v10521_v55 }
 0x1ad   :  { %7660 = vmatpush.bf16.msk.msra.mxu2 %vm7659_vm8, %v15071_v13  ;;  %vm7669_vm15 = vmpackc.low %vm1134_vm2, %vm1132_vm3  ;;  %vm1128_vm8 = vcmp.eq.s32.totalorder %v9402_v2, %v10521_v55  ;;  %vm1420_vm3 = vcmp.eq.s32.totalorder %v9424_v10, %v10577_v38 }
 0x1af   :  { %7634 = vmatpush.bf16.msk.msra.mxu0 %vm7633_vm7, %v15071_v13  ;;  %vm1148_vm7 = vcmp.eq.s32.totalorder %v9464_v14, %v10521_v55 }
 0x1b0   :  { %vm7661_vm6 = vmpackc.low %vm1150_vm1, %vm1148_vm7  ;;  %vm1130_vm7 = vcmp.eq.s32.totalorder %v9650_v34, %v10521_v55 }
 0x1b1   :  { %7662 = vmatpush.bf16.msk.msra.mxu2 %vm7661_vm6, %v15071_v13  ;;  %vm7671_vm1 = vmpackc.low %vm1130_vm7, %vm1128_vm8  ;;  %vm1188_vm6 = vcmp.eq.s32.totalorder %v9415_v7, %v10521_v55  ;;  %vm1414_vm8 = vcmp.eq.s32.totalorder %v9464_v14, %v10577_v38  ;;  %vm1416_vm7 = vcmp.eq.s32.totalorder %v9467_v15, %v10577_v38 }
 0x1b3   :  { %7636 = vmatpush.bf16.msk.msra.mxu0 %vm7635_vm10, %v15071_v13  ;;  %vm1144_vm10 = vcmp.eq.s32.totalorder %v9492_v18, %v10521_v55 }
 0x1b4   :  { %vm7663_vm4 = vmpackc.low %vm1146_vm13, %vm1144_vm10  ;;  %vm1190_vm10 = vcmp.eq.s32.totalorder %v9418_v8, %v10521_v55  ;;  %vm1422_vm13 = vcmp.eq.s32.totalorder %v9409_v5, %v10577_v38 }
 0x1b5   :  { %7664 = vmatpush.bf16.msk.msra.mxu2 %vm7663_vm4, %v15071_v13  ;;  %vm1424_vm4 = vcmp.eq.s32.totalorder %v9412_v6, %v10577_v38 }
 0x1b7   :  { %7638 = vmatpush.bf16.msk.msra.mxu0 %vm7637_vm12, %v15071_v13  ;;  %vm1140_vm12 = vcmp.eq.s32.totalorder %v9536_v22, %v10521_v55 }
 0x1b8   :  { %vm7665_vm0 = vmpackc.low %vm1142_vm11, %vm1140_vm12 }
 0x1b9   :  { %7666 = vmatpush.bf16.msk.msra.mxu2 %vm7665_vm0, %v15071_v13  ;;  %vm7698_vm12 = vmpackc.low %vm1424_vm4, %vm1422_vm13  ;;  %vm15120_vm0 = vcmask 1043456  }
 0x1ba   :  { %vm7673_vm11 = vmpackc.low %vm1190_vm10, %vm1188_vm6  ;;  %vm1180_vm6 = vcmp.eq.s32.totalorder %v9470_v16, %v10521_v55  ;;  %vm1182_vm10 = vcmp.eq.s32.totalorder %v9473_v17, %v10521_v55 }
 0x1bb   :  { %7640 = vmatpush.bf16.msk.msra.mxu0 %vm7639_vm9, %v15071_v13  ;;  %vm1136_vm9 = vcmp.eq.s32.totalorder %v9574_v26, %v10521_v55  ;;  %vm7702_vm13 = vmpackc.low %vm1416_vm7, %vm1414_vm8  ;;  %vm1174_vm8 = vcmp.eq.s32.totalorder %v9550_v25, %v10521_v55 }
 0x1bc   :  { %vm7667_vm14 = vmpackc.low %vm1138_vm5, %vm1136_vm9  ;;  %vm1184_vm9 = vcmp.eq.s32.totalorder %v9427_v11, %v10521_v55  ;;  %vm1186_vm5 = vcmp.eq.s32.totalorder %v9430_v12, %v10521_v55 }
 0x1bd   :  { %7668 = vmatpush.bf16.msk.msra.mxu2 %vm7667_vm14, %v15071_v13  ;;  %vm1418_vm14 = vcmp.eq.s32.totalorder %v9421_v9, %v10577_v38  ;;  %vm7677_vm4 = vmpackc.low %vm1182_vm10, %vm1180_vm6  ;;  %vm1402_vm6 = vcmp.eq.s32.totalorder %v9574_v26, %v10577_v38  ;;  %vm1404_vm10 = vcmp.eq.s32.totalorder %v9577_v27, %v10577_v38 }
 0x1be   :  { %1295 = vmatmul.bf16.vlgmr.msra.gmra.mxu0 %v9728_v43  ;;  %vm7700_vm2 = vmpackc.low %vm1420_vm3, %vm1418_vm14  ;;  %vm1406_vm3 = vcmp.eq.s32.totalorder %v9536_v22, %v10577_v38 }
 0x1c1   :  { %7670 = vmatpush.bf16.msk.msra.mxu2 %vm7669_vm15, %v15071_v13  ;;  %vm7675_vm15 = vmpackc.low %vm1186_vm5, %vm1184_vm9  ;;  %vm1178_vm9 = vcmp.eq.s32.totalorder %v9512_v21, %v10521_v55 }
 0x1c5   :  { %7672 = vmatpush.bf16.msk.msra.mxu2 %vm7671_vm1, %v15071_v13  ;;  %vm15121_vm1 = vcmask 64512  }
 0x1c8   :  { %1321 = vmatmul.bf16.vlgmr.msra.gmra.mxu2 %v9728_v43 }
 0x1c9   :  { %7699 = vmatpush.bf16.msk.msrb.mxu2 %vm7698_vm12, %v15071_v13  ;;  %vm1410_vm12 = vcmp.eq.s32.totalorder %v9492_v18, %v10577_v38 }
 0x1cd   :  { %7701 = vmatpush.bf16.msk.msrb.mxu2 %vm7700_vm2, %v15071_v13  ;;  %vm1408_vm2 = vcmp.eq.s32.totalorder %v9539_v23, %v10577_v38 }
 0x1ce   :  { %vm7706_vm7 = vmpackc.low %vm1408_vm2, %vm1406_vm3 }
 0x1d1   :  { %7703 = vmatpush.bf16.msk.msrb.mxu2 %vm7702_vm13, %v15071_v13  ;;  %vm1168_vm13 = vcmp.eq.s32.totalorder %v9585_v28, %v10521_v55 }
 0x1df   :  { %v847_v50 = vpop.f32.mrf.mxu1 }
 0x1e0   :  { %v10518_v54 = vadd.f32 %v847_v50, %v10320_v51  ;;  %v10669_v50 = vld [vmem:[%s15064_s2 + $0x20] sm:$0xff] }
 0x1e7   :  { %v10528_v62 = vpop.f32.mrf.mxu1 }
 0x1fb   :  { %v833_v51 = vpop.f32.mrf.mxu0 }
 0x1fc   :  { %v852_v56 = vadd.f32 %v833_v51, %v10315_v47 }
 0x200   :  { %v1068_v59 = vpop.f32.mrf.mxu1 }
 0x203   :  { %v10567_v3 = vpop.f32.mrf.mxu0 }
 0x204   :  { %15119 = vst [vmem:[#allocation7_spill] sm:$0xff] %v10567_v3 }
 0x205   :  { %v1100_v47 = vpop.f32.mrf.mxu2 }
 0x206   :  { %v10550_v60 = vadd.f32 %v1100_v47, %v852_v56 }
 0x208   :  { %v1070_v61 = vpop.f32.mrf.mxu1 }
 0x20d   :  { %v10713_v51 = vpop.f32.mrf.mxu2 }
 0x20e   :  { %15124 = vst [vmem:[#allocation8_spill] sm:$0xff] %v10713_v51 }
 0x21b   :  { %v1055_v37 = vpop.f32.mrf.mxu0 }
 0x21c   :  { %v1069_v39 = vadd.f32 %v1068_v59, %v1055_v37  ;;  %v10716_v59 = vperm.slane %v10574_v4, 1 }
 0x21e   :  { %v1076_v40 = vpack.c.bf16 %v1069_v39, %v1069_v39 }
 0x220   :  { %v1309_v63 = vpop.f32.mrf.mxu1  ;;  %v1089_v41 = vsel %vm15120_vm0, %v1076_v40, 0  ;;  %vm1176_vm0 = vcmp.eq.s32.totalorder %v9509_v20, %v10521_v55  ;;  %v10772_v40 = vld [vmem:[%s15062_s0 + $0xc] sm:$0x3] }
 0x221   :  { %1112 = vmatpush.bf16.msrb.mxu3 %v1089_v41  ;;  %vm7679_vm14 = vmpackc.low %vm1178_vm9, %vm1176_vm0  ;;  %vm1398_vm0 = vcmp.eq.s32.totalorder %v9612_v30, %v10577_v38  ;;  %vm1400_vm9 = vcmp.eq.s32.totalorder %v9615_v31, %v10577_v38  ;;  %v10775_v41 = vperm.slane %v10772_v40, 0 }
 0x222   :  { %vm7710_vm3 = vmpackc.low %vm1400_vm9, %vm1398_vm0  ;;  %vm1450_vm0 = vcmp.eq.s32.totalorder %v9427_v11, %v10577_v38  ;;  %vm1452_vm9 = vcmp.eq.s32.totalorder %v9430_v12, %v10577_v38 }
 0x223   :  { %v1057_v45 = vpop.f32.mrf.mxu0 }
 0x224   :  { %7623 = vmatmul.msk.bf16.vlgmr.msrb.gmra.mxu3 %vm15121_vm1, %v10403_v46 }
 0x225   :  { %7674 = vmatpush.bf16.msk.msra.mxu3 %vm7673_vm11, %v15071_v13  ;;  %vm1412_vm11 = vcmp.eq.s32.totalorder %v9495_v19, %v10577_v38 }
 0x226   :  { %vm7704_vm5 = vmpackc.low %vm1412_vm11, %vm1410_vm12 }
 0x227   :  { %7705 = vmatpush.bf16.msk.msrb.mxu2 %vm7704_vm5, %v15071_v13  ;;  %vm7708_vm12 = vmpackc.low %vm1404_vm10, %vm1402_vm6  ;;  %vm1164_vm5 = vcmp.eq.s32.totalorder %v9623_v32, %v10521_v55  ;;  %vm1454_vm10 = vcmp.eq.s32.totalorder %v9415_v7, %v10577_v38 }
 0x228   :  { %v1311_v48 = vpop.f32.mrf.mxu1 }
 0x229   :  { %7676 = vmatpush.bf16.msk.msra.mxu3 %vm7675_vm15, %v15071_v13  ;;  %vm1172_vm15 = vcmp.eq.s32.totalorder %v9547_v24, %v10521_v55 }
 0x22a   :  { %vm7681_vm1 = vmpackc.low %vm1174_vm8, %vm1172_vm15  ;;  %vm1394_vm15 = vcmp.eq.s32.totalorder %v9402_v2, %v10577_v38  ;;  %vm1396_vm8 = vcmp.eq.s32.totalorder %v9650_v34, %v10577_v38 }
 0x22b   :  { %7707 = vmatpush.bf16.msk.msrb.mxu2 %vm7706_vm7, %v15071_v13  ;;  %vm1160_vm7 = vcmp.eq.s32.totalorder %v9658_v35, %v10521_v55  ;;  %vm7712_vm6 = vmpackc.low %vm1396_vm8, %vm1394_vm15  ;;  %vm1442_vm8 = vcmp.eq.s32.totalorder %v9509_v20, %v10577_v38 }
 0x22d   :  { %7678 = vmatpush.bf16.msk.msra.mxu3 %vm7677_vm4, %v15071_v13  ;;  %vm1170_vm4 = vcmp.eq.s32.totalorder %v9588_v29, %v10521_v55 }
 0x22e   :  { %vm7683_vm11 = vmpackc.low %vm1170_vm4, %vm1168_vm13  ;;  %vm1456_vm13 = vcmp.eq.s32.totalorder %v9418_v8, %v10577_v38 }
 0x22f   :  { %7709 = vmatpush.bf16.msk.msrb.mxu2 %vm7708_vm12, %v15071_v13  ;;  %vm7714_vm12 = vmpackc.low %vm1456_vm13, %vm1454_vm10  ;;  %vm1440_vm10 = vcmp.eq.s32.totalorder %v9550_v25, %v10577_v38 }
 0x231   :  { %7680 = vmatpush.bf16.msk.msra.mxu3 %vm7679_vm14, %v15071_v13  ;;  %vm1166_vm14 = vcmp.eq.s32.totalorder %v9626_v33, %v10521_v55 }
 0x232   :  { %vm7685_vm2 = vmpackc.low %vm1166_vm14, %vm1164_vm5  ;;  %vm15123_vm14 = vcmask 64512  }
 0x233   :  { %7711 = vmatpush.bf16.msk.msrb.mxu2 %vm7710_vm3, %v15071_v13  ;;  %vm7716_vm5 = vmpackc.low %vm1452_vm9, %vm1450_vm0  ;;  %vm1446_vm3 = vcmp.eq.s32.totalorder %v9470_v16, %v10577_v38  ;;  %vm1430_vm0 = vcmp.eq.s32.totalorder %v9623_v32, %v10577_v38  ;;  %vm1432_vm9 = vcmp.eq.s32.totalorder %v9626_v33, %v10577_v38 }
 0x235   :  { %7682 = vmatpush.bf16.msk.msra.mxu3 %vm7681_vm1, %v15071_v13  ;;  %vm1162_vm1 = vcmp.eq.s32.totalorder %v9661_v36, %v10521_v55 }
 0x236   :  { %vm7687_vm4 = vmpackc.low %vm1162_vm1, %vm1160_vm7  ;;  %vm1444_vm7 = vcmp.eq.s32.totalorder %v9512_v21, %v10577_v38 }
 0x237   :  { %7713 = vmatpush.bf16.msk.msrb.mxu2 %vm7712_vm6, %v15071_v13  ;;  %vm7720_vm1 = vmpackc.low %vm1444_vm7, %vm1442_vm8  ;;  %vm1438_vm6 = vcmp.eq.s32.totalorder %v9547_v24, %v10577_v38  ;;  %vm1425_vm8 = vcmp.eq.s32.totalorder %v9412_v6, %v10716_v59 }
 0x238   :  { %vm7722_vm13 = vmpackc.low %vm1440_vm10, %vm1438_vm6  ;;  %vm1421_vm6 = vcmp.eq.s32.totalorder %v9424_v10, %v10716_v59 }
 0x239   :  { %7684 = vmatpush.bf16.msk.msra.mxu3 %vm7683_vm11, %v15071_v13  ;;  %vm15122_vm11 = vcmask 1043456  }
 0x23a   :  { %1562 = vmatmul.bf16.vlgmr.msrb.gmra.mxu2 %v9728_v43 }
 0x23b   :  { %v1296_v49 = vpop.f32.mrf.mxu0 }
 0x23c   :  { %v1310_v52 = vadd.f32 %v1309_v63, %v1296_v49 }
 0x23d   :  { %7686 = vmatpush.bf16.msk.msra.mxu3 %vm7685_vm2, %v15071_v13  ;;  %vm1448_vm2 = vcmp.eq.s32.totalorder %v9473_v17, %v10577_v38 }
 0x23e   :  { %v1342_v46 = vpack.c.bf16 %v1310_v52, %v1310_v52  ;;  %vm7718_vm15 = vmpackc.low %vm1448_vm2, %vm1446_vm3  ;;  %vm1428_vm3 = vcmp.eq.s32.totalorder %v9661_v36, %v10577_v38 }
 0x240   :  { %v1353_v53 = vsel %vm15122_vm11, %v1342_v46, 0 }
 0x241   :  { %7688 = vmatpush.bf16.msk.msra.mxu3 %vm7687_vm4, %v15071_v13  ;;  %1365 = vmatpush.bf16.msrb.mxu0 %v1353_v53  ;;  %vm1434_vm4 = vcmp.eq.s32.totalorder %v9585_v28, %v10577_v38 }
 0x243   :  { %v1298_v55 = vpop.f32.mrf.mxu0 }
 0x244   :  { %1334 = vmatmul.bf16.vlgmr.msra.gmra.mxu3 %v9735_v44  ;;  %7695 = vmatmul.msk.bf16.vlgmr.msrb.gmra.mxu0 %vm15123_vm14, %v10669_v50  ;;  %vm1426_vm14 = vcmp.eq.s32.totalorder %v9658_v35, %v10577_v38 }
 0x245   :  { %7715 = vmatpush.bf16.msk.msrb.mxu3 %vm7714_vm12, %v15071_v13  ;;  %vm1436_vm12 = vcmp.eq.s32.totalorder %v9588_v29, %v10577_v38  ;;  %vm7728_vm2 = vmpackc.low %vm1428_vm3, %vm1426_vm14  ;;  %vm1409_vm14 = vcmp.eq.s32.totalorder %v9539_v23, %v10716_v59 }
 0x246   :  { %vm7724_vm11 = vmpackc.low %vm1436_vm12, %vm1434_vm4  ;;  %vm1417_vm4 = vcmp.eq.s32.totalorder %v9467_v15, %v10716_v59 }
 0x249   :  { %7717 = vmatpush.bf16.msk.msrb.mxu3 %vm7716_vm5, %v15071_v13  ;;  %vm7726_vm5 = vmpackc.low %vm1432_vm9, %vm1430_vm0  ;;  %vm1413_vm0 = vcmp.eq.s32.totalorder %v9495_v19, %v10716_v59 }
 0x24b   :  { %v1322_v56 = vpop.f32.mrf.mxu2 }
 0x24d   :  { %7719 = vmatpush.bf16.msk.msrb.mxu3 %vm7718_vm15, %v15071_v13  ;;  %vm1423_vm15 = vcmp.eq.s32.totalorder %v9409_v5, %v10716_v59 }
 0x24e   :  { %vm7730_vm7 = vmpackc.low %vm1425_vm8, %vm1423_vm15  ;;  %vm1405_vm15 = vcmp.eq.s32.totalorder %v9577_v27, %v10716_v59 }
 0x24f   :  { %7731 = vmatpush.bf16.msk.msra.mxu0 %vm7730_vm7, %v15071_v13  ;;  %vm1399_vm7 = vcmp.eq.s32.totalorder %v9612_v30, %v10716_v59 }
 0x251   :  { %7721 = vmatpush.bf16.msk.msrb.mxu3 %vm7720_vm1, %v15071_v13  ;;  %vm1419_vm1 = vcmp.eq.s32.totalorder %v9421_v9, %v10716_v59 }
 0x252   :  { %vm7732_vm10 = vmpackc.low %vm1421_vm6, %vm1419_vm1  ;;  %vm1401_vm1 = vcmp.eq.s32.totalorder %v9615_v31, %v10716_v59 }
 0x253   :  { %v1324_v47 = vpop.f32.mrf.mxu2  ;;  %7733 = vmatpush.bf16.msk.msra.mxu0 %vm7732_vm10, %v15071_v13  ;;  %vm7742_vm6 = vmpackc.low %vm1401_vm1, %vm1399_vm7  ;;  %vm1395_vm10 = vcmp.eq.s32.totalorder %v9402_v2, %v10716_v59  ;;  %vm1687_vm7 = vcmp.eq.s32.totalorder %v9424_v10, %v10775_v41 }
 0x254   :  { %v10913_v47 = vperm.slane %v10772_v40, 1 }
 0x255   :  { %7723 = vmatpush.bf16.msk.msrb.mxu3 %vm7722_vm13, %v15071_v13  ;;  %vm1415_vm13 = vcmp.eq.s32.totalorder %v9464_v14, %v10716_v59 }
 0x256   :  { %vm7734_vm12 = vmpackc.low %vm1417_vm4, %vm1415_vm13  ;;  %vm1397_vm13 = vcmp.eq.s32.totalorder %v9650_v34, %v10716_v59 }
 0x257   :  { %7735 = vmatpush.bf16.msk.msra.mxu0 %vm7734_vm12, %v15071_v13  ;;  %vm7744_vm4 = vmpackc.low %vm1397_vm13, %vm1395_vm10  ;;  %vm1455_vm12 = vcmp.eq.s32.totalorder %v9415_v7, %v10716_v59  ;;  %vm1681_vm10 = vcmp.eq.s32.totalorder %v9464_v14, %v10775_v41  ;;  %vm1683_vm13 = vcmp.eq.s32.totalorder %v9467_v15, %v10775_v41 }
 0x259   :  { %7725 = vmatpush.bf16.msk.msrb.mxu3 %vm7724_vm11, %v15071_v13  ;;  %vm1411_vm11 = vcmp.eq.s32.totalorder %v9492_v18, %v10716_v59 }
 0x25a   :  { %vm7736_vm9 = vmpackc.low %vm1413_vm0, %vm1411_vm11  ;;  %vm1457_vm11 = vcmp.eq.s32.totalorder %v9418_v8, %v10716_v59  ;;  %vm1689_vm0 = vcmp.eq.s32.totalorder %v9409_v5, %v10775_v41 }
 0x25b   :  { %7737 = vmatpush.bf16.msk.msra.mxu0 %vm7736_vm9, %v15071_v13  ;;  %vm1691_vm9 = vcmp.eq.s32.totalorder %v9412_v6, %v10775_v41 }
 0x25d   :  { %7727 = vmatpush.bf16.msk.msrb.mxu3 %vm7726_vm5, %v15071_v13  ;;  %vm1407_vm5 = vcmp.eq.s32.totalorder %v9536_v22, %v10716_v59 }
 0x25e   :  { %vm7738_vm3 = vmpackc.low %vm1409_vm14, %vm1407_vm5 }
 0x25f   :  { %7739 = vmatpush.bf16.msk.msra.mxu0 %vm7738_vm3, %v15071_v13  ;;  %vm7771_vm5 = vmpackc.low %vm1691_vm9, %vm1689_vm0  ;;  %vm15125_vm3 = vcmask 1043456  }
 0x260   :  { %vm7746_vm14 = vmpackc.low %vm1457_vm11, %vm1455_vm12  ;;  %vm1447_vm12 = vcmp.eq.s32.totalorder %v9470_v16, %v10716_v59  ;;  %vm1449_vm11 = vcmp.eq.s32.totalorder %v9473_v17, %v10716_v59 }
 0x261   :  { %7729 = vmatpush.bf16.msk.msrb.mxu3 %vm7728_vm2, %v15071_v13  ;;  %vm1403_vm2 = vcmp.eq.s32.totalorder %v9574_v26, %v10716_v59  ;;  %vm7775_vm0 = vmpackc.low %vm1683_vm13, %vm1681_vm10  ;;  %vm1441_vm10 = vcmp.eq.s32.totalorder %v9550_v25, %v10716_v59 }
 0x262   :  { %vm7740_vm8 = vmpackc.low %vm1405_vm15, %vm1403_vm2  ;;  %vm1451_vm2 = vcmp.eq.s32.totalorder %v9427_v11, %v10716_v59  ;;  %vm1453_vm15 = vcmp.eq.s32.totalorder %v9430_v12, %v10716_v59 }
 0x263   :  { %7741 = vmatpush.bf16.msk.msra.mxu0 %vm7740_vm8, %v15071_v13  ;;  %vm1685_vm8 = vcmp.eq.s32.totalorder %v9421_v9, %v10775_v41  ;;  %vm7750_vm9 = vmpackc.low %vm1449_vm11, %vm1447_vm12  ;;  %vm1669_vm12 = vcmp.eq.s32.totalorder %v9574_v26, %v10775_v41  ;;  %vm1671_vm11 = vcmp.eq.s32.totalorder %v9577_v27, %v10775_v41 }
 0x264   :  { %1575 = vmatmul.bf16.vlgmr.msrb.gmra.mxu3 %v9735_v44  ;;  %vm7773_vm1 = vmpackc.low %vm1687_vm7, %vm1685_vm8  ;;  %vm1673_vm7 = vcmp.eq.s32.totalorder %v9536_v22, %v10775_v41 }
 0x267   :  { %7743 = vmatpush.bf16.msk.msra.mxu0 %vm7742_vm6, %v15071_v13  ;;  %vm7748_vm6 = vmpackc.low %vm1453_vm15, %vm1451_vm2  ;;  %vm1445_vm2 = vcmp.eq.s32.totalorder %v9512_v21, %v10716_v59 }
 0x26b   :  { %7745 = vmatpush.bf16.msk.msra.mxu0 %vm7744_vm4, %v15071_v13  ;;  %vm15126_vm4 = vcmask 64512  }
 0x26e   :  { %1588 = vmatmul.bf16.vlgmr.msra.gmra.mxu0 %v9728_v43 }
 0x26f   :  { %7772 = vmatpush.bf16.msk.msrb.mxu0 %vm7771_vm5, %v15071_v13  ;;  %vm1677_vm5 = vcmp.eq.s32.totalorder %v9492_v18, %v10775_v41 }
 0x273   :  { %7774 = vmatpush.bf16.msk.msrb.mxu0 %vm7773_vm1, %v15071_v13  ;;  %vm1675_vm1 = vcmp.eq.s32.totalorder %v9539_v23, %v10775_v41 }
 0x274   :  { %vm7779_vm13 = vmpackc.low %vm1675_vm1, %vm1673_vm7 }
 0x277   :  { %7776 = vmatpush.bf16.msk.msrb.mxu0 %vm7775_vm0, %v15071_v13  ;;  %vm1435_vm0 = vcmp.eq.s32.totalorder %v9585_v28, %v10716_v59 }
 0x2a7   :  { %v1114_v61 = vpop.f32.mrf.mxu3 }
 0x2a8   :  { %v10729_v4 = vadd.f32 %v1114_v61, %v10518_v54 }
 0x2af   :  { %v10760_v54 = vpop.f32.mrf.mxu3 }
 0x2bd   :  { %v10766_v39 = vpop.f32.mrf.mxu2 }
 0x2c1   :  { %v1367_v37 = vpop.f32.mrf.mxu0 }
 0x2c2   :  { %v10763_v38 = vadd.f32 %v1367_v37, %v10550_v60 }
 0x2c5   :  { %v1565_v49 = vpop.f32.mrf.mxu2 }
 0x2c7   :  { %v1335_v63 = vpop.f32.mrf.mxu3 }
 0x2c8   :  { %v1336_v45 = vadd.f32 %v1335_v63, %v1322_v56  ;;  %v10868_v56 = vld [vmem:[%s15064_s2 + $0x28] sm:$0xff] }
 0x2c9   :  { %v10919_v61 = vpop.f32.mrf.mxu0 }
 0x2ca   :  { %v1343_v60 = vpack.c.bf16 %v1336_v45, %v1336_v45  ;;  %15129 = vst [vmem:[#allocation9_spill] sm:$0xff] %v10919_v61  ;;  %v10968_v45 = vld [vmem:[%s15062_s0 + $0xe] sm:$0x3] }
 0x2cc   :  { %v1356_v48 = vsel %vm15125_vm3, %v1343_v60, 0  ;;  %vm1443_vm3 = vcmp.eq.s32.totalorder %v9509_v20, %v10716_v59 }
 0x2cd   :  { %1379 = vmatpush.bf16.msrb.mxu1 %v1356_v48  ;;  %vm7752_vm8 = vmpackc.low %vm1445_vm2, %vm1443_vm3  ;;  %vm1665_vm3 = vcmp.eq.s32.totalorder %v9612_v30, %v10775_v41  ;;  %vm1667_vm2 = vcmp.eq.s32.totalorder %v9615_v31, %v10775_v41  ;;  %v10971_v48 = vperm.slane %v10968_v45, 0 }
 0x2ce   :  { %vm7783_vm7 = vmpackc.low %vm1667_vm2, %vm1665_vm3  ;;  %vm1717_vm3 = vcmp.eq.s32.totalorder %v9427_v11, %v10775_v41  ;;  %vm1719_vm2 = vcmp.eq.s32.totalorder %v9430_v12, %v10775_v41 }
 0x2cf   :  { %v1337_v52 = vpop.f32.mrf.mxu3 }
 0x2d0   :  { %7696 = vmatmul.msk.bf16.vlgmr.msrb.gmra.mxu1 %vm15126_vm4, %v10669_v50 }
 0x2d1   :  { %7747 = vmatpush.bf16.msk.msra.mxu1 %vm7746_vm14, %v15071_v13  ;;  %vm1679_vm14 = vcmp.eq.s32.totalorder %v9495_v19, %v10775_v41 }
 0x2d2   :  { %vm7777_vm15 = vmpackc.low %vm1679_vm14, %vm1677_vm5 }
 0x2d3   :  { %7778 = vmatpush.bf16.msk.msrb.mxu0 %vm7777_vm15, %v15071_v13  ;;  %vm7781_vm5 = vmpackc.low %vm1671_vm11, %vm1669_vm12  ;;  %vm1431_vm15 = vcmp.eq.s32.totalorder %v9623_v32, %v10716_v59  ;;  %vm1721_vm11 = vcmp.eq.s32.totalorder %v9415_v7, %v10775_v41 }
 0x2d5   :  { %7749 = vmatpush.bf16.msk.msra.mxu1 %vm7748_vm6, %v15071_v13  ;;  %vm1439_vm6 = vcmp.eq.s32.totalorder %v9547_v24, %v10716_v59 }
 0x2d6   :  { %vm7754_vm4 = vmpackc.low %vm1441_vm10, %vm1439_vm6  ;;  %vm1661_vm6 = vcmp.eq.s32.totalorder %v9402_v2, %v10775_v41  ;;  %vm1663_vm10 = vcmp.eq.s32.totalorder %v9650_v34, %v10775_v41 }
 0x2d7   :  { %7780 = vmatpush.bf16.msk.msrb.mxu0 %vm7779_vm13, %v15071_v13  ;;  %vm1427_vm13 = vcmp.eq.s32.totalorder %v9658_v35, %v10716_v59  ;;  %vm7785_vm12 = vmpackc.low %vm1663_vm10, %vm1661_vm6  ;;  %vm1709_vm10 = vcmp.eq.s32.totalorder %v9509_v20, %v10775_v41 }
 0x2d9   :  { %7751 = vmatpush.bf16.msk.msra.mxu1 %vm7750_vm9, %v15071_v13  ;;  %vm1437_vm9 = vcmp.eq.s32.totalorder %v9588_v29, %v10716_v59 }
 0x2da   :  { %vm7756_vm14 = vmpackc.low %vm1437_vm9, %vm1435_vm0  ;;  %vm1723_vm0 = vcmp.eq.s32.totalorder %v9418_v8, %v10775_v41 }
 0x2db   :  { %7782 = vmatpush.bf16.msk.msrb.mxu0 %vm7781_vm5, %v15071_v13  ;;  %vm7787_vm5 = vmpackc.low %vm1723_vm0, %vm1721_vm11  ;;  %vm1707_vm11 = vcmp.eq.s32.totalorder %v9550_v25, %v10775_v41 }
 0x2dd   :  { %7753 = vmatpush.bf16.msk.msra.mxu1 %vm7752_vm8, %v15071_v13  ;;  %vm1433_vm8 = vcmp.eq.s32.totalorder %v9626_v33, %v10716_v59 }
 0x2de   :  { %vm7758_vm1 = vmpackc.low %vm1433_vm8, %vm1431_vm15  ;;  %vm15128_vm8 = vcmask 64512  }
 0x2df   :  { %7784 = vmatpush.bf16.msk.msrb.mxu0 %vm7783_vm7, %v15071_v13  ;;  %vm7789_vm15 = vmpackc.low %vm1719_vm2, %vm1717_vm3  ;;  %vm1713_vm7 = vcmp.eq.s32.totalorder %v9470_v16, %v10775_v41  ;;  %vm1697_vm3 = vcmp.eq.s32.totalorder %v9623_v32, %v10775_v41  ;;  %vm1699_vm2 = vcmp.eq.s32.totalorder %v9626_v33, %v10775_v41 }
 0x2e1   :  { %7755 = vmatpush.bf16.msk.msra.mxu1 %vm7754_vm4, %v15071_v13  ;;  %vm1429_vm4 = vcmp.eq.s32.totalorder %v9661_v36, %v10716_v59 }
 0x2e2   :  { %vm7760_vm9 = vmpackc.low %vm1429_vm4, %vm1427_vm13  ;;  %vm1711_vm13 = vcmp.eq.s32.totalorder %v9512_v21, %v10775_v41 }
 0x2e3   :  { %7786 = vmatpush.bf16.msk.msrb.mxu0 %vm7785_vm12, %v15071_v13  ;;  %vm7793_vm4 = vmpackc.low %vm1711_vm13, %vm1709_vm10  ;;  %vm1705_vm12 = vcmp.eq.s32.totalorder %v9547_v24, %v10775_v41  ;;  %vm1692_vm10 = vcmp.eq.s32.totalorder %v9412_v6, %v10913_v47 }
 0x2e4   :  { %vm7795_vm0 = vmpackc.low %vm1707_vm11, %vm1705_vm12  ;;  %vm1688_vm12 = vcmp.eq.s32.totalorder %v9424_v10, %v10913_v47 }
 0x2e5   :  { %7757 = vmatpush.bf16.msk.msra.mxu1 %vm7756_vm14, %v15071_v13  ;;  %vm15127_vm14 = vcmask 1043456  }
 0x2e6   :  { %1829 = vmatmul.bf16.vlgmr.msrb.gmra.mxu0 %v9728_v43 }
 0x2e7   :  { %v1576_v46 = vpop.f32.mrf.mxu3 }
 0x2e8   :  { %v1577_v53 = vadd.f32 %v1576_v46, %v10766_v39 }
 0x2e9   :  { %7759 = vmatpush.bf16.msk.msra.mxu1 %vm7758_vm1, %v15071_v13  ;;  %vm1715_vm1 = vcmp.eq.s32.totalorder %v9473_v17, %v10775_v41 }
 0x2ea   :  { %v1609_v50 = vpack.c.bf16 %v1577_v53, %v1577_v53  ;;  %vm7791_vm6 = vmpackc.low %vm1715_vm1, %vm1713_vm7  ;;  %vm1695_vm7 = vcmp.eq.s32.totalorder %v9661_v36, %v10775_v41 }
 0x2eb   :  { %v1589_v37 = vpop.f32.mrf.mxu0 }
 0x2ec   :  { %v1620_v55 = vsel %vm15127_vm14, %v1609_v50, 0 }
 0x2ed   :  { %7761 = vmatpush.bf16.msk.msra.mxu1 %vm7760_vm9, %v15071_v13  ;;  %1632 = vmatpush.bf16.msra.mxu2 %v1620_v55  ;;  %vm1701_vm9 = vcmp.eq.s32.totalorder %v9585_v28, %v10775_v41 }
 0x2ef   :  { %v1578_v59 = vpop.f32.mrf.mxu3 }
 0x2f0   :  { %1601 = vmatmul.bf16.vlgmr.msra.gmra.mxu1 %v9735_v44  ;;  %7768 = vmatmul.msk.bf16.vlgmr.msra.gmra.mxu2 %vm15128_vm8, %v10868_v56  ;;  %vm1693_vm8 = vcmp.eq.s32.totalorder %v9658_v35, %v10775_v41 }
 0x2f1   :  { %7788 = vmatpush.bf16.msk.msrb.mxu1 %vm7787_vm5, %v15071_v13  ;;  %vm1703_vm5 = vcmp.eq.s32.totalorder %v9588_v29, %v10775_v41  ;;  %vm7801_vm1 = vmpackc.low %vm1695_vm7, %vm1693_vm8  ;;  %vm1676_vm8 = vcmp.eq.s32.totalorder %v9539_v23, %v10913_v47 }
 0x2f2   :  { %vm7797_vm14 = vmpackc.low %vm1703_vm5, %vm1701_vm9  ;;  %vm1684_vm9 = vcmp.eq.s32.totalorder %v9467_v15, %v10913_v47 }
 0x2f3   :  { %v1591_v39 = vpop.f32.mrf.mxu0 }
 0x2f5   :  { %7790 = vmatpush.bf16.msk.msrb.mxu1 %vm7789_vm15, %v15071_v13  ;;  %vm7799_vm15 = vmpackc.low %vm1699_vm2, %vm1697_vm3  ;;  %vm1680_vm3 = vcmp.eq.s32.totalorder %v9495_v19, %v10913_v47 }
 0x2f9   :  { %7792 = vmatpush.bf16.msk.msrb.mxu1 %vm7791_vm6, %v15071_v13  ;;  %vm1690_vm6 = vcmp.eq.s32.totalorder %v9409_v5, %v10913_v47 }
 0x2fa   :  { %vm7803_vm13 = vmpackc.low %vm1692_vm10, %vm1690_vm6  ;;  %vm1672_vm6 = vcmp.eq.s32.totalorder %v9577_v27, %v10913_v47 }
 0x2fb   :  { %7804 = vmatpush.bf16.msk.msrb.mxu2 %vm7803_vm13, %v15071_v13  ;;  %vm1666_vm13 = vcmp.eq.s32.totalorder %v9612_v30, %v10913_v47 }
 0x2fd   :  { %7794 = vmatpush.bf16.msk.msrb.mxu1 %vm7793_vm4, %v15071_v13  ;;  %vm1686_vm4 = vcmp.eq.s32.totalorder %v9421_v9, %v10913_v47 }
 0x2fe   :  { %vm7805_vm11 = vmpackc.low %vm1688_vm12, %vm1686_vm4  ;;  %vm1668_vm4 = vcmp.eq.s32.totalorder %v9615_v31, %v10913_v47 }
 0x2ff   :  { %7806 = vmatpush.bf16.msk.msrb.mxu2 %vm7805_vm11, %v15071_v13  ;;  %vm7815_vm12 = vmpackc.low %vm1668_vm4, %vm1666_vm13  ;;  %vm1662_vm11 = vcmp.eq.s32.totalorder %v9402_v2, %v10913_v47  ;;  %vm1954_vm13 = vcmp.eq.s32.totalorder %v9424_v10, %v10971_v48 }
 0x301   :  { %7796 = vmatpush.bf16.msk.msrb.mxu1 %vm7795_vm0, %v15071_v13  ;;  %vm1682_vm0 = vcmp.eq.s32.totalorder %v9464_v14, %v10913_v47 }
 0x302   :  { %vm7807_vm5 = vmpackc.low %vm1684_vm9, %vm1682_vm0  ;;  %vm1664_vm0 = vcmp.eq.s32.totalorder %v9650_v34, %v10913_v47 }
 0x303   :  { %7808 = vmatpush.bf16.msk.msrb.mxu2 %vm7807_vm5, %v15071_v13  ;;  %vm7817_vm9 = vmpackc.low %vm1664_vm0, %vm1662_vm11  ;;  %vm1722_vm5 = vcmp.eq.s32.totalorder %v9415_v7, %v10913_v47  ;;  %vm1948_vm11 = vcmp.eq.s32.totalorder %v9464_v14, %v10971_v48  ;;  %vm1950_vm0 = vcmp.eq.s32.totalorder %v9467_v15, %v10971_v48 }
 0x305   :  { %7798 = vmatpush.bf16.msk.msrb.mxu1 %vm7797_vm14, %v15071_v13  ;;  %vm1678_vm14 = vcmp.eq.s32.totalorder %v9492_v18, %v10913_v47 }
 0x306   :  { %vm7809_vm2 = vmpackc.low %vm1680_vm3, %vm1678_vm14  ;;  %vm1724_vm14 = vcmp.eq.s32.totalorder %v9418_v8, %v10913_v47  ;;  %vm1956_vm3 = vcmp.eq.s32.totalorder %v9409_v5, %v10971_v48 }
 0x307   :  { %7810 = vmatpush.bf16.msk.msrb.mxu2 %vm7809_vm2, %v15071_v13  ;;  %vm1958_vm2 = vcmp.eq.s32.totalorder %v9412_v6, %v10971_v48 }
 0x309   :  { %7800 = vmatpush.bf16.msk.msrb.mxu1 %vm7799_vm15, %v15071_v13  ;;  %vm1674_vm15 = vcmp.eq.s32.totalorder %v9536_v22, %v10913_v47 }
 0x30a   :  { %vm7811_vm7 = vmpackc.low %vm1676_vm8, %vm1674_vm15 }
 0x30b   :  { %7812 = vmatpush.bf16.msk.msrb.mxu2 %vm7811_vm7, %v15071_v13  ;;  %vm7844_vm15 = vmpackc.low %vm1958_vm2, %vm1956_vm3  ;;  %vm15130_vm7 = vcmask 1043456  }
 0x30c   :  { %vm7819_vm8 = vmpackc.low %vm1724_vm14, %vm1722_vm5  ;;  %vm1714_vm5 = vcmp.eq.s32.totalorder %v9470_v16, %v10913_v47  ;;  %vm1716_vm14 = vcmp.eq.s32.totalorder %v9473_v17, %v10913_v47 }
 0x30d   :  { %7802 = vmatpush.bf16.msk.msrb.mxu1 %vm7801_vm1, %v15071_v13  ;;  %vm1670_vm1 = vcmp.eq.s32.totalorder %v9574_v26, %v10913_v47  ;;  %vm7848_vm3 = vmpackc.low %vm1950_vm0, %vm1948_vm11  ;;  %vm1708_vm11 = vcmp.eq.s32.totalorder %v9550_v25, %v10913_v47 }
 0x30e   :  { %vm7813_vm10 = vmpackc.low %vm1672_vm6, %vm1670_vm1  ;;  %vm1718_vm1 = vcmp.eq.s32.totalorder %v9427_v11, %v10913_v47  ;;  %vm1720_vm6 = vcmp.eq.s32.totalorder %v9430_v12, %v10913_v47 }
 0x30f   :  { %7814 = vmatpush.bf16.msk.msrb.mxu2 %vm7813_vm10, %v15071_v13  ;;  %vm1952_vm10 = vcmp.eq.s32.totalorder %v9421_v9, %v10971_v48  ;;  %vm7823_vm2 = vmpackc.low %vm1716_vm14, %vm1714_vm5  ;;  %vm1936_vm5 = vcmp.eq.s32.totalorder %v9574_v26, %v10971_v48  ;;  %vm1938_vm14 = vcmp.eq.s32.totalorder %v9577_v27, %v10971_v48 }
 0x310   :  { %1842 = vmatmul.bf16.vlgmr.msrb.gmra.mxu1 %v9735_v44  ;;  %vm7846_vm4 = vmpackc.low %vm1954_vm13, %vm1952_vm10  ;;  %vm1940_vm13 = vcmp.eq.s32.totalorder %v9536_v22, %v10971_v48 }
 0x313   :  { %7816 = vmatpush.bf16.msk.msrb.mxu2 %vm7815_vm12, %v15071_v13  ;;  %vm7821_vm12 = vmpackc.low %vm1720_vm6, %vm1718_vm1  ;;  %vm1712_vm1 = vcmp.eq.s32.totalorder %v9512_v21, %v10913_v47 }
 0x317   :  { %7818 = vmatpush.bf16.msk.msrb.mxu2 %vm7817_vm9, %v15071_v13  ;;  %vm15131_vm9 = vcmask 64512  }
 0x31a   :  { %1855 = vmatmul.bf16.vlgmr.msrb.gmra.mxu2 %v9728_v43 }
 0x31b   :  { %7845 = vmatpush.bf16.msk.msra.mxu2 %vm7844_vm15, %v15071_v13  ;;  %vm1944_vm15 = vcmp.eq.s32.totalorder %v9492_v18, %v10971_v48 }
 0x31f   :  { %7847 = vmatpush.bf16.msk.msra.mxu2 %vm7846_vm4, %v15071_v13  ;;  %vm1942_vm4 = vcmp.eq.s32.totalorder %v9539_v23, %v10971_v48 }
 0x320   :  { %vm7852_vm0 = vmpackc.low %vm1942_vm4, %vm1940_vm13 }
 0x323   :  { %7849 = vmatpush.bf16.msk.msra.mxu2 %vm7848_vm3, %v15071_v13  ;;  %vm1702_vm3 = vcmp.eq.s32.totalorder %v9585_v28, %v10913_v47 }
 0x34d   :  { %v1381_v40 = vpop.f32.mrf.mxu1 }
 0x34e   :  { %v10928_v63 = vadd.f32 %v1381_v40, %v10729_v4 }
 0x355   :  { %v10959_v4 = vpop.f32.mrf.mxu1 }
 0x363   :  { %v10962_v41 = vpop.f32.mrf.mxu0 }
 0x36b   :  { %v1832_v50 = vpop.f32.mrf.mxu0 }
 0x36d   :  { %v1602_v60 = vpop.f32.mrf.mxu1 }
 0x36e   :  { %v1603_v49 = vadd.f32 %v1602_v60, %v1589_v37 }
 0x370   :  { %v1610_v52 = vpack.c.bf16 %v1603_v49, %v1603_v49  ;;  %v11114_v49 = vperm.slane %v10968_v45, 1 }
 0x372   :  { %v1623_v46 = vsel %vm15130_vm7, %v1610_v52, 0  ;;  %vm1710_vm7 = vcmp.eq.s32.totalorder %v9509_v20, %v10913_v47 }
 0x373   :  { %v1634_v53 = vpop.f32.mrf.mxu2  ;;  %1646 = vmatpush.bf16.msra.mxu3 %v1623_v46  ;;  %vm7825_vm10 = vmpackc.low %vm1712_vm1, %vm1710_vm7  ;;  %vm1932_vm7 = vcmp.eq.s32.totalorder %v9612_v30, %v10971_v48  ;;  %vm1934_vm1 = vcmp.eq.s32.totalorder %v9615_v31, %v10971_v48 }
 0x374   :  { %v10992_v55 = vadd.f32 %v1634_v53, %v10763_v38  ;;  %vm7856_vm13 = vmpackc.low %vm1934_vm1, %vm1932_vm7  ;;  %vm1984_vm7 = vcmp.eq.s32.totalorder %v9427_v11, %v10971_v48  ;;  %vm1986_vm1 = vcmp.eq.s32.totalorder %v9430_v12, %v10971_v48 }
 0x375   :  { %v1604_v59 = vpop.f32.mrf.mxu1 }
 0x376   :  { %7769 = vmatmul.msk.bf16.vlgmr.msra.gmra.mxu3 %vm15131_vm9, %v10868_v56  ;;  %v11170_v59 = vld [vmem:[%s15062_s0 + $0x10] sm:$0x3] }
 0x377   :  { %7820 = vmatpush.bf16.msk.msrb.mxu3 %vm7819_vm8, %v15071_v13  ;;  %vm1946_vm8 = vcmp.eq.s32.totalorder %v9495_v19, %v10971_v48 }
 0x378   :  { %vm7850_vm6 = vmpackc.low %vm1946_vm8, %vm1944_vm15 }
 0x379   :  { %7851 = vmatpush.bf16.msk.msra.mxu2 %vm7850_vm6, %v15071_v13  ;;  %vm7854_vm15 = vmpackc.low %vm1938_vm14, %vm1936_vm5  ;;  %vm1698_vm6 = vcmp.eq.s32.totalorder %v9623_v32, %v10913_v47  ;;  %vm1988_vm14 = vcmp.eq.s32.totalorder %v9415_v7, %v10971_v48 }
 0x37b   :  { %7822 = vmatpush.bf16.msk.msrb.mxu3 %vm7821_vm12, %v15071_v13  ;;  %vm1706_vm12 = vcmp.eq.s32.totalorder %v9547_v24, %v10913_v47 }
 0x37c   :  { %vm7827_vm9 = vmpackc.low %vm1708_vm11, %vm1706_vm12  ;;  %vm1928_vm12 = vcmp.eq.s32.totalorder %v9402_v2, %v10971_v48  ;;  %vm1930_vm11 = vcmp.eq.s32.totalorder %v9650_v34, %v10971_v48 }
 0x37d   :  { %7853 = vmatpush.bf16.msk.msra.mxu2 %vm7852_vm0, %v15071_v13  ;;  %vm1694_vm0 = vcmp.eq.s32.totalorder %v9658_v35, %v10913_v47  ;;  %vm7858_vm5 = vmpackc.low %vm1930_vm11, %vm1928_vm12  ;;  %vm1976_vm11 = vcmp.eq.s32.totalorder %v9509_v20, %v10971_v48 }
 0x37f   :  { %7824 = vmatpush.bf16.msk.msrb.mxu3 %vm7823_vm2, %v15071_v13  ;;  %vm1704_vm2 = vcmp.eq.s32.totalorder %v9588_v29, %v10913_v47 }
 0x380   :  { %vm7829_vm8 = vmpackc.low %vm1704_vm2, %vm1702_vm3  ;;  %vm1990_vm3 = vcmp.eq.s32.totalorder %v9418_v8, %v10971_v48 }
 0x381   :  { %7855 = vmatpush.bf16.msk.msra.mxu2 %vm7854_vm15, %v15071_v13  ;;  %vm7860_vm15 = vmpackc.low %vm1990_vm3, %vm1988_vm14  ;;  %vm1974_vm14 = vcmp.eq.s32.totalorder %v9550_v25, %v10971_v48 }
 0x383   :  { %7826 = vmatpush.bf16.msk.msrb.mxu3 %vm7825_vm10, %v15071_v13  ;;  %vm1700_vm10 = vcmp.eq.s32.totalorder %v9626_v33, %v10913_v47 }
 0x384   :  { %vm7831_vm4 = vmpackc.low %vm1700_vm10, %vm1698_vm6  ;;  %vm15133_vm10 = vcmask 64512  }
 0x385   :  { %7857 = vmatpush.bf16.msk.msra.mxu2 %vm7856_vm13, %v15071_v13  ;;  %vm7862_vm6 = vmpackc.low %vm1986_vm1, %vm1984_vm7  ;;  %vm1980_vm13 = vcmp.eq.s32.totalorder %v9470_v16, %v10971_v48  ;;  %vm1964_vm7 = vcmp.eq.s32.totalorder %v9623_v32, %v10971_v48  ;;  %vm1966_vm1 = vcmp.eq.s32.totalorder %v9626_v33, %v10971_v48 }
 0x387   :  { %7828 = vmatpush.bf16.msk.msrb.mxu3 %vm7827_vm9, %v15071_v13  ;;  %vm1696_vm9 = vcmp.eq.s32.totalorder %v9661_v36, %v10913_v47  ;;  %v11067_v47 = vld [vmem:[%s15064_s2 + $0x30] sm:$0xff] }
 0x388   :  { %vm7833_vm2 = vmpackc.low %vm1696_vm9, %vm1694_vm0  ;;  %vm1978_vm0 = vcmp.eq.s32.totalorder %v9512_v21, %v10971_v48 }
 0x389   :  { %7859 = vmatpush.bf16.msk.msra.mxu2 %vm7858_vm5, %v15071_v13  ;;  %vm7866_vm9 = vmpackc.low %vm1978_vm0, %vm1976_vm11  ;;  %vm1972_vm5 = vcmp.eq.s32.totalorder %v9547_v24, %v10971_v48  ;;  %vm1959_vm11 = vcmp.eq.s32.totalorder %v9412_v6, %v11114_v49 }
 0x38a   :  { %vm7868_vm3 = vmpackc.low %vm1974_vm14, %vm1972_vm5  ;;  %vm1955_vm5 = vcmp.eq.s32.totalorder %v9424_v10, %v11114_v49 }
 0x38b   :  { %7830 = vmatpush.bf16.msk.msrb.mxu3 %vm7829_vm8, %v15071_v13  ;;  %vm15132_vm8 = vcmask 1043456  }
 0x38c   :  { %2096 = vmatmul.bf16.vlgmr.msra.gmra.mxu2 %v9728_v43 }
 0x38d   :  { %v1843_v38 = vpop.f32.mrf.mxu1 }
 0x38e   :  { %v1844_v56 = vadd.f32 %v1843_v38, %v10962_v41  ;;  %v11111_v41 = vpop.f32.mrf.mxu2 }
 0x38f   :  { %7832 = vmatpush.bf16.msk.msrb.mxu3 %vm7831_vm4, %v15071_v13  ;;  %vm1982_vm4 = vcmp.eq.s32.totalorder %v9473_v17, %v10971_v48  ;;  %15134 = vst [vmem:[#allocation10_spill] sm:$0xff] %v11111_v41 }
 0x390   :  { %v1876_v37 = vpack.c.bf16 %v1844_v56, %v1844_v56  ;;  %vm7864_vm12 = vmpackc.low %vm1982_vm4, %vm1980_vm13  ;;  %vm1962_vm13 = vcmp.eq.s32.totalorder %v9661_v36, %v10971_v48  ;;  %v11173_v56 = vperm.slane %v11170_v59, 0 }
 0x392   :  { %v1887_v39 = vsel %vm15132_vm8, %v1876_v37, 0 }
 0x393   :  { %7834 = vmatpush.bf16.msk.msrb.mxu3 %vm7833_vm2, %v15071_v13  ;;  %1899 = vmatpush.bf16.msra.mxu0 %v1887_v39  ;;  %vm1968_vm2 = vcmp.eq.s32.totalorder %v9585_v28, %v10971_v48 }
 0x395   :  { %v1845_v40 = vpop.f32.mrf.mxu1 }
 0x396   :  { %1868 = vmatmul.bf16.vlgmr.msrb.gmra.mxu3 %v9735_v44  ;;  %7841 = vmatmul.msk.bf16.vlgmr.msra.gmra.mxu0 %vm15133_vm10, %v11067_v47  ;;  %vm1960_vm10 = vcmp.eq.s32.totalorder %v9658_v35, %v10971_v48 }
 0x397   :  { %7861 = vmatpush.bf16.msk.msra.mxu3 %vm7860_vm15, %v15071_v13  ;;  %vm1970_vm15 = vcmp.eq.s32.totalorder %v9588_v29, %v10971_v48  ;;  %vm7874_vm4 = vmpackc.low %vm1962_vm13, %vm1960_vm10  ;;  %vm1943_vm10 = vcmp.eq.s32.totalorder %v9539_v23, %v11114_v49 }
 0x398   :  { %vm7870_vm8 = vmpackc.low %vm1970_vm15, %vm1968_vm2  ;;  %vm1951_vm2 = vcmp.eq.s32.totalorder %v9467_v15, %v11114_v49 }
 0x39b   :  { %7863 = vmatpush.bf16.msk.msra.mxu3 %vm7862_vm6, %v15071_v13  ;;  %vm7872_vm6 = vmpackc.low %vm1966_vm1, %vm1964_vm7  ;;  %vm1947_vm7 = vcmp.eq.s32.totalorder %v9495_v19, %v11114_v49 }
 0x39d   :  { %v1856_v60 = vpop.f32.mrf.mxu2 }
 0x39f   :  { %7865 = vmatpush.bf16.msk.msra.mxu3 %vm7864_vm12, %v15071_v13  ;;  %vm1957_vm12 = vcmp.eq.s32.totalorder %v9409_v5, %v11114_v49 }
 0x3a0   :  { %vm7876_vm0 = vmpackc.low %vm1959_vm11, %vm1957_vm12  ;;  %vm1939_vm12 = vcmp.eq.s32.totalorder %v9577_v27, %v11114_v49 }
 0x3a1   :  { %7877 = vmatpush.bf16.msk.msrb.mxu0 %vm7876_vm0, %v15071_v13  ;;  %vm1933_vm0 = vcmp.eq.s32.totalorder %v9612_v30, %v11114_v49 }
 0x3a3   :  { %7867 = vmatpush.bf16.msk.msra.mxu3 %vm7866_vm9, %v15071_v13  ;;  %vm1953_vm9 = vcmp.eq.s32.totalorder %v9421_v9, %v11114_v49 }
 0x3a4   :  { %vm7878_vm14 = vmpackc.low %vm1955_vm5, %vm1953_vm9  ;;  %vm1935_vm9 = vcmp.eq.s32.totalorder %v9615_v31, %v11114_v49 }
 0x3a5   :  { %v1858_v48 = vpop.f32.mrf.mxu2  ;;  %7879 = vmatpush.bf16.msk.msrb.mxu0 %vm7878_vm14, %v15071_v13  ;;  %vm7888_vm5 = vmpackc.low %vm1935_vm9, %vm1933_vm0  ;;  %vm1929_vm14 = vcmp.eq.s32.totalorder %v9402_v2, %v11114_v49  ;;  %vm2221_vm0 = vcmp.eq.s32.totalorder %v9424_v10, %v11173_v56 }
 0x3a7   :  { %7869 = vmatpush.bf16.msk.msra.mxu3 %vm7868_vm3, %v15071_v13  ;;  %vm1949_vm3 = vcmp.eq.s32.totalorder %v9464_v14, %v11114_v49 }
 0x3a8   :  { %vm7880_vm15 = vmpackc.low %vm1951_vm2, %vm1949_vm3  ;;  %vm1931_vm3 = vcmp.eq.s32.totalorder %v9650_v34, %v11114_v49 }
 0x3a9   :  { %7881 = vmatpush.bf16.msk.msrb.mxu0 %vm7880_vm15, %v15071_v13  ;;  %vm7890_vm2 = vmpackc.low %vm1931_vm3, %vm1929_vm14  ;;  %vm1989_vm15 = vcmp.eq.s32.totalorder %v9415_v7, %v11114_v49  ;;  %vm2215_vm14 = vcmp.eq.s32.totalorder %v9464_v14, %v11173_v56  ;;  %vm2217_vm3 = vcmp.eq.s32.totalorder %v9467_v15, %v11173_v56 }
 0x3ab   :  { %7871 = vmatpush.bf16.msk.msra.mxu3 %vm7870_vm8, %v15071_v13  ;;  %vm1945_vm8 = vcmp.eq.s32.totalorder %v9492_v18, %v11114_v49 }
 0x3ac   :  { %vm7882_vm1 = vmpackc.low %vm1947_vm7, %vm1945_vm8  ;;  %vm1991_vm8 = vcmp.eq.s32.totalorder %v9418_v8, %v11114_v49  ;;  %vm2223_vm7 = vcmp.eq.s32.totalorder %v9409_v5, %v11173_v56 }
 0x3ad   :  { %7883 = vmatpush.bf16.msk.msrb.mxu0 %vm7882_vm1, %v15071_v13  ;;  %vm2225_vm1 = vcmp.eq.s32.totalorder %v9412_v6, %v11173_v56 }
 0x3af   :  { %7873 = vmatpush.bf16.msk.msra.mxu3 %vm7872_vm6, %v15071_v13  ;;  %vm1941_vm6 = vcmp.eq.s32.totalorder %v9536_v22, %v11114_v49 }
 0x3b0   :  { %vm7884_vm13 = vmpackc.low %vm1943_vm10, %vm1941_vm6 }
 0x3b1   :  { %7885 = vmatpush.bf16.msk.msrb.mxu0 %vm7884_vm13, %v15071_v13  ;;  %vm7917_vm6 = vmpackc.low %vm2225_vm1, %vm2223_vm7  ;;  %vm15135_vm13 = vcmask 1043456  }
 0x3b2   :  { %vm7892_vm10 = vmpackc.low %vm1991_vm8, %vm1989_vm15  ;;  %vm1981_vm15 = vcmp.eq.s32.totalorder %v9470_v16, %v11114_v49  ;;  %vm1983_vm8 = vcmp.eq.s32.totalorder %v9473_v17, %v11114_v49 }
 0x3b3   :  { %7875 = vmatpush.bf16.msk.msra.mxu3 %vm7874_vm4, %v15071_v13  ;;  %vm1937_vm4 = vcmp.eq.s32.totalorder %v9574_v26, %v11114_v49  ;;  %vm7921_vm7 = vmpackc.low %vm2217_vm3, %vm2215_vm14  ;;  %vm1975_vm14 = vcmp.eq.s32.totalorder %v9550_v25, %v11114_v49 }
 0x3b4   :  { %vm7886_vm11 = vmpackc.low %vm1939_vm12, %vm1937_vm4  ;;  %vm1985_vm4 = vcmp.eq.s32.totalorder %v9427_v11, %v11114_v49  ;;  %vm1987_vm12 = vcmp.eq.s32.totalorder %v9430_v12, %v11114_v49 }
 0x3b5   :  { %7887 = vmatpush.bf16.msk.msrb.mxu0 %vm7886_vm11, %v15071_v13  ;;  %vm2219_vm11 = vcmp.eq.s32.totalorder %v9421_v9, %v11173_v56  ;;  %vm7896_vm1 = vmpackc.low %vm1983_vm8, %vm1981_vm15  ;;  %vm2203_vm15 = vcmp.eq.s32.totalorder %v9574_v26, %v11173_v56  ;;  %vm2205_vm8 = vcmp.eq.s32.totalorder %v9577_v27, %v11173_v56 }
 0x3b6   :  { %2109 = vmatmul.bf16.vlgmr.msra.gmra.mxu3 %v9735_v44  ;;  %vm7919_vm9 = vmpackc.low %vm2221_vm0, %vm2219_vm11  ;;  %vm2207_vm0 = vcmp.eq.s32.totalorder %v9536_v22, %v11173_v56 }
 0x3b9   :  { %7889 = vmatpush.bf16.msk.msrb.mxu0 %vm7888_vm5, %v15071_v13  ;;  %vm7894_vm5 = vmpackc.low %vm1987_vm12, %vm1985_vm4  ;;  %vm1979_vm4 = vcmp.eq.s32.totalorder %v9512_v21, %v11114_v49 }
 0x3bd   :  { %7891 = vmatpush.bf16.msk.msrb.mxu0 %vm7890_vm2, %v15071_v13  ;;  %vm15136_vm2 = vcmask 64512  }
 0x3c0   :  { %2122 = vmatmul.bf16.vlgmr.msrb.gmra.mxu0 %v9728_v43 }
 0x3c1   :  { %7918 = vmatpush.bf16.msk.msra.mxu0 %vm7917_vm6, %v15071_v13  ;;  %vm2211_vm6 = vcmp.eq.s32.totalorder %v9492_v18, %v11173_v56 }
 0x3c5   :  { %7920 = vmatpush.bf16.msk.msra.mxu0 %vm7919_vm9, %v15071_v13  ;;  %vm2209_vm9 = vcmp.eq.s32.totalorder %v9539_v23, %v11173_v56 }
 0x3c6   :  { %vm7925_vm3 = vmpackc.low %vm2209_vm9, %vm2207_vm0 }
 0x3c9   :  { %7922 = vmatpush.bf16.msk.msra.mxu0 %vm7921_vm7, %v15071_v13  ;;  %vm1969_vm7 = vcmp.eq.s32.totalorder %v9585_v28, %v11114_v49 }
 0x3f9   :  { %v1648_v52 = vpop.f32.mrf.mxu3 }
 0x3fa   :  { %v11127_v45 = vadd.f32 %v1648_v52, %v10928_v63 }
 0x401   :  { %v11158_v63 = vpop.f32.mrf.mxu3 }
 0x40f   :  { %v11164_v50 = vpop.f32.mrf.mxu2 }
 0x413   :  { %v1901_v46 = vpop.f32.mrf.mxu0 }
 0x414   :  { %v11161_v53 = vadd.f32 %v1901_v46, %v10992_v55 }
 0x417   :  { %v2099_v40 = vpop.f32.mrf.mxu2 }
 0x419   :  { %v1869_v38 = vpop.f32.mrf.mxu3 }
 0x41a   :  { %v1870_v37 = vadd.f32 %v1869_v38, %v1856_v60  ;;  %v11311_v38 = vperm.slane %v11170_v59, 1 }
 0x41c   :  { %v1877_v55 = vpack.c.bf16 %v1870_v37, %v1870_v37  ;;  %v11317_v37 = vpop.f32.mrf.mxu0 }
 0x41d   :  { %15139 = vst [vmem:[#allocation11_spill] sm:$0xff] %v11317_v37 }
 0x41e   :  { %v1890_v39 = vsel %vm15135_vm13, %v1877_v55, 0  ;;  %vm1977_vm13 = vcmp.eq.s32.totalorder %v9509_v20, %v11114_v49 }
 0x41f   :  { %1913 = vmatpush.bf16.msra.mxu1 %v1890_v39  ;;  %vm7898_vm11 = vmpackc.low %vm1979_vm4, %vm1977_vm13  ;;  %vm2199_vm13 = vcmp.eq.s32.totalorder %v9612_v30, %v11173_v56  ;;  %vm2201_vm4 = vcmp.eq.s32.totalorder %v9615_v31, %v11173_v56 }
 0x420   :  { %vm7929_vm0 = vmpackc.low %vm2201_vm4, %vm2199_vm13  ;;  %vm2251_vm13 = vcmp.eq.s32.totalorder %v9427_v11, %v11173_v56  ;;  %vm2253_vm4 = vcmp.eq.s32.totalorder %v9430_v12, %v11173_v56 }
 0x421   :  { %v1871_v60 = vpop.f32.mrf.mxu3 }
 0x422   :  { %7842 = vmatmul.msk.bf16.vlgmr.msra.gmra.mxu1 %vm15136_vm2, %v11067_v47  ;;  %v11366_v60 = vld [vmem:[%s15062_s0 + $0x12] sm:$0x3] }
 0x423   :  { %7893 = vmatpush.bf16.msk.msrb.mxu1 %vm7892_vm10, %v15071_v13  ;;  %vm2213_vm10 = vcmp.eq.s32.totalorder %v9495_v19, %v11173_v56 }
 0x424   :  { %vm7923_vm12 = vmpackc.low %vm2213_vm10, %vm2211_vm6 }
 0x425   :  { %7924 = vmatpush.bf16.msk.msra.mxu0 %vm7923_vm12, %v15071_v13  ;;  %vm7927_vm6 = vmpackc.low %vm2205_vm8, %vm2203_vm15  ;;  %vm1965_vm12 = vcmp.eq.s32.totalorder %v9623_v32, %v11114_v49  ;;  %vm2255_vm8 = vcmp.eq.s32.totalorder %v9415_v7, %v11173_v56 }
 0x427   :  { %7895 = vmatpush.bf16.msk.msrb.mxu1 %vm7894_vm5, %v15071_v13  ;;  %vm1973_vm5 = vcmp.eq.s32.totalorder %v9547_v24, %v11114_v49 }
 0x428   :  { %vm7900_vm2 = vmpackc.low %vm1975_vm14, %vm1973_vm5  ;;  %vm2195_vm5 = vcmp.eq.s32.totalorder %v9402_v2, %v11173_v56  ;;  %vm2197_vm14 = vcmp.eq.s32.totalorder %v9650_v34, %v11173_v56 }
 0x429   :  { %7926 = vmatpush.bf16.msk.msra.mxu0 %vm7925_vm3, %v15071_v13  ;;  %vm1961_vm3 = vcmp.eq.s32.totalorder %v9658_v35, %v11114_v49  ;;  %vm7931_vm15 = vmpackc.low %vm2197_vm14, %vm2195_vm5  ;;  %vm2243_vm14 = vcmp.eq.s32.totalorder %v9509_v20, %v11173_v56 }
 0x42b   :  { %7897 = vmatpush.bf16.msk.msrb.mxu1 %vm7896_vm1, %v15071_v13  ;;  %vm1971_vm1 = vcmp.eq.s32.totalorder %v9588_v29, %v11114_v49 }
 0x42c   :  { %vm7902_vm10 = vmpackc.low %vm1971_vm1, %vm1969_vm7  ;;  %vm2257_vm7 = vcmp.eq.s32.totalorder %v9418_v8, %v11173_v56 }
 0x42d   :  { %7928 = vmatpush.bf16.msk.msra.mxu0 %vm7927_vm6, %v15071_v13  ;;  %vm7933_vm6 = vmpackc.low %vm2257_vm7, %vm2255_vm8  ;;  %vm2241_vm8 = vcmp.eq.s32.totalorder %v9550_v25, %v11173_v56 }
 0x42f   :  { %7899 = vmatpush.bf16.msk.msrb.mxu1 %vm7898_vm11, %v15071_v13  ;;  %vm1967_vm11 = vcmp.eq.s32.totalorder %v9626_v33, %v11114_v49 }
 0x430   :  { %vm7904_vm9 = vmpackc.low %vm1967_vm11, %vm1965_vm12  ;;  %vm15138_vm11 = vcmask 64512  }
 0x431   :  { %7930 = vmatpush.bf16.msk.msra.mxu0 %vm7929_vm0, %v15071_v13  ;;  %vm7935_vm12 = vmpackc.low %vm2253_vm4, %vm2251_vm13  ;;  %vm2247_vm0 = vcmp.eq.s32.totalorder %v9470_v16, %v11173_v56  ;;  %vm2231_vm13 = vcmp.eq.s32.totalorder %v9623_v32, %v11173_v56  ;;  %vm2233_vm4 = vcmp.eq.s32.totalorder %v9626_v33, %v11173_v56 }
 0x433   :  { %7901 = vmatpush.bf16.msk.msrb.mxu1 %vm7900_vm2, %v15071_v13  ;;  %vm1963_vm2 = vcmp.eq.s32.totalorder %v9661_v36, %v11114_v49  ;;  %v11266_v49 = vld [vmem:[%s15064_s2 + $0x38] sm:$0xff] }
 0x434   :  { %vm7906_vm1 = vmpackc.low %vm1963_vm2, %vm1961_vm3  ;;  %vm2245_vm3 = vcmp.eq.s32.totalorder %v9512_v21, %v11173_v56 }
 0x435   :  { %7932 = vmatpush.bf16.msk.msra.mxu0 %vm7931_vm15, %v15071_v13  ;;  %vm7939_vm2 = vmpackc.low %vm2245_vm3, %vm2243_vm14  ;;  %vm2239_vm15 = vcmp.eq.s32.totalorder %v9547_v24, %v11173_v56  ;;  %vm2226_vm14 = vcmp.eq.s32.totalorder %v9412_v6, %v11311_v38 }
 0x436   :  { %vm7941_vm7 = vmpackc.low %vm2241_vm8, %vm2239_vm15  ;;  %vm2222_vm15 = vcmp.eq.s32.totalorder %v9424_v10, %v11311_v38 }
 0x437   :  { %7903 = vmatpush.bf16.msk.msrb.mxu1 %vm7902_vm10, %v15071_v13  ;;  %vm15137_vm10 = vcmask 1043456  }
 0x438   :  { %2363 = vmatmul.bf16.vlgmr.msra.gmra.mxu0 %v9728_v43 }
 0x439   :  { %v2110_v47 = vpop.f32.mrf.mxu3 }
 0x43a   :  { %v2111_v48 = vadd.f32 %v2110_v47, %v11164_v50 }
 0x43b   :  { %7905 = vmatpush.bf16.msk.msrb.mxu1 %vm7904_vm9, %v15071_v13  ;;  %vm2249_vm9 = vcmp.eq.s32.totalorder %v9473_v17, %v11173_v56 }
 0x43c   :  { %v2143_v52 = vpack.c.bf16 %v2111_v48, %v2111_v48  ;;  %vm7937_vm5 = vmpackc.low %vm2249_vm9, %vm2247_vm0  ;;  %vm2229_vm0 = vcmp.eq.s32.totalorder %v9661_v36, %v11173_v56  ;;  %v11369_v48 = vperm.slane %v11366_v60, 0 }
 0x43e   :  { %v2154_v46 = vsel %vm15137_vm10, %v2143_v52, 0 }
 0x43f   :  { %7907 = vmatpush.bf16.msk.msrb.mxu1 %vm7906_vm1, %v15071_v13  ;;  %2166 = vmatpush.bf16.msrb.mxu2 %v2154_v46  ;;  %vm2235_vm1 = vcmp.eq.s32.totalorder %v9585_v28, %v11173_v56 }
 0x441   :  { %v2112_v50 = vpop.f32.mrf.mxu3 }
 0x442   :  { %2135 = vmatmul.bf16.vlgmr.msrb.gmra.mxu1 %v9735_v44  ;;  %7914 = vmatmul.msk.bf16.vlgmr.msrb.gmra.mxu2 %vm15138_vm11, %v11266_v49  ;;  %vm2227_vm11 = vcmp.eq.s32.totalorder %v9658_v35, %v11173_v56 }
 0x443   :  { %7934 = vmatpush.bf16.msk.msra.mxu1 %vm7933_vm6, %v15071_v13  ;;  %vm2237_vm6 = vcmp.eq.s32.totalorder %v9588_v29, %v11173_v56  ;;  %vm7947_vm9 = vmpackc.low %vm2229_vm0, %vm2227_vm11  ;;  %v2123_v56 = vpop.f32.mrf.mxu0  ;;  %vm2210_vm11 = vcmp.eq.s32.totalorder %v9539_v23, %v11311_v38 }
 0x444   :  { %vm7943_vm10 = vmpackc.low %vm2237_vm6, %vm2235_vm1  ;;  %vm2218_vm1 = vcmp.eq.s32.totalorder %v9467_v15, %v11311_v38 }
 0x447   :  { %7936 = vmatpush.bf16.msk.msra.mxu1 %vm7935_vm12, %v15071_v13  ;;  %vm7945_vm12 = vmpackc.low %vm2233_vm4, %vm2231_vm13  ;;  %vm2214_vm13 = vcmp.eq.s32.totalorder %v9495_v19, %v11311_v38 }
 0x44b   :  { %7938 = vmatpush.bf16.msk.msra.mxu1 %vm7937_vm5, %v15071_v13  ;;  %vm2224_vm5 = vcmp.eq.s32.totalorder %v9409_v5, %v11311_v38  ;;  %v2125_v55 = vpop.f32.mrf.mxu0 }
 0x44c   :  { %vm7949_vm3 = vmpackc.low %vm2226_vm14, %vm2224_vm5  ;;  %vm2206_vm5 = vcmp.eq.s32.totalorder %v9577_v27, %v11311_v38 }
 0x44d   :  { %7950 = vmatpush.bf16.msk.msra.mxu2 %vm7949_vm3, %v15071_v13  ;;  %vm2200_vm3 = vcmp.eq.s32.totalorder %v9612_v30, %v11311_v38 }
 0x44f   :  { %7940 = vmatpush.bf16.msk.msra.mxu1 %vm7939_vm2, %v15071_v13  ;;  %vm2220_vm2 = vcmp.eq.s32.totalorder %v9421_v9, %v11311_v38 }
 0x450   :  { %vm7951_vm8 = vmpackc.low %vm2222_vm15, %vm2220_vm2  ;;  %vm2202_vm2 = vcmp.eq.s32.totalorder %v9615_v31, %v11311_v38 }
 0x451   :  { %7952 = vmatpush.bf16.msk.msra.mxu2 %vm7951_vm8, %v15071_v13  ;;  %vm7961_vm15 = vmpackc.low %vm2202_vm2, %vm2200_vm3  ;;  %vm2196_vm8 = vcmp.eq.s32.totalorder %v9402_v2, %v11311_v38  ;;  %vm2488_vm3 = vcmp.eq.s32.totalorder %v9424_v10, %v11369_v48 }
 0x453   :  { %7942 = vmatpush.bf16.msk.msra.mxu1 %vm7941_vm7, %v15071_v13  ;;  %vm2216_vm7 = vcmp.eq.s32.totalorder %v9464_v14, %v11311_v38 }
 0x454   :  { %vm7953_vm6 = vmpackc.low %vm2218_vm1, %vm2216_vm7  ;;  %vm2198_vm7 = vcmp.eq.s32.totalorder %v9650_v34, %v11311_v38 }
 0x455   :  { %7954 = vmatpush.bf16.msk.msra.mxu2 %vm7953_vm6, %v15071_v13  ;;  %vm7963_vm1 = vmpackc.low %vm2198_vm7, %vm2196_vm8  ;;  %vm2256_vm6 = vcmp.eq.s32.totalorder %v9415_v7, %v11311_v38  ;;  %vm2482_vm8 = vcmp.eq.s32.totalorder %v9464_v14, %v11369_v48  ;;  %vm2484_vm7 = vcmp.eq.s32.totalorder %v9467_v15, %v11369_v48 }
 0x457   :  { %7944 = vmatpush.bf16.msk.msra.mxu1 %vm7943_vm10, %v15071_v13  ;;  %vm2212_vm10 = vcmp.eq.s32.totalorder %v9492_v18, %v11311_v38 }
 0x458   :  { %vm7955_vm4 = vmpackc.low %vm2214_vm13, %vm2212_vm10  ;;  %vm2258_vm10 = vcmp.eq.s32.totalorder %v9418_v8, %v11311_v38  ;;  %vm2490_vm13 = vcmp.eq.s32.totalorder %v9409_v5, %v11369_v48 }
 0x459   :  { %7956 = vmatpush.bf16.msk.msra.mxu2 %vm7955_vm4, %v15071_v13  ;;  %vm2492_vm4 = vcmp.eq.s32.totalorder %v9412_v6, %v11369_v48 }
 0x45b   :  { %7946 = vmatpush.bf16.msk.msra.mxu1 %vm7945_vm12, %v15071_v13  ;;  %vm2208_vm12 = vcmp.eq.s32.totalorder %v9536_v22, %v11311_v38 }
 0x45c   :  { %vm7957_vm0 = vmpackc.low %vm2210_vm11, %vm2208_vm12 }
 0x45d   :  { %7958 = vmatpush.bf16.msk.msra.mxu2 %vm7957_vm0, %v15071_v13  ;;  %vm7990_vm12 = vmpackc.low %vm2492_vm4, %vm2490_vm13  ;;  %vm15140_vm0 = vcmask 1043456  }
 0x45e   :  { %vm7965_vm11 = vmpackc.low %vm2258_vm10, %vm2256_vm6  ;;  %vm2248_vm6 = vcmp.eq.s32.totalorder %v9470_v16, %v11311_v38  ;;  %vm2250_vm10 = vcmp.eq.s32.totalorder %v9473_v17, %v11311_v38 }
 0x45f   :  { %7948 = vmatpush.bf16.msk.msra.mxu1 %vm7947_vm9, %v15071_v13  ;;  %vm2204_vm9 = vcmp.eq.s32.totalorder %v9574_v26, %v11311_v38  ;;  %vm7994_vm13 = vmpackc.low %vm2484_vm7, %vm2482_vm8  ;;  %vm2242_vm8 = vcmp.eq.s32.totalorder %v9550_v25, %v11311_v38 }
 0x460   :  { %vm7959_vm14 = vmpackc.low %vm2206_vm5, %vm2204_vm9  ;;  %vm2252_vm9 = vcmp.eq.s32.totalorder %v9427_v11, %v11311_v38  ;;  %vm2254_vm5 = vcmp.eq.s32.totalorder %v9430_v12, %v11311_v38 }
 0x461   :  { %7960 = vmatpush.bf16.msk.msra.mxu2 %vm7959_vm14, %v15071_v13  ;;  %vm2486_vm14 = vcmp.eq.s32.totalorder %v9421_v9, %v11369_v48  ;;  %vm7969_vm4 = vmpackc.low %vm2250_vm10, %vm2248_vm6  ;;  %vm2470_vm6 = vcmp.eq.s32.totalorder %v9574_v26, %v11369_v48  ;;  %vm2472_vm10 = vcmp.eq.s32.totalorder %v9577_v27, %v11369_v48 }
 0x462   :  { %2376 = vmatmul.bf16.vlgmr.msra.gmra.mxu1 %v9735_v44  ;;  %vm7992_vm2 = vmpackc.low %vm2488_vm3, %vm2486_vm14  ;;  %vm2474_vm3 = vcmp.eq.s32.totalorder %v9536_v22, %v11369_v48 }
 0x465   :  { %7962 = vmatpush.bf16.msk.msra.mxu2 %vm7961_vm15, %v15071_v13  ;;  %vm7967_vm15 = vmpackc.low %vm2254_vm5, %vm2252_vm9  ;;  %vm2246_vm9 = vcmp.eq.s32.totalorder %v9512_v21, %v11311_v38 }
 0x469   :  { %7964 = vmatpush.bf16.msk.msra.mxu2 %vm7963_vm1, %v15071_v13  ;;  %vm15141_vm1 = vcmask 64512  }
 0x46c   :  { %2389 = vmatmul.bf16.vlgmr.msra.gmra.mxu2 %v9728_v43 }
 0x46d   :  { %7991 = vmatpush.bf16.msk.msrb.mxu2 %vm7990_vm12, %v15071_v13  ;;  %vm2478_vm12 = vcmp.eq.s32.totalorder %v9492_v18, %v11369_v48 }
 0x471   :  { %7993 = vmatpush.bf16.msk.msrb.mxu2 %vm7992_vm2, %v15071_v13  ;;  %vm2476_vm2 = vcmp.eq.s32.totalorder %v9539_v23, %v11369_v48 }
 0x472   :  { %vm7998_vm7 = vmpackc.low %vm2476_vm2, %vm2474_vm3 }
 0x475   :  { %7995 = vmatpush.bf16.msk.msrb.mxu2 %vm7994_vm13, %v15071_v13  ;;  %vm2236_vm13 = vcmp.eq.s32.totalorder %v9585_v28, %v11311_v38 }
 0x49f   :  { %v1915_v59 = vpop.f32.mrf.mxu1 }
 0x4a0   :  { %v11326_v39 = vadd.f32 %v1915_v59, %v11127_v45 }
 0x4a7   :  { %v11357_v45 = vpop.f32.mrf.mxu1 }
 0x4b5   :  { %v11360_v40 = vpop.f32.mrf.mxu0 }
 0x4bd   :  { %v2366_v55 = vpop.f32.mrf.mxu0 }
 0x4be   :  { %v11512_v55 = vperm.slane %v11366_v60, 1 }
 0x4bf   :  { %v2136_v47 = vpop.f32.mrf.mxu1 }
 0x4c0   :  { %v2137_v52 = vadd.f32 %v2136_v47, %v2123_v56 }
 0x4c2   :  { %v2144_v46 = vpack.c.bf16 %v2137_v52, %v2137_v52 }
 0x4c4   :  { %v2157_v50 = vsel %vm15140_vm0, %v2144_v46, 0  ;;  %vm2244_vm0 = vcmp.eq.s32.totalorder %v9509_v20, %v11311_v38 }
 0x4c5   :  { %v2168_v56 = vpop.f32.mrf.mxu2  ;;  %2180 = vmatpush.bf16.msrb.mxu3 %v2157_v50  ;;  %vm7971_vm14 = vmpackc.low %vm2246_vm9, %vm2244_vm0  ;;  %vm2466_vm0 = vcmp.eq.s32.totalorder %v9612_v30, %v11369_v48  ;;  %vm2468_vm9 = vcmp.eq.s32.totalorder %v9615_v31, %v11369_v48 }
 0x4c6   :  { %v11390_v59 = vadd.f32 %v2168_v56, %v11161_v53  ;;  %vm8002_vm3 = vmpackc.low %vm2468_vm9, %vm2466_vm0  ;;  %vm2518_vm0 = vcmp.eq.s32.totalorder %v9427_v11, %v11369_v48  ;;  %vm2520_vm9 = vcmp.eq.s32.totalorder %v9430_v12, %v11369_v48 }
 0x4c7   :  { %v2138_v47 = vpop.f32.mrf.mxu1 }
 0x4c8   :  { %7915 = vmatmul.msk.bf16.vlgmr.msrb.gmra.mxu3 %vm15141_vm1, %v11266_v49 }
 0x4c9   :  { %7966 = vmatpush.bf16.msk.msra.mxu3 %vm7965_vm11, %v15071_v13  ;;  %vm2480_vm11 = vcmp.eq.s32.totalorder %v9495_v19, %v11369_v48 }
 0x4ca   :  { %vm7996_vm5 = vmpackc.low %vm2480_vm11, %vm2478_vm12 }
 0x4cb   :  { %7997 = vmatpush.bf16.msk.msrb.mxu2 %vm7996_vm5, %v15071_v13  ;;  %vm8000_vm12 = vmpackc.low %vm2472_vm10, %vm2470_vm6  ;;  %vm2232_vm5 = vcmp.eq.s32.totalorder %v9623_v32, %v11311_v38  ;;  %vm2522_vm10 = vcmp.eq.s32.totalorder %v9415_v7, %v11369_v48 }
 0x4cd   :  { %7968 = vmatpush.bf16.msk.msra.mxu3 %vm7967_vm15, %v15071_v13  ;;  %vm2240_vm15 = vcmp.eq.s32.totalorder %v9547_v24, %v11311_v38  ;;  %v11509_v50 = vpop.f32.mrf.mxu2 }
 0x4ce   :  { %vm7973_vm1 = vmpackc.low %vm2242_vm8, %vm2240_vm15  ;;  %vm2462_vm15 = vcmp.eq.s32.totalorder %v9402_v2, %v11369_v48  ;;  %vm2464_vm8 = vcmp.eq.s32.totalorder %v9650_v34, %v11369_v48  ;;  %15144 = vst [vmem:[#allocation12_spill] sm:$0xff] %v11509_v50 }
 0x4cf   :  { %7999 = vmatpush.bf16.msk.msrb.mxu2 %vm7998_vm7, %v15071_v13  ;;  %vm2228_vm7 = vcmp.eq.s32.totalorder %v9658_v35, %v11311_v38  ;;  %vm8004_vm6 = vmpackc.low %vm2464_vm8, %vm2462_vm15  ;;  %vm2510_vm8 = vcmp.eq.s32.totalorder %v9509_v20, %v11369_v48 }
 0x4d1   :  { %7970 = vmatpush.bf16.msk.msra.mxu3 %vm7969_vm4, %v15071_v13  ;;  %vm2238_vm4 = vcmp.eq.s32.totalorder %v9588_v29, %v11311_v38 }
 0x4d2   :  { %vm7975_vm11 = vmpackc.low %vm2238_vm4, %vm2236_vm13  ;;  %vm2524_vm13 = vcmp.eq.s32.totalorder %v9418_v8, %v11369_v48 }
 0x4d3   :  { %8001 = vmatpush.bf16.msk.msrb.mxu2 %vm8000_vm12, %v15071_v13  ;;  %vm8006_vm12 = vmpackc.low %vm2524_vm13, %vm2522_vm10  ;;  %vm2508_vm10 = vcmp.eq.s32.totalorder %v9550_v25, %v11369_v48 }
 0x4d5   :  { %7972 = vmatpush.bf16.msk.msra.mxu3 %vm7971_vm14, %v15071_v13  ;;  %vm2234_vm14 = vcmp.eq.s32.totalorder %v9626_v33, %v11311_v38 }
 0x4d6   :  { %vm7977_vm2 = vmpackc.low %vm2234_vm14, %vm2232_vm5  ;;  %vm15143_vm14 = vcmask 64512  }
 0x4d7   :  { %8003 = vmatpush.bf16.msk.msrb.mxu2 %vm8002_vm3, %v15071_v13  ;;  %vm8008_vm5 = vmpackc.low %vm2520_vm9, %vm2518_vm0  ;;  %vm2514_vm3 = vcmp.eq.s32.totalorder %v9470_v16, %v11369_v48  ;;  %vm2498_vm0 = vcmp.eq.s32.totalorder %v9623_v32, %v11369_v48  ;;  %vm2500_vm9 = vcmp.eq.s32.totalorder %v9626_v33, %v11369_v48 }
 0x4d9   :  { %7974 = vmatpush.bf16.msk.msra.mxu3 %vm7973_vm1, %v15071_v13  ;;  %vm2230_vm1 = vcmp.eq.s32.totalorder %v9661_v36, %v11311_v38  ;;  %v11465_v38 = vld [vmem:[%s15064_s2 + $0x40] sm:$0xff] }
 0x4da   :  { %vm7979_vm4 = vmpackc.low %vm2230_vm1, %vm2228_vm7  ;;  %vm2512_vm7 = vcmp.eq.s32.totalorder %v9512_v21, %v11369_v48 }
 0x4db   :  { %8005 = vmatpush.bf16.msk.msrb.mxu2 %vm8004_vm6, %v15071_v13  ;;  %vm8012_vm1 = vmpackc.low %vm2512_vm7, %vm2510_vm8  ;;  %vm2506_vm6 = vcmp.eq.s32.totalorder %v9547_v24, %v11369_v48  ;;  %vm2493_vm8 = vcmp.eq.s32.totalorder %v9412_v6, %v11512_v55 }
 0x4dc   :  { %vm8014_vm13 = vmpackc.low %vm2508_vm10, %vm2506_vm6  ;;  %vm2489_vm6 = vcmp.eq.s32.totalorder %v9424_v10, %v11512_v55 }
 0x4dd   :  { %7976 = vmatpush.bf16.msk.msra.mxu3 %vm7975_vm11, %v15071_v13  ;;  %vm15142_vm11 = vcmask 1043456  }
 0x4de   :  { %2630 = vmatmul.bf16.vlgmr.msrb.gmra.mxu2 %v9728_v43 }
 0x4df   :  { %v2377_v53 = vpop.f32.mrf.mxu1 }
 0x4e0   :  { %v2378_v49 = vadd.f32 %v2377_v53, %v11360_v40 }
 0x4e1   :  { %7978 = vmatpush.bf16.msk.msra.mxu3 %vm7977_vm2, %v15071_v13  ;;  %vm2516_vm2 = vcmp.eq.s32.totalorder %v9473_v17, %v11369_v48 }
 0x4e2   :  { %v2410_v52 = vpack.c.bf16 %v2378_v49, %v2378_v49  ;;  %vm8010_vm15 = vmpackc.low %vm2516_vm2, %vm2514_vm3  ;;  %vm2496_vm3 = vcmp.eq.s32.totalorder %v9661_v36, %v11369_v48 }
 0x4e4   :  { %v2421_v46 = vsel %vm15142_vm11, %v2410_v52, 0 }
 0x4e5   :  { %7980 = vmatpush.bf16.msk.msra.mxu3 %vm7979_vm4, %v15071_v13  ;;  %2433 = vmatpush.bf16.msrb.mxu0 %v2421_v46  ;;  %vm2502_vm4 = vcmp.eq.s32.totalorder %v9585_v28, %v11369_v48  ;;  %v11568_v46 = vld [vmem:[%s15062_s0 + $0x14] sm:$0x3] }
 0x4e7   :  { %v2379_v40 = vpop.f32.mrf.mxu1 }
 0x4e8   :  { %2402 = vmatmul.bf16.vlgmr.msra.gmra.mxu3 %v9735_v44  ;;  %7987 = vmatmul.msk.bf16.vlgmr.msrb.gmra.mxu0 %vm15143_vm14, %v11465_v38  ;;  %vm2494_vm14 = vcmp.eq.s32.totalorder %v9658_v35, %v11369_v48 }
 0x4e9   :  { %8007 = vmatpush.bf16.msk.msrb.mxu3 %vm8006_vm12, %v15071_v13  ;;  %vm2504_vm12 = vcmp.eq.s32.totalorder %v9588_v29, %v11369_v48  ;;  %vm8020_vm2 = vmpackc.low %vm2496_vm3, %vm2494_vm14  ;;  %vm2477_vm14 = vcmp.eq.s32.totalorder %v9539_v23, %v11512_v55 }
 0x4ea   :  { %vm8016_vm11 = vmpackc.low %vm2504_vm12, %vm2502_vm4  ;;  %vm2485_vm4 = vcmp.eq.s32.totalorder %v9467_v15, %v11512_v55 }
 0x4ed   :  { %8009 = vmatpush.bf16.msk.msrb.mxu3 %vm8008_vm5, %v15071_v13  ;;  %vm8018_vm5 = vmpackc.low %vm2500_vm9, %vm2498_vm0  ;;  %vm2481_vm0 = vcmp.eq.s32.totalorder %v9495_v19, %v11512_v55 }
 0x4ef   :  { %v2390_v56 = vpop.f32.mrf.mxu2 }
 0x4f1   :  { %8011 = vmatpush.bf16.msk.msrb.mxu3 %vm8010_vm15, %v15071_v13  ;;  %vm2491_vm15 = vcmp.eq.s32.totalorder %v9409_v5, %v11512_v55 }
 0x4f2   :  { %vm8022_vm7 = vmpackc.low %vm2493_vm8, %vm2491_vm15  ;;  %vm2473_vm15 = vcmp.eq.s32.totalorder %v9577_v27, %v11512_v55 }
 0x4f3   :  { %8023 = vmatpush.bf16.msk.msra.mxu0 %vm8022_vm7, %v15071_v13  ;;  %vm2467_vm7 = vcmp.eq.s32.totalorder %v9612_v30, %v11512_v55 }
 0x4f5   :  { %8013 = vmatpush.bf16.msk.msrb.mxu3 %vm8012_vm1, %v15071_v13  ;;  %vm2487_vm1 = vcmp.eq.s32.totalorder %v9421_v9, %v11512_v55 }
 0x4f6   :  { %vm8024_vm10 = vmpackc.low %vm2489_vm6, %vm2487_vm1  ;;  %vm2469_vm1 = vcmp.eq.s32.totalorder %v9615_v31, %v11512_v55 }
 0x4f7   :  { %v2392_v48 = vpop.f32.mrf.mxu2  ;;  %8025 = vmatpush.bf16.msk.msra.mxu0 %vm8024_vm10, %v15071_v13  ;;  %vm8034_vm6 = vmpackc.low %vm2469_vm1, %vm2467_vm7  ;;  %vm2463_vm10 = vcmp.eq.s32.totalorder %v9402_v2, %v11512_v55 }
 0x4f8   :  { %v11571_v48 = vperm.slane %v11568_v46, 0 }
 0x4f9   :  { %8015 = vmatpush.bf16.msk.msrb.mxu3 %vm8014_vm13, %v15071_v13  ;;  %vm2483_vm13 = vcmp.eq.s32.totalorder %v9464_v14, %v11512_v55 }
 0x4fa   :  { %vm8026_vm12 = vmpackc.low %vm2485_vm4, %vm2483_vm13  ;;  %vm2465_vm13 = vcmp.eq.s32.totalorder %v9650_v34, %v11512_v55  ;;  %vm2755_vm7 = vcmp.eq.s32.totalorder %v9424_v10, %v11571_v48 }
 0x4fb   :  { %8027 = vmatpush.bf16.msk.msra.mxu0 %vm8026_vm12, %v15071_v13  ;;  %vm8036_vm4 = vmpackc.low %vm2465_vm13, %vm2463_vm10  ;;  %vm2523_vm12 = vcmp.eq.s32.totalorder %v9415_v7, %v11512_v55  ;;  %vm2749_vm10 = vcmp.eq.s32.totalorder %v9464_v14, %v11571_v48  ;;  %vm2751_vm13 = vcmp.eq.s32.totalorder %v9467_v15, %v11571_v48 }
 0x4fd   :  { %8017 = vmatpush.bf16.msk.msrb.mxu3 %vm8016_vm11, %v15071_v13  ;;  %vm2479_vm11 = vcmp.eq.s32.totalorder %v9492_v18, %v11512_v55 }
 0x4fe   :  { %vm8028_vm9 = vmpackc.low %vm2481_vm0, %vm2479_vm11  ;;  %vm2525_vm11 = vcmp.eq.s32.totalorder %v9418_v8, %v11512_v55  ;;  %vm2757_vm0 = vcmp.eq.s32.totalorder %v9409_v5, %v11571_v48 }
 0x4ff   :  { %8029 = vmatpush.bf16.msk.msra.mxu0 %vm8028_vm9, %v15071_v13  ;;  %vm2759_vm9 = vcmp.eq.s32.totalorder %v9412_v6, %v11571_v48 }
 0x501   :  { %8019 = vmatpush.bf16.msk.msrb.mxu3 %vm8018_vm5, %v15071_v13  ;;  %vm2475_vm5 = vcmp.eq.s32.totalorder %v9536_v22, %v11512_v55 }
 0x502   :  { %vm8030_vm3 = vmpackc.low %vm2477_vm14, %vm2475_vm5 }
 0x503   :  { %8031 = vmatpush.bf16.msk.msra.mxu0 %vm8030_vm3, %v15071_v13  ;;  %vm8063_vm5 = vmpackc.low %vm2759_vm9, %vm2757_vm0  ;;  %vm15145_vm3 = vcmask 1043456  }
 0x504   :  { %vm8038_vm14 = vmpackc.low %vm2525_vm11, %vm2523_vm12  ;;  %vm2515_vm12 = vcmp.eq.s32.totalorder %v9470_v16, %v11512_v55  ;;  %vm2517_vm11 = vcmp.eq.s32.totalorder %v9473_v17, %v11512_v55 }
 0x505   :  { %8021 = vmatpush.bf16.msk.msrb.mxu3 %vm8020_vm2, %v15071_v13  ;;  %vm2471_vm2 = vcmp.eq.s32.totalorder %v9574_v26, %v11512_v55  ;;  %vm8067_vm0 = vmpackc.low %vm2751_vm13, %vm2749_vm10  ;;  %vm2509_vm10 = vcmp.eq.s32.totalorder %v9550_v25, %v11512_v55 }
 0x506   :  { %vm8032_vm8 = vmpackc.low %vm2473_vm15, %vm2471_vm2  ;;  %vm2519_vm2 = vcmp.eq.s32.totalorder %v9427_v11, %v11512_v55  ;;  %vm2521_vm15 = vcmp.eq.s32.totalorder %v9430_v12, %v11512_v55 }
 0x507   :  { %8033 = vmatpush.bf16.msk.msra.mxu0 %vm8032_vm8, %v15071_v13  ;;  %vm2753_vm8 = vcmp.eq.s32.totalorder %v9421_v9, %v11571_v48  ;;  %vm8042_vm9 = vmpackc.low %vm2517_vm11, %vm2515_vm12  ;;  %vm2737_vm12 = vcmp.eq.s32.totalorder %v9574_v26, %v11571_v48  ;;  %vm2739_vm11 = vcmp.eq.s32.totalorder %v9577_v27, %v11571_v48 }
 0x508   :  { %2643 = vmatmul.bf16.vlgmr.msrb.gmra.mxu3 %v9735_v44  ;;  %vm8065_vm1 = vmpackc.low %vm2755_vm7, %vm2753_vm8  ;;  %vm2741_vm7 = vcmp.eq.s32.totalorder %v9536_v22, %v11571_v48 }
 0x50b   :  { %8035 = vmatpush.bf16.msk.msra.mxu0 %vm8034_vm6, %v15071_v13  ;;  %vm8040_vm6 = vmpackc.low %vm2521_vm15, %vm2519_vm2  ;;  %vm2513_vm2 = vcmp.eq.s32.totalorder %v9512_v21, %v11512_v55 }
 0x50f   :  { %8037 = vmatpush.bf16.msk.msra.mxu0 %vm8036_vm4, %v15071_v13  ;;  %vm15146_vm4 = vcmask 64512  }
 0x512   :  { %2656 = vmatmul.bf16.vlgmr.msra.gmra.mxu0 %v9728_v43 }
 0x513   :  { %8064 = vmatpush.bf16.msk.msrb.mxu0 %vm8063_vm5, %v15071_v13  ;;  %vm2745_vm5 = vcmp.eq.s32.totalorder %v9492_v18, %v11571_v48 }
 0x517   :  { %8066 = vmatpush.bf16.msk.msrb.mxu0 %vm8065_vm1, %v15071_v13  ;;  %vm2743_vm1 = vcmp.eq.s32.totalorder %v9539_v23, %v11571_v48 }
 0x518   :  { %vm8071_vm13 = vmpackc.low %vm2743_vm1, %vm2741_vm7 }
 0x51b   :  { %8068 = vmatpush.bf16.msk.msrb.mxu0 %vm8067_vm0, %v15071_v13  ;;  %vm2503_vm0 = vcmp.eq.s32.totalorder %v9585_v28, %v11512_v55 }
 0x54b   :  { %v2182_v47 = vpop.f32.mrf.mxu3 }
 0x54c   :  { %v11525_v60 = vadd.f32 %v2182_v47, %v11326_v39 }
 0x553   :  { %v11556_v39 = vpop.f32.mrf.mxu3 }
 0x561   :  { %v11562_v52 = vpop.f32.mrf.mxu2 }
 0x565   :  { %v2435_v53 = vpop.f32.mrf.mxu0 }
 0x566   :  { %v11559_v49 = vadd.f32 %v2435_v53, %v11390_v59 }
 0x56b   :  { %v2403_v40 = vpop.f32.mrf.mxu3 }
 0x56c   :  { %v2404_v47 = vadd.f32 %v2403_v40, %v2390_v56  ;;  %v2633_v56 = vpop.f32.mrf.mxu2 }
 0x56d   :  { %v11709_v56 = vperm.slane %v11568_v46, 1 }
 0x56e   :  { %v2411_v59 = vpack.c.bf16 %v2404_v47, %v2404_v47 }
 0x570   :  { %v2424_v53 = vsel %vm15145_vm3, %v2411_v59, 0  ;;  %vm2511_vm3 = vcmp.eq.s32.totalorder %v9509_v20, %v11512_v55 }
 0x571   :  { %2447 = vmatpush.bf16.msrb.mxu1 %v2424_v53  ;;  %vm8044_vm8 = vmpackc.low %vm2513_vm2, %vm2511_vm3  ;;  %vm2733_vm3 = vcmp.eq.s32.totalorder %v9612_v30, %v11571_v48  ;;  %vm2735_vm2 = vcmp.eq.s32.totalorder %v9615_v31, %v11571_v48 }
 0x572   :  { %vm8075_vm7 = vmpackc.low %vm2735_vm2, %vm2733_vm3  ;;  %vm2785_vm3 = vcmp.eq.s32.totalorder %v9427_v11, %v11571_v48  ;;  %vm2787_vm2 = vcmp.eq.s32.totalorder %v9430_v12, %v11571_v48 }
 0x573   :  { %v2405_v40 = vpop.f32.mrf.mxu3 }
 0x574   :  { %7988 = vmatmul.msk.bf16.vlgmr.msrb.gmra.mxu1 %vm15146_vm4, %v11465_v38  ;;  %v11715_v40 = vpop.f32.mrf.mxu0 }
 0x575   :  { %8039 = vmatpush.bf16.msk.msra.mxu1 %vm8038_vm14, %v15071_v13  ;;  %vm2747_vm14 = vcmp.eq.s32.totalorder %v9495_v19, %v11571_v48  ;;  %15149 = vst [vmem:[#allocation13_spill] sm:$0xff] %v11715_v40 }
 0x576   :  { %vm8069_vm15 = vmpackc.low %vm2747_vm14, %vm2745_vm5 }
 0x577   :  { %8070 = vmatpush.bf16.msk.msrb.mxu0 %vm8069_vm15, %v15071_v13  ;;  %vm8073_vm5 = vmpackc.low %vm2739_vm11, %vm2737_vm12  ;;  %vm2499_vm15 = vcmp.eq.s32.totalorder %v9623_v32, %v11512_v55  ;;  %vm2789_vm11 = vcmp.eq.s32.totalorder %v9415_v7, %v11571_v48 }
 0x579   :  { %8041 = vmatpush.bf16.msk.msra.mxu1 %vm8040_vm6, %v15071_v13  ;;  %vm2507_vm6 = vcmp.eq.s32.totalorder %v9547_v24, %v11512_v55 }
 0x57a   :  { %vm8046_vm4 = vmpackc.low %vm2509_vm10, %vm2507_vm6  ;;  %vm2729_vm6 = vcmp.eq.s32.totalorder %v9402_v2, %v11571_v48  ;;  %vm2731_vm10 = vcmp.eq.s32.totalorder %v9650_v34, %v11571_v48 }
 0x57b   :  { %8072 = vmatpush.bf16.msk.msrb.mxu0 %vm8071_vm13, %v15071_v13  ;;  %vm2495_vm13 = vcmp.eq.s32.totalorder %v9658_v35, %v11512_v55  ;;  %vm8077_vm12 = vmpackc.low %vm2731_vm10, %vm2729_vm6  ;;  %vm2777_vm10 = vcmp.eq.s32.totalorder %v9509_v20, %v11571_v48 }
 0x57d   :  { %8043 = vmatpush.bf16.msk.msra.mxu1 %vm8042_vm9, %v15071_v13  ;;  %vm2505_vm9 = vcmp.eq.s32.totalorder %v9588_v29, %v11512_v55 }
 0x57e   :  { %vm8048_vm14 = vmpackc.low %vm2505_vm9, %vm2503_vm0  ;;  %vm2791_vm0 = vcmp.eq.s32.totalorder %v9418_v8, %v11571_v48 }
 0x57f   :  { %8074 = vmatpush.bf16.msk.msrb.mxu0 %vm8073_vm5, %v15071_v13  ;;  %vm8079_vm5 = vmpackc.low %vm2791_vm0, %vm2789_vm11  ;;  %vm2775_vm11 = vcmp.eq.s32.totalorder %v9550_v25, %v11571_v48 }
 0x581   :  { %8045 = vmatpush.bf16.msk.msra.mxu1 %vm8044_vm8, %v15071_v13  ;;  %vm2501_vm8 = vcmp.eq.s32.totalorder %v9626_v33, %v11512_v55 }
 0x582   :  { %vm8050_vm1 = vmpackc.low %vm2501_vm8, %vm2499_vm15  ;;  %vm15148_vm8 = vcmask 64512  }
 0x583   :  { %8076 = vmatpush.bf16.msk.msrb.mxu0 %vm8075_vm7, %v15071_v13  ;;  %vm8081_vm15 = vmpackc.low %vm2787_vm2, %vm2785_vm3  ;;  %vm2781_vm7 = vcmp.eq.s32.totalorder %v9470_v16, %v11571_v48  ;;  %vm2765_vm3 = vcmp.eq.s32.totalorder %v9623_v32, %v11571_v48  ;;  %vm2767_vm2 = vcmp.eq.s32.totalorder %v9626_v33, %v11571_v48 }
 0x585   :  { %8047 = vmatpush.bf16.msk.msra.mxu1 %vm8046_vm4, %v15071_v13  ;;  %vm2497_vm4 = vcmp.eq.s32.totalorder %v9661_v36, %v11512_v55  ;;  %v11664_v55 = vld [vmem:[%s15064_s2 + $0x48] sm:$0xff] }
 0x586   :  { %vm8052_vm9 = vmpackc.low %vm2497_vm4, %vm2495_vm13  ;;  %vm2779_vm13 = vcmp.eq.s32.totalorder %v9512_v21, %v11571_v48 }
 0x587   :  { %8078 = vmatpush.bf16.msk.msrb.mxu0 %vm8077_vm12, %v15071_v13  ;;  %vm8085_vm4 = vmpackc.low %vm2779_vm13, %vm2777_vm10  ;;  %vm2773_vm12 = vcmp.eq.s32.totalorder %v9547_v24, %v11571_v48  ;;  %vm2760_vm10 = vcmp.eq.s32.totalorder %v9412_v6, %v11709_v56 }
 0x588   :  { %vm8087_vm0 = vmpackc.low %vm2775_vm11, %vm2773_vm12  ;;  %vm2756_vm12 = vcmp.eq.s32.totalorder %v9424_v10, %v11709_v56 }
 0x589   :  { %8049 = vmatpush.bf16.msk.msra.mxu1 %vm8048_vm14, %v15071_v13  ;;  %vm15147_vm14 = vcmask 1043456  }
 0x58a   :  { %2897 = vmatmul.bf16.vlgmr.msrb.gmra.mxu0 %v9728_v43 }
 0x58b   :  { %v2644_v38 = vpop.f32.mrf.mxu3 }
 0x58c   :  { %v2645_v47 = vadd.f32 %v2644_v38, %v11562_v52 }
 0x58d   :  { %8051 = vmatpush.bf16.msk.msra.mxu1 %vm8050_vm1, %v15071_v13  ;;  %vm2783_vm1 = vcmp.eq.s32.totalorder %v9473_v17, %v11571_v48 }
 0x58e   :  { %v2677_v59 = vpack.c.bf16 %v2645_v47, %v2645_v47  ;;  %vm8083_vm6 = vmpackc.low %vm2783_vm1, %vm2781_vm7  ;;  %vm2763_vm7 = vcmp.eq.s32.totalorder %v9661_v36, %v11571_v48 }
 0x590   :  { %v2688_v53 = vsel %vm15147_vm14, %v2677_v59, 0 }
 0x591   :  { %8053 = vmatpush.bf16.msk.msra.mxu1 %vm8052_vm9, %v15071_v13  ;;  %2700 = vmatpush.bf16.msra.mxu2 %v2688_v53  ;;  %vm2769_vm9 = vcmp.eq.s32.totalorder %v9585_v28, %v11571_v48  ;;  %v11764_v53 = vld [vmem:[%s15062_s0 + $0x16] sm:$0x3] }
 0x593   :  { %v2646_v52 = vpop.f32.mrf.mxu3 }
 0x594   :  { %2669 = vmatmul.bf16.vlgmr.msra.gmra.mxu1 %v9735_v44  ;;  %8060 = vmatmul.msk.bf16.vlgmr.msra.gmra.mxu2 %vm15148_vm8, %v11664_v55  ;;  %vm2761_vm8 = vcmp.eq.s32.totalorder %v9658_v35, %v11571_v48 }
 0x595   :  { %8080 = vmatpush.bf16.msk.msrb.mxu1 %vm8079_vm5, %v15071_v13  ;;  %vm2771_vm5 = vcmp.eq.s32.totalorder %v9588_v29, %v11571_v48  ;;  %vm8093_vm1 = vmpackc.low %vm2763_vm7, %vm2761_vm8  ;;  %v2657_v48 = vpop.f32.mrf.mxu0  ;;  %vm2744_vm8 = vcmp.eq.s32.totalorder %v9539_v23, %v11709_v56 }
 0x596   :  { %vm8089_vm14 = vmpackc.low %vm2771_vm5, %vm2769_vm9  ;;  %vm2752_vm9 = vcmp.eq.s32.totalorder %v9467_v15, %v11709_v56 }
 0x599   :  { %8082 = vmatpush.bf16.msk.msrb.mxu1 %vm8081_vm15, %v15071_v13  ;;  %vm8091_vm15 = vmpackc.low %vm2767_vm2, %vm2765_vm3  ;;  %vm2748_vm3 = vcmp.eq.s32.totalorder %v9495_v19, %v11709_v56 }
 0x59d   :  { %8084 = vmatpush.bf16.msk.msrb.mxu1 %vm8083_vm6, %v15071_v13  ;;  %vm2758_vm6 = vcmp.eq.s32.totalorder %v9409_v5, %v11709_v56  ;;  %v2659_v38 = vpop.f32.mrf.mxu0 }
 0x59e   :  { %vm8095_vm13 = vmpackc.low %vm2760_vm10, %vm2758_vm6  ;;  %vm2740_vm6 = vcmp.eq.s32.totalorder %v9577_v27, %v11709_v56  ;;  %v11767_v38 = vperm.slane %v11764_v53, 0 }
 0x59f   :  { %8096 = vmatpush.bf16.msk.msrb.mxu2 %vm8095_vm13, %v15071_v13  ;;  %vm2734_vm13 = vcmp.eq.s32.totalorder %v9612_v30, %v11709_v56 }
 0x5a1   :  { %8086 = vmatpush.bf16.msk.msrb.mxu1 %vm8085_vm4, %v15071_v13  ;;  %vm2754_vm4 = vcmp.eq.s32.totalorder %v9421_v9, %v11709_v56 }
 0x5a2   :  { %vm8097_vm11 = vmpackc.low %vm2756_vm12, %vm2754_vm4  ;;  %vm2736_vm4 = vcmp.eq.s32.totalorder %v9615_v31, %v11709_v56 }
 0x5a3   :  { %8098 = vmatpush.bf16.msk.msrb.mxu2 %vm8097_vm11, %v15071_v13  ;;  %vm8107_vm12 = vmpackc.low %vm2736_vm4, %vm2734_vm13  ;;  %vm2730_vm11 = vcmp.eq.s32.totalorder %v9402_v2, %v11709_v56  ;;  %vm3022_vm13 = vcmp.eq.s32.totalorder %v9424_v10, %v11767_v38 }
 0x5a5   :  { %8088 = vmatpush.bf16.msk.msrb.mxu1 %vm8087_vm0, %v15071_v13  ;;  %vm2750_vm0 = vcmp.eq.s32.totalorder %v9464_v14, %v11709_v56 }
 0x5a6   :  { %vm8099_vm5 = vmpackc.low %vm2752_vm9, %vm2750_vm0  ;;  %vm2732_vm0 = vcmp.eq.s32.totalorder %v9650_v34, %v11709_v56 }
 0x5a7   :  { %8100 = vmatpush.bf16.msk.msrb.mxu2 %vm8099_vm5, %v15071_v13  ;;  %vm8109_vm9 = vmpackc.low %vm2732_vm0, %vm2730_vm11  ;;  %vm2790_vm5 = vcmp.eq.s32.totalorder %v9415_v7, %v11709_v56  ;;  %vm3016_vm11 = vcmp.eq.s32.totalorder %v9464_v14, %v11767_v38  ;;  %vm3018_vm0 = vcmp.eq.s32.totalorder %v9467_v15, %v11767_v38 }
 0x5a9   :  { %8090 = vmatpush.bf16.msk.msrb.mxu1 %vm8089_vm14, %v15071_v13  ;;  %vm2746_vm14 = vcmp.eq.s32.totalorder %v9492_v18, %v11709_v56 }
 0x5aa   :  { %vm8101_vm2 = vmpackc.low %vm2748_vm3, %vm2746_vm14  ;;  %vm2792_vm14 = vcmp.eq.s32.totalorder %v9418_v8, %v11709_v56  ;;  %vm3024_vm3 = vcmp.eq.s32.totalorder %v9409_v5, %v11767_v38 }
 0x5ab   :  { %8102 = vmatpush.bf16.msk.msrb.mxu2 %vm8101_vm2, %v15071_v13  ;;  %vm3026_vm2 = vcmp.eq.s32.totalorder %v9412_v6, %v11767_v38 }
 0x5ad   :  { %8092 = vmatpush.bf16.msk.msrb.mxu1 %vm8091_vm15, %v15071_v13  ;;  %vm2742_vm15 = vcmp.eq.s32.totalorder %v9536_v22, %v11709_v56 }
 0x5ae   :  { %vm8103_vm7 = vmpackc.low %vm2744_vm8, %vm2742_vm15 }
 0x5af   :  { %8104 = vmatpush.bf16.msk.msrb.mxu2 %vm8103_vm7, %v15071_v13  ;;  %vm8136_vm15 = vmpackc.low %vm3026_vm2, %vm3024_vm3  ;;  %vm15150_vm7 = vcmask 1043456  }
 0x5b0   :  { %vm8111_vm8 = vmpackc.low %vm2792_vm14, %vm2790_vm5  ;;  %vm2782_vm5 = vcmp.eq.s32.totalorder %v9470_v16, %v11709_v56  ;;  %vm2784_vm14 = vcmp.eq.s32.totalorder %v9473_v17, %v11709_v56 }
 0x5b1   :  { %8094 = vmatpush.bf16.msk.msrb.mxu1 %vm8093_vm1, %v15071_v13  ;;  %vm2738_vm1 = vcmp.eq.s32.totalorder %v9574_v26, %v11709_v56  ;;  %vm8140_vm3 = vmpackc.low %vm3018_vm0, %vm3016_vm11  ;;  %vm2776_vm11 = vcmp.eq.s32.totalorder %v9550_v25, %v11709_v56 }
 0x5b2   :  { %vm8105_vm10 = vmpackc.low %vm2740_vm6, %vm2738_vm1  ;;  %vm2786_vm1 = vcmp.eq.s32.totalorder %v9427_v11, %v11709_v56  ;;  %vm2788_vm6 = vcmp.eq.s32.totalorder %v9430_v12, %v11709_v56 }
 0x5b3   :  { %8106 = vmatpush.bf16.msk.msrb.mxu2 %vm8105_vm10, %v15071_v13  ;;  %vm3020_vm10 = vcmp.eq.s32.totalorder %v9421_v9, %v11767_v38  ;;  %vm8115_vm2 = vmpackc.low %vm2784_vm14, %vm2782_vm5  ;;  %vm3004_vm5 = vcmp.eq.s32.totalorder %v9574_v26, %v11767_v38  ;;  %vm3006_vm14 = vcmp.eq.s32.totalorder %v9577_v27, %v11767_v38 }
 0x5b4   :  { %2910 = vmatmul.bf16.vlgmr.msrb.gmra.mxu1 %v9735_v44  ;;  %vm8138_vm4 = vmpackc.low %vm3022_vm13, %vm3020_vm10  ;;  %vm3008_vm13 = vcmp.eq.s32.totalorder %v9536_v22, %v11767_v38 }
 0x5b7   :  { %8108 = vmatpush.bf16.msk.msrb.mxu2 %vm8107_vm12, %v15071_v13  ;;  %vm8113_vm12 = vmpackc.low %vm2788_vm6, %vm2786_vm1  ;;  %vm2780_vm1 = vcmp.eq.s32.totalorder %v9512_v21, %v11709_v56 }
 0x5bb   :  { %8110 = vmatpush.bf16.msk.msrb.mxu2 %vm8109_vm9, %v15071_v13  ;;  %vm15151_vm9 = vcmask 64512  }
 0x5be   :  { %2923 = vmatmul.bf16.vlgmr.msrb.gmra.mxu2 %v9728_v43 }
 0x5bf   :  { %8137 = vmatpush.bf16.msk.msra.mxu2 %vm8136_vm15, %v15071_v13  ;;  %vm3012_vm15 = vcmp.eq.s32.totalorder %v9492_v18, %v11767_v38 }
 0x5c3   :  { %8139 = vmatpush.bf16.msk.msra.mxu2 %vm8138_vm4, %v15071_v13  ;;  %vm3010_vm4 = vcmp.eq.s32.totalorder %v9539_v23, %v11767_v38 }
 0x5c4   :  { %vm8144_vm0 = vmpackc.low %vm3010_vm4, %vm3008_vm13 }
 0x5c7   :  { %8141 = vmatpush.bf16.msk.msra.mxu2 %vm8140_vm3, %v15071_v13  ;;  %vm2770_vm3 = vcmp.eq.s32.totalorder %v9585_v28, %v11709_v56 }
 0x5f1   :  { %v2449_v46 = vpop.f32.mrf.mxu1 }
 0x5f2   :  { %v11724_v47 = vadd.f32 %v2449_v46, %v11525_v60 }
 0x5f9   :  { %v11755_v60 = vpop.f32.mrf.mxu1 }
 0x607   :  { %v11758_v59 = vpop.f32.mrf.mxu0 }
 0x611   :  { %v2670_v52 = vpop.f32.mrf.mxu1 }
 0x612   :  { %v2671_v46 = vadd.f32 %v2670_v52, %v2657_v48  ;;  %v2900_v52 = vpop.f32.mrf.mxu0 }
 0x614   :  { %v2678_v0 = vpack.c.bf16 %v2671_v46, %v2671_v46 }
 0x616   :  { %v2691_v40 = vsel %vm15150_vm7, %v2678_v0, 0  ;;  %vm2778_vm7 = vcmp.eq.s32.totalorder %v9509_v20, %v11709_v56 }
 0x617   :  { %v2702_v48 = vpop.f32.mrf.mxu2  ;;  %2714 = vmatpush.bf16.msra.mxu3 %v2691_v40  ;;  %vm8117_vm10 = vmpackc.low %vm2780_vm1, %vm2778_vm7  ;;  %vm3000_vm7 = vcmp.eq.s32.totalorder %v9612_v30, %v11767_v38  ;;  %vm3002_vm1 = vcmp.eq.s32.totalorder %v9615_v31, %v11767_v38 }
 0x618   :  { %v11788_v46 = vadd.f32 %v2702_v48, %v11559_v49  ;;  %vm8148_vm13 = vmpackc.low %vm3002_vm1, %vm3000_vm7  ;;  %vm3052_vm7 = vcmp.eq.s32.totalorder %v9427_v11, %v11767_v38  ;;  %vm3054_vm1 = vcmp.eq.s32.totalorder %v9430_v12, %v11767_v38 }
 0x619   :  { %v2672_v0 = vpop.f32.mrf.mxu1 }
 0x61a   :  { %8061 = vmatmul.msk.bf16.vlgmr.msra.gmra.mxu3 %vm15151_vm9, %v11664_v55 }
 0x61b   :  { %8112 = vmatpush.bf16.msk.msrb.mxu3 %vm8111_vm8, %v15071_v13  ;;  %vm3014_vm8 = vcmp.eq.s32.totalorder %v9495_v19, %v11767_v38 }
 0x61c   :  { %vm8142_vm6 = vmpackc.low %vm3014_vm8, %vm3012_vm15 }
 0x61d   :  { %8143 = vmatpush.bf16.msk.msra.mxu2 %vm8142_vm6, %v15071_v13  ;;  %vm8146_vm15 = vmpackc.low %vm3006_vm14, %vm3004_vm5  ;;  %vm2766_vm6 = vcmp.eq.s32.totalorder %v9623_v32, %v11709_v56  ;;  %vm3056_vm14 = vcmp.eq.s32.totalorder %v9415_v7, %v11767_v38 }
 0x61f   :  { %8114 = vmatpush.bf16.msk.msrb.mxu3 %vm8113_vm12, %v15071_v13  ;;  %vm2774_vm12 = vcmp.eq.s32.totalorder %v9547_v24, %v11709_v56  ;;  %v11907_v52 = vpop.f32.mrf.mxu2 }
 0x620   :  { %vm8119_vm9 = vmpackc.low %vm2776_vm11, %vm2774_vm12  ;;  %vm2996_vm12 = vcmp.eq.s32.totalorder %v9402_v2, %v11767_v38  ;;  %vm2998_vm11 = vcmp.eq.s32.totalorder %v9650_v34, %v11767_v38  ;;  %15154 = vst [vmem:[#allocation14_spill] sm:$0xff] %v11907_v52 }
 0x621   :  { %8145 = vmatpush.bf16.msk.msra.mxu2 %vm8144_vm0, %v15071_v13  ;;  %vm2762_vm0 = vcmp.eq.s32.totalorder %v9658_v35, %v11709_v56  ;;  %vm8150_vm5 = vmpackc.low %vm2998_vm11, %vm2996_vm12  ;;  %vm3044_vm11 = vcmp.eq.s32.totalorder %v9509_v20, %v11767_v38 }
 0x623   :  { %8116 = vmatpush.bf16.msk.msrb.mxu3 %vm8115_vm2, %v15071_v13  ;;  %vm2772_vm2 = vcmp.eq.s32.totalorder %v9588_v29, %v11709_v56 }
 0x624   :  { %vm8121_vm8 = vmpackc.low %vm2772_vm2, %vm2770_vm3  ;;  %vm3058_vm3 = vcmp.eq.s32.totalorder %v9418_v8, %v11767_v38 }
 0x625   :  { %8147 = vmatpush.bf16.msk.msra.mxu2 %vm8146_vm15, %v15071_v13  ;;  %vm8152_vm15 = vmpackc.low %vm3058_vm3, %vm3056_vm14  ;;  %vm3042_vm14 = vcmp.eq.s32.totalorder %v9550_v25, %v11767_v38 }
 0x627   :  { %8118 = vmatpush.bf16.msk.msrb.mxu3 %vm8117_vm10, %v15071_v13  ;;  %vm2768_vm10 = vcmp.eq.s32.totalorder %v9626_v33, %v11709_v56 }
 0x628   :  { %vm8123_vm4 = vmpackc.low %vm2768_vm10, %vm2766_vm6  ;;  %vm15153_vm10 = vcmask 64512  }
 0x629   :  { %8149 = vmatpush.bf16.msk.msra.mxu2 %vm8148_vm13, %v15071_v13  ;;  %vm8154_vm6 = vmpackc.low %vm3054_vm1, %vm3052_vm7  ;;  %vm3048_vm13 = vcmp.eq.s32.totalorder %v9470_v16, %v11767_v38  ;;  %vm3032_vm7 = vcmp.eq.s32.totalorder %v9623_v32, %v11767_v38  ;;  %vm3034_vm1 = vcmp.eq.s32.totalorder %v9626_v33, %v11767_v38 }
 0x62b   :  { %8120 = vmatpush.bf16.msk.msrb.mxu3 %vm8119_vm9, %v15071_v13  ;;  %vm2764_vm9 = vcmp.eq.s32.totalorder %v9661_v36, %v11709_v56  ;;  %v11863_v56 = vld [vmem:[%s15064_s2 + $0x50] sm:$0xff] }
 0x62c   :  { %vm8125_vm2 = vmpackc.low %vm2764_vm9, %vm2762_vm0  ;;  %vm3046_vm0 = vcmp.eq.s32.totalorder %v9512_v21, %v11767_v38 }
 0x62d   :  { %8151 = vmatpush.bf16.msk.msra.mxu2 %vm8150_vm5, %v15071_v13  ;;  %vm8158_vm9 = vmpackc.low %vm3046_vm0, %vm3044_vm11  ;;  %vm3040_vm5 = vcmp.eq.s32.totalorder %v9547_v24, %v11767_v38 }
 0x62e   :  { %vm8160_vm3 = vmpackc.low %vm3042_vm14, %vm3040_vm5 }
 0x62f   :  { %8122 = vmatpush.bf16.msk.msrb.mxu3 %vm8121_vm8, %v15071_v13  ;;  %vm15152_vm8 = vcmask 1043456  }
 0x630   :  { %3164 = vmatmul.bf16.vlgmr.msra.gmra.mxu2 %v9728_v43 }
 0x631   :  { %v2911_v49 = vpop.f32.mrf.mxu1 }
 0x632   :  { %v2912_v55 = vadd.f32 %v2911_v49, %v11758_v59  ;;  %v11910_v49 = vperm.slane %v11764_v53, 1 }
 0x633   :  { %8124 = vmatpush.bf16.msk.msrb.mxu3 %vm8123_vm4, %v15071_v13  ;;  %vm3050_vm4 = vcmp.eq.s32.totalorder %v9473_v17, %v11767_v38 }
 0x634   :  { %v2944_v40 = vpack.c.bf16 %v2912_v55, %v2912_v55  ;;  %vm8156_vm12 = vmpackc.low %vm3050_vm4, %vm3048_vm13  ;;  %vm3030_vm13 = vcmp.eq.s32.totalorder %v9661_v36, %v11767_v38  ;;  %vm3027_vm11 = vcmp.eq.s32.totalorder %v9412_v6, %v11910_v49  ;;  %vm3023_vm5 = vcmp.eq.s32.totalorder %v9424_v10, %v11910_v49 }
 0x636   :  { %v2955_v48 = vsel %vm15152_vm8, %v2944_v40, 0 }
 0x637   :  { %8126 = vmatpush.bf16.msk.msrb.mxu3 %vm8125_vm2, %v15071_v13  ;;  %2967 = vmatpush.bf16.msra.mxu0 %v2955_v48  ;;  %vm3036_vm2 = vcmp.eq.s32.totalorder %v9585_v28, %v11767_v38 }
 0x639   :  { %v2913_v59 = vpop.f32.mrf.mxu1 }
 0x63a   :  { %2936 = vmatmul.bf16.vlgmr.msrb.gmra.mxu3 %v9735_v44  ;;  %8133 = vmatmul.msk.bf16.vlgmr.msra.gmra.mxu0 %vm15153_vm10, %v11863_v56  ;;  %vm3028_vm10 = vcmp.eq.s32.totalorder %v9658_v35, %v11767_v38 }
 0x63b   :  { %8153 = vmatpush.bf16.msk.msra.mxu3 %vm8152_vm15, %v15071_v13  ;;  %vm3038_vm15 = vcmp.eq.s32.totalorder %v9588_v29, %v11767_v38  ;;  %vm8166_vm4 = vmpackc.low %vm3030_vm13, %vm3028_vm10  ;;  %vm3011_vm10 = vcmp.eq.s32.totalorder %v9539_v23, %v11910_v49 }
 0x63c   :  { %vm8162_vm8 = vmpackc.low %vm3038_vm15, %vm3036_vm2  ;;  %vm3019_vm2 = vcmp.eq.s32.totalorder %v9467_v15, %v11910_v49 }
 0x63f   :  { %8155 = vmatpush.bf16.msk.msra.mxu3 %vm8154_vm6, %v15071_v13  ;;  %vm8164_vm6 = vmpackc.low %vm3034_vm1, %vm3032_vm7  ;;  %vm3015_vm7 = vcmp.eq.s32.totalorder %v9495_v19, %v11910_v49 }
 0x641   :  { %v2924_v0 = vpop.f32.mrf.mxu2 }
 0x643   :  { %8157 = vmatpush.bf16.msk.msra.mxu3 %vm8156_vm12, %v15071_v13  ;;  %vm3025_vm12 = vcmp.eq.s32.totalorder %v9409_v5, %v11910_v49 }
 0x644   :  { %vm8168_vm0 = vmpackc.low %vm3027_vm11, %vm3025_vm12  ;;  %vm3007_vm12 = vcmp.eq.s32.totalorder %v9577_v27, %v11910_v49 }
 0x645   :  { %8169 = vmatpush.bf16.msk.msrb.mxu0 %vm8168_vm0, %v15071_v13  ;;  %vm3001_vm0 = vcmp.eq.s32.totalorder %v9612_v30, %v11910_v49 }
 0x647   :  { %8159 = vmatpush.bf16.msk.msra.mxu3 %vm8158_vm9, %v15071_v13  ;;  %vm3021_vm9 = vcmp.eq.s32.totalorder %v9421_v9, %v11910_v49 }
 0x648   :  { %vm8170_vm14 = vmpackc.low %vm3023_vm5, %vm3021_vm9  ;;  %vm3003_vm9 = vcmp.eq.s32.totalorder %v9615_v31, %v11910_v49 }
 0x649   :  { %v2926_v38 = vpop.f32.mrf.mxu2  ;;  %8171 = vmatpush.bf16.msk.msrb.mxu0 %vm8170_vm14, %v15071_v13  ;;  %vm8180_vm5 = vmpackc.low %vm3003_vm9, %vm3001_vm0  ;;  %vm2997_vm14 = vcmp.eq.s32.totalorder %v9402_v2, %v11910_v49 }
 0x64a   :  { %v11966_v38 = vld [vmem:[%s15062_s0 + $0x18] sm:$0x3] }
 0x64b   :  { %8161 = vmatpush.bf16.msk.msra.mxu3 %vm8160_vm3, %v15071_v13  ;;  %vm3017_vm3 = vcmp.eq.s32.totalorder %v9464_v14, %v11910_v49  ;;  %v11969_v52 = vperm.slane %v11966_v38, 0 }
 0x64c   :  { %vm8172_vm15 = vmpackc.low %vm3019_vm2, %vm3017_vm3  ;;  %vm2999_vm3 = vcmp.eq.s32.totalorder %v9650_v34, %v11910_v49 }
 0x64d   :  { %8173 = vmatpush.bf16.msk.msrb.mxu0 %vm8172_vm15, %v15071_v13  ;;  %vm8182_vm2 = vmpackc.low %vm2999_vm3, %vm2997_vm14  ;;  %vm3057_vm15 = vcmp.eq.s32.totalorder %v9415_v7, %v11910_v49  ;;  %vm3289_vm0 = vcmp.eq.s32.totalorder %v9424_v10, %v11969_v52  ;;  %vm3283_vm14 = vcmp.eq.s32.totalorder %v9464_v14, %v11969_v52  ;;  %vm3285_vm3 = vcmp.eq.s32.totalorder %v9467_v15, %v11969_v52 }
 0x64f   :  { %8163 = vmatpush.bf16.msk.msra.mxu3 %vm8162_vm8, %v15071_v13  ;;  %vm3013_vm8 = vcmp.eq.s32.totalorder %v9492_v18, %v11910_v49 }
 0x650   :  { %vm8174_vm1 = vmpackc.low %vm3015_vm7, %vm3013_vm8  ;;  %vm3059_vm8 = vcmp.eq.s32.totalorder %v9418_v8, %v11910_v49  ;;  %vm3291_vm7 = vcmp.eq.s32.totalorder %v9409_v5, %v11969_v52 }
 0x651   :  { %8175 = vmatpush.bf16.msk.msrb.mxu0 %vm8174_vm1, %v15071_v13  ;;  %vm3293_vm1 = vcmp.eq.s32.totalorder %v9412_v6, %v11969_v52 }
 0x653   :  { %8165 = vmatpush.bf16.msk.msra.mxu3 %vm8164_vm6, %v15071_v13  ;;  %vm3009_vm6 = vcmp.eq.s32.totalorder %v9536_v22, %v11910_v49 }
 0x654   :  { %vm8176_vm13 = vmpackc.low %vm3011_vm10, %vm3009_vm6 }
 0x655   :  { %8177 = vmatpush.bf16.msk.msrb.mxu0 %vm8176_vm13, %v15071_v13  ;;  %vm8209_vm6 = vmpackc.low %vm3293_vm1, %vm3291_vm7  ;;  %vm15155_vm13 = vcmask 1043456  }
 0x656   :  { %vm8184_vm10 = vmpackc.low %vm3059_vm8, %vm3057_vm15  ;;  %vm3049_vm15 = vcmp.eq.s32.totalorder %v9470_v16, %v11910_v49  ;;  %vm3051_vm8 = vcmp.eq.s32.totalorder %v9473_v17, %v11910_v49 }
 0x657   :  { %8167 = vmatpush.bf16.msk.msra.mxu3 %vm8166_vm4, %v15071_v13  ;;  %vm3005_vm4 = vcmp.eq.s32.totalorder %v9574_v26, %v11910_v49  ;;  %vm8213_vm7 = vmpackc.low %vm3285_vm3, %vm3283_vm14  ;;  %vm3043_vm14 = vcmp.eq.s32.totalorder %v9550_v25, %v11910_v49 }
 0x658   :  { %vm8178_vm11 = vmpackc.low %vm3007_vm12, %vm3005_vm4  ;;  %vm3053_vm4 = vcmp.eq.s32.totalorder %v9427_v11, %v11910_v49  ;;  %vm3055_vm12 = vcmp.eq.s32.totalorder %v9430_v12, %v11910_v49 }
 0x659   :  { %8179 = vmatpush.bf16.msk.msrb.mxu0 %vm8178_vm11, %v15071_v13  ;;  %vm3287_vm11 = vcmp.eq.s32.totalorder %v9421_v9, %v11969_v52  ;;  %vm8188_vm1 = vmpackc.low %vm3051_vm8, %vm3049_vm15  ;;  %vm3271_vm15 = vcmp.eq.s32.totalorder %v9574_v26, %v11969_v52  ;;  %vm3273_vm8 = vcmp.eq.s32.totalorder %v9577_v27, %v11969_v52 }
 0x65a   :  { %3177 = vmatmul.bf16.vlgmr.msra.gmra.mxu3 %v9735_v44  ;;  %vm8211_vm9 = vmpackc.low %vm3289_vm0, %vm3287_vm11  ;;  %vm3275_vm0 = vcmp.eq.s32.totalorder %v9536_v22, %v11969_v52 }
 0x65d   :  { %8181 = vmatpush.bf16.msk.msrb.mxu0 %vm8180_vm5, %v15071_v13  ;;  %vm8186_vm5 = vmpackc.low %vm3055_vm12, %vm3053_vm4  ;;  %vm3047_vm4 = vcmp.eq.s32.totalorder %v9512_v21, %v11910_v49 }
 0x661   :  { %8183 = vmatpush.bf16.msk.msrb.mxu0 %vm8182_vm2, %v15071_v13  ;;  %vm15156_vm2 = vcmask 64512  }
 0x664   :  { %3190 = vmatmul.bf16.vlgmr.msrb.gmra.mxu0 %v9728_v43 }
 0x665   :  { %8210 = vmatpush.bf16.msk.msra.mxu0 %vm8209_vm6, %v15071_v13  ;;  %vm3279_vm6 = vcmp.eq.s32.totalorder %v9492_v18, %v11969_v52 }
 0x669   :  { %8212 = vmatpush.bf16.msk.msra.mxu0 %vm8211_vm9, %v15071_v13  ;;  %vm3277_vm9 = vcmp.eq.s32.totalorder %v9539_v23, %v11969_v52 }
 0x66a   :  { %vm8217_vm3 = vmpackc.low %vm3277_vm9, %vm3275_vm0 }
 0x66d   :  { %8214 = vmatpush.bf16.msk.msra.mxu0 %vm8213_vm7, %v15071_v13  ;;  %vm3037_vm7 = vcmp.eq.s32.totalorder %v9585_v28, %v11910_v49 }
 0x69d   :  { %v2716_v55 = vpop.f32.mrf.mxu3 }
 0x69e   :  { %v11923_v53 = vadd.f32 %v2716_v55, %v11724_v47 }
 0x6a5   :  { %v11954_v47 = vpop.f32.mrf.mxu3 }
 0x6b3   :  { %v11960_v59 = vpop.f32.mrf.mxu2 }
 0x6b7   :  { %v2969_v40 = vpop.f32.mrf.mxu0 }
 0x6b8   :  { %v11957_v48 = vadd.f32 %v2969_v40, %v11788_v46 }
 0x6bd   :  { %v2937_v55 = vpop.f32.mrf.mxu3 }
 0x6be   :  { %v2938_v50 = vadd.f32 %v2937_v55, %v2924_v0 }
 0x6c0   :  { %v2945_v46 = vpack.c.bf16 %v2938_v50, %v2938_v50  ;;  %v3167_v50 = vpop.f32.mrf.mxu2 }
 0x6c1   :  { %v12107_v50 = vperm.slane %v11966_v38, 1 }
 0x6c2   :  { %v2958_v40 = vsel %vm15155_vm13, %v2945_v46, 0  ;;  %vm3045_vm13 = vcmp.eq.s32.totalorder %v9509_v20, %v11910_v49 }
 0x6c3   :  { %2981 = vmatpush.bf16.msra.mxu1 %v2958_v40  ;;  %vm8190_vm11 = vmpackc.low %vm3047_vm4, %vm3045_vm13  ;;  %vm3267_vm13 = vcmp.eq.s32.totalorder %v9612_v30, %v11969_v52  ;;  %vm3269_vm4 = vcmp.eq.s32.totalorder %v9615_v31, %v11969_v52 }
 0x6c4   :  { %vm8221_vm0 = vmpackc.low %vm3269_vm4, %vm3267_vm13  ;;  %vm3319_vm13 = vcmp.eq.s32.totalorder %v9427_v11, %v11969_v52  ;;  %vm3321_vm4 = vcmp.eq.s32.totalorder %v9430_v12, %v11969_v52 }
 0x6c5   :  { %v2939_v0 = vpop.f32.mrf.mxu3 }
 0x6c6   :  { %8134 = vmatmul.msk.bf16.vlgmr.msra.gmra.mxu1 %vm15156_vm2, %v11863_v56  ;;  %v12113_v0 = vpop.f32.mrf.mxu0 }
 0x6c7   :  { %8185 = vmatpush.bf16.msk.msrb.mxu1 %vm8184_vm10, %v15071_v13  ;;  %vm3281_vm10 = vcmp.eq.s32.totalorder %v9495_v19, %v11969_v52  ;;  %15159 = vst [vmem:[#allocation15_spill] sm:$0xff] %v12113_v0  ;;  %v15160_v0 = vmov 1.0|1.0  }
 0x6c8   :  { %vm8215_vm12 = vmpackc.low %vm3281_vm10, %vm3279_vm6 }
 0x6c9   :  { %8216 = vmatpush.bf16.msk.msra.mxu0 %vm8215_vm12, %v15071_v13  ;;  %vm8219_vm6 = vmpackc.low %vm3273_vm8, %vm3271_vm15  ;;  %vm3033_vm12 = vcmp.eq.s32.totalorder %v9623_v32, %v11910_v49  ;;  %vm3323_vm8 = vcmp.eq.s32.totalorder %v9415_v7, %v11969_v52 }
 0x6cb   :  { %8187 = vmatpush.bf16.msk.msrb.mxu1 %vm8186_vm5, %v15071_v13  ;;  %vm3041_vm5 = vcmp.eq.s32.totalorder %v9547_v24, %v11910_v49 }
 0x6cc   :  { %vm8192_vm2 = vmpackc.low %vm3043_vm14, %vm3041_vm5  ;;  %vm3263_vm5 = vcmp.eq.s32.totalorder %v9402_v2, %v11969_v52  ;;  %vm3265_vm14 = vcmp.eq.s32.totalorder %v9650_v34, %v11969_v52 }
 0x6cd   :  { %8218 = vmatpush.bf16.msk.msra.mxu0 %vm8217_vm3, %v15071_v13  ;;  %vm3029_vm3 = vcmp.eq.s32.totalorder %v9658_v35, %v11910_v49  ;;  %vm8223_vm15 = vmpackc.low %vm3265_vm14, %vm3263_vm5  ;;  %vm3311_vm14 = vcmp.eq.s32.totalorder %v9509_v20, %v11969_v52 }
 0x6cf   :  { %8189 = vmatpush.bf16.msk.msrb.mxu1 %vm8188_vm1, %v15071_v13  ;;  %vm3039_vm1 = vcmp.eq.s32.totalorder %v9588_v29, %v11910_v49 }
 0x6d0   :  { %vm8194_vm10 = vmpackc.low %vm3039_vm1, %vm3037_vm7  ;;  %vm3325_vm7 = vcmp.eq.s32.totalorder %v9418_v8, %v11969_v52 }
 0x6d1   :  { %8220 = vmatpush.bf16.msk.msra.mxu0 %vm8219_vm6, %v15071_v13  ;;  %vm8225_vm6 = vmpackc.low %vm3325_vm7, %vm3323_vm8  ;;  %vm3309_vm8 = vcmp.eq.s32.totalorder %v9550_v25, %v11969_v52 }
 0x6d3   :  { %8191 = vmatpush.bf16.msk.msrb.mxu1 %vm8190_vm11, %v15071_v13  ;;  %vm3035_vm11 = vcmp.eq.s32.totalorder %v9626_v33, %v11910_v49 }
 0x6d4   :  { %vm8196_vm9 = vmpackc.low %vm3035_vm11, %vm3033_vm12  ;;  %vm15158_vm11 = vcmask 64512  }
 0x6d5   :  { %8222 = vmatpush.bf16.msk.msra.mxu0 %vm8221_vm0, %v15071_v13  ;;  %vm8227_vm12 = vmpackc.low %vm3321_vm4, %vm3319_vm13  ;;  %vm3315_vm0 = vcmp.eq.s32.totalorder %v9470_v16, %v11969_v52  ;;  %vm3299_vm13 = vcmp.eq.s32.totalorder %v9623_v32, %v11969_v52  ;;  %vm3301_vm4 = vcmp.eq.s32.totalorder %v9626_v33, %v11969_v52 }
 0x6d7   :  { %8193 = vmatpush.bf16.msk.msrb.mxu1 %vm8192_vm2, %v15071_v13  ;;  %vm3031_vm2 = vcmp.eq.s32.totalorder %v9661_v36, %v11910_v49  ;;  %v12062_v49 = vld [vmem:[%s15064_s2 + $0x58] sm:$0xff] }
 0x6d8   :  { %vm8198_vm1 = vmpackc.low %vm3031_vm2, %vm3029_vm3  ;;  %vm3313_vm3 = vcmp.eq.s32.totalorder %v9512_v21, %v11969_v52 }
 0x6d9   :  { %8224 = vmatpush.bf16.msk.msra.mxu0 %vm8223_vm15, %v15071_v13  ;;  %vm8231_vm2 = vmpackc.low %vm3313_vm3, %vm3311_vm14  ;;  %vm3307_vm15 = vcmp.eq.s32.totalorder %v9547_v24, %v11969_v52  ;;  %vm3294_vm14 = vcmp.eq.s32.totalorder %v9412_v6, %v12107_v50 }
 0x6da   :  { %vm8233_vm7 = vmpackc.low %vm3309_vm8, %vm3307_vm15  ;;  %vm3290_vm15 = vcmp.eq.s32.totalorder %v9424_v10, %v12107_v50 }
 0x6db   :  { %8195 = vmatpush.bf16.msk.msrb.mxu1 %vm8194_vm10, %v15071_v13  ;;  %vm15157_vm10 = vcmask 1043456  }
 0x6dc   :  { %3431 = vmatmul.bf16.vlgmr.msra.gmra.mxu0 %v9728_v43 }
 0x6dd   :  { %v3178_v56 = vpop.f32.mrf.mxu3 }
 0x6de   :  { %v3179_v55 = vadd.f32 %v3178_v56, %v11960_v59 }
 0x6df   :  { %8197 = vmatpush.bf16.msk.msrb.mxu1 %vm8196_vm9, %v15071_v13  ;;  %vm3317_vm9 = vcmp.eq.s32.totalorder %v9473_v17, %v11969_v52 }
 0x6e0   :  { %v3211_v46 = vpack.c.bf16 %v3179_v55, %v3179_v55  ;;  %vm8229_vm5 = vmpackc.low %vm3317_vm9, %vm3315_vm0  ;;  %vm3297_vm0 = vcmp.eq.s32.totalorder %v9661_v36, %v11969_v52 }
 0x6e2   :  { %v3222_v40 = vsel %vm15157_vm10, %v3211_v46, 0 }
 0x6e3   :  { %8199 = vmatpush.bf16.msk.msrb.mxu1 %vm8198_vm1, %v15071_v13  ;;  %3234 = vmatpush.bf16.msrb.mxu2 %v3222_v40  ;;  %vm3303_vm1 = vcmp.eq.s32.totalorder %v9585_v28, %v11969_v52  ;;  %v12162_v40 = vld [vmem:[%s15062_s0 + $0x1a] sm:$0x3] }
 0x6e5   :  { %v3180_v59 = vpop.f32.mrf.mxu3 }
 0x6e6   :  { %3203 = vmatmul.bf16.vlgmr.msrb.gmra.mxu1 %v9735_v44  ;;  %8206 = vmatmul.msk.bf16.vlgmr.msrb.gmra.mxu2 %vm15158_vm11, %v12062_v49  ;;  %vm3295_vm11 = vcmp.eq.s32.totalorder %v9658_v35, %v11969_v52 }
 0x6e7   :  { %8226 = vmatpush.bf16.msk.msra.mxu1 %vm8225_vm6, %v15071_v13  ;;  %vm3305_vm6 = vcmp.eq.s32.totalorder %v9588_v29, %v11969_v52  ;;  %vm8239_vm9 = vmpackc.low %vm3297_vm0, %vm3295_vm11  ;;  %v3191_v52 = vpop.f32.mrf.mxu0  ;;  %vm3278_vm11 = vcmp.eq.s32.totalorder %v9539_v23, %v12107_v50 }
 0x6e8   :  { %vm8235_vm10 = vmpackc.low %vm3305_vm6, %vm3303_vm1  ;;  %vm3286_vm1 = vcmp.eq.s32.totalorder %v9467_v15, %v12107_v50 }
 0x6eb   :  { %8228 = vmatpush.bf16.msk.msra.mxu1 %vm8227_vm12, %v15071_v13  ;;  %vm8237_vm12 = vmpackc.low %vm3301_vm4, %vm3299_vm13  ;;  %vm3282_vm13 = vcmp.eq.s32.totalorder %v9495_v19, %v12107_v50 }
 0x6ef   :  { %8230 = vmatpush.bf16.msk.msra.mxu1 %vm8229_vm5, %v15071_v13  ;;  %vm3292_vm5 = vcmp.eq.s32.totalorder %v9409_v5, %v12107_v50  ;;  %v3193_v56 = vpop.f32.mrf.mxu0 }
 0x6f0   :  { %vm8241_vm3 = vmpackc.low %vm3294_vm14, %vm3292_vm5  ;;  %vm3274_vm5 = vcmp.eq.s32.totalorder %v9577_v27, %v12107_v50  ;;  %v12165_v56 = vperm.slane %v12162_v40, 0 }
 0x6f1   :  { %8242 = vmatpush.bf16.msk.msra.mxu2 %vm8241_vm3, %v15071_v13  ;;  %vm3268_vm3 = vcmp.eq.s32.totalorder %v9612_v30, %v12107_v50 }
 0x6f3   :  { %8232 = vmatpush.bf16.msk.msra.mxu1 %vm8231_vm2, %v15071_v13  ;;  %vm3288_vm2 = vcmp.eq.s32.totalorder %v9421_v9, %v12107_v50 }
 0x6f4   :  { %vm8243_vm8 = vmpackc.low %vm3290_vm15, %vm3288_vm2  ;;  %vm3270_vm2 = vcmp.eq.s32.totalorder %v9615_v31, %v12107_v50 }
 0x6f5   :  { %8244 = vmatpush.bf16.msk.msra.mxu2 %vm8243_vm8, %v15071_v13  ;;  %vm8253_vm15 = vmpackc.low %vm3270_vm2, %vm3268_vm3  ;;  %vm3264_vm8 = vcmp.eq.s32.totalorder %v9402_v2, %v12107_v50  ;;  %vm3556_vm3 = vcmp.eq.s32.totalorder %v9424_v10, %v12165_v56 }
 0x6f7   :  { %8234 = vmatpush.bf16.msk.msra.mxu1 %vm8233_vm7, %v15071_v13  ;;  %vm3284_vm7 = vcmp.eq.s32.totalorder %v9464_v14, %v12107_v50 }
 0x6f8   :  { %vm8245_vm6 = vmpackc.low %vm3286_vm1, %vm3284_vm7  ;;  %vm3266_vm7 = vcmp.eq.s32.totalorder %v9650_v34, %v12107_v50 }
 0x6f9   :  { %8246 = vmatpush.bf16.msk.msra.mxu2 %vm8245_vm6, %v15071_v13  ;;  %vm8255_vm1 = vmpackc.low %vm3266_vm7, %vm3264_vm8  ;;  %vm3324_vm6 = vcmp.eq.s32.totalorder %v9415_v7, %v12107_v50  ;;  %vm3550_vm8 = vcmp.eq.s32.totalorder %v9464_v14, %v12165_v56  ;;  %vm3552_vm7 = vcmp.eq.s32.totalorder %v9467_v15, %v12165_v56 }
 0x6fb   :  { %8236 = vmatpush.bf16.msk.msra.mxu1 %vm8235_vm10, %v15071_v13  ;;  %vm3280_vm10 = vcmp.eq.s32.totalorder %v9492_v18, %v12107_v50 }
 0x6fc   :  { %vm8247_vm4 = vmpackc.low %vm3282_vm13, %vm3280_vm10  ;;  %vm3326_vm10 = vcmp.eq.s32.totalorder %v9418_v8, %v12107_v50  ;;  %vm3558_vm13 = vcmp.eq.s32.totalorder %v9409_v5, %v12165_v56 }
 0x6fd   :  { %8248 = vmatpush.bf16.msk.msra.mxu2 %vm8247_vm4, %v15071_v13  ;;  %vm3560_vm4 = vcmp.eq.s32.totalorder %v9412_v6, %v12165_v56 }
 0x6ff   :  { %8238 = vmatpush.bf16.msk.msra.mxu1 %vm8237_vm12, %v15071_v13  ;;  %vm3276_vm12 = vcmp.eq.s32.totalorder %v9536_v22, %v12107_v50 }
 0x700   :  { %vm8249_vm0 = vmpackc.low %vm3278_vm11, %vm3276_vm12 }
 0x701   :  { %8250 = vmatpush.bf16.msk.msra.mxu2 %vm8249_vm0, %v15071_v13  ;;  %vm8282_vm12 = vmpackc.low %vm3560_vm4, %vm3558_vm13  ;;  %vm15161_vm0 = vcmask 1043456  }
 0x702   :  { %vm8257_vm11 = vmpackc.low %vm3326_vm10, %vm3324_vm6  ;;  %vm3316_vm6 = vcmp.eq.s32.totalorder %v9470_v16, %v12107_v50  ;;  %vm3318_vm10 = vcmp.eq.s32.totalorder %v9473_v17, %v12107_v50 }
 0x703   :  { %8240 = vmatpush.bf16.msk.msra.mxu1 %vm8239_vm9, %v15071_v13  ;;  %vm3272_vm9 = vcmp.eq.s32.totalorder %v9574_v26, %v12107_v50  ;;  %vm8286_vm13 = vmpackc.low %vm3552_vm7, %vm3550_vm8  ;;  %vm3310_vm8 = vcmp.eq.s32.totalorder %v9550_v25, %v12107_v50 }
 0x704   :  { %vm8251_vm14 = vmpackc.low %vm3274_vm5, %vm3272_vm9  ;;  %vm3320_vm9 = vcmp.eq.s32.totalorder %v9427_v11, %v12107_v50  ;;  %vm3322_vm5 = vcmp.eq.s32.totalorder %v9430_v12, %v12107_v50 }
 0x705   :  { %8252 = vmatpush.bf16.msk.msra.mxu2 %vm8251_vm14, %v15071_v13  ;;  %vm3554_vm14 = vcmp.eq.s32.totalorder %v9421_v9, %v12165_v56  ;;  %vm8261_vm4 = vmpackc.low %vm3318_vm10, %vm3316_vm6  ;;  %vm3538_vm6 = vcmp.eq.s32.totalorder %v9574_v26, %v12165_v56  ;;  %vm3540_vm10 = vcmp.eq.s32.totalorder %v9577_v27, %v12165_v56 }
 0x706   :  { %3444 = vmatmul.bf16.vlgmr.msra.gmra.mxu1 %v9735_v44  ;;  %vm8284_vm2 = vmpackc.low %vm3556_vm3, %vm3554_vm14  ;;  %vm3542_vm3 = vcmp.eq.s32.totalorder %v9536_v22, %v12165_v56 }
 0x709   :  { %8254 = vmatpush.bf16.msk.msra.mxu2 %vm8253_vm15, %v15071_v13  ;;  %vm8259_vm15 = vmpackc.low %vm3322_vm5, %vm3320_vm9  ;;  %vm3314_vm9 = vcmp.eq.s32.totalorder %v9512_v21, %v12107_v50 }
 0x70d   :  { %8256 = vmatpush.bf16.msk.msra.mxu2 %vm8255_vm1, %v15071_v13  ;;  %vm15162_vm1 = vcmask 64512  }
 0x710   :  { %3457 = vmatmul.bf16.vlgmr.msra.gmra.mxu2 %v9728_v43 }
 0x711   :  { %8283 = vmatpush.bf16.msk.msrb.mxu2 %vm8282_vm12, %v15160_v0  ;;  %vm3546_vm12 = vcmp.eq.s32.totalorder %v9492_v18, %v12165_v56 }
 0x715   :  { %8285 = vmatpush.bf16.msk.msrb.mxu2 %vm8284_vm2, %v15160_v0  ;;  %vm3544_vm2 = vcmp.eq.s32.totalorder %v9539_v23, %v12165_v56 }
 0x716   :  { %vm8290_vm7 = vmpackc.low %vm3544_vm2, %vm3542_vm3 }
 0x719   :  { %8287 = vmatpush.bf16.msk.msrb.mxu2 %vm8286_vm13, %v15160_v0  ;;  %vm3304_vm13 = vcmp.eq.s32.totalorder %v9585_v28, %v12107_v50 }
 0x743   :  { %v2983_v38 = vpop.f32.mrf.mxu1 }
 0x744   :  { %v12122_v55 = vadd.f32 %v2983_v38, %v11923_v53 }
 0x74b   :  { %v12153_v53 = vpop.f32.mrf.mxu1 }
 0x759   :  { %v12156_v46 = vpop.f32.mrf.mxu0 }
 0x763   :  { %v3204_v59 = vpop.f32.mrf.mxu1 }
 0x764   :  { %v3205_v38 = vadd.f32 %v3204_v59, %v3191_v52  ;;  %v3434_v59 = vpop.f32.mrf.mxu0 }
 0x766   :  { %v3212_v13 = vpack.c.bf16 %v3205_v38, %v3205_v38 }
 0x768   :  { %v3225_v37 = vsel %vm15161_vm0, %v3212_v13, 0  ;;  %vm3312_vm0 = vcmp.eq.s32.totalorder %v9509_v20, %v12107_v50 }
 0x769   :  { %v3236_v52 = vpop.f32.mrf.mxu2  ;;  %3248 = vmatpush.bf16.msrb.mxu3 %v3225_v37  ;;  %vm8263_vm14 = vmpackc.low %vm3314_vm9, %vm3312_vm0  ;;  %vm3534_vm0 = vcmp.eq.s32.totalorder %v9612_v30, %v12165_v56  ;;  %vm3536_vm9 = vcmp.eq.s32.totalorder %v9615_v31, %v12165_v56 }
 0x76a   :  { %v12186_v38 = vadd.f32 %v3236_v52, %v11957_v48  ;;  %vm8294_vm3 = vmpackc.low %vm3536_vm9, %vm3534_vm0  ;;  %vm3586_vm0 = vcmp.eq.s32.totalorder %v9427_v11, %v12165_v56  ;;  %vm3588_vm9 = vcmp.eq.s32.totalorder %v9430_v12, %v12165_v56 }
 0x76b   :  { %v3206_v13 = vpop.f32.mrf.mxu1 }
 0x76c   :  { %8207 = vmatmul.msk.bf16.vlgmr.msrb.gmra.mxu3 %vm15162_vm1, %v12062_v49 }
 0x76d   :  { %8258 = vmatpush.bf16.msk.msra.mxu3 %vm8257_vm11, %v15160_v0  ;;  %vm3548_vm11 = vcmp.eq.s32.totalorder %v9495_v19, %v12165_v56 }
 0x76e   :  { %vm8288_vm5 = vmpackc.low %vm3548_vm11, %vm3546_vm12 }
 0x76f   :  { %8289 = vmatpush.bf16.msk.msrb.mxu2 %vm8288_vm5, %v15160_v0  ;;  %vm8292_vm12 = vmpackc.low %vm3540_vm10, %vm3538_vm6  ;;  %vm3300_vm5 = vcmp.eq.s32.totalorder %v9623_v32, %v12107_v50  ;;  %vm3590_vm10 = vcmp.eq.s32.totalorder %v9415_v7, %v12165_v56 }
 0x771   :  { %8260 = vmatpush.bf16.msk.msra.mxu3 %vm8259_vm15, %v15160_v0  ;;  %vm3308_vm15 = vcmp.eq.s32.totalorder %v9547_v24, %v12107_v50  ;;  %v12305_v59 = vpop.f32.mrf.mxu2 }
 0x772   :  { %vm8265_vm1 = vmpackc.low %vm3310_vm8, %vm3308_vm15  ;;  %vm3530_vm15 = vcmp.eq.s32.totalorder %v9402_v2, %v12165_v56  ;;  %vm3532_vm8 = vcmp.eq.s32.totalorder %v9650_v34, %v12165_v56  ;;  %15165 = vst [vmem:[#allocation16_spill] sm:$0xff] %v12305_v59 }
 0x773   :  { %8291 = vmatpush.bf16.msk.msrb.mxu2 %vm8290_vm7, %v15160_v0  ;;  %vm3296_vm7 = vcmp.eq.s32.totalorder %v9658_v35, %v12107_v50  ;;  %vm8296_vm6 = vmpackc.low %vm3532_vm8, %vm3530_vm15  ;;  %vm3578_vm8 = vcmp.eq.s32.totalorder %v9509_v20, %v12165_v56 }
 0x775   :  { %8262 = vmatpush.bf16.msk.msra.mxu3 %vm8261_vm4, %v15160_v0  ;;  %vm3306_vm4 = vcmp.eq.s32.totalorder %v9588_v29, %v12107_v50 }
 0x776   :  { %vm8267_vm11 = vmpackc.low %vm3306_vm4, %vm3304_vm13  ;;  %vm3592_vm13 = vcmp.eq.s32.totalorder %v9418_v8, %v12165_v56 }
 0x777   :  { %8293 = vmatpush.bf16.msk.msrb.mxu2 %vm8292_vm12, %v15160_v0  ;;  %vm8298_vm12 = vmpackc.low %vm3592_vm13, %vm3590_vm10  ;;  %vm3576_vm10 = vcmp.eq.s32.totalorder %v9550_v25, %v12165_v56 }
 0x779   :  { %8264 = vmatpush.bf16.msk.msra.mxu3 %vm8263_vm14, %v15160_v0  ;;  %vm3302_vm14 = vcmp.eq.s32.totalorder %v9626_v33, %v12107_v50 }
 0x77a   :  { %vm8269_vm2 = vmpackc.low %vm3302_vm14, %vm3300_vm5  ;;  %vm15164_vm14 = vcmask 64512  }
 0x77b   :  { %8295 = vmatpush.bf16.msk.msrb.mxu2 %vm8294_vm3, %v15160_v0  ;;  %vm8300_vm5 = vmpackc.low %vm3588_vm9, %vm3586_vm0  ;;  %vm3582_vm3 = vcmp.eq.s32.totalorder %v9470_v16, %v12165_v56  ;;  %vm3566_vm0 = vcmp.eq.s32.totalorder %v9623_v32, %v12165_v56  ;;  %vm3568_vm9 = vcmp.eq.s32.totalorder %v9626_v33, %v12165_v56 }
 0x77d   :  { %8266 = vmatpush.bf16.msk.msra.mxu3 %vm8265_vm1, %v15160_v0  ;;  %vm3298_vm1 = vcmp.eq.s32.totalorder %v9661_v36, %v12107_v50  ;;  %v12261_v50 = vld [vmem:[%s15064_s2 + $0x60] sm:$0xff] }
 0x77e   :  { %vm8271_vm4 = vmpackc.low %vm3298_vm1, %vm3296_vm7  ;;  %vm3580_vm7 = vcmp.eq.s32.totalorder %v9512_v21, %v12165_v56 }
 0x77f   :  { %8297 = vmatpush.bf16.msk.msrb.mxu2 %vm8296_vm6, %v15160_v0  ;;  %vm8304_vm1 = vmpackc.low %vm3580_vm7, %vm3578_vm8  ;;  %vm3574_vm6 = vcmp.eq.s32.totalorder %v9547_v24, %v12165_v56 }
 0x780   :  { %vm8306_vm13 = vmpackc.low %vm3576_vm10, %vm3574_vm6 }
 0x781   :  { %8268 = vmatpush.bf16.msk.msra.mxu3 %vm8267_vm11, %v15160_v0  ;;  %vm15163_vm11 = vcmask 1043456  }
 0x782   :  { %3698 = vmatmul.bf16.vlgmr.msrb.gmra.mxu2 %v9728_v43 }
 0x783   :  { %v3445_v37 = vpop.f32.mrf.mxu1 }
 0x784   :  { %v3446_v48 = vadd.f32 %v3445_v37, %v12156_v46  ;;  %v12308_v37 = vperm.slane %v12162_v40, 1 }
 0x785   :  { %8270 = vmatpush.bf16.msk.msra.mxu3 %vm8269_vm2, %v15160_v0  ;;  %vm3584_vm2 = vcmp.eq.s32.totalorder %v9473_v17, %v12165_v56 }
 0x786   :  { %v3478_v49 = vpack.c.bf16 %v3446_v48, %v3446_v48  ;;  %vm8302_vm15 = vmpackc.low %vm3584_vm2, %vm3582_vm3  ;;  %vm3564_vm3 = vcmp.eq.s32.totalorder %v9661_v36, %v12165_v56  ;;  %vm3561_vm8 = vcmp.eq.s32.totalorder %v9412_v6, %v12308_v37  ;;  %vm3557_vm6 = vcmp.eq.s32.totalorder %v9424_v10, %v12308_v37 }
 0x788   :  { %v3489_v52 = vsel %vm15163_vm11, %v3478_v49, 0 }
 0x789   :  { %8272 = vmatpush.bf16.msk.msra.mxu3 %vm8271_vm4, %v15160_v0  ;;  %3501 = vmatpush.bf16.msrb.mxu0 %v3489_v52  ;;  %vm3570_vm4 = vcmp.eq.s32.totalorder %v9585_v28, %v12165_v56 }
 0x78b   :  { %v3447_v46 = vpop.f32.mrf.mxu1 }
 0x78c   :  { %3470 = vmatmul.bf16.vlgmr.msra.gmra.mxu3 %v9735_v44  ;;  %8279 = vmatmul.msk.bf16.vlgmr.msrb.gmra.mxu0 %vm15164_vm14, %v12261_v50  ;;  %vm3562_vm14 = vcmp.eq.s32.totalorder %v9658_v35, %v12165_v56 }
 0x78d   :  { %8299 = vmatpush.bf16.msk.msrb.mxu3 %vm8298_vm12, %v15160_v0  ;;  %vm3572_vm12 = vcmp.eq.s32.totalorder %v9588_v29, %v12165_v56  ;;  %vm8312_vm2 = vmpackc.low %vm3564_vm3, %vm3562_vm14  ;;  %vm3545_vm14 = vcmp.eq.s32.totalorder %v9539_v23, %v12308_v37 }
 0x78e   :  { %vm8308_vm11 = vmpackc.low %vm3572_vm12, %vm3570_vm4  ;;  %vm3553_vm4 = vcmp.eq.s32.totalorder %v9467_v15, %v12308_v37 }
 0x791   :  { %8301 = vmatpush.bf16.msk.msrb.mxu3 %vm8300_vm5, %v15160_v0  ;;  %vm8310_vm5 = vmpackc.low %vm3568_vm9, %vm3566_vm0  ;;  %vm3549_vm0 = vcmp.eq.s32.totalorder %v9495_v19, %v12308_v37 }
 0x793   :  { %v3458_v13 = vpop.f32.mrf.mxu2 }
 0x795   :  { %8303 = vmatpush.bf16.msk.msrb.mxu3 %vm8302_vm15, %v15160_v0  ;;  %vm3559_vm15 = vcmp.eq.s32.totalorder %v9409_v5, %v12308_v37 }
 0x796   :  { %vm8314_vm7 = vmpackc.low %vm3561_vm8, %vm3559_vm15  ;;  %vm3541_vm15 = vcmp.eq.s32.totalorder %v9577_v27, %v12308_v37 }
 0x797   :  { %8315 = vmatpush.bf16.msk.msra.mxu0 %vm8314_vm7, %v15160_v0  ;;  %vm3535_vm7 = vcmp.eq.s32.totalorder %v9612_v30, %v12308_v37 }
 0x799   :  { %8305 = vmatpush.bf16.msk.msrb.mxu3 %vm8304_vm1, %v15160_v0  ;;  %vm3555_vm1 = vcmp.eq.s32.totalorder %v9421_v9, %v12308_v37 }
 0x79a   :  { %vm8316_vm10 = vmpackc.low %vm3557_vm6, %vm3555_vm1  ;;  %vm3537_vm1 = vcmp.eq.s32.totalorder %v9615_v31, %v12308_v37 }
 0x79b   :  { %v3460_v56 = vpop.f32.mrf.mxu2  ;;  %8317 = vmatpush.bf16.msk.msra.mxu0 %vm8316_vm10, %v15160_v0  ;;  %vm8326_vm6 = vmpackc.low %vm3537_vm1, %vm3535_vm7  ;;  %vm3531_vm10 = vcmp.eq.s32.totalorder %v9402_v2, %v12308_v37 }
 0x79c   :  { %v12364_v56 = vld [vmem:[%s15062_s0 + $0x1c] sm:$0x3] }
 0x79d   :  { %8307 = vmatpush.bf16.msk.msrb.mxu3 %vm8306_vm13, %v15160_v0  ;;  %vm3551_vm13 = vcmp.eq.s32.totalorder %v9464_v14, %v12308_v37  ;;  %v12367_v59 = vperm.slane %v12364_v56, 0 }
 0x79e   :  { %vm8318_vm12 = vmpackc.low %vm3553_vm4, %vm3551_vm13  ;;  %vm3533_vm13 = vcmp.eq.s32.totalorder %v9650_v34, %v12308_v37 }
 0x79f   :  { %8319 = vmatpush.bf16.msk.msra.mxu0 %vm8318_vm12, %v15160_v0  ;;  %vm8328_vm4 = vmpackc.low %vm3533_vm13, %vm3531_vm10  ;;  %vm3591_vm12 = vcmp.eq.s32.totalorder %v9415_v7, %v12308_v37  ;;  %vm3823_vm7 = vcmp.eq.s32.totalorder %v9424_v10, %v12367_v59  ;;  %vm3817_vm10 = vcmp.eq.s32.totalorder %v9464_v14, %v12367_v59  ;;  %vm3819_vm13 = vcmp.eq.s32.totalorder %v9467_v15, %v12367_v59 }
 0x7a1   :  { %8309 = vmatpush.bf16.msk.msrb.mxu3 %vm8308_vm11, %v15160_v0  ;;  %vm3547_vm11 = vcmp.eq.s32.totalorder %v9492_v18, %v12308_v37 }
 0x7a2   :  { %vm8320_vm9 = vmpackc.low %vm3549_vm0, %vm3547_vm11  ;;  %vm3593_vm11 = vcmp.eq.s32.totalorder %v9418_v8, %v12308_v37  ;;  %vm3825_vm0 = vcmp.eq.s32.totalorder %v9409_v5, %v12367_v59 }
 0x7a3   :  { %8321 = vmatpush.bf16.msk.msra.mxu0 %vm8320_vm9, %v15160_v0  ;;  %vm3827_vm9 = vcmp.eq.s32.totalorder %v9412_v6, %v12367_v59 }
 0x7a5   :  { %8311 = vmatpush.bf16.msk.msrb.mxu3 %vm8310_vm5, %v15160_v0  ;;  %vm3543_vm5 = vcmp.eq.s32.totalorder %v9536_v22, %v12308_v37 }
 0x7a6   :  { %vm8322_vm3 = vmpackc.low %vm3545_vm14, %vm3543_vm5 }
 0x7a7   :  { %8323 = vmatpush.bf16.msk.msra.mxu0 %vm8322_vm3, %v15160_v0  ;;  %vm8355_vm5 = vmpackc.low %vm3827_vm9, %vm3825_vm0  ;;  %vm15166_vm3 = vcmask 1043456  }
 0x7a8   :  { %vm8330_vm14 = vmpackc.low %vm3593_vm11, %vm3591_vm12  ;;  %vm3583_vm12 = vcmp.eq.s32.totalorder %v9470_v16, %v12308_v37  ;;  %vm3585_vm11 = vcmp.eq.s32.totalorder %v9473_v17, %v12308_v37 }
 0x7a9   :  { %8313 = vmatpush.bf16.msk.msrb.mxu3 %vm8312_vm2, %v15160_v0  ;;  %vm3539_vm2 = vcmp.eq.s32.totalorder %v9574_v26, %v12308_v37  ;;  %vm8359_vm0 = vmpackc.low %vm3819_vm13, %vm3817_vm10  ;;  %vm3577_vm10 = vcmp.eq.s32.totalorder %v9550_v25, %v12308_v37 }
 0x7aa   :  { %vm8324_vm8 = vmpackc.low %vm3541_vm15, %vm3539_vm2  ;;  %vm3587_vm2 = vcmp.eq.s32.totalorder %v9427_v11, %v12308_v37  ;;  %vm3589_vm15 = vcmp.eq.s32.totalorder %v9430_v12, %v12308_v37 }
 0x7ab   :  { %8325 = vmatpush.bf16.msk.msra.mxu0 %vm8324_vm8, %v15160_v0  ;;  %vm3821_vm8 = vcmp.eq.s32.totalorder %v9421_v9, %v12367_v59  ;;  %vm8334_vm9 = vmpackc.low %vm3585_vm11, %vm3583_vm12  ;;  %vm3805_vm12 = vcmp.eq.s32.totalorder %v9574_v26, %v12367_v59  ;;  %vm3807_vm11 = vcmp.eq.s32.totalorder %v9577_v27, %v12367_v59 }
 0x7ac   :  { %3711 = vmatmul.bf16.vlgmr.msrb.gmra.mxu3 %v9735_v44  ;;  %vm8357_vm1 = vmpackc.low %vm3823_vm7, %vm3821_vm8  ;;  %vm3809_vm7 = vcmp.eq.s32.totalorder %v9536_v22, %v12367_v59 }
 0x7af   :  { %8327 = vmatpush.bf16.msk.msra.mxu0 %vm8326_vm6, %v15160_v0  ;;  %vm8332_vm6 = vmpackc.low %vm3589_vm15, %vm3587_vm2  ;;  %vm3581_vm2 = vcmp.eq.s32.totalorder %v9512_v21, %v12308_v37 }
 0x7b3   :  { %8329 = vmatpush.bf16.msk.msra.mxu0 %vm8328_vm4, %v15160_v0  ;;  %vm15167_vm4 = vcmask 64512  }
 0x7b6   :  { %3724 = vmatmul.bf16.vlgmr.msra.gmra.mxu0 %v9728_v43 }
 0x7b7   :  { %8356 = vmatpush.bf16.msk.msrb.mxu0 %vm8355_vm5, %v15160_v0  ;;  %vm3813_vm5 = vcmp.eq.s32.totalorder %v9492_v18, %v12367_v59 }
 0x7bb   :  { %8358 = vmatpush.bf16.msk.msrb.mxu0 %vm8357_vm1, %v15160_v0  ;;  %vm3811_vm1 = vcmp.eq.s32.totalorder %v9539_v23, %v12367_v59 }
 0x7bc   :  { %vm8363_vm13 = vmpackc.low %vm3811_vm1, %vm3809_vm7 }
 0x7bf   :  { %8360 = vmatpush.bf16.msk.msrb.mxu0 %vm8359_vm0, %v15160_v0  ;;  %vm3571_vm0 = vcmp.eq.s32.totalorder %v9585_v28, %v12308_v37 }
 0x7ef   :  { %v3250_v48 = vpop.f32.mrf.mxu3 }
 0x7f0   :  { %v12321_v40 = vadd.f32 %v3250_v48, %v12122_v55 }
 0x7f7   :  { %v12352_v55 = vpop.f32.mrf.mxu3 }
 0x805   :  { %v12358_v46 = vpop.f32.mrf.mxu2 }
 0x809   :  { %v3503_v49 = vpop.f32.mrf.mxu0 }
 0x80a   :  { %v12355_v52 = vadd.f32 %v3503_v49, %v12186_v38 }
 0x80f   :  { %v3471_v48 = vpop.f32.mrf.mxu3 }
 0x810   :  { %v3472_v41 = vadd.f32 %v3471_v48, %v3458_v13 }
 0x812   :  { %v3479_v38 = vpack.c.bf16 %v3472_v41, %v3472_v41  ;;  %v3701_v41 = vpop.f32.mrf.mxu2 }
 0x813   :  { %v12505_v41 = vperm.slane %v12364_v56, 1 }
 0x814   :  { %v3492_v49 = vsel %vm15166_vm3, %v3479_v38, 0  ;;  %vm3579_vm3 = vcmp.eq.s32.totalorder %v9509_v20, %v12308_v37 }
 0x815   :  { %3515 = vmatpush.bf16.msrb.mxu1 %v3492_v49  ;;  %vm8336_vm8 = vmpackc.low %vm3581_vm2, %vm3579_vm3  ;;  %vm3801_vm3 = vcmp.eq.s32.totalorder %v9612_v30, %v12367_v59  ;;  %vm3803_vm2 = vcmp.eq.s32.totalorder %v9615_v31, %v12367_v59 }
 0x816   :  { %vm8367_vm7 = vmpackc.low %vm3803_vm2, %vm3801_vm3  ;;  %vm3853_vm3 = vcmp.eq.s32.totalorder %v9427_v11, %v12367_v59  ;;  %vm3855_vm2 = vcmp.eq.s32.totalorder %v9430_v12, %v12367_v59 }
 0x817   :  { %v3473_v13 = vpop.f32.mrf.mxu3 }
 0x818   :  { %8280 = vmatmul.msk.bf16.vlgmr.msrb.gmra.mxu1 %vm15167_vm4, %v12261_v50  ;;  %v12511_v13 = vpop.f32.mrf.mxu0 }
 0x819   :  { %8331 = vmatpush.bf16.msk.msra.mxu1 %vm8330_vm14, %v15160_v0  ;;  %vm3815_vm14 = vcmp.eq.s32.totalorder %v9495_v19, %v12367_v59  ;;  %15170 = vst [vmem:[#allocation17_spill] sm:$0xff] %v12511_v13 }
 0x81a   :  { %vm8361_vm15 = vmpackc.low %vm3815_vm14, %vm3813_vm5 }
 0x81b   :  { %8362 = vmatpush.bf16.msk.msrb.mxu0 %vm8361_vm15, %v15160_v0  ;;  %vm8365_vm5 = vmpackc.low %vm3807_vm11, %vm3805_vm12  ;;  %vm3567_vm15 = vcmp.eq.s32.totalorder %v9623_v32, %v12308_v37  ;;  %vm3857_vm11 = vcmp.eq.s32.totalorder %v9415_v7, %v12367_v59 }
 0x81d   :  { %8333 = vmatpush.bf16.msk.msra.mxu1 %vm8332_vm6, %v15160_v0  ;;  %vm3575_vm6 = vcmp.eq.s32.totalorder %v9547_v24, %v12308_v37 }
 0x81e   :  { %vm8338_vm4 = vmpackc.low %vm3577_vm10, %vm3575_vm6  ;;  %vm3797_vm6 = vcmp.eq.s32.totalorder %v9402_v2, %v12367_v59  ;;  %vm3799_vm10 = vcmp.eq.s32.totalorder %v9650_v34, %v12367_v59 }
 0x81f   :  { %8364 = vmatpush.bf16.msk.msrb.mxu0 %vm8363_vm13, %v15160_v0  ;;  %vm3563_vm13 = vcmp.eq.s32.totalorder %v9658_v35, %v12308_v37  ;;  %vm8369_vm12 = vmpackc.low %vm3799_vm10, %vm3797_vm6  ;;  %vm3845_vm10 = vcmp.eq.s32.totalorder %v9509_v20, %v12367_v59 }
 0x821   :  { %8335 = vmatpush.bf16.msk.msra.mxu1 %vm8334_vm9, %v15160_v0  ;;  %vm3573_vm9 = vcmp.eq.s32.totalorder %v9588_v29, %v12308_v37 }
 0x822   :  { %vm8340_vm14 = vmpackc.low %vm3573_vm9, %vm3571_vm0  ;;  %vm3859_vm0 = vcmp.eq.s32.totalorder %v9418_v8, %v12367_v59 }
 0x823   :  { %8366 = vmatpush.bf16.msk.msrb.mxu0 %vm8365_vm5, %v15160_v0  ;;  %vm8371_vm5 = vmpackc.low %vm3859_vm0, %vm3857_vm11  ;;  %vm3843_vm11 = vcmp.eq.s32.totalorder %v9550_v25, %v12367_v59 }
 0x825   :  { %8337 = vmatpush.bf16.msk.msra.mxu1 %vm8336_vm8, %v15160_v0  ;;  %vm3569_vm8 = vcmp.eq.s32.totalorder %v9626_v33, %v12308_v37 }
 0x826   :  { %vm8342_vm1 = vmpackc.low %vm3569_vm8, %vm3567_vm15  ;;  %vm15169_vm8 = vcmask 64512  }
 0x827   :  { %8368 = vmatpush.bf16.msk.msrb.mxu0 %vm8367_vm7, %v15160_v0  ;;  %vm8373_vm15 = vmpackc.low %vm3855_vm2, %vm3853_vm3  ;;  %vm3849_vm7 = vcmp.eq.s32.totalorder %v9470_v16, %v12367_v59  ;;  %vm3833_vm3 = vcmp.eq.s32.totalorder %v9623_v32, %v12367_v59  ;;  %vm3835_vm2 = vcmp.eq.s32.totalorder %v9626_v33, %v12367_v59 }
 0x829   :  { %8339 = vmatpush.bf16.msk.msra.mxu1 %vm8338_vm4, %v15160_v0  ;;  %vm3565_vm4 = vcmp.eq.s32.totalorder %v9661_v36, %v12308_v37  ;;  %v12460_v37 = vld [vmem:[%s15064_s2 + $0x68] sm:$0xff] }
 0x82a   :  { %vm8344_vm9 = vmpackc.low %vm3565_vm4, %vm3563_vm13  ;;  %vm3847_vm13 = vcmp.eq.s32.totalorder %v9512_v21, %v12367_v59 }
 0x82b   :  { %8370 = vmatpush.bf16.msk.msrb.mxu0 %vm8369_vm12, %v15160_v0  ;;  %vm8377_vm4 = vmpackc.low %vm3847_vm13, %vm3845_vm10  ;;  %vm3841_vm12 = vcmp.eq.s32.totalorder %v9547_v24, %v12367_v59  ;;  %vm3828_vm10 = vcmp.eq.s32.totalorder %v9412_v6, %v12505_v41 }
 0x82c   :  { %vm8379_vm0 = vmpackc.low %vm3843_vm11, %vm3841_vm12  ;;  %vm3824_vm12 = vcmp.eq.s32.totalorder %v9424_v10, %v12505_v41 }
 0x82d   :  { %8341 = vmatpush.bf16.msk.msra.mxu1 %vm8340_vm14, %v15160_v0  ;;  %vm15168_vm14 = vcmask 1043456  }
 0x82e   :  { %3965 = vmatmul.bf16.vlgmr.msrb.gmra.mxu0 %v9728_v43 }
 0x82f   :  { %v3712_v50 = vpop.f32.mrf.mxu3 }
 0x830   :  { %v3713_v48 = vadd.f32 %v3712_v50, %v12358_v46 }
 0x831   :  { %8343 = vmatpush.bf16.msk.msra.mxu1 %vm8342_vm1, %v15160_v0  ;;  %vm3851_vm1 = vcmp.eq.s32.totalorder %v9473_v17, %v12367_v59 }
 0x832   :  { %v3745_v38 = vpack.c.bf16 %v3713_v48, %v3713_v48  ;;  %vm8375_vm6 = vmpackc.low %vm3851_vm1, %vm3849_vm7  ;;  %vm3831_vm7 = vcmp.eq.s32.totalorder %v9661_v36, %v12367_v59 }
 0x834   :  { %v3756_v49 = vsel %vm15168_vm14, %v3745_v38, 0 }
 0x835   :  { %8345 = vmatpush.bf16.msk.msra.mxu1 %vm8344_vm9, %v15160_v0  ;;  %3768 = vmatpush.bf16.msra.mxu2 %v3756_v49  ;;  %vm3837_vm9 = vcmp.eq.s32.totalorder %v9585_v28, %v12367_v59  ;;  %v12560_v49 = vld [vmem:[%s15062_s0 + $0x1e] sm:$0x3] }
 0x837   :  { %v3714_v46 = vpop.f32.mrf.mxu3 }
 0x838   :  { %3737 = vmatmul.bf16.vlgmr.msra.gmra.mxu1 %v9735_v44  ;;  %8352 = vmatmul.msk.bf16.vlgmr.msra.gmra.mxu2 %vm15169_vm8, %v12460_v37  ;;  %vm3829_vm8 = vcmp.eq.s32.totalorder %v9658_v35, %v12367_v59 }
 0x839   :  { %8372 = vmatpush.bf16.msk.msrb.mxu1 %vm8371_vm5, %v15160_v0  ;;  %vm3839_vm5 = vcmp.eq.s32.totalorder %v9588_v29, %v12367_v59  ;;  %vm8385_vm1 = vmpackc.low %vm3831_vm7, %vm3829_vm8  ;;  %v3725_v59 = vpop.f32.mrf.mxu0  ;;  %vm3812_vm8 = vcmp.eq.s32.totalorder %v9539_v23, %v12505_v41 }
 0x83a   :  { %vm8381_vm14 = vmpackc.low %vm3839_vm5, %vm3837_vm9  ;;  %vm3820_vm9 = vcmp.eq.s32.totalorder %v9467_v15, %v12505_v41 }
 0x83d   :  { %8374 = vmatpush.bf16.msk.msrb.mxu1 %vm8373_vm15, %v15160_v0  ;;  %vm8383_vm15 = vmpackc.low %vm3835_vm2, %vm3833_vm3  ;;  %vm3816_vm3 = vcmp.eq.s32.totalorder %v9495_v19, %v12505_v41 }
 0x841   :  { %8376 = vmatpush.bf16.msk.msrb.mxu1 %vm8375_vm6, %v15160_v0  ;;  %vm3826_vm6 = vcmp.eq.s32.totalorder %v9409_v5, %v12505_v41  ;;  %v3727_v50 = vpop.f32.mrf.mxu0 }
 0x842   :  { %vm8387_vm13 = vmpackc.low %vm3828_vm10, %vm3826_vm6  ;;  %vm3808_vm6 = vcmp.eq.s32.totalorder %v9577_v27, %v12505_v41  ;;  %v12563_v50 = vperm.slane %v12560_v49, 0 }
 0x843   :  { %8388 = vmatpush.bf16.msk.msrb.mxu2 %vm8387_vm13, %v15160_v0  ;;  %vm3802_vm13 = vcmp.eq.s32.totalorder %v9612_v30, %v12505_v41 }
 0x845   :  { %8378 = vmatpush.bf16.msk.msrb.mxu1 %vm8377_vm4, %v15160_v0  ;;  %vm3822_vm4 = vcmp.eq.s32.totalorder %v9421_v9, %v12505_v41 }
 0x846   :  { %vm8389_vm11 = vmpackc.low %vm3824_vm12, %vm3822_vm4  ;;  %vm3804_vm4 = vcmp.eq.s32.totalorder %v9615_v31, %v12505_v41 }
 0x847   :  { %8390 = vmatpush.bf16.msk.msrb.mxu2 %vm8389_vm11, %v15160_v0  ;;  %vm8399_vm12 = vmpackc.low %vm3804_vm4, %vm3802_vm13  ;;  %vm3798_vm11 = vcmp.eq.s32.totalorder %v9402_v2, %v12505_v41  ;;  %vm4090_vm13 = vcmp.eq.s32.totalorder %v9424_v10, %v12563_v50 }
 0x849   :  { %8380 = vmatpush.bf16.msk.msrb.mxu1 %vm8379_vm0, %v15160_v0  ;;  %vm3818_vm0 = vcmp.eq.s32.totalorder %v9464_v14, %v12505_v41 }
 0x84a   :  { %vm8391_vm5 = vmpackc.low %vm3820_vm9, %vm3818_vm0  ;;  %vm3800_vm0 = vcmp.eq.s32.totalorder %v9650_v34, %v12505_v41 }
 0x84b   :  { %8392 = vmatpush.bf16.msk.msrb.mxu2 %vm8391_vm5, %v15160_v0  ;;  %vm8401_vm9 = vmpackc.low %vm3800_vm0, %vm3798_vm11  ;;  %vm3858_vm5 = vcmp.eq.s32.totalorder %v9415_v7, %v12505_v41  ;;  %vm4084_vm11 = vcmp.eq.s32.totalorder %v9464_v14, %v12563_v50  ;;  %vm4086_vm0 = vcmp.eq.s32.totalorder %v9467_v15, %v12563_v50 }
 0x84d   :  { %8382 = vmatpush.bf16.msk.msrb.mxu1 %vm8381_vm14, %v15160_v0  ;;  %vm3814_vm14 = vcmp.eq.s32.totalorder %v9492_v18, %v12505_v41 }
 0x84e   :  { %vm8393_vm2 = vmpackc.low %vm3816_vm3, %vm3814_vm14  ;;  %vm3860_vm14 = vcmp.eq.s32.totalorder %v9418_v8, %v12505_v41  ;;  %vm4092_vm3 = vcmp.eq.s32.totalorder %v9409_v5, %v12563_v50 }
 0x84f   :  { %8394 = vmatpush.bf16.msk.msrb.mxu2 %vm8393_vm2, %v15160_v0  ;;  %vm4094_vm2 = vcmp.eq.s32.totalorder %v9412_v6, %v12563_v50 }
 0x851   :  { %8384 = vmatpush.bf16.msk.msrb.mxu1 %vm8383_vm15, %v15160_v0  ;;  %vm3810_vm15 = vcmp.eq.s32.totalorder %v9536_v22, %v12505_v41 }
 0x852   :  { %vm8395_vm7 = vmpackc.low %vm3812_vm8, %vm3810_vm15 }
 0x853   :  { %8396 = vmatpush.bf16.msk.msrb.mxu2 %vm8395_vm7, %v15160_v0  ;;  %vm8428_vm15 = vmpackc.low %vm4094_vm2, %vm4092_vm3  ;;  %vm15171_vm7 = vcmask 1043456  }
 0x854   :  { %vm8403_vm8 = vmpackc.low %vm3860_vm14, %vm3858_vm5  ;;  %vm3850_vm5 = vcmp.eq.s32.totalorder %v9470_v16, %v12505_v41  ;;  %vm3852_vm14 = vcmp.eq.s32.totalorder %v9473_v17, %v12505_v41 }
 0x855   :  { %8386 = vmatpush.bf16.msk.msrb.mxu1 %vm8385_vm1, %v15160_v0  ;;  %vm3806_vm1 = vcmp.eq.s32.totalorder %v9574_v26, %v12505_v41  ;;  %vm8432_vm3 = vmpackc.low %vm4086_vm0, %vm4084_vm11  ;;  %vm3844_vm11 = vcmp.eq.s32.totalorder %v9550_v25, %v12505_v41 }
 0x856   :  { %vm8397_vm10 = vmpackc.low %vm3808_vm6, %vm3806_vm1  ;;  %vm3854_vm1 = vcmp.eq.s32.totalorder %v9427_v11, %v12505_v41  ;;  %vm3856_vm6 = vcmp.eq.s32.totalorder %v9430_v12, %v12505_v41 }
 0x857   :  { %8398 = vmatpush.bf16.msk.msrb.mxu2 %vm8397_vm10, %v15160_v0  ;;  %vm4088_vm10 = vcmp.eq.s32.totalorder %v9421_v9, %v12563_v50  ;;  %vm8407_vm2 = vmpackc.low %vm3852_vm14, %vm3850_vm5  ;;  %vm4072_vm5 = vcmp.eq.s32.totalorder %v9574_v26, %v12563_v50  ;;  %vm4074_vm14 = vcmp.eq.s32.totalorder %v9577_v27, %v12563_v50 }
 0x858   :  { %3978 = vmatmul.bf16.vlgmr.msrb.gmra.mxu1 %v9735_v44  ;;  %vm8430_vm4 = vmpackc.low %vm4090_vm13, %vm4088_vm10  ;;  %vm4076_vm13 = vcmp.eq.s32.totalorder %v9536_v22, %v12563_v50 }
 0x85b   :  { %8400 = vmatpush.bf16.msk.msrb.mxu2 %vm8399_vm12, %v15160_v0  ;;  %vm8405_vm12 = vmpackc.low %vm3856_vm6, %vm3854_vm1  ;;  %vm3848_vm1 = vcmp.eq.s32.totalorder %v9512_v21, %v12505_v41 }
 0x85f   :  { %8402 = vmatpush.bf16.msk.msrb.mxu2 %vm8401_vm9, %v15160_v0  ;;  %vm15172_vm9 = vcmask 64512  }
 0x862   :  { %3991 = vmatmul.bf16.vlgmr.msrb.gmra.mxu2 %v9728_v43 }
 0x863   :  { %8429 = vmatpush.bf16.msk.msra.mxu2 %vm8428_vm15, %v15160_v0  ;;  %vm4080_vm15 = vcmp.eq.s32.totalorder %v9492_v18, %v12563_v50 }
 0x867   :  { %8431 = vmatpush.bf16.msk.msra.mxu2 %vm8430_vm4, %v15160_v0  ;;  %vm4078_vm4 = vcmp.eq.s32.totalorder %v9539_v23, %v12563_v50 }
 0x868   :  { %vm8436_vm0 = vmpackc.low %vm4078_vm4, %vm4076_vm13 }
 0x86b   :  { %8433 = vmatpush.bf16.msk.msra.mxu2 %vm8432_vm3, %v15160_v0  ;;  %vm3838_vm3 = vcmp.eq.s32.totalorder %v9585_v28, %v12505_v41 }
 0x895   :  { %v3517_v56 = vpop.f32.mrf.mxu1 }
 0x896   :  { %v12520_v48 = vadd.f32 %v3517_v56, %v12321_v40 }
 0x89d   :  { %v12551_v40 = vpop.f32.mrf.mxu1 }
 0x8ab   :  { %v12554_v38 = vpop.f32.mrf.mxu0 }
 0x8b5   :  { %v3738_v46 = vpop.f32.mrf.mxu1 }
 0x8b6   :  { %v3739_v56 = vadd.f32 %v3738_v46, %v3725_v59  ;;  %v3968_v46 = vpop.f32.mrf.mxu0 }
 0x8b8   :  { %v3746_v13 = vpack.c.bf16 %v3739_v56, %v3739_v56 }
 0x8ba   :  { %v3759_v61 = vsel %vm15171_vm7, %v3746_v13, 0  ;;  %vm3846_vm7 = vcmp.eq.s32.totalorder %v9509_v20, %v12505_v41 }
 0x8bb   :  { %v3770_v59 = vpop.f32.mrf.mxu2  ;;  %3782 = vmatpush.bf16.msra.mxu3 %v3759_v61  ;;  %vm8409_vm10 = vmpackc.low %vm3848_vm1, %vm3846_vm7  ;;  %vm4068_vm7 = vcmp.eq.s32.totalorder %v9612_v30, %v12563_v50  ;;  %vm4070_vm1 = vcmp.eq.s32.totalorder %v9615_v31, %v12563_v50 }
 0x8bc   :  { %v12584_v56 = vadd.f32 %v3770_v59, %v12355_v52  ;;  %vm8440_vm13 = vmpackc.low %vm4070_vm1, %vm4068_vm7  ;;  %vm4120_vm7 = vcmp.eq.s32.totalorder %v9427_v11, %v12563_v50  ;;  %vm4122_vm1 = vcmp.eq.s32.totalorder %v9430_v12, %v12563_v50 }
 0x8bd   :  { %v3740_v13 = vpop.f32.mrf.mxu1 }
 0x8be   :  { %8353 = vmatmul.msk.bf16.vlgmr.msra.gmra.mxu3 %vm15172_vm9, %v12460_v37 }
 0x8bf   :  { %8404 = vmatpush.bf16.msk.msrb.mxu3 %vm8403_vm8, %v15160_v0  ;;  %vm4082_vm8 = vcmp.eq.s32.totalorder %v9495_v19, %v12563_v50 }
 0x8c0   :  { %vm8434_vm6 = vmpackc.low %vm4082_vm8, %vm4080_vm15 }
 0x8c1   :  { %8435 = vmatpush.bf16.msk.msra.mxu2 %vm8434_vm6, %v15160_v0  ;;  %vm8438_vm15 = vmpackc.low %vm4074_vm14, %vm4072_vm5  ;;  %vm3834_vm6 = vcmp.eq.s32.totalorder %v9623_v32, %v12505_v41  ;;  %vm4124_vm14 = vcmp.eq.s32.totalorder %v9415_v7, %v12563_v50 }
 0x8c3   :  { %8406 = vmatpush.bf16.msk.msrb.mxu3 %vm8405_vm12, %v15160_v0  ;;  %vm3842_vm12 = vcmp.eq.s32.totalorder %v9547_v24, %v12505_v41  ;;  %v12703_v46 = vpop.f32.mrf.mxu2 }
 0x8c4   :  { %vm8411_vm9 = vmpackc.low %vm3844_vm11, %vm3842_vm12  ;;  %vm4064_vm12 = vcmp.eq.s32.totalorder %v9402_v2, %v12563_v50  ;;  %vm4066_vm11 = vcmp.eq.s32.totalorder %v9650_v34, %v12563_v50  ;;  %15175 = vst [vmem:[#allocation18_spill] sm:$0xff] %v12703_v46 }
 0x8c5   :  { %8437 = vmatpush.bf16.msk.msra.mxu2 %vm8436_vm0, %v15160_v0  ;;  %vm3830_vm0 = vcmp.eq.s32.totalorder %v9658_v35, %v12505_v41  ;;  %vm8442_vm5 = vmpackc.low %vm4066_vm11, %vm4064_vm12  ;;  %vm4112_vm11 = vcmp.eq.s32.totalorder %v9509_v20, %v12563_v50 }
 0x8c7   :  { %8408 = vmatpush.bf16.msk.msrb.mxu3 %vm8407_vm2, %v15160_v0  ;;  %vm3840_vm2 = vcmp.eq.s32.totalorder %v9588_v29, %v12505_v41 }
 0x8c8   :  { %vm8413_vm8 = vmpackc.low %vm3840_vm2, %vm3838_vm3  ;;  %vm4126_vm3 = vcmp.eq.s32.totalorder %v9418_v8, %v12563_v50 }
 0x8c9   :  { %8439 = vmatpush.bf16.msk.msra.mxu2 %vm8438_vm15, %v15160_v0  ;;  %vm8444_vm15 = vmpackc.low %vm4126_vm3, %vm4124_vm14  ;;  %vm4110_vm14 = vcmp.eq.s32.totalorder %v9550_v25, %v12563_v50 }
 0x8cb   :  { %8410 = vmatpush.bf16.msk.msrb.mxu3 %vm8409_vm10, %v15160_v0  ;;  %vm3836_vm10 = vcmp.eq.s32.totalorder %v9626_v33, %v12505_v41 }
 0x8cc   :  { %vm8415_vm4 = vmpackc.low %vm3836_vm10, %vm3834_vm6  ;;  %vm15174_vm10 = vcmask 64512  }
 0x8cd   :  { %8441 = vmatpush.bf16.msk.msra.mxu2 %vm8440_vm13, %v15160_v0  ;;  %vm8446_vm6 = vmpackc.low %vm4122_vm1, %vm4120_vm7  ;;  %vm4116_vm13 = vcmp.eq.s32.totalorder %v9470_v16, %v12563_v50  ;;  %vm4100_vm7 = vcmp.eq.s32.totalorder %v9623_v32, %v12563_v50  ;;  %vm4102_vm1 = vcmp.eq.s32.totalorder %v9626_v33, %v12563_v50 }
 0x8cf   :  { %8412 = vmatpush.bf16.msk.msrb.mxu3 %vm8411_vm9, %v15160_v0  ;;  %vm3832_vm9 = vcmp.eq.s32.totalorder %v9661_v36, %v12505_v41  ;;  %v12659_v41 = vld [vmem:[%s15064_s2 + $0x70] sm:$0xff] }
 0x8d0   :  { %vm8417_vm2 = vmpackc.low %vm3832_vm9, %vm3830_vm0  ;;  %vm4114_vm0 = vcmp.eq.s32.totalorder %v9512_v21, %v12563_v50 }
 0x8d1   :  { %8443 = vmatpush.bf16.msk.msra.mxu2 %vm8442_vm5, %v15160_v0  ;;  %vm8450_vm9 = vmpackc.low %vm4114_vm0, %vm4112_vm11  ;;  %vm4108_vm5 = vcmp.eq.s32.totalorder %v9547_v24, %v12563_v50 }
 0x8d2   :  { %vm8452_vm3 = vmpackc.low %vm4110_vm14, %vm4108_vm5 }
 0x8d3   :  { %8414 = vmatpush.bf16.msk.msrb.mxu3 %vm8413_vm8, %v15160_v0  ;;  %vm15173_vm8 = vcmask 1043456  }
 0x8d4   :  { %4232 = vmatmul.bf16.vlgmr.msra.gmra.mxu2 %v9728_v43 }
 0x8d5   :  { %v3979_v61 = vpop.f32.mrf.mxu1 }
 0x8d6   :  { %v3980_v52 = vadd.f32 %v3979_v61, %v12554_v38  ;;  %v12706_v61 = vperm.slane %v12560_v49, 1 }
 0x8d7   :  { %8416 = vmatpush.bf16.msk.msrb.mxu3 %vm8415_vm4, %v15160_v0  ;;  %vm4118_vm4 = vcmp.eq.s32.totalorder %v9473_v17, %v12563_v50 }
 0x8d8   :  { %v4012_v37 = vpack.c.bf16 %v3980_v52, %v3980_v52  ;;  %vm8448_vm12 = vmpackc.low %vm4118_vm4, %vm4116_vm13  ;;  %vm4098_vm13 = vcmp.eq.s32.totalorder %v9661_v36, %v12563_v50  ;;  %vm4095_vm11 = vcmp.eq.s32.totalorder %v9412_v6, %v12706_v61  ;;  %vm4091_vm5 = vcmp.eq.s32.totalorder %v9424_v10, %v12706_v61 }
 0x8da   :  { %v4023_v59 = vsel %vm15173_vm8, %v4012_v37, 0 }
 0x8db   :  { %8418 = vmatpush.bf16.msk.msrb.mxu3 %vm8417_vm2, %v15160_v0  ;;  %4035 = vmatpush.bf16.msra.mxu0 %v4023_v59  ;;  %vm4104_vm2 = vcmp.eq.s32.totalorder %v9585_v28, %v12563_v50 }
 0x8dd   :  { %v3981_v38 = vpop.f32.mrf.mxu1 }
 0x8de   :  { %4004 = vmatmul.bf16.vlgmr.msrb.gmra.mxu3 %v9735_v44  ;;  %8425 = vmatmul.msk.bf16.vlgmr.msra.gmra.mxu0 %vm15174_vm10, %v12659_v41  ;;  %vm4096_vm10 = vcmp.eq.s32.totalorder %v9658_v35, %v12563_v50 }
 0x8df   :  { %8445 = vmatpush.bf16.msk.msra.mxu3 %vm8444_vm15, %v15160_v0  ;;  %vm4106_vm15 = vcmp.eq.s32.totalorder %v9588_v29, %v12563_v50  ;;  %vm8458_vm4 = vmpackc.low %vm4098_vm13, %vm4096_vm10  ;;  %vm4079_vm10 = vcmp.eq.s32.totalorder %v9539_v23, %v12706_v61 }
 0x8e0   :  { %vm8454_vm8 = vmpackc.low %vm4106_vm15, %vm4104_vm2  ;;  %vm4087_vm2 = vcmp.eq.s32.totalorder %v9467_v15, %v12706_v61 }
 0x8e3   :  { %8447 = vmatpush.bf16.msk.msra.mxu3 %vm8446_vm6, %v15160_v0  ;;  %vm8456_vm6 = vmpackc.low %vm4102_vm1, %vm4100_vm7  ;;  %vm4083_vm7 = vcmp.eq.s32.totalorder %v9495_v19, %v12706_v61 }
 0x8e5   :  { %v3992_v13 = vpop.f32.mrf.mxu2 }
 0x8e7   :  { %8449 = vmatpush.bf16.msk.msra.mxu3 %vm8448_vm12, %v15160_v0  ;;  %vm4093_vm12 = vcmp.eq.s32.totalorder %v9409_v5, %v12706_v61 }
 0x8e8   :  { %vm8460_vm0 = vmpackc.low %vm4095_vm11, %vm4093_vm12  ;;  %vm4075_vm12 = vcmp.eq.s32.totalorder %v9577_v27, %v12706_v61 }
 0x8e9   :  { %8461 = vmatpush.bf16.msk.msrb.mxu0 %vm8460_vm0, %v15160_v0  ;;  %vm4069_vm0 = vcmp.eq.s32.totalorder %v9612_v30, %v12706_v61 }
 0x8eb   :  { %8451 = vmatpush.bf16.msk.msra.mxu3 %vm8450_vm9, %v15160_v0  ;;  %vm4089_vm9 = vcmp.eq.s32.totalorder %v9421_v9, %v12706_v61 }
 0x8ec   :  { %vm8462_vm14 = vmpackc.low %vm4091_vm5, %vm4089_vm9  ;;  %vm4071_vm9 = vcmp.eq.s32.totalorder %v9615_v31, %v12706_v61 }
 0x8ed   :  { %v3994_v50 = vpop.f32.mrf.mxu2  ;;  %8463 = vmatpush.bf16.msk.msrb.mxu0 %vm8462_vm14, %v15160_v0  ;;  %vm8472_vm5 = vmpackc.low %vm4071_vm9, %vm4069_vm0  ;;  %vm4065_vm14 = vcmp.eq.s32.totalorder %v9402_v2, %v12706_v61 }
 0x8ee   :  { %v12762_v50 = vld [vmem:[%s15062_s0 + $0x20] sm:$0x3] }
 0x8ef   :  { %8453 = vmatpush.bf16.msk.msra.mxu3 %vm8452_vm3, %v15160_v0  ;;  %vm4085_vm3 = vcmp.eq.s32.totalorder %v9464_v14, %v12706_v61  ;;  %v12765_v46 = vperm.slane %v12762_v50, 0 }
 0x8f0   :  { %vm8464_vm15 = vmpackc.low %vm4087_vm2, %vm4085_vm3  ;;  %vm4067_vm3 = vcmp.eq.s32.totalorder %v9650_v34, %v12706_v61 }
 0x8f1   :  { %8465 = vmatpush.bf16.msk.msrb.mxu0 %vm8464_vm15, %v15160_v0  ;;  %vm8474_vm2 = vmpackc.low %vm4067_vm3, %vm4065_vm14  ;;  %vm4125_vm15 = vcmp.eq.s32.totalorder %v9415_v7, %v12706_v61  ;;  %vm4357_vm0 = vcmp.eq.s32.totalorder %v9424_v10, %v12765_v46  ;;  %vm4351_vm14 = vcmp.eq.s32.totalorder %v9464_v14, %v12765_v46  ;;  %vm4353_vm3 = vcmp.eq.s32.totalorder %v9467_v15, %v12765_v46 }
 0x8f3   :  { %8455 = vmatpush.bf16.msk.msra.mxu3 %vm8454_vm8, %v15160_v0  ;;  %vm4081_vm8 = vcmp.eq.s32.totalorder %v9492_v18, %v12706_v61 }
 0x8f4   :  { %vm8466_vm1 = vmpackc.low %vm4083_vm7, %vm4081_vm8  ;;  %vm4127_vm8 = vcmp.eq.s32.totalorder %v9418_v8, %v12706_v61  ;;  %vm4359_vm7 = vcmp.eq.s32.totalorder %v9409_v5, %v12765_v46 }
 0x8f5   :  { %8467 = vmatpush.bf16.msk.msrb.mxu0 %vm8466_vm1, %v15160_v0  ;;  %vm4361_vm1 = vcmp.eq.s32.totalorder %v9412_v6, %v12765_v46 }
 0x8f7   :  { %8457 = vmatpush.bf16.msk.msra.mxu3 %vm8456_vm6, %v15160_v0  ;;  %vm4077_vm6 = vcmp.eq.s32.totalorder %v9536_v22, %v12706_v61 }
 0x8f8   :  { %vm8468_vm13 = vmpackc.low %vm4079_vm10, %vm4077_vm6 }
 0x8f9   :  { %8469 = vmatpush.bf16.msk.msrb.mxu0 %vm8468_vm13, %v15160_v0  ;;  %vm8501_vm6 = vmpackc.low %vm4361_vm1, %vm4359_vm7  ;;  %vm15176_vm13 = vcmask 1043456  }
 0x8fa   :  { %vm8476_vm10 = vmpackc.low %vm4127_vm8, %vm4125_vm15  ;;  %vm4117_vm15 = vcmp.eq.s32.totalorder %v9470_v16, %v12706_v61  ;;  %vm4119_vm8 = vcmp.eq.s32.totalorder %v9473_v17, %v12706_v61 }
 0x8fb   :  { %8459 = vmatpush.bf16.msk.msra.mxu3 %vm8458_vm4, %v15160_v0  ;;  %vm4073_vm4 = vcmp.eq.s32.totalorder %v9574_v26, %v12706_v61  ;;  %vm8505_vm7 = vmpackc.low %vm4353_vm3, %vm4351_vm14  ;;  %vm4111_vm14 = vcmp.eq.s32.totalorder %v9550_v25, %v12706_v61 }
 0x8fc   :  { %vm8470_vm11 = vmpackc.low %vm4075_vm12, %vm4073_vm4  ;;  %vm4121_vm4 = vcmp.eq.s32.totalorder %v9427_v11, %v12706_v61  ;;  %vm4123_vm12 = vcmp.eq.s32.totalorder %v9430_v12, %v12706_v61 }
 0x8fd   :  { %8471 = vmatpush.bf16.msk.msrb.mxu0 %vm8470_vm11, %v15160_v0  ;;  %vm4355_vm11 = vcmp.eq.s32.totalorder %v9421_v9, %v12765_v46  ;;  %vm8480_vm1 = vmpackc.low %vm4119_vm8, %vm4117_vm15  ;;  %vm4339_vm15 = vcmp.eq.s32.totalorder %v9574_v26, %v12765_v46  ;;  %vm4341_vm8 = vcmp.eq.s32.totalorder %v9577_v27, %v12765_v46 }
 0x8fe   :  { %4245 = vmatmul.bf16.vlgmr.msra.gmra.mxu3 %v9735_v44  ;;  %vm8503_vm9 = vmpackc.low %vm4357_vm0, %vm4355_vm11  ;;  %vm4343_vm0 = vcmp.eq.s32.totalorder %v9536_v22, %v12765_v46 }
 0x901   :  { %8473 = vmatpush.bf16.msk.msrb.mxu0 %vm8472_vm5, %v15160_v0  ;;  %vm8478_vm5 = vmpackc.low %vm4123_vm12, %vm4121_vm4  ;;  %vm4115_vm4 = vcmp.eq.s32.totalorder %v9512_v21, %v12706_v61 }
 0x905   :  { %8475 = vmatpush.bf16.msk.msrb.mxu0 %vm8474_vm2, %v15160_v0  ;;  %vm15177_vm2 = vcmask 64512  }
 0x908   :  { %4258 = vmatmul.bf16.vlgmr.msrb.gmra.mxu0 %v9728_v43 }
 0x909   :  { %8502 = vmatpush.bf16.msk.msra.mxu0 %vm8501_vm6, %v15160_v0  ;;  %vm4347_vm6 = vcmp.eq.s32.totalorder %v9492_v18, %v12765_v46 }
 0x90d   :  { %8504 = vmatpush.bf16.msk.msra.mxu0 %vm8503_vm9, %v15160_v0  ;;  %vm4345_vm9 = vcmp.eq.s32.totalorder %v9539_v23, %v12765_v46 }
 0x90e   :  { %vm8509_vm3 = vmpackc.low %vm4345_vm9, %vm4343_vm0 }
 0x911   :  { %8506 = vmatpush.bf16.msk.msra.mxu0 %vm8505_vm7, %v15160_v0  ;;  %vm4105_vm7 = vcmp.eq.s32.totalorder %v9585_v28, %v12706_v61 }
 0x941   :  { %v3784_v52 = vpop.f32.mrf.mxu3 }
 0x942   :  { %v12719_v49 = vadd.f32 %v3784_v52, %v12520_v48 }
 0x949   :  { %v12750_v48 = vpop.f32.mrf.mxu3 }
 0x957   :  { %v12756_v38 = vpop.f32.mrf.mxu2 }
 0x95b   :  { %v4037_v37 = vpop.f32.mrf.mxu0 }
 0x95c   :  { %v12753_v59 = vadd.f32 %v4037_v37, %v12584_v56 }
 0x961   :  { %v4005_v52 = vpop.f32.mrf.mxu3 }
 0x962   :  { %v4006_v51 = vadd.f32 %v4005_v52, %v3992_v13 }
 0x964   :  { %v4013_v56 = vpack.c.bf16 %v4006_v51, %v4006_v51  ;;  %v4235_v51 = vpop.f32.mrf.mxu2 }
 0x965   :  { %v12903_v51 = vperm.slane %v12762_v50, 1 }
 0x966   :  { %v4026_v37 = vsel %vm15176_vm13, %v4013_v56, 0  ;;  %vm4113_vm13 = vcmp.eq.s32.totalorder %v9509_v20, %v12706_v61 }
 0x967   :  { %4049 = vmatpush.bf16.msra.mxu1 %v4026_v37  ;;  %vm8482_vm11 = vmpackc.low %vm4115_vm4, %vm4113_vm13  ;;  %vm4335_vm13 = vcmp.eq.s32.totalorder %v9612_v30, %v12765_v46  ;;  %vm4337_vm4 = vcmp.eq.s32.totalorder %v9615_v31, %v12765_v46 }
 0x968   :  { %vm8513_vm0 = vmpackc.low %vm4337_vm4, %vm4335_vm13  ;;  %vm4387_vm13 = vcmp.eq.s32.totalorder %v9427_v11, %v12765_v46  ;;  %vm4389_vm4 = vcmp.eq.s32.totalorder %v9430_v12, %v12765_v46 }
 0x969   :  { %v4007_v13 = vpop.f32.mrf.mxu3 }
 0x96a   :  { %8426 = vmatmul.msk.bf16.vlgmr.msra.gmra.mxu1 %vm15177_vm2, %v12659_v41  ;;  %v12909_v13 = vpop.f32.mrf.mxu0 }
 0x96b   :  { %8477 = vmatpush.bf16.msk.msrb.mxu1 %vm8476_vm10, %v15160_v0  ;;  %vm4349_vm10 = vcmp.eq.s32.totalorder %v9495_v19, %v12765_v46  ;;  %15180 = vst [vmem:[#allocation19_spill] sm:$0xff] %v12909_v13 }
 0x96c   :  { %vm8507_vm12 = vmpackc.low %vm4349_vm10, %vm4347_vm6 }
 0x96d   :  { %8508 = vmatpush.bf16.msk.msra.mxu0 %vm8507_vm12, %v15160_v0  ;;  %vm8511_vm6 = vmpackc.low %vm4341_vm8, %vm4339_vm15  ;;  %vm4101_vm12 = vcmp.eq.s32.totalorder %v9623_v32, %v12706_v61  ;;  %vm4391_vm8 = vcmp.eq.s32.totalorder %v9415_v7, %v12765_v46 }
 0x96f   :  { %8479 = vmatpush.bf16.msk.msrb.mxu1 %vm8478_vm5, %v15160_v0  ;;  %vm4109_vm5 = vcmp.eq.s32.totalorder %v9547_v24, %v12706_v61 }
 0x970   :  { %vm8484_vm2 = vmpackc.low %vm4111_vm14, %vm4109_vm5  ;;  %vm4331_vm5 = vcmp.eq.s32.totalorder %v9402_v2, %v12765_v46  ;;  %vm4333_vm14 = vcmp.eq.s32.totalorder %v9650_v34, %v12765_v46 }
 0x971   :  { %8510 = vmatpush.bf16.msk.msra.mxu0 %vm8509_vm3, %v15160_v0  ;;  %vm4097_vm3 = vcmp.eq.s32.totalorder %v9658_v35, %v12706_v61  ;;  %vm8515_vm15 = vmpackc.low %vm4333_vm14, %vm4331_vm5  ;;  %vm4379_vm14 = vcmp.eq.s32.totalorder %v9509_v20, %v12765_v46 }
 0x973   :  { %8481 = vmatpush.bf16.msk.msrb.mxu1 %vm8480_vm1, %v15160_v0  ;;  %vm4107_vm1 = vcmp.eq.s32.totalorder %v9588_v29, %v12706_v61 }
 0x974   :  { %vm8486_vm10 = vmpackc.low %vm4107_vm1, %vm4105_vm7  ;;  %vm4393_vm7 = vcmp.eq.s32.totalorder %v9418_v8, %v12765_v46 }
 0x975   :  { %8512 = vmatpush.bf16.msk.msra.mxu0 %vm8511_vm6, %v15160_v0  ;;  %vm8517_vm6 = vmpackc.low %vm4393_vm7, %vm4391_vm8  ;;  %vm4377_vm8 = vcmp.eq.s32.totalorder %v9550_v25, %v12765_v46 }
 0x977   :  { %8483 = vmatpush.bf16.msk.msrb.mxu1 %vm8482_vm11, %v15160_v0  ;;  %vm4103_vm11 = vcmp.eq.s32.totalorder %v9626_v33, %v12706_v61 }
 0x978   :  { %vm8488_vm9 = vmpackc.low %vm4103_vm11, %vm4101_vm12  ;;  %vm15179_vm11 = vcmask 64512  }
 0x979   :  { %8514 = vmatpush.bf16.msk.msra.mxu0 %vm8513_vm0, %v15160_v0  ;;  %vm8519_vm12 = vmpackc.low %vm4389_vm4, %vm4387_vm13  ;;  %vm4383_vm0 = vcmp.eq.s32.totalorder %v9470_v16, %v12765_v46  ;;  %vm4367_vm13 = vcmp.eq.s32.totalorder %v9623_v32, %v12765_v46  ;;  %vm4369_vm4 = vcmp.eq.s32.totalorder %v9626_v33, %v12765_v46 }
 0x97b   :  { %8485 = vmatpush.bf16.msk.msrb.mxu1 %vm8484_vm2, %v15160_v0  ;;  %vm4099_vm2 = vcmp.eq.s32.totalorder %v9661_v36, %v12706_v61  ;;  %v12858_v61 = vld [vmem:[%s15064_s2 + $0x78] sm:$0xff] }
 0x97c   :  { %vm8490_vm1 = vmpackc.low %vm4099_vm2, %vm4097_vm3  ;;  %vm4381_vm3 = vcmp.eq.s32.totalorder %v9512_v21, %v12765_v46 }
 0x97d   :  { %8516 = vmatpush.bf16.msk.msra.mxu0 %vm8515_vm15, %v15160_v0  ;;  %vm8523_vm2 = vmpackc.low %vm4381_vm3, %vm4379_vm14  ;;  %vm4375_vm15 = vcmp.eq.s32.totalorder %v9547_v24, %v12765_v46  ;;  %vm4362_vm14 = vcmp.eq.s32.totalorder %v9412_v6, %v12903_v51 }
 0x97e   :  { %vm8525_vm7 = vmpackc.low %vm4377_vm8, %vm4375_vm15  ;;  %vm4358_vm15 = vcmp.eq.s32.totalorder %v9424_v10, %v12903_v51 }
 0x97f   :  { %8487 = vmatpush.bf16.msk.msrb.mxu1 %vm8486_vm10, %v15160_v0  ;;  %vm15178_vm10 = vcmask 1043456  }
 0x980   :  { %4499 = vmatmul.bf16.vlgmr.msra.gmra.mxu0 %v9728_v43 }
 0x981   :  { %v4246_v41 = vpop.f32.mrf.mxu3 }
 0x982   :  { %v4247_v52 = vadd.f32 %v4246_v41, %v12756_v38 }
 0x983   :  { %8489 = vmatpush.bf16.msk.msrb.mxu1 %vm8488_vm9, %v15160_v0  ;;  %vm4385_vm9 = vcmp.eq.s32.totalorder %v9473_v17, %v12765_v46 }
 0x984   :  { %v4279_v56 = vpack.c.bf16 %v4247_v52, %v4247_v52  ;;  %vm8521_vm5 = vmpackc.low %vm4385_vm9, %vm4383_vm0  ;;  %vm4365_vm0 = vcmp.eq.s32.totalorder %v9661_v36, %v12765_v46 }
 0x986   :  { %v4290_v37 = vsel %vm15178_vm10, %v4279_v56, 0 }
 0x987   :  { %8491 = vmatpush.bf16.msk.msrb.mxu1 %vm8490_vm1, %v15160_v0  ;;  %4302 = vmatpush.bf16.msrb.mxu2 %v4290_v37  ;;  %vm4371_vm1 = vcmp.eq.s32.totalorder %v9585_v28, %v12765_v46  ;;  %v12958_v37 = vld [vmem:[%s15062_s0 + $0x22] sm:$0x3] }
 0x989   :  { %v4248_v38 = vpop.f32.mrf.mxu3 }
 0x98a   :  { %4271 = vmatmul.bf16.vlgmr.msrb.gmra.mxu1 %v9735_v44  ;;  %8498 = vmatmul.msk.bf16.vlgmr.msrb.gmra.mxu2 %vm15179_vm11, %v12858_v61  ;;  %vm4363_vm11 = vcmp.eq.s32.totalorder %v9658_v35, %v12765_v46 }
 0x98b   :  { %8518 = vmatpush.bf16.msk.msra.mxu1 %vm8517_vm6, %v15160_v0  ;;  %vm4373_vm6 = vcmp.eq.s32.totalorder %v9588_v29, %v12765_v46  ;;  %vm8531_vm9 = vmpackc.low %vm4365_vm0, %vm4363_vm11  ;;  %v4259_v46 = vpop.f32.mrf.mxu0  ;;  %vm4346_vm11 = vcmp.eq.s32.totalorder %v9539_v23, %v12903_v51 }
 0x98c   :  { %vm8527_vm10 = vmpackc.low %vm4373_vm6, %vm4371_vm1  ;;  %vm4354_vm1 = vcmp.eq.s32.totalorder %v9467_v15, %v12903_v51 }
 0x98f   :  { %8520 = vmatpush.bf16.msk.msra.mxu1 %vm8519_vm12, %v15160_v0  ;;  %vm8529_vm12 = vmpackc.low %vm4369_vm4, %vm4367_vm13  ;;  %vm4350_vm13 = vcmp.eq.s32.totalorder %v9495_v19, %v12903_v51 }
 0x993   :  { %8522 = vmatpush.bf16.msk.msra.mxu1 %vm8521_vm5, %v15160_v0  ;;  %vm4360_vm5 = vcmp.eq.s32.totalorder %v9409_v5, %v12903_v51  ;;  %v4261_v41 = vpop.f32.mrf.mxu0 }
 0x994   :  { %vm8533_vm3 = vmpackc.low %vm4362_vm14, %vm4360_vm5  ;;  %vm4342_vm5 = vcmp.eq.s32.totalorder %v9577_v27, %v12903_v51  ;;  %v12961_v41 = vperm.slane %v12958_v37, 0 }
 0x995   :  { %8534 = vmatpush.bf16.msk.msra.mxu2 %vm8533_vm3, %v15160_v0  ;;  %vm4336_vm3 = vcmp.eq.s32.totalorder %v9612_v30, %v12903_v51 }
 0x997   :  { %8524 = vmatpush.bf16.msk.msra.mxu1 %vm8523_vm2, %v15160_v0  ;;  %vm4356_vm2 = vcmp.eq.s32.totalorder %v9421_v9, %v12903_v51 }
 0x998   :  { %vm8535_vm8 = vmpackc.low %vm4358_vm15, %vm4356_vm2  ;;  %vm4338_vm2 = vcmp.eq.s32.totalorder %v9615_v31, %v12903_v51 }
 0x999   :  { %8536 = vmatpush.bf16.msk.msra.mxu2 %vm8535_vm8, %v15160_v0  ;;  %vm8545_vm15 = vmpackc.low %vm4338_vm2, %vm4336_vm3  ;;  %vm4332_vm8 = vcmp.eq.s32.totalorder %v9402_v2, %v12903_v51  ;;  %vm4624_vm3 = vcmp.eq.s32.totalorder %v9424_v10, %v12961_v41 }
 0x99b   :  { %8526 = vmatpush.bf16.msk.msra.mxu1 %vm8525_vm7, %v15160_v0  ;;  %vm4352_vm7 = vcmp.eq.s32.totalorder %v9464_v14, %v12903_v51 }
 0x99c   :  { %vm8537_vm6 = vmpackc.low %vm4354_vm1, %vm4352_vm7  ;;  %vm4334_vm7 = vcmp.eq.s32.totalorder %v9650_v34, %v12903_v51 }
 0x99d   :  { %8538 = vmatpush.bf16.msk.msra.mxu2 %vm8537_vm6, %v15160_v0  ;;  %vm8547_vm1 = vmpackc.low %vm4334_vm7, %vm4332_vm8  ;;  %vm4392_vm6 = vcmp.eq.s32.totalorder %v9415_v7, %v12903_v51  ;;  %vm4618_vm8 = vcmp.eq.s32.totalorder %v9464_v14, %v12961_v41  ;;  %vm4620_vm7 = vcmp.eq.s32.totalorder %v9467_v15, %v12961_v41 }
 0x99f   :  { %8528 = vmatpush.bf16.msk.msra.mxu1 %vm8527_vm10, %v15160_v0  ;;  %vm4348_vm10 = vcmp.eq.s32.totalorder %v9492_v18, %v12903_v51 }
 0x9a0   :  { %vm8539_vm4 = vmpackc.low %vm4350_vm13, %vm4348_vm10  ;;  %vm4394_vm10 = vcmp.eq.s32.totalorder %v9418_v8, %v12903_v51  ;;  %vm4626_vm13 = vcmp.eq.s32.totalorder %v9409_v5, %v12961_v41 }
 0x9a1   :  { %8540 = vmatpush.bf16.msk.msra.mxu2 %vm8539_vm4, %v15160_v0  ;;  %vm4628_vm4 = vcmp.eq.s32.totalorder %v9412_v6, %v12961_v41 }
 0x9a3   :  { %8530 = vmatpush.bf16.msk.msra.mxu1 %vm8529_vm12, %v15160_v0  ;;  %vm4344_vm12 = vcmp.eq.s32.totalorder %v9536_v22, %v12903_v51 }
 0x9a4   :  { %vm8541_vm0 = vmpackc.low %vm4346_vm11, %vm4344_vm12 }
 0x9a5   :  { %8542 = vmatpush.bf16.msk.msra.mxu2 %vm8541_vm0, %v15160_v0  ;;  %vm8574_vm12 = vmpackc.low %vm4628_vm4, %vm4626_vm13  ;;  %vm15181_vm0 = vcmask 1043456  }
 0x9a6   :  { %vm8549_vm11 = vmpackc.low %vm4394_vm10, %vm4392_vm6  ;;  %vm4384_vm6 = vcmp.eq.s32.totalorder %v9470_v16, %v12903_v51  ;;  %vm4386_vm10 = vcmp.eq.s32.totalorder %v9473_v17, %v12903_v51 }
 0x9a7   :  { %8532 = vmatpush.bf16.msk.msra.mxu1 %vm8531_vm9, %v15160_v0  ;;  %vm4340_vm9 = vcmp.eq.s32.totalorder %v9574_v26, %v12903_v51  ;;  %vm8578_vm13 = vmpackc.low %vm4620_vm7, %vm4618_vm8  ;;  %vm4378_vm8 = vcmp.eq.s32.totalorder %v9550_v25, %v12903_v51 }
 0x9a8   :  { %vm8543_vm14 = vmpackc.low %vm4342_vm5, %vm4340_vm9  ;;  %vm4388_vm9 = vcmp.eq.s32.totalorder %v9427_v11, %v12903_v51  ;;  %vm4390_vm5 = vcmp.eq.s32.totalorder %v9430_v12, %v12903_v51 }
 0x9a9   :  { %8544 = vmatpush.bf16.msk.msra.mxu2 %vm8543_vm14, %v15160_v0  ;;  %vm4622_vm14 = vcmp.eq.s32.totalorder %v9421_v9, %v12961_v41  ;;  %vm8553_vm4 = vmpackc.low %vm4386_vm10, %vm4384_vm6  ;;  %vm4606_vm6 = vcmp.eq.s32.totalorder %v9574_v26, %v12961_v41  ;;  %vm4608_vm10 = vcmp.eq.s32.totalorder %v9577_v27, %v12961_v41 }
 0x9aa   :  { %4512 = vmatmul.bf16.vlgmr.msra.gmra.mxu1 %v9735_v44  ;;  %vm8576_vm2 = vmpackc.low %vm4624_vm3, %vm4622_vm14  ;;  %vm4610_vm3 = vcmp.eq.s32.totalorder %v9536_v22, %v12961_v41 }
 0x9ad   :  { %8546 = vmatpush.bf16.msk.msra.mxu2 %vm8545_vm15, %v15160_v0  ;;  %vm8551_vm15 = vmpackc.low %vm4390_vm5, %vm4388_vm9  ;;  %vm4382_vm9 = vcmp.eq.s32.totalorder %v9512_v21, %v12903_v51 }
 0x9b1   :  { %8548 = vmatpush.bf16.msk.msra.mxu2 %vm8547_vm1, %v15160_v0  ;;  %vm15182_vm1 = vcmask 64512  }
 0x9b4   :  { %4525 = vmatmul.bf16.vlgmr.msra.gmra.mxu2 %v9728_v43 }
 0x9b5   :  { %8575 = vmatpush.bf16.msk.msrb.mxu2 %vm8574_vm12, %v15160_v0  ;;  %vm4614_vm12 = vcmp.eq.s32.totalorder %v9492_v18, %v12961_v41 }
 0x9b9   :  { %8577 = vmatpush.bf16.msk.msrb.mxu2 %vm8576_vm2, %v15160_v0  ;;  %vm4612_vm2 = vcmp.eq.s32.totalorder %v9539_v23, %v12961_v41 }
 0x9ba   :  { %vm8582_vm7 = vmpackc.low %vm4612_vm2, %vm4610_vm3 }
 0x9bd   :  { %8579 = vmatpush.bf16.msk.msrb.mxu2 %vm8578_vm13, %v15160_v0  ;;  %vm4372_vm13 = vcmp.eq.s32.totalorder %v9585_v28, %v12903_v51 }
 0x9e7   :  { %v4051_v50 = vpop.f32.mrf.mxu1 }
 0x9e8   :  { %v12918_v52 = vadd.f32 %v4051_v50, %v12719_v49 }
 0x9ef   :  { %v12949_v49 = vpop.f32.mrf.mxu1 }
 0x9fd   :  { %v12952_v56 = vpop.f32.mrf.mxu0 }
 0xa07   :  { %v4272_v38 = vpop.f32.mrf.mxu1 }
 0xa08   :  { %v4273_v50 = vadd.f32 %v4272_v38, %v4259_v46  ;;  %v4502_v38 = vpop.f32.mrf.mxu0 }
 0xa0a   :  { %v4280_v13 = vpack.c.bf16 %v4273_v50, %v4273_v50 }
 0xa0c   :  { %v4293_v3 = vsel %vm15181_vm0, %v4280_v13, 0  ;;  %vm4380_vm0 = vcmp.eq.s32.totalorder %v9509_v20, %v12903_v51 }
 0xa0d   :  { %v4304_v46 = vpop.f32.mrf.mxu2  ;;  %4316 = vmatpush.bf16.msrb.mxu3 %v4293_v3  ;;  %vm8555_vm14 = vmpackc.low %vm4382_vm9, %vm4380_vm0  ;;  %vm4602_vm0 = vcmp.eq.s32.totalorder %v9612_v30, %v12961_v41  ;;  %vm4604_vm9 = vcmp.eq.s32.totalorder %v9615_v31, %v12961_v41 }
 0xa0e   :  { %v12982_v50 = vadd.f32 %v4304_v46, %v12753_v59  ;;  %vm8586_vm3 = vmpackc.low %vm4604_vm9, %vm4602_vm0  ;;  %vm4654_vm0 = vcmp.eq.s32.totalorder %v9427_v11, %v12961_v41  ;;  %vm4656_vm9 = vcmp.eq.s32.totalorder %v9430_v12, %v12961_v41 }
 0xa0f   :  { %v4274_v13 = vpop.f32.mrf.mxu1 }
 0xa10   :  { %8499 = vmatmul.msk.bf16.vlgmr.msrb.gmra.mxu3 %vm15182_vm1, %v12858_v61 }
 0xa11   :  { %8550 = vmatpush.bf16.msk.msra.mxu3 %vm8549_vm11, %v15160_v0  ;;  %vm4616_vm11 = vcmp.eq.s32.totalorder %v9495_v19, %v12961_v41 }
 0xa12   :  { %vm8580_vm5 = vmpackc.low %vm4616_vm11, %vm4614_vm12 }
 0xa13   :  { %8581 = vmatpush.bf16.msk.msrb.mxu2 %vm8580_vm5, %v15160_v0  ;;  %vm8584_vm12 = vmpackc.low %vm4608_vm10, %vm4606_vm6  ;;  %vm4368_vm5 = vcmp.eq.s32.totalorder %v9623_v32, %v12903_v51  ;;  %vm4658_vm10 = vcmp.eq.s32.totalorder %v9415_v7, %v12961_v41 }
 0xa15   :  { %8552 = vmatpush.bf16.msk.msra.mxu3 %vm8551_vm15, %v15160_v0  ;;  %vm4376_vm15 = vcmp.eq.s32.totalorder %v9547_v24, %v12903_v51  ;;  %v13101_v38 = vpop.f32.mrf.mxu2 }
 0xa16   :  { %vm8557_vm1 = vmpackc.low %vm4378_vm8, %vm4376_vm15  ;;  %vm4598_vm15 = vcmp.eq.s32.totalorder %v9402_v2, %v12961_v41  ;;  %vm4600_vm8 = vcmp.eq.s32.totalorder %v9650_v34, %v12961_v41  ;;  %15185 = vst [vmem:[#allocation20_spill] sm:$0xff] %v13101_v38 }
 0xa17   :  { %8583 = vmatpush.bf16.msk.msrb.mxu2 %vm8582_vm7, %v15160_v0  ;;  %vm4364_vm7 = vcmp.eq.s32.totalorder %v9658_v35, %v12903_v51  ;;  %vm8588_vm6 = vmpackc.low %vm4600_vm8, %vm4598_vm15  ;;  %vm4646_vm8 = vcmp.eq.s32.totalorder %v9509_v20, %v12961_v41 }
 0xa19   :  { %8554 = vmatpush.bf16.msk.msra.mxu3 %vm8553_vm4, %v15160_v0  ;;  %vm4374_vm4 = vcmp.eq.s32.totalorder %v9588_v29, %v12903_v51 }
 0xa1a   :  { %vm8559_vm11 = vmpackc.low %vm4374_vm4, %vm4372_vm13  ;;  %vm4660_vm13 = vcmp.eq.s32.totalorder %v9418_v8, %v12961_v41 }
 0xa1b   :  { %8585 = vmatpush.bf16.msk.msrb.mxu2 %vm8584_vm12, %v15160_v0  ;;  %vm8590_vm12 = vmpackc.low %vm4660_vm13, %vm4658_vm10  ;;  %vm4644_vm10 = vcmp.eq.s32.totalorder %v9550_v25, %v12961_v41 }
 0xa1d   :  { %8556 = vmatpush.bf16.msk.msra.mxu3 %vm8555_vm14, %v15160_v0  ;;  %vm4370_vm14 = vcmp.eq.s32.totalorder %v9626_v33, %v12903_v51 }
 0xa1e   :  { %vm8561_vm2 = vmpackc.low %vm4370_vm14, %vm4368_vm5  ;;  %vm15184_vm14 = vcmask 64512  }
 0xa1f   :  { %8587 = vmatpush.bf16.msk.msrb.mxu2 %vm8586_vm3, %v15160_v0  ;;  %vm8592_vm5 = vmpackc.low %vm4656_vm9, %vm4654_vm0  ;;  %vm4650_vm3 = vcmp.eq.s32.totalorder %v9470_v16, %v12961_v41  ;;  %vm4634_vm0 = vcmp.eq.s32.totalorder %v9623_v32, %v12961_v41  ;;  %vm4636_vm9 = vcmp.eq.s32.totalorder %v9626_v33, %v12961_v41 }
 0xa21   :  { %8558 = vmatpush.bf16.msk.msra.mxu3 %vm8557_vm1, %v15160_v0  ;;  %vm4366_vm1 = vcmp.eq.s32.totalorder %v9661_v36, %v12903_v51  ;;  %v13057_v51 = vld [vmem:[%s15064_s2 + $0x80] sm:$0xff] }
 0xa22   :  { %vm8563_vm4 = vmpackc.low %vm4366_vm1, %vm4364_vm7  ;;  %vm4648_vm7 = vcmp.eq.s32.totalorder %v9512_v21, %v12961_v41 }
 0xa23   :  { %8589 = vmatpush.bf16.msk.msrb.mxu2 %vm8588_vm6, %v15160_v0  ;;  %vm8596_vm1 = vmpackc.low %vm4648_vm7, %vm4646_vm8  ;;  %vm4642_vm6 = vcmp.eq.s32.totalorder %v9547_v24, %v12961_v41 }
 0xa24   :  { %vm8598_vm13 = vmpackc.low %vm4644_vm10, %vm4642_vm6 }
 0xa25   :  { %8560 = vmatpush.bf16.msk.msra.mxu3 %vm8559_vm11, %v15160_v0  ;;  %vm15183_vm11 = vcmask 1043456  }
 0xa26   :  { %4766 = vmatmul.bf16.vlgmr.msrb.gmra.mxu2 %v9728_v43 }
 0xa27   :  { %v4513_v3 = vpop.f32.mrf.mxu1 }
 0xa28   :  { %v4514_v59 = vadd.f32 %v4513_v3, %v12952_v56  ;;  %v13104_v3 = vperm.slane %v12958_v37, 1 }
 0xa29   :  { %8562 = vmatpush.bf16.msk.msra.mxu3 %vm8561_vm2, %v15160_v0  ;;  %vm4652_vm2 = vcmp.eq.s32.totalorder %v9473_v17, %v12961_v41 }
 0xa2a   :  { %v4546_v61 = vpack.c.bf16 %v4514_v59, %v4514_v59  ;;  %vm8594_vm15 = vmpackc.low %vm4652_vm2, %vm4650_vm3  ;;  %vm4632_vm3 = vcmp.eq.s32.totalorder %v9661_v36, %v12961_v41  ;;  %vm4629_vm8 = vcmp.eq.s32.totalorder %v9412_v6, %v13104_v3  ;;  %vm4625_vm6 = vcmp.eq.s32.totalorder %v9424_v10, %v13104_v3 }
 0xa2c   :  { %v4557_v46 = vsel %vm15183_vm11, %v4546_v61, 0 }
 0xa2d   :  { %8564 = vmatpush.bf16.msk.msra.mxu3 %vm8563_vm4, %v15160_v0  ;;  %4569 = vmatpush.bf16.msrb.mxu0 %v4557_v46  ;;  %vm4638_vm4 = vcmp.eq.s32.totalorder %v9585_v28, %v12961_v41 }
 0xa2f   :  { %v4515_v56 = vpop.f32.mrf.mxu1 }
 0xa30   :  { %4538 = vmatmul.bf16.vlgmr.msra.gmra.mxu3 %v9735_v44  ;;  %8571 = vmatmul.msk.bf16.vlgmr.msrb.gmra.mxu0 %vm15184_vm14, %v13057_v51  ;;  %vm4630_vm14 = vcmp.eq.s32.totalorder %v9658_v35, %v12961_v41 }
 0xa31   :  { %8591 = vmatpush.bf16.msk.msrb.mxu3 %vm8590_vm12, %v15160_v0  ;;  %vm4640_vm12 = vcmp.eq.s32.totalorder %v9588_v29, %v12961_v41  ;;  %vm8604_vm2 = vmpackc.low %vm4632_vm3, %vm4630_vm14  ;;  %vm4613_vm14 = vcmp.eq.s32.totalorder %v9539_v23, %v13104_v3 }
 0xa32   :  { %vm8600_vm11 = vmpackc.low %vm4640_vm12, %vm4638_vm4  ;;  %vm4621_vm4 = vcmp.eq.s32.totalorder %v9467_v15, %v13104_v3 }
 0xa35   :  { %8593 = vmatpush.bf16.msk.msrb.mxu3 %vm8592_vm5, %v15160_v0  ;;  %vm8602_vm5 = vmpackc.low %vm4636_vm9, %vm4634_vm0  ;;  %vm4617_vm0 = vcmp.eq.s32.totalorder %v9495_v19, %v13104_v3 }
 0xa37   :  { %v4526_v13 = vpop.f32.mrf.mxu2 }
 0xa39   :  { %8595 = vmatpush.bf16.msk.msrb.mxu3 %vm8594_vm15, %v15160_v0  ;;  %vm4627_vm15 = vcmp.eq.s32.totalorder %v9409_v5, %v13104_v3 }
 0xa3a   :  { %vm8606_vm7 = vmpackc.low %vm4629_vm8, %vm4627_vm15  ;;  %vm4609_vm15 = vcmp.eq.s32.totalorder %v9577_v27, %v13104_v3 }
 0xa3b   :  { %8607 = vmatpush.bf16.msk.msra.mxu0 %vm8606_vm7, %v15160_v0  ;;  %vm4603_vm7 = vcmp.eq.s32.totalorder %v9612_v30, %v13104_v3 }
 0xa3d   :  { %8597 = vmatpush.bf16.msk.msrb.mxu3 %vm8596_vm1, %v15160_v0  ;;  %vm4623_vm1 = vcmp.eq.s32.totalorder %v9421_v9, %v13104_v3 }
 0xa3e   :  { %vm8608_vm10 = vmpackc.low %vm4625_vm6, %vm4623_vm1  ;;  %vm4605_vm1 = vcmp.eq.s32.totalorder %v9615_v31, %v13104_v3 }
 0xa3f   :  { %v4528_v41 = vpop.f32.mrf.mxu2  ;;  %8609 = vmatpush.bf16.msk.msra.mxu0 %vm8608_vm10, %v15160_v0  ;;  %vm8618_vm6 = vmpackc.low %vm4605_vm1, %vm4603_vm7  ;;  %vm4599_vm10 = vcmp.eq.s32.totalorder %v9402_v2, %v13104_v3 }
 0xa40   :  { %v13160_v41 = vld [vmem:[%s15062_s0 + $0x24] sm:$0x3] }
 0xa41   :  { %8599 = vmatpush.bf16.msk.msrb.mxu3 %vm8598_vm13, %v15160_v0  ;;  %vm4619_vm13 = vcmp.eq.s32.totalorder %v9464_v14, %v13104_v3  ;;  %v13163_v38 = vperm.slane %v13160_v41, 0 }
 0xa42   :  { %vm8610_vm12 = vmpackc.low %vm4621_vm4, %vm4619_vm13  ;;  %vm4601_vm13 = vcmp.eq.s32.totalorder %v9650_v34, %v13104_v3 }
 0xa43   :  { %8611 = vmatpush.bf16.msk.msra.mxu0 %vm8610_vm12, %v15160_v0  ;;  %vm8620_vm4 = vmpackc.low %vm4601_vm13, %vm4599_vm10  ;;  %vm4659_vm12 = vcmp.eq.s32.totalorder %v9415_v7, %v13104_v3  ;;  %vm4891_vm7 = vcmp.eq.s32.totalorder %v9424_v10, %v13163_v38  ;;  %vm4885_vm10 = vcmp.eq.s32.totalorder %v9464_v14, %v13163_v38  ;;  %vm4887_vm13 = vcmp.eq.s32.totalorder %v9467_v15, %v13163_v38 }
 0xa45   :  { %8601 = vmatpush.bf16.msk.msrb.mxu3 %vm8600_vm11, %v15160_v0  ;;  %vm4615_vm11 = vcmp.eq.s32.totalorder %v9492_v18, %v13104_v3 }
 0xa46   :  { %vm8612_vm9 = vmpackc.low %vm4617_vm0, %vm4615_vm11  ;;  %vm4661_vm11 = vcmp.eq.s32.totalorder %v9418_v8, %v13104_v3  ;;  %vm4893_vm0 = vcmp.eq.s32.totalorder %v9409_v5, %v13163_v38 }
 0xa47   :  { %8613 = vmatpush.bf16.msk.msra.mxu0 %vm8612_vm9, %v15160_v0  ;;  %vm4895_vm9 = vcmp.eq.s32.totalorder %v9412_v6, %v13163_v38 }
 0xa49   :  { %8603 = vmatpush.bf16.msk.msrb.mxu3 %vm8602_vm5, %v15160_v0  ;;  %vm4611_vm5 = vcmp.eq.s32.totalorder %v9536_v22, %v13104_v3 }
 0xa4a   :  { %vm8614_vm3 = vmpackc.low %vm4613_vm14, %vm4611_vm5 }
 0xa4b   :  { %8615 = vmatpush.bf16.msk.msra.mxu0 %vm8614_vm3, %v15160_v0  ;;  %vm8647_vm5 = vmpackc.low %vm4895_vm9, %vm4893_vm0  ;;  %vm15186_vm3 = vcmask 1043456  }
 0xa4c   :  { %vm8622_vm14 = vmpackc.low %vm4661_vm11, %vm4659_vm12  ;;  %vm4651_vm12 = vcmp.eq.s32.totalorder %v9470_v16, %v13104_v3  ;;  %vm4653_vm11 = vcmp.eq.s32.totalorder %v9473_v17, %v13104_v3 }
 0xa4d   :  { %8605 = vmatpush.bf16.msk.msrb.mxu3 %vm8604_vm2, %v15160_v0  ;;  %vm4607_vm2 = vcmp.eq.s32.totalorder %v9574_v26, %v13104_v3  ;;  %vm8651_vm0 = vmpackc.low %vm4887_vm13, %vm4885_vm10  ;;  %vm4645_vm10 = vcmp.eq.s32.totalorder %v9550_v25, %v13104_v3 }
 0xa4e   :  { %vm8616_vm8 = vmpackc.low %vm4609_vm15, %vm4607_vm2  ;;  %vm4655_vm2 = vcmp.eq.s32.totalorder %v9427_v11, %v13104_v3  ;;  %vm4657_vm15 = vcmp.eq.s32.totalorder %v9430_v12, %v13104_v3 }
 0xa4f   :  { %8617 = vmatpush.bf16.msk.msra.mxu0 %vm8616_vm8, %v15160_v0  ;;  %vm4889_vm8 = vcmp.eq.s32.totalorder %v9421_v9, %v13163_v38  ;;  %vm8626_vm9 = vmpackc.low %vm4653_vm11, %vm4651_vm12  ;;  %vm4873_vm12 = vcmp.eq.s32.totalorder %v9574_v26, %v13163_v38  ;;  %vm4875_vm11 = vcmp.eq.s32.totalorder %v9577_v27, %v13163_v38 }
 0xa50   :  { %4779 = vmatmul.bf16.vlgmr.msrb.gmra.mxu3 %v9735_v44  ;;  %vm8649_vm1 = vmpackc.low %vm4891_vm7, %vm4889_vm8  ;;  %vm4877_vm7 = vcmp.eq.s32.totalorder %v9536_v22, %v13163_v38 }
 0xa53   :  { %8619 = vmatpush.bf16.msk.msra.mxu0 %vm8618_vm6, %v15160_v0  ;;  %vm8624_vm6 = vmpackc.low %vm4657_vm15, %vm4655_vm2  ;;  %vm4649_vm2 = vcmp.eq.s32.totalorder %v9512_v21, %v13104_v3 }
 0xa57   :  { %8621 = vmatpush.bf16.msk.msra.mxu0 %vm8620_vm4, %v15160_v0  ;;  %vm15187_vm4 = vcmask 64512  }
 0xa5a   :  { %4792 = vmatmul.bf16.vlgmr.msra.gmra.mxu0 %v9728_v43 }
 0xa5b   :  { %8648 = vmatpush.bf16.msk.msrb.mxu0 %vm8647_vm5, %v15160_v0  ;;  %vm4881_vm5 = vcmp.eq.s32.totalorder %v9492_v18, %v13163_v38 }
 0xa5f   :  { %8650 = vmatpush.bf16.msk.msrb.mxu0 %vm8649_vm1, %v15160_v0  ;;  %vm4879_vm1 = vcmp.eq.s32.totalorder %v9539_v23, %v13163_v38 }
 0xa60   :  { %vm8655_vm13 = vmpackc.low %vm4879_vm1, %vm4877_vm7 }
 0xa63   :  { %8652 = vmatpush.bf16.msk.msrb.mxu0 %vm8651_vm0, %v15160_v0  ;;  %vm4639_vm0 = vcmp.eq.s32.totalorder %v9585_v28, %v13104_v3 }
 0xa93   :  { %v4318_v59 = vpop.f32.mrf.mxu3 }
 0xa94   :  { %v13117_v37 = vadd.f32 %v4318_v59, %v12918_v52 }
 0xa9b   :  { %v13148_v52 = vpop.f32.mrf.mxu3 }
 0xaa9   :  { %v13154_v56 = vpop.f32.mrf.mxu2 }
 0xaad   :  { %v4571_v61 = vpop.f32.mrf.mxu0 }
 0xaae   :  { %v13151_v46 = vadd.f32 %v4571_v61, %v12982_v50 }
 0xab3   :  { %v4539_v59 = vpop.f32.mrf.mxu3 }
 0xab4   :  { %v4540_v42 = vadd.f32 %v4539_v59, %v4526_v13 }
 0xab6   :  { %v4547_v50 = vpack.c.bf16 %v4540_v42, %v4540_v42  ;;  %v4769_v42 = vpop.f32.mrf.mxu2 }
 0xab7   :  { %v13301_v42 = vperm.slane %v13160_v41, 1 }
 0xab8   :  { %v4560_v61 = vsel %vm15186_vm3, %v4547_v50, 0  ;;  %vm4647_vm3 = vcmp.eq.s32.totalorder %v9509_v20, %v13104_v3 }
 0xab9   :  { %4583 = vmatpush.bf16.msrb.mxu1 %v4560_v61  ;;  %vm8628_vm8 = vmpackc.low %vm4649_vm2, %vm4647_vm3  ;;  %vm4869_vm3 = vcmp.eq.s32.totalorder %v9612_v30, %v13163_v38  ;;  %vm4871_vm2 = vcmp.eq.s32.totalorder %v9615_v31, %v13163_v38 }
 0xaba   :  { %vm8659_vm7 = vmpackc.low %vm4871_vm2, %vm4869_vm3  ;;  %vm4921_vm3 = vcmp.eq.s32.totalorder %v9427_v11, %v13163_v38  ;;  %vm4923_vm2 = vcmp.eq.s32.totalorder %v9430_v12, %v13163_v38 }
 0xabb   :  { %v4541_v13 = vpop.f32.mrf.mxu3 }
 0xabc   :  { %8572 = vmatmul.msk.bf16.vlgmr.msrb.gmra.mxu1 %vm15187_vm4, %v13057_v51  ;;  %v13307_v13 = vpop.f32.mrf.mxu0 }
 0xabd   :  { %8623 = vmatpush.bf16.msk.msra.mxu1 %vm8622_vm14, %v15160_v0  ;;  %vm4883_vm14 = vcmp.eq.s32.totalorder %v9495_v19, %v13163_v38  ;;  %15190 = vst [vmem:[#allocation21_spill] sm:$0xff] %v13307_v13 }
 0xabe   :  { %vm8653_vm15 = vmpackc.low %vm4883_vm14, %vm4881_vm5 }
 0xabf   :  { %8654 = vmatpush.bf16.msk.msrb.mxu0 %vm8653_vm15, %v15160_v0  ;;  %vm8657_vm5 = vmpackc.low %vm4875_vm11, %vm4873_vm12  ;;  %vm4635_vm15 = vcmp.eq.s32.totalorder %v9623_v32, %v13104_v3  ;;  %vm4925_vm11 = vcmp.eq.s32.totalorder %v9415_v7, %v13163_v38 }
 0xac1   :  { %8625 = vmatpush.bf16.msk.msra.mxu1 %vm8624_vm6, %v15160_v0  ;;  %vm4643_vm6 = vcmp.eq.s32.totalorder %v9547_v24, %v13104_v3 }
 0xac2   :  { %vm8630_vm4 = vmpackc.low %vm4645_vm10, %vm4643_vm6  ;;  %vm4865_vm6 = vcmp.eq.s32.totalorder %v9402_v2, %v13163_v38  ;;  %vm4867_vm10 = vcmp.eq.s32.totalorder %v9650_v34, %v13163_v38 }
 0xac3   :  { %8656 = vmatpush.bf16.msk.msrb.mxu0 %vm8655_vm13, %v15160_v0  ;;  %vm4631_vm13 = vcmp.eq.s32.totalorder %v9658_v35, %v13104_v3  ;;  %vm8661_vm12 = vmpackc.low %vm4867_vm10, %vm4865_vm6  ;;  %vm4913_vm10 = vcmp.eq.s32.totalorder %v9509_v20, %v13163_v38 }
 0xac5   :  { %8627 = vmatpush.bf16.msk.msra.mxu1 %vm8626_vm9, %v15160_v0  ;;  %vm4641_vm9 = vcmp.eq.s32.totalorder %v9588_v29, %v13104_v3 }
 0xac6   :  { %vm8632_vm14 = vmpackc.low %vm4641_vm9, %vm4639_vm0  ;;  %vm4927_vm0 = vcmp.eq.s32.totalorder %v9418_v8, %v13163_v38 }
 0xac7   :  { %8658 = vmatpush.bf16.msk.msrb.mxu0 %vm8657_vm5, %v15160_v0  ;;  %vm8663_vm5 = vmpackc.low %vm4927_vm0, %vm4925_vm11  ;;  %vm4911_vm11 = vcmp.eq.s32.totalorder %v9550_v25, %v13163_v38 }
 0xac9   :  { %8629 = vmatpush.bf16.msk.msra.mxu1 %vm8628_vm8, %v15160_v0  ;;  %vm4637_vm8 = vcmp.eq.s32.totalorder %v9626_v33, %v13104_v3 }
 0xaca   :  { %vm8634_vm1 = vmpackc.low %vm4637_vm8, %vm4635_vm15  ;;  %vm15189_vm8 = vcmask 64512  }
 0xacb   :  { %8660 = vmatpush.bf16.msk.msrb.mxu0 %vm8659_vm7, %v15160_v0  ;;  %vm8665_vm15 = vmpackc.low %vm4923_vm2, %vm4921_vm3  ;;  %vm4917_vm7 = vcmp.eq.s32.totalorder %v9470_v16, %v13163_v38  ;;  %vm4901_vm3 = vcmp.eq.s32.totalorder %v9623_v32, %v13163_v38  ;;  %vm4903_vm2 = vcmp.eq.s32.totalorder %v9626_v33, %v13163_v38 }
 0xacd   :  { %8631 = vmatpush.bf16.msk.msra.mxu1 %vm8630_vm4, %v15160_v0  ;;  %vm4633_vm4 = vcmp.eq.s32.totalorder %v9661_v36, %v13104_v3  ;;  %v13256_v3 = vld [vmem:[%s15064_s2 + $0x88] sm:$0xff] }
 0xace   :  { %vm8636_vm9 = vmpackc.low %vm4633_vm4, %vm4631_vm13  ;;  %vm4915_vm13 = vcmp.eq.s32.totalorder %v9512_v21, %v13163_v38 }
 0xacf   :  { %8662 = vmatpush.bf16.msk.msrb.mxu0 %vm8661_vm12, %v15160_v0  ;;  %vm8669_vm4 = vmpackc.low %vm4915_vm13, %vm4913_vm10  ;;  %vm4909_vm12 = vcmp.eq.s32.totalorder %v9547_v24, %v13163_v38  ;;  %vm4896_vm10 = vcmp.eq.s32.totalorder %v9412_v6, %v13301_v42 }
 0xad0   :  { %vm8671_vm0 = vmpackc.low %vm4911_vm11, %vm4909_vm12  ;;  %vm4892_vm12 = vcmp.eq.s32.totalorder %v9424_v10, %v13301_v42 }
 0xad1   :  { %8633 = vmatpush.bf16.msk.msra.mxu1 %vm8632_vm14, %v15160_v0  ;;  %vm15188_vm14 = vcmask 1043456  }
 0xad2   :  { %5033 = vmatmul.bf16.vlgmr.msrb.gmra.mxu0 %v9728_v43 }
 0xad3   :  { %v4780_v51 = vpop.f32.mrf.mxu3 }
 0xad4   :  { %v4781_v59 = vadd.f32 %v4780_v51, %v13154_v56 }
 0xad5   :  { %8635 = vmatpush.bf16.msk.msra.mxu1 %vm8634_vm1, %v15160_v0  ;;  %vm4919_vm1 = vcmp.eq.s32.totalorder %v9473_v17, %v13163_v38 }
 0xad6   :  { %v4813_v50 = vpack.c.bf16 %v4781_v59, %v4781_v59  ;;  %vm8667_vm6 = vmpackc.low %vm4919_vm1, %vm4917_vm7  ;;  %vm4899_vm7 = vcmp.eq.s32.totalorder %v9661_v36, %v13163_v38 }
 0xad8   :  { %v4824_v61 = vsel %vm15188_vm14, %v4813_v50, 0 }
 0xad9   :  { %8637 = vmatpush.bf16.msk.msra.mxu1 %vm8636_vm9, %v15160_v0  ;;  %4836 = vmatpush.bf16.msra.mxu2 %v4824_v61  ;;  %vm4905_vm9 = vcmp.eq.s32.totalorder %v9585_v28, %v13163_v38  ;;  %v13356_v61 = vld [vmem:[%s15062_s0 + $0x26] sm:$0x3] }
 0xadb   :  { %v4782_v56 = vpop.f32.mrf.mxu3 }
 0xadc   :  { %4805 = vmatmul.bf16.vlgmr.msra.gmra.mxu1 %v9735_v44  ;;  %8644 = vmatmul.msk.bf16.vlgmr.msra.gmra.mxu2 %vm15189_vm8, %v13256_v3  ;;  %vm4897_vm8 = vcmp.eq.s32.totalorder %v9658_v35, %v13163_v38 }
 0xadd   :  { %8664 = vmatpush.bf16.msk.msrb.mxu1 %vm8663_vm5, %v15160_v0  ;;  %vm4907_vm5 = vcmp.eq.s32.totalorder %v9588_v29, %v13163_v38  ;;  %vm8677_vm1 = vmpackc.low %vm4899_vm7, %vm4897_vm8  ;;  %v4793_v38 = vpop.f32.mrf.mxu0  ;;  %vm4880_vm8 = vcmp.eq.s32.totalorder %v9539_v23, %v13301_v42 }
 0xade   :  { %vm8673_vm14 = vmpackc.low %vm4907_vm5, %vm4905_vm9  ;;  %vm4888_vm9 = vcmp.eq.s32.totalorder %v9467_v15, %v13301_v42 }
 0xae1   :  { %8666 = vmatpush.bf16.msk.msrb.mxu1 %vm8665_vm15, %v15160_v0  ;;  %vm8675_vm15 = vmpackc.low %vm4903_vm2, %vm4901_vm3  ;;  %vm4884_vm3 = vcmp.eq.s32.totalorder %v9495_v19, %v13301_v42 }
 0xae5   :  { %8668 = vmatpush.bf16.msk.msrb.mxu1 %vm8667_vm6, %v15160_v0  ;;  %vm4894_vm6 = vcmp.eq.s32.totalorder %v9409_v5, %v13301_v42  ;;  %v4795_v51 = vpop.f32.mrf.mxu0 }
 0xae6   :  { %vm8679_vm13 = vmpackc.low %vm4896_vm10, %vm4894_vm6  ;;  %vm4876_vm6 = vcmp.eq.s32.totalorder %v9577_v27, %v13301_v42  ;;  %v13359_v51 = vperm.slane %v13356_v61, 0 }
 0xae7   :  { %8680 = vmatpush.bf16.msk.msrb.mxu2 %vm8679_vm13, %v15160_v0  ;;  %vm4870_vm13 = vcmp.eq.s32.totalorder %v9612_v30, %v13301_v42 }
 0xae9   :  { %8670 = vmatpush.bf16.msk.msrb.mxu1 %vm8669_vm4, %v15160_v0  ;;  %vm4890_vm4 = vcmp.eq.s32.totalorder %v9421_v9, %v13301_v42 }
 0xaea   :  { %vm8681_vm11 = vmpackc.low %vm4892_vm12, %vm4890_vm4  ;;  %vm4872_vm4 = vcmp.eq.s32.totalorder %v9615_v31, %v13301_v42 }
 0xaeb   :  { %8682 = vmatpush.bf16.msk.msrb.mxu2 %vm8681_vm11, %v15160_v0  ;;  %vm8691_vm12 = vmpackc.low %vm4872_vm4, %vm4870_vm13  ;;  %vm4866_vm11 = vcmp.eq.s32.totalorder %v9402_v2, %v13301_v42  ;;  %vm5158_vm13 = vcmp.eq.s32.totalorder %v9424_v10, %v13359_v51 }
 0xaed   :  { %8672 = vmatpush.bf16.msk.msrb.mxu1 %vm8671_vm0, %v15160_v0  ;;  %vm4886_vm0 = vcmp.eq.s32.totalorder %v9464_v14, %v13301_v42 }
 0xaee   :  { %vm8683_vm5 = vmpackc.low %vm4888_vm9, %vm4886_vm0  ;;  %vm4868_vm0 = vcmp.eq.s32.totalorder %v9650_v34, %v13301_v42 }
 0xaef   :  { %8684 = vmatpush.bf16.msk.msrb.mxu2 %vm8683_vm5, %v15160_v0  ;;  %vm8693_vm9 = vmpackc.low %vm4868_vm0, %vm4866_vm11  ;;  %vm4926_vm5 = vcmp.eq.s32.totalorder %v9415_v7, %v13301_v42  ;;  %vm5152_vm11 = vcmp.eq.s32.totalorder %v9464_v14, %v13359_v51  ;;  %vm5154_vm0 = vcmp.eq.s32.totalorder %v9467_v15, %v13359_v51 }
 0xaf1   :  { %8674 = vmatpush.bf16.msk.msrb.mxu1 %vm8673_vm14, %v15160_v0  ;;  %vm4882_vm14 = vcmp.eq.s32.totalorder %v9492_v18, %v13301_v42 }
 0xaf2   :  { %vm8685_vm2 = vmpackc.low %vm4884_vm3, %vm4882_vm14  ;;  %vm4928_vm14 = vcmp.eq.s32.totalorder %v9418_v8, %v13301_v42  ;;  %vm5160_vm3 = vcmp.eq.s32.totalorder %v9409_v5, %v13359_v51 }
 0xaf3   :  { %8686 = vmatpush.bf16.msk.msrb.mxu2 %vm8685_vm2, %v15160_v0  ;;  %vm5162_vm2 = vcmp.eq.s32.totalorder %v9412_v6, %v13359_v51 }
 0xaf5   :  { %8676 = vmatpush.bf16.msk.msrb.mxu1 %vm8675_vm15, %v15160_v0  ;;  %vm4878_vm15 = vcmp.eq.s32.totalorder %v9536_v22, %v13301_v42 }
 0xaf6   :  { %vm8687_vm7 = vmpackc.low %vm4880_vm8, %vm4878_vm15 }
 0xaf7   :  { %8688 = vmatpush.bf16.msk.msrb.mxu2 %vm8687_vm7, %v15160_v0  ;;  %vm8720_vm15 = vmpackc.low %vm5162_vm2, %vm5160_vm3  ;;  %vm15191_vm7 = vcmask 1043456  }
 0xaf8   :  { %vm8695_vm8 = vmpackc.low %vm4928_vm14, %vm4926_vm5  ;;  %vm4918_vm5 = vcmp.eq.s32.totalorder %v9470_v16, %v13301_v42  ;;  %vm4920_vm14 = vcmp.eq.s32.totalorder %v9473_v17, %v13301_v42 }
 0xaf9   :  { %8678 = vmatpush.bf16.msk.msrb.mxu1 %vm8677_vm1, %v15160_v0  ;;  %vm4874_vm1 = vcmp.eq.s32.totalorder %v9574_v26, %v13301_v42  ;;  %vm8724_vm3 = vmpackc.low %vm5154_vm0, %vm5152_vm11  ;;  %vm4912_vm11 = vcmp.eq.s32.totalorder %v9550_v25, %v13301_v42 }
 0xafa   :  { %vm8689_vm10 = vmpackc.low %vm4876_vm6, %vm4874_vm1  ;;  %vm4922_vm1 = vcmp.eq.s32.totalorder %v9427_v11, %v13301_v42  ;;  %vm4924_vm6 = vcmp.eq.s32.totalorder %v9430_v12, %v13301_v42 }
 0xafb   :  { %8690 = vmatpush.bf16.msk.msrb.mxu2 %vm8689_vm10, %v15160_v0  ;;  %vm5156_vm10 = vcmp.eq.s32.totalorder %v9421_v9, %v13359_v51  ;;  %vm8699_vm2 = vmpackc.low %vm4920_vm14, %vm4918_vm5  ;;  %vm5140_vm5 = vcmp.eq.s32.totalorder %v9574_v26, %v13359_v51  ;;  %vm5142_vm14 = vcmp.eq.s32.totalorder %v9577_v27, %v13359_v51 }
 0xafc   :  { %5046 = vmatmul.bf16.vlgmr.msrb.gmra.mxu1 %v9735_v44  ;;  %vm8722_vm4 = vmpackc.low %vm5158_vm13, %vm5156_vm10  ;;  %vm5144_vm13 = vcmp.eq.s32.totalorder %v9536_v22, %v13359_v51 }
 0xaff   :  { %8692 = vmatpush.bf16.msk.msrb.mxu2 %vm8691_vm12, %v15160_v0  ;;  %vm8697_vm12 = vmpackc.low %vm4924_vm6, %vm4922_vm1  ;;  %vm4916_vm1 = vcmp.eq.s32.totalorder %v9512_v21, %v13301_v42 }
 0xb03   :  { %8694 = vmatpush.bf16.msk.msrb.mxu2 %vm8693_vm9, %v15160_v0  ;;  %vm15192_vm9 = vcmask 64512  }
 0xb06   :  { %5059 = vmatmul.bf16.vlgmr.msrb.gmra.mxu2 %v9728_v43 }
 0xb07   :  { %8721 = vmatpush.bf16.msk.msra.mxu2 %vm8720_vm15, %v15160_v0  ;;  %vm5148_vm15 = vcmp.eq.s32.totalorder %v9492_v18, %v13359_v51 }
 0xb0b   :  { %8723 = vmatpush.bf16.msk.msra.mxu2 %vm8722_vm4, %v15160_v0  ;;  %vm5146_vm4 = vcmp.eq.s32.totalorder %v9539_v23, %v13359_v51 }
 0xb0c   :  { %vm8728_vm0 = vmpackc.low %vm5146_vm4, %vm5144_vm13 }
 0xb0f   :  { %8725 = vmatpush.bf16.msk.msra.mxu2 %vm8724_vm3, %v15160_v0  ;;  %vm4906_vm3 = vcmp.eq.s32.totalorder %v9585_v28, %v13301_v42 }
 0xb39   :  { %v4585_v41 = vpop.f32.mrf.mxu1 }
 0xb3a   :  { %v13316_v59 = vadd.f32 %v4585_v41, %v13117_v37 }
 0xb41   :  { %v13347_v37 = vpop.f32.mrf.mxu1 }
 0xb4f   :  { %v13350_v50 = vpop.f32.mrf.mxu0 }
 0xb59   :  { %v4806_v56 = vpop.f32.mrf.mxu1 }
 0xb5a   :  { %v4807_v41 = vadd.f32 %v4806_v56, %v4793_v38  ;;  %v5036_v56 = vpop.f32.mrf.mxu0 }
 0xb5c   :  { %v4814_v13 = vpack.c.bf16 %v4807_v41, %v4807_v41 }
 0xb5e   :  { %v4827_v57 = vsel %vm15191_vm7, %v4814_v13, 0  ;;  %vm4914_vm7 = vcmp.eq.s32.totalorder %v9509_v20, %v13301_v42 }
 0xb5f   :  { %v4838_v38 = vpop.f32.mrf.mxu2  ;;  %4850 = vmatpush.bf16.msra.mxu3 %v4827_v57  ;;  %vm8701_vm10 = vmpackc.low %vm4916_vm1, %vm4914_vm7  ;;  %vm5136_vm7 = vcmp.eq.s32.totalorder %v9612_v30, %v13359_v51  ;;  %vm5138_vm1 = vcmp.eq.s32.totalorder %v9615_v31, %v13359_v51 }
 0xb60   :  { %v13380_v41 = vadd.f32 %v4838_v38, %v13151_v46  ;;  %vm8732_vm13 = vmpackc.low %vm5138_vm1, %vm5136_vm7  ;;  %vm5188_vm7 = vcmp.eq.s32.totalorder %v9427_v11, %v13359_v51  ;;  %vm5190_vm1 = vcmp.eq.s32.totalorder %v9430_v12, %v13359_v51 }
 0xb61   :  { %v4808_v13 = vpop.f32.mrf.mxu1 }
 0xb62   :  { %8645 = vmatmul.msk.bf16.vlgmr.msra.gmra.mxu3 %vm15192_vm9, %v13256_v3 }
 0xb63   :  { %8696 = vmatpush.bf16.msk.msrb.mxu3 %vm8695_vm8, %v15160_v0  ;;  %vm5150_vm8 = vcmp.eq.s32.totalorder %v9495_v19, %v13359_v51 }
 0xb64   :  { %vm8726_vm6 = vmpackc.low %vm5150_vm8, %vm5148_vm15 }
 0xb65   :  { %8727 = vmatpush.bf16.msk.msra.mxu2 %vm8726_vm6, %v15160_v0  ;;  %vm8730_vm15 = vmpackc.low %vm5142_vm14, %vm5140_vm5  ;;  %vm4902_vm6 = vcmp.eq.s32.totalorder %v9623_v32, %v13301_v42  ;;  %vm5192_vm14 = vcmp.eq.s32.totalorder %v9415_v7, %v13359_v51 }
 0xb67   :  { %8698 = vmatpush.bf16.msk.msrb.mxu3 %vm8697_vm12, %v15160_v0  ;;  %vm4910_vm12 = vcmp.eq.s32.totalorder %v9547_v24, %v13301_v42  ;;  %v13499_v56 = vpop.f32.mrf.mxu2 }
 0xb68   :  { %vm8703_vm9 = vmpackc.low %vm4912_vm11, %vm4910_vm12  ;;  %vm5132_vm12 = vcmp.eq.s32.totalorder %v9402_v2, %v13359_v51  ;;  %vm5134_vm11 = vcmp.eq.s32.totalorder %v9650_v34, %v13359_v51  ;;  %15195 = vst [vmem:[#allocation22_spill] sm:$0xff] %v13499_v56 }
 0xb69   :  { %8729 = vmatpush.bf16.msk.msra.mxu2 %vm8728_vm0, %v15160_v0  ;;  %vm4898_vm0 = vcmp.eq.s32.totalorder %v9658_v35, %v13301_v42  ;;  %vm8734_vm5 = vmpackc.low %vm5134_vm11, %vm5132_vm12  ;;  %vm5180_vm11 = vcmp.eq.s32.totalorder %v9509_v20, %v13359_v51 }
 0xb6b   :  { %8700 = vmatpush.bf16.msk.msrb.mxu3 %vm8699_vm2, %v15160_v0  ;;  %vm4908_vm2 = vcmp.eq.s32.totalorder %v9588_v29, %v13301_v42 }
 0xb6c   :  { %vm8705_vm8 = vmpackc.low %vm4908_vm2, %vm4906_vm3  ;;  %vm5194_vm3 = vcmp.eq.s32.totalorder %v9418_v8, %v13359_v51 }
 0xb6d   :  { %8731 = vmatpush.bf16.msk.msra.mxu2 %vm8730_vm15, %v15160_v0  ;;  %vm8736_vm15 = vmpackc.low %vm5194_vm3, %vm5192_vm14  ;;  %vm5178_vm14 = vcmp.eq.s32.totalorder %v9550_v25, %v13359_v51 }
 0xb6f   :  { %8702 = vmatpush.bf16.msk.msrb.mxu3 %vm8701_vm10, %v15160_v0  ;;  %vm4904_vm10 = vcmp.eq.s32.totalorder %v9626_v33, %v13301_v42 }
 0xb70   :  { %vm8707_vm4 = vmpackc.low %vm4904_vm10, %vm4902_vm6  ;;  %vm15194_vm10 = vcmask 64512  }
 0xb71   :  { %8733 = vmatpush.bf16.msk.msra.mxu2 %vm8732_vm13, %v15160_v0  ;;  %vm8738_vm6 = vmpackc.low %vm5190_vm1, %vm5188_vm7  ;;  %vm5184_vm13 = vcmp.eq.s32.totalorder %v9470_v16, %v13359_v51  ;;  %vm5168_vm7 = vcmp.eq.s32.totalorder %v9623_v32, %v13359_v51  ;;  %vm5170_vm1 = vcmp.eq.s32.totalorder %v9626_v33, %v13359_v51 }
 0xb73   :  { %8704 = vmatpush.bf16.msk.msrb.mxu3 %vm8703_vm9, %v15160_v0  ;;  %vm4900_vm9 = vcmp.eq.s32.totalorder %v9661_v36, %v13301_v42  ;;  %v13455_v42 = vld [vmem:[%s15064_s2 + $0x90] sm:$0xff] }
 0xb74   :  { %vm8709_vm2 = vmpackc.low %vm4900_vm9, %vm4898_vm0  ;;  %vm5182_vm0 = vcmp.eq.s32.totalorder %v9512_v21, %v13359_v51 }
 0xb75   :  { %8735 = vmatpush.bf16.msk.msra.mxu2 %vm8734_vm5, %v15160_v0  ;;  %vm8742_vm9 = vmpackc.low %vm5182_vm0, %vm5180_vm11  ;;  %vm5176_vm5 = vcmp.eq.s32.totalorder %v9547_v24, %v13359_v51 }
 0xb76   :  { %vm8744_vm3 = vmpackc.low %vm5178_vm14, %vm5176_vm5 }
 0xb77   :  { %8706 = vmatpush.bf16.msk.msrb.mxu3 %vm8705_vm8, %v15160_v0  ;;  %vm15193_vm8 = vcmask 1043456  }
 0xb78   :  { %5300 = vmatmul.bf16.vlgmr.msra.gmra.mxu2 %v9728_v43 }
 0xb79   :  { %v5047_v57 = vpop.f32.mrf.mxu1 }
 0xb7a   :  { %v5048_v46 = vadd.f32 %v5047_v57, %v13350_v50  ;;  %v13502_v57 = vperm.slane %v13356_v61, 1 }
 0xb7b   :  { %8708 = vmatpush.bf16.msk.msrb.mxu3 %vm8707_vm4, %v15160_v0  ;;  %vm5186_vm4 = vcmp.eq.s32.totalorder %v9473_v17, %v13359_v51 }
 0xb7c   :  { %v5080_v3 = vpack.c.bf16 %v5048_v46, %v5048_v46  ;;  %vm8740_vm12 = vmpackc.low %vm5186_vm4, %vm5184_vm13  ;;  %vm5166_vm13 = vcmp.eq.s32.totalorder %v9661_v36, %v13359_v51  ;;  %vm5163_vm11 = vcmp.eq.s32.totalorder %v9412_v6, %v13502_v57  ;;  %vm5159_vm5 = vcmp.eq.s32.totalorder %v9424_v10, %v13502_v57 }
 0xb7e   :  { %v5091_v38 = vsel %vm15193_vm8, %v5080_v3, 0 }
 0xb7f   :  { %8710 = vmatpush.bf16.msk.msrb.mxu3 %vm8709_vm2, %v15160_v0  ;;  %5103 = vmatpush.bf16.msra.mxu0 %v5091_v38  ;;  %vm5172_vm2 = vcmp.eq.s32.totalorder %v9585_v28, %v13359_v51 }
 0xb81   :  { %v5049_v50 = vpop.f32.mrf.mxu1 }
 0xb82   :  { %5072 = vmatmul.bf16.vlgmr.msrb.gmra.mxu3 %v9735_v44  ;;  %8717 = vmatmul.msk.bf16.vlgmr.msra.gmra.mxu0 %vm15194_vm10, %v13455_v42  ;;  %vm5164_vm10 = vcmp.eq.s32.totalorder %v9658_v35, %v13359_v51 }
 0xb83   :  { %8737 = vmatpush.bf16.msk.msra.mxu3 %vm8736_vm15, %v15160_v0  ;;  %vm5174_vm15 = vcmp.eq.s32.totalorder %v9588_v29, %v13359_v51  ;;  %vm8750_vm4 = vmpackc.low %vm5166_vm13, %vm5164_vm10  ;;  %vm5147_vm10 = vcmp.eq.s32.totalorder %v9539_v23, %v13502_v57 }
 0xb84   :  { %vm8746_vm8 = vmpackc.low %vm5174_vm15, %vm5172_vm2  ;;  %vm5155_vm2 = vcmp.eq.s32.totalorder %v9467_v15, %v13502_v57 }
 0xb87   :  { %8739 = vmatpush.bf16.msk.msra.mxu3 %vm8738_vm6, %v15160_v0  ;;  %vm8748_vm6 = vmpackc.low %vm5170_vm1, %vm5168_vm7  ;;  %vm5151_vm7 = vcmp.eq.s32.totalorder %v9495_v19, %v13502_v57 }
 0xb89   :  { %v5060_v13 = vpop.f32.mrf.mxu2 }
 0xb8b   :  { %8741 = vmatpush.bf16.msk.msra.mxu3 %vm8740_vm12, %v15160_v0  ;;  %vm5161_vm12 = vcmp.eq.s32.totalorder %v9409_v5, %v13502_v57 }
 0xb8c   :  { %vm8752_vm0 = vmpackc.low %vm5163_vm11, %vm5161_vm12  ;;  %vm5143_vm12 = vcmp.eq.s32.totalorder %v9577_v27, %v13502_v57 }
 0xb8d   :  { %8753 = vmatpush.bf16.msk.msrb.mxu0 %vm8752_vm0, %v15160_v0  ;;  %vm5137_vm0 = vcmp.eq.s32.totalorder %v9612_v30, %v13502_v57 }
 0xb8f   :  { %8743 = vmatpush.bf16.msk.msra.mxu3 %vm8742_vm9, %v15160_v0  ;;  %vm5157_vm9 = vcmp.eq.s32.totalorder %v9421_v9, %v13502_v57 }
 0xb90   :  { %vm8754_vm14 = vmpackc.low %vm5159_vm5, %vm5157_vm9  ;;  %vm5139_vm9 = vcmp.eq.s32.totalorder %v9615_v31, %v13502_v57 }
 0xb91   :  { %v5062_v51 = vpop.f32.mrf.mxu2  ;;  %8755 = vmatpush.bf16.msk.msrb.mxu0 %vm8754_vm14, %v15160_v0  ;;  %vm8764_vm5 = vmpackc.low %vm5139_vm9, %vm5137_vm0  ;;  %vm5133_vm14 = vcmp.eq.s32.totalorder %v9402_v2, %v13502_v57 }
 0xb92   :  { %v13558_v51 = vld [vmem:[%s15062_s0 + $0x28] sm:$0x3] }
 0xb93   :  { %8745 = vmatpush.bf16.msk.msra.mxu3 %vm8744_vm3, %v15160_v0  ;;  %vm5153_vm3 = vcmp.eq.s32.totalorder %v9464_v14, %v13502_v57  ;;  %v13561_v56 = vperm.slane %v13558_v51, 0 }
 0xb94   :  { %vm8756_vm15 = vmpackc.low %vm5155_vm2, %vm5153_vm3  ;;  %vm5135_vm3 = vcmp.eq.s32.totalorder %v9650_v34, %v13502_v57 }
 0xb95   :  { %8757 = vmatpush.bf16.msk.msrb.mxu0 %vm8756_vm15, %v15160_v0  ;;  %vm8766_vm2 = vmpackc.low %vm5135_vm3, %vm5133_vm14  ;;  %vm5193_vm15 = vcmp.eq.s32.totalorder %v9415_v7, %v13502_v57  ;;  %vm5425_vm0 = vcmp.eq.s32.totalorder %v9424_v10, %v13561_v56  ;;  %vm5419_vm14 = vcmp.eq.s32.totalorder %v9464_v14, %v13561_v56  ;;  %vm5421_vm3 = vcmp.eq.s32.totalorder %v9467_v15, %v13561_v56 }
 0xb97   :  { %8747 = vmatpush.bf16.msk.msra.mxu3 %vm8746_vm8, %v15160_v0  ;;  %vm5149_vm8 = vcmp.eq.s32.totalorder %v9492_v18, %v13502_v57 }
 0xb98   :  { %vm8758_vm1 = vmpackc.low %vm5151_vm7, %vm5149_vm8  ;;  %vm5195_vm8 = vcmp.eq.s32.totalorder %v9418_v8, %v13502_v57  ;;  %vm5427_vm7 = vcmp.eq.s32.totalorder %v9409_v5, %v13561_v56 }
 0xb99   :  { %8759 = vmatpush.bf16.msk.msrb.mxu0 %vm8758_vm1, %v15160_v0  ;;  %vm5429_vm1 = vcmp.eq.s32.totalorder %v9412_v6, %v13561_v56 }
 0xb9b   :  { %8749 = vmatpush.bf16.msk.msra.mxu3 %vm8748_vm6, %v15160_v0  ;;  %vm5145_vm6 = vcmp.eq.s32.totalorder %v9536_v22, %v13502_v57 }
 0xb9c   :  { %vm8760_vm13 = vmpackc.low %vm5147_vm10, %vm5145_vm6 }
 0xb9d   :  { %8761 = vmatpush.bf16.msk.msrb.mxu0 %vm8760_vm13, %v15160_v0  ;;  %vm8793_vm6 = vmpackc.low %vm5429_vm1, %vm5427_vm7  ;;  %vm15197_vm13 = vcmask 1043456  }
 0xb9e   :  { %vm8768_vm10 = vmpackc.low %vm5195_vm8, %vm5193_vm15  ;;  %vm5185_vm15 = vcmp.eq.s32.totalorder %v9470_v16, %v13502_v57  ;;  %vm5187_vm8 = vcmp.eq.s32.totalorder %v9473_v17, %v13502_v57 }
 0xb9f   :  { %8751 = vmatpush.bf16.msk.msra.mxu3 %vm8750_vm4, %v15160_v0  ;;  %vm5141_vm4 = vcmp.eq.s32.totalorder %v9574_v26, %v13502_v57  ;;  %vm8797_vm7 = vmpackc.low %vm5421_vm3, %vm5419_vm14  ;;  %vm5179_vm14 = vcmp.eq.s32.totalorder %v9550_v25, %v13502_v57 }
 0xba0   :  { %vm8762_vm11 = vmpackc.low %vm5143_vm12, %vm5141_vm4  ;;  %vm5189_vm4 = vcmp.eq.s32.totalorder %v9427_v11, %v13502_v57  ;;  %vm5191_vm12 = vcmp.eq.s32.totalorder %v9430_v12, %v13502_v57 }
 0xba1   :  { %8763 = vmatpush.bf16.msk.msrb.mxu0 %vm8762_vm11, %v15160_v0  ;;  %vm5423_vm11 = vcmp.eq.s32.totalorder %v9421_v9, %v13561_v56  ;;  %vm8772_vm1 = vmpackc.low %vm5187_vm8, %vm5185_vm15  ;;  %vm5407_vm15 = vcmp.eq.s32.totalorder %v9574_v26, %v13561_v56  ;;  %vm5409_vm8 = vcmp.eq.s32.totalorder %v9577_v27, %v13561_v56 }
 0xba2   :  { %5313 = vmatmul.bf16.vlgmr.msra.gmra.mxu3 %v9735_v44  ;;  %vm8795_vm9 = vmpackc.low %vm5425_vm0, %vm5423_vm11  ;;  %vm5411_vm0 = vcmp.eq.s32.totalorder %v9536_v22, %v13561_v56 }
 0xba5   :  { %8765 = vmatpush.bf16.msk.msrb.mxu0 %vm8764_vm5, %v15160_v0  ;;  %vm8770_vm5 = vmpackc.low %vm5191_vm12, %vm5189_vm4  ;;  %vm5183_vm4 = vcmp.eq.s32.totalorder %v9512_v21, %v13502_v57 }
 0xba9   :  { %8767 = vmatpush.bf16.msk.msrb.mxu0 %vm8766_vm2, %v15160_v0  ;;  %vm15198_vm2 = vcmask 64512  }
 0xbac   :  { %5326 = vmatmul.bf16.vlgmr.msrb.gmra.mxu0 %v9728_v43 }
 0xbad   :  { %8794 = vmatpush.bf16.msk.msra.mxu0 %vm8793_vm6, %v15160_v0  ;;  %vm5415_vm6 = vcmp.eq.s32.totalorder %v9492_v18, %v13561_v56 }
 0xbb1   :  { %8796 = vmatpush.bf16.msk.msra.mxu0 %vm8795_vm9, %v15160_v0  ;;  %vm5413_vm9 = vcmp.eq.s32.totalorder %v9539_v23, %v13561_v56 }
 0xbb2   :  { %vm8801_vm3 = vmpackc.low %vm5413_vm9, %vm5411_vm0 }
 0xbb5   :  { %8798 = vmatpush.bf16.msk.msra.mxu0 %vm8797_vm7, %v15160_v0  ;;  %vm5173_vm7 = vcmp.eq.s32.totalorder %v9585_v28, %v13502_v57 }
 0xbe5   :  { %v4852_v46 = vpop.f32.mrf.mxu3 }
 0xbe6   :  { %v13515_v61 = vadd.f32 %v4852_v46, %v13316_v59 }
 0xbed   :  { %v13546_v59 = vpop.f32.mrf.mxu3 }
 0xbee   :  { %15196 = vst [vmem:[#allocation23_spill] sm:$0xff] %v13546_v59 }
 0xbfb   :  { %v13552_v50 = vpop.f32.mrf.mxu2 }
 0xbff   :  { %v5105_v3 = vpop.f32.mrf.mxu0 }
 0xc00   :  { %v13549_v38 = vadd.f32 %v5105_v3, %v13380_v41 }
 0xc05   :  { %v5073_v46 = vpop.f32.mrf.mxu3 }
 0xc06   :  { %v5074_v59 = vadd.f32 %v5073_v46, %v5060_v13  ;;  %v5303_v13 = vpop.f32.mrf.mxu2 }
 0xc07   :  { %v13699_v13 = vperm.slane %v13558_v51, 1 }
 0xc08   :  { %v5081_v41 = vpack.c.bf16 %v5074_v59, %v5074_v59 }
 0xc0a   :  { %v5094_v3 = vsel %vm15197_vm13, %v5081_v41, 0  ;;  %vm5181_vm13 = vcmp.eq.s32.totalorder %v9509_v20, %v13502_v57 }
 0xc0b   :  { %5117 = vmatpush.bf16.msra.mxu1 %v5094_v3  ;;  %vm8774_vm11 = vmpackc.low %vm5183_vm4, %vm5181_vm13  ;;  %vm5403_vm13 = vcmp.eq.s32.totalorder %v9612_v30, %v13561_v56  ;;  %vm5405_vm4 = vcmp.eq.s32.totalorder %v9615_v31, %v13561_v56 }
 0xc0c   :  { %vm8805_vm0 = vmpackc.low %vm5405_vm4, %vm5403_vm13  ;;  %vm5455_vm13 = vcmp.eq.s32.totalorder %v9427_v11, %v13561_v56  ;;  %vm5457_vm4 = vcmp.eq.s32.totalorder %v9430_v12, %v13561_v56 }
 0xc0d   :  { %v5075_v59 = vpop.f32.mrf.mxu3 }
 0xc0e   :  { %8718 = vmatmul.msk.bf16.vlgmr.msra.gmra.mxu1 %vm15198_vm2, %v13455_v42  ;;  %v13705_v59 = vpop.f32.mrf.mxu0 }
 0xc0f   :  { %8769 = vmatpush.bf16.msk.msrb.mxu1 %vm8768_vm10, %v15160_v0  ;;  %vm5417_vm10 = vcmp.eq.s32.totalorder %v9495_v19, %v13561_v56  ;;  %15201 = vst [vmem:[#allocation24_spill] sm:$0xff] %v13705_v59 }
 0xc10   :  { %vm8799_vm12 = vmpackc.low %vm5417_vm10, %vm5415_vm6 }
 0xc11   :  { %8800 = vmatpush.bf16.msk.msra.mxu0 %vm8799_vm12, %v15160_v0  ;;  %vm8803_vm6 = vmpackc.low %vm5409_vm8, %vm5407_vm15  ;;  %vm5169_vm12 = vcmp.eq.s32.totalorder %v9623_v32, %v13502_v57  ;;  %vm5459_vm8 = vcmp.eq.s32.totalorder %v9415_v7, %v13561_v56 }
 0xc13   :  { %8771 = vmatpush.bf16.msk.msrb.mxu1 %vm8770_vm5, %v15160_v0  ;;  %vm5177_vm5 = vcmp.eq.s32.totalorder %v9547_v24, %v13502_v57 }
 0xc14   :  { %vm8776_vm2 = vmpackc.low %vm5179_vm14, %vm5177_vm5  ;;  %vm5399_vm5 = vcmp.eq.s32.totalorder %v9402_v2, %v13561_v56  ;;  %vm5401_vm14 = vcmp.eq.s32.totalorder %v9650_v34, %v13561_v56 }
 0xc15   :  { %8802 = vmatpush.bf16.msk.msra.mxu0 %vm8801_vm3, %v15160_v0  ;;  %vm5165_vm3 = vcmp.eq.s32.totalorder %v9658_v35, %v13502_v57  ;;  %vm8807_vm15 = vmpackc.low %vm5401_vm14, %vm5399_vm5  ;;  %vm5447_vm14 = vcmp.eq.s32.totalorder %v9509_v20, %v13561_v56 }
 0xc17   :  { %8773 = vmatpush.bf16.msk.msrb.mxu1 %vm8772_vm1, %v15160_v0  ;;  %vm5175_vm1 = vcmp.eq.s32.totalorder %v9588_v29, %v13502_v57 }
 0xc18   :  { %vm8778_vm10 = vmpackc.low %vm5175_vm1, %vm5173_vm7  ;;  %vm5461_vm7 = vcmp.eq.s32.totalorder %v9418_v8, %v13561_v56 }
 0xc19   :  { %8804 = vmatpush.bf16.msk.msra.mxu0 %vm8803_vm6, %v15160_v0  ;;  %vm8809_vm6 = vmpackc.low %vm5461_vm7, %vm5459_vm8  ;;  %vm5445_vm8 = vcmp.eq.s32.totalorder %v9550_v25, %v13561_v56 }
 0xc1b   :  { %8775 = vmatpush.bf16.msk.msrb.mxu1 %vm8774_vm11, %v15160_v0  ;;  %vm5171_vm11 = vcmp.eq.s32.totalorder %v9626_v33, %v13502_v57 }
 0xc1c   :  { %vm8780_vm9 = vmpackc.low %vm5171_vm11, %vm5169_vm12  ;;  %vm15200_vm11 = vcmask 64512  }
 0xc1d   :  { %8806 = vmatpush.bf16.msk.msra.mxu0 %vm8805_vm0, %v15160_v0  ;;  %vm8811_vm12 = vmpackc.low %vm5457_vm4, %vm5455_vm13  ;;  %vm5451_vm0 = vcmp.eq.s32.totalorder %v9470_v16, %v13561_v56  ;;  %vm5435_vm13 = vcmp.eq.s32.totalorder %v9623_v32, %v13561_v56  ;;  %vm5437_vm4 = vcmp.eq.s32.totalorder %v9626_v33, %v13561_v56 }
 0xc1f   :  { %8777 = vmatpush.bf16.msk.msrb.mxu1 %vm8776_vm2, %v15160_v0  ;;  %vm5167_vm2 = vcmp.eq.s32.totalorder %v9661_v36, %v13502_v57  ;;  %v13654_v57 = vld [vmem:[%s15064_s2 + $0x98] sm:$0xff] }
 0xc20   :  { %vm8782_vm1 = vmpackc.low %vm5167_vm2, %vm5165_vm3  ;;  %vm5449_vm3 = vcmp.eq.s32.totalorder %v9512_v21, %v13561_v56 }
 0xc21   :  { %8808 = vmatpush.bf16.msk.msra.mxu0 %vm8807_vm15, %v15160_v0  ;;  %vm8815_vm2 = vmpackc.low %vm5449_vm3, %vm5447_vm14  ;;  %vm5443_vm15 = vcmp.eq.s32.totalorder %v9547_v24, %v13561_v56  ;;  %vm5430_vm14 = vcmp.eq.s32.totalorder %v9412_v6, %v13699_v13 }
 0xc22   :  { %vm8817_vm7 = vmpackc.low %vm5445_vm8, %vm5443_vm15  ;;  %vm5426_vm15 = vcmp.eq.s32.totalorder %v9424_v10, %v13699_v13 }
 0xc23   :  { %8779 = vmatpush.bf16.msk.msrb.mxu1 %vm8778_vm10, %v15160_v0  ;;  %vm15199_vm10 = vcmask 1043456  }
 0xc24   :  { %5567 = vmatmul.bf16.vlgmr.msra.gmra.mxu0 %v9728_v43 }
 0xc25   :  { %v5314_v42 = vpop.f32.mrf.mxu3 }
 0xc26   :  { %v5315_v46 = vadd.f32 %v5314_v42, %v13552_v50 }
 0xc27   :  { %8781 = vmatpush.bf16.msk.msrb.mxu1 %vm8780_vm9, %v15160_v0  ;;  %vm5453_vm9 = vcmp.eq.s32.totalorder %v9473_v17, %v13561_v56 }
 0xc28   :  { %v5347_v41 = vpack.c.bf16 %v5315_v46, %v5315_v46  ;;  %vm8813_vm5 = vmpackc.low %vm5453_vm9, %vm5451_vm0  ;;  %vm5433_vm0 = vcmp.eq.s32.totalorder %v9661_v36, %v13561_v56 }
 0xc2a   :  { %v5358_v3 = vsel %vm15199_vm10, %v5347_v41, 0 }
 0xc2b   :  { %8783 = vmatpush.bf16.msk.msrb.mxu1 %vm8782_vm1, %v15160_v0  ;;  %5370 = vmatpush.bf16.msrb.mxu2 %v5358_v3  ;;  %vm5439_vm1 = vcmp.eq.s32.totalorder %v9585_v28, %v13561_v56  ;;  %v13754_v3 = vld [vmem:[%s15062_s0 + $0x2a] sm:$0x3] }
 0xc2d   :  { %v5316_v50 = vpop.f32.mrf.mxu3 }
 0xc2e   :  { %5339 = vmatmul.bf16.vlgmr.msrb.gmra.mxu1 %v9735_v44  ;;  %8790 = vmatmul.msk.bf16.vlgmr.msrb.gmra.mxu2 %vm15200_vm11, %v13654_v57  ;;  %vm5431_vm11 = vcmp.eq.s32.totalorder %v9658_v35, %v13561_v56 }
 0xc2f   :  { %8810 = vmatpush.bf16.msk.msra.mxu1 %vm8809_vm6, %v15160_v0  ;;  %vm5441_vm6 = vcmp.eq.s32.totalorder %v9588_v29, %v13561_v56  ;;  %vm8823_vm9 = vmpackc.low %vm5433_vm0, %vm5431_vm11  ;;  %v5327_v56 = vpop.f32.mrf.mxu0  ;;  %vm5414_vm11 = vcmp.eq.s32.totalorder %v9539_v23, %v13699_v13 }
 0xc30   :  { %vm8819_vm10 = vmpackc.low %vm5441_vm6, %vm5439_vm1  ;;  %vm5422_vm1 = vcmp.eq.s32.totalorder %v9467_v15, %v13699_v13 }
 0xc33   :  { %8812 = vmatpush.bf16.msk.msra.mxu1 %vm8811_vm12, %v15160_v0  ;;  %vm8821_vm12 = vmpackc.low %vm5437_vm4, %vm5435_vm13  ;;  %vm5418_vm13 = vcmp.eq.s32.totalorder %v9495_v19, %v13699_v13 }
 0xc37   :  { %8814 = vmatpush.bf16.msk.msra.mxu1 %vm8813_vm5, %v15160_v0  ;;  %vm5428_vm5 = vcmp.eq.s32.totalorder %v9409_v5, %v13699_v13  ;;  %v5329_v42 = vpop.f32.mrf.mxu0 }
 0xc38   :  { %vm8825_vm3 = vmpackc.low %vm5430_vm14, %vm5428_vm5  ;;  %vm5410_vm5 = vcmp.eq.s32.totalorder %v9577_v27, %v13699_v13  ;;  %v13757_v42 = vperm.slane %v13754_v3, 0 }
 0xc39   :  { %8826 = vmatpush.bf16.msk.msra.mxu2 %vm8825_vm3, %v15160_v0  ;;  %vm5404_vm3 = vcmp.eq.s32.totalorder %v9612_v30, %v13699_v13 }
 0xc3b   :  { %8816 = vmatpush.bf16.msk.msra.mxu1 %vm8815_vm2, %v15160_v0  ;;  %vm5424_vm2 = vcmp.eq.s32.totalorder %v9421_v9, %v13699_v13 }
 0xc3c   :  { %vm8827_vm8 = vmpackc.low %vm5426_vm15, %vm5424_vm2  ;;  %vm5406_vm2 = vcmp.eq.s32.totalorder %v9615_v31, %v13699_v13 }
 0xc3d   :  { %8828 = vmatpush.bf16.msk.msra.mxu2 %vm8827_vm8, %v15160_v0  ;;  %vm8837_vm15 = vmpackc.low %vm5406_vm2, %vm5404_vm3  ;;  %vm5400_vm8 = vcmp.eq.s32.totalorder %v9402_v2, %v13699_v13  ;;  %vm5692_vm3 = vcmp.eq.s32.totalorder %v9424_v10, %v13757_v42 }
 0xc3f   :  { %8818 = vmatpush.bf16.msk.msra.mxu1 %vm8817_vm7, %v15160_v0  ;;  %vm5420_vm7 = vcmp.eq.s32.totalorder %v9464_v14, %v13699_v13 }
 0xc40   :  { %vm8829_vm6 = vmpackc.low %vm5422_vm1, %vm5420_vm7  ;;  %vm5402_vm7 = vcmp.eq.s32.totalorder %v9650_v34, %v13699_v13 }
 0xc41   :  { %8830 = vmatpush.bf16.msk.msra.mxu2 %vm8829_vm6, %v15160_v0  ;;  %vm8839_vm1 = vmpackc.low %vm5402_vm7, %vm5400_vm8  ;;  %vm5460_vm6 = vcmp.eq.s32.totalorder %v9415_v7, %v13699_v13  ;;  %vm5686_vm8 = vcmp.eq.s32.totalorder %v9464_v14, %v13757_v42  ;;  %vm5688_vm7 = vcmp.eq.s32.totalorder %v9467_v15, %v13757_v42 }
 0xc43   :  { %8820 = vmatpush.bf16.msk.msra.mxu1 %vm8819_vm10, %v15160_v0  ;;  %vm5416_vm10 = vcmp.eq.s32.totalorder %v9492_v18, %v13699_v13 }
 0xc44   :  { %vm8831_vm4 = vmpackc.low %vm5418_vm13, %vm5416_vm10  ;;  %vm5462_vm10 = vcmp.eq.s32.totalorder %v9418_v8, %v13699_v13  ;;  %vm5694_vm13 = vcmp.eq.s32.totalorder %v9409_v5, %v13757_v42 }
 0xc45   :  { %8832 = vmatpush.bf16.msk.msra.mxu2 %vm8831_vm4, %v15160_v0  ;;  %vm5696_vm4 = vcmp.eq.s32.totalorder %v9412_v6, %v13757_v42 }
 0xc47   :  { %8822 = vmatpush.bf16.msk.msra.mxu1 %vm8821_vm12, %v15160_v0  ;;  %vm5412_vm12 = vcmp.eq.s32.totalorder %v9536_v22, %v13699_v13 }
 0xc48   :  { %vm8833_vm0 = vmpackc.low %vm5414_vm11, %vm5412_vm12 }
 0xc49   :  { %8834 = vmatpush.bf16.msk.msra.mxu2 %vm8833_vm0, %v15160_v0  ;;  %vm8866_vm12 = vmpackc.low %vm5696_vm4, %vm5694_vm13  ;;  %vm15203_vm0 = vcmask 1043456  }
 0xc4a   :  { %vm8841_vm11 = vmpackc.low %vm5462_vm10, %vm5460_vm6  ;;  %vm5452_vm6 = vcmp.eq.s32.totalorder %v9470_v16, %v13699_v13  ;;  %vm5454_vm10 = vcmp.eq.s32.totalorder %v9473_v17, %v13699_v13 }
 0xc4b   :  { %8824 = vmatpush.bf16.msk.msra.mxu1 %vm8823_vm9, %v15160_v0  ;;  %vm5408_vm9 = vcmp.eq.s32.totalorder %v9574_v26, %v13699_v13  ;;  %vm8870_vm13 = vmpackc.low %vm5688_vm7, %vm5686_vm8  ;;  %vm5446_vm8 = vcmp.eq.s32.totalorder %v9550_v25, %v13699_v13 }
 0xc4c   :  { %vm8835_vm14 = vmpackc.low %vm5410_vm5, %vm5408_vm9  ;;  %vm5456_vm9 = vcmp.eq.s32.totalorder %v9427_v11, %v13699_v13  ;;  %vm5458_vm5 = vcmp.eq.s32.totalorder %v9430_v12, %v13699_v13 }
 0xc4d   :  { %8836 = vmatpush.bf16.msk.msra.mxu2 %vm8835_vm14, %v15160_v0  ;;  %vm5690_vm14 = vcmp.eq.s32.totalorder %v9421_v9, %v13757_v42  ;;  %vm8845_vm4 = vmpackc.low %vm5454_vm10, %vm5452_vm6  ;;  %vm5674_vm6 = vcmp.eq.s32.totalorder %v9574_v26, %v13757_v42  ;;  %vm5676_vm10 = vcmp.eq.s32.totalorder %v9577_v27, %v13757_v42 }
 0xc4e   :  { %5580 = vmatmul.bf16.vlgmr.msra.gmra.mxu1 %v9735_v44  ;;  %vm8868_vm2 = vmpackc.low %vm5692_vm3, %vm5690_vm14  ;;  %vm5678_vm3 = vcmp.eq.s32.totalorder %v9536_v22, %v13757_v42 }
 0xc51   :  { %8838 = vmatpush.bf16.msk.msra.mxu2 %vm8837_vm15, %v15160_v0  ;;  %vm8843_vm15 = vmpackc.low %vm5458_vm5, %vm5456_vm9  ;;  %vm5450_vm9 = vcmp.eq.s32.totalorder %v9512_v21, %v13699_v13 }
 0xc55   :  { %8840 = vmatpush.bf16.msk.msra.mxu2 %vm8839_vm1, %v15160_v0  ;;  %vm15204_vm1 = vcmask 64512  }
 0xc58   :  { %5593 = vmatmul.bf16.vlgmr.msra.gmra.mxu2 %v9728_v43 }
 0xc59   :  { %8867 = vmatpush.bf16.msk.msrb.mxu2 %vm8866_vm12, %v15160_v0  ;;  %vm5682_vm12 = vcmp.eq.s32.totalorder %v9492_v18, %v13757_v42 }
 0xc5d   :  { %8869 = vmatpush.bf16.msk.msrb.mxu2 %vm8868_vm2, %v15160_v0  ;;  %vm5680_vm2 = vcmp.eq.s32.totalorder %v9539_v23, %v13757_v42 }
 0xc5e   :  { %vm8874_vm7 = vmpackc.low %vm5680_vm2, %vm5678_vm3 }
 0xc61   :  { %8871 = vmatpush.bf16.msk.msrb.mxu2 %vm8870_vm13, %v15160_v0  ;;  %vm5440_vm13 = vcmp.eq.s32.totalorder %v9585_v28, %v13699_v13 }
 0xc8b   :  { %v5119_v51 = vpop.f32.mrf.mxu1 }
 0xc8c   :  { %v13714_v46 = vadd.f32 %v5119_v51, %v13515_v61 }
 0xc93   :  { %v13745_v61 = vpop.f32.mrf.mxu1 }
 0xc94   :  { %15202 = vst [vmem:[#allocation25_spill] sm:$0xff] %v13745_v61 }
 0xca1   :  { %v13748_v41 = vpop.f32.mrf.mxu0 }
 0xcab   :  { %v5340_v50 = vpop.f32.mrf.mxu1 }
 0xcac   :  { %v5341_v51 = vadd.f32 %v5340_v50, %v5327_v56  ;;  %v5570_v50 = vpop.f32.mrf.mxu0 }
 0xcae   :  { %v5348_v59 = vpack.c.bf16 %v5341_v51, %v5341_v51 }
 0xcb0   :  { %v5361_v61 = vsel %vm15203_vm0, %v5348_v59, 0  ;;  %vm5448_vm0 = vcmp.eq.s32.totalorder %v9509_v20, %v13699_v13 }
 0xcb1   :  { %v5372_v56 = vpop.f32.mrf.mxu2  ;;  %5384 = vmatpush.bf16.msrb.mxu3 %v5361_v61  ;;  %vm8847_vm14 = vmpackc.low %vm5450_vm9, %vm5448_vm0  ;;  %vm5670_vm0 = vcmp.eq.s32.totalorder %v9612_v30, %v13757_v42  ;;  %vm5672_vm9 = vcmp.eq.s32.totalorder %v9615_v31, %v13757_v42 }
 0xcb2   :  { %v13778_v51 = vadd.f32 %v5372_v56, %v13549_v38  ;;  %vm8878_vm3 = vmpackc.low %vm5672_vm9, %vm5670_vm0  ;;  %vm5722_vm0 = vcmp.eq.s32.totalorder %v9427_v11, %v13757_v42  ;;  %vm5724_vm9 = vcmp.eq.s32.totalorder %v9430_v12, %v13757_v42 }
 0xcb3   :  { %v5342_v59 = vpop.f32.mrf.mxu1 }
 0xcb4   :  { %8791 = vmatmul.msk.bf16.vlgmr.msrb.gmra.mxu3 %vm15204_vm1, %v13654_v57 }
 0xcb5   :  { %8842 = vmatpush.bf16.msk.msra.mxu3 %vm8841_vm11, %v15160_v0  ;;  %vm5684_vm11 = vcmp.eq.s32.totalorder %v9495_v19, %v13757_v42 }
 0xcb6   :  { %vm8872_vm5 = vmpackc.low %vm5684_vm11, %vm5682_vm12 }
 0xcb7   :  { %8873 = vmatpush.bf16.msk.msrb.mxu2 %vm8872_vm5, %v15160_v0  ;;  %vm8876_vm12 = vmpackc.low %vm5676_vm10, %vm5674_vm6  ;;  %vm5436_vm5 = vcmp.eq.s32.totalorder %v9623_v32, %v13699_v13  ;;  %vm5726_vm10 = vcmp.eq.s32.totalorder %v9415_v7, %v13757_v42 }
 0xcb9   :  { %8844 = vmatpush.bf16.msk.msra.mxu3 %vm8843_vm15, %v15160_v0  ;;  %vm5444_vm15 = vcmp.eq.s32.totalorder %v9547_v24, %v13699_v13  ;;  %v13897_v50 = vpop.f32.mrf.mxu2 }
 0xcba   :  { %vm8849_vm1 = vmpackc.low %vm5446_vm8, %vm5444_vm15  ;;  %vm5666_vm15 = vcmp.eq.s32.totalorder %v9402_v2, %v13757_v42  ;;  %vm5668_vm8 = vcmp.eq.s32.totalorder %v9650_v34, %v13757_v42  ;;  %15207 = vst [vmem:[#allocation26_spill] sm:$0xff] %v13897_v50 }
 0xcbb   :  { %8875 = vmatpush.bf16.msk.msrb.mxu2 %vm8874_vm7, %v15160_v0  ;;  %vm5432_vm7 = vcmp.eq.s32.totalorder %v9658_v35, %v13699_v13  ;;  %vm8880_vm6 = vmpackc.low %vm5668_vm8, %vm5666_vm15  ;;  %vm5714_vm8 = vcmp.eq.s32.totalorder %v9509_v20, %v13757_v42 }
 0xcbd   :  { %8846 = vmatpush.bf16.msk.msra.mxu3 %vm8845_vm4, %v15160_v0  ;;  %vm5442_vm4 = vcmp.eq.s32.totalorder %v9588_v29, %v13699_v13 }
 0xcbe   :  { %vm8851_vm11 = vmpackc.low %vm5442_vm4, %vm5440_vm13  ;;  %vm5728_vm13 = vcmp.eq.s32.totalorder %v9418_v8, %v13757_v42 }
 0xcbf   :  { %8877 = vmatpush.bf16.msk.msrb.mxu2 %vm8876_vm12, %v15160_v0  ;;  %vm8882_vm12 = vmpackc.low %vm5728_vm13, %vm5726_vm10  ;;  %vm5712_vm10 = vcmp.eq.s32.totalorder %v9550_v25, %v13757_v42 }
 0xcc1   :  { %8848 = vmatpush.bf16.msk.msra.mxu3 %vm8847_vm14, %v15160_v0  ;;  %vm5438_vm14 = vcmp.eq.s32.totalorder %v9626_v33, %v13699_v13 }
 0xcc2   :  { %vm8853_vm2 = vmpackc.low %vm5438_vm14, %vm5436_vm5  ;;  %vm15206_vm14 = vcmask 64512  }
 0xcc3   :  { %8879 = vmatpush.bf16.msk.msrb.mxu2 %vm8878_vm3, %v15160_v0  ;;  %vm8884_vm5 = vmpackc.low %vm5724_vm9, %vm5722_vm0  ;;  %vm5718_vm3 = vcmp.eq.s32.totalorder %v9470_v16, %v13757_v42  ;;  %vm5702_vm0 = vcmp.eq.s32.totalorder %v9623_v32, %v13757_v42  ;;  %vm5704_vm9 = vcmp.eq.s32.totalorder %v9626_v33, %v13757_v42 }
 0xcc5   :  { %8850 = vmatpush.bf16.msk.msra.mxu3 %vm8849_vm1, %v15160_v0  ;;  %vm5434_vm1 = vcmp.eq.s32.totalorder %v9661_v36, %v13699_v13  ;;  %v13853_v13 = vld [vmem:[%s15064_s2 + $0xa0] sm:$0xff] }
 0xcc6   :  { %vm8855_vm4 = vmpackc.low %vm5434_vm1, %vm5432_vm7  ;;  %vm5716_vm7 = vcmp.eq.s32.totalorder %v9512_v21, %v13757_v42 }
 0xcc7   :  { %8881 = vmatpush.bf16.msk.msrb.mxu2 %vm8880_vm6, %v15160_v0  ;;  %vm8888_vm1 = vmpackc.low %vm5716_vm7, %vm5714_vm8  ;;  %vm5710_vm6 = vcmp.eq.s32.totalorder %v9547_v24, %v13757_v42 }
 0xcc8   :  { %vm8890_vm13 = vmpackc.low %vm5712_vm10, %vm5710_vm6 }
 0xcc9   :  { %8852 = vmatpush.bf16.msk.msra.mxu3 %vm8851_vm11, %v15160_v0  ;;  %vm15205_vm11 = vcmask 1043456  }
 0xcca   :  { %5834 = vmatmul.bf16.vlgmr.msrb.gmra.mxu2 %v9728_v43 }
 0xccb   :  { %v5581_v38 = vpop.f32.mrf.mxu1 }
 0xccc   :  { %v5582_v57 = vadd.f32 %v5581_v38, %v13748_v41  ;;  %v13900_v38 = vperm.slane %v13754_v3, 1 }
 0xccd   :  { %8854 = vmatpush.bf16.msk.msra.mxu3 %vm8853_vm2, %v15160_v0  ;;  %vm5720_vm2 = vcmp.eq.s32.totalorder %v9473_v17, %v13757_v42 }
 0xcce   :  { %v5614_v61 = vpack.c.bf16 %v5582_v57, %v5582_v57  ;;  %vm8886_vm15 = vmpackc.low %vm5720_vm2, %vm5718_vm3  ;;  %vm5700_vm3 = vcmp.eq.s32.totalorder %v9661_v36, %v13757_v42  ;;  %vm5697_vm8 = vcmp.eq.s32.totalorder %v9412_v6, %v13900_v38  ;;  %vm5693_vm6 = vcmp.eq.s32.totalorder %v9424_v10, %v13900_v38 }
 0xcd0   :  { %v5625_v56 = vsel %vm15205_vm11, %v5614_v61, 0 }
 0xcd1   :  { %8856 = vmatpush.bf16.msk.msra.mxu3 %vm8855_vm4, %v15160_v0  ;;  %5637 = vmatpush.bf16.msrb.mxu0 %v5625_v56  ;;  %vm5706_vm4 = vcmp.eq.s32.totalorder %v9585_v28, %v13757_v42 }
 0xcd3   :  { %v5583_v41 = vpop.f32.mrf.mxu1 }
 0xcd4   :  { %5606 = vmatmul.bf16.vlgmr.msra.gmra.mxu3 %v9735_v44  ;;  %8863 = vmatmul.msk.bf16.vlgmr.msrb.gmra.mxu0 %vm15206_vm14, %v13853_v13  ;;  %vm5698_vm14 = vcmp.eq.s32.totalorder %v9658_v35, %v13757_v42 }
 0xcd5   :  { %8883 = vmatpush.bf16.msk.msrb.mxu3 %vm8882_vm12, %v15160_v0  ;;  %vm5708_vm12 = vcmp.eq.s32.totalorder %v9588_v29, %v13757_v42  ;;  %vm8896_vm2 = vmpackc.low %vm5700_vm3, %vm5698_vm14  ;;  %vm5681_vm14 = vcmp.eq.s32.totalorder %v9539_v23, %v13900_v38 }
 0xcd6   :  { %vm8892_vm11 = vmpackc.low %vm5708_vm12, %vm5706_vm4  ;;  %vm5689_vm4 = vcmp.eq.s32.totalorder %v9467_v15, %v13900_v38 }
 0xcd9   :  { %8885 = vmatpush.bf16.msk.msrb.mxu3 %vm8884_vm5, %v15160_v0  ;;  %vm8894_vm5 = vmpackc.low %vm5704_vm9, %vm5702_vm0  ;;  %vm5685_vm0 = vcmp.eq.s32.totalorder %v9495_v19, %v13900_v38 }
 0xcdb   :  { %v5594_v59 = vpop.f32.mrf.mxu2 }
 0xcdd   :  { %8887 = vmatpush.bf16.msk.msrb.mxu3 %vm8886_vm15, %v15160_v0  ;;  %vm5695_vm15 = vcmp.eq.s32.totalorder %v9409_v5, %v13900_v38 }
 0xcde   :  { %vm8898_vm7 = vmpackc.low %vm5697_vm8, %vm5695_vm15  ;;  %vm5677_vm15 = vcmp.eq.s32.totalorder %v9577_v27, %v13900_v38 }
 0xcdf   :  { %8899 = vmatpush.bf16.msk.msra.mxu0 %vm8898_vm7, %v15160_v0  ;;  %vm5671_vm7 = vcmp.eq.s32.totalorder %v9612_v30, %v13900_v38 }
 0xce1   :  { %8889 = vmatpush.bf16.msk.msrb.mxu3 %vm8888_vm1, %v15160_v0  ;;  %vm5691_vm1 = vcmp.eq.s32.totalorder %v9421_v9, %v13900_v38 }
 0xce2   :  { %vm8900_vm10 = vmpackc.low %vm5693_vm6, %vm5691_vm1  ;;  %vm5673_vm1 = vcmp.eq.s32.totalorder %v9615_v31, %v13900_v38 }
 0xce3   :  { %v5596_v42 = vpop.f32.mrf.mxu2  ;;  %8901 = vmatpush.bf16.msk.msra.mxu0 %vm8900_vm10, %v15160_v0  ;;  %vm8910_vm6 = vmpackc.low %vm5673_vm1, %vm5671_vm7  ;;  %vm5667_vm10 = vcmp.eq.s32.totalorder %v9402_v2, %v13900_v38 }
 0xce4   :  { %v13956_v42 = vld [vmem:[%s15062_s0 + $0x2c] sm:$0x3] }
 0xce5   :  { %8891 = vmatpush.bf16.msk.msrb.mxu3 %vm8890_vm13, %v15160_v0  ;;  %vm5687_vm13 = vcmp.eq.s32.totalorder %v9464_v14, %v13900_v38  ;;  %v13959_v50 = vperm.slane %v13956_v42, 0 }
 0xce6   :  { %vm8902_vm12 = vmpackc.low %vm5689_vm4, %vm5687_vm13  ;;  %vm5669_vm13 = vcmp.eq.s32.totalorder %v9650_v34, %v13900_v38 }
 0xce7   :  { %8903 = vmatpush.bf16.msk.msra.mxu0 %vm8902_vm12, %v15160_v0  ;;  %vm8912_vm4 = vmpackc.low %vm5669_vm13, %vm5667_vm10  ;;  %vm5727_vm12 = vcmp.eq.s32.totalorder %v9415_v7, %v13900_v38  ;;  %vm5959_vm7 = vcmp.eq.s32.totalorder %v9424_v10, %v13959_v50  ;;  %vm5953_vm10 = vcmp.eq.s32.totalorder %v9464_v14, %v13959_v50  ;;  %vm5955_vm13 = vcmp.eq.s32.totalorder %v9467_v15, %v13959_v50 }
 0xce9   :  { %8893 = vmatpush.bf16.msk.msrb.mxu3 %vm8892_vm11, %v15160_v0  ;;  %vm5683_vm11 = vcmp.eq.s32.totalorder %v9492_v18, %v13900_v38 }
 0xcea   :  { %vm8904_vm9 = vmpackc.low %vm5685_vm0, %vm5683_vm11  ;;  %vm5729_vm11 = vcmp.eq.s32.totalorder %v9418_v8, %v13900_v38  ;;  %vm5961_vm0 = vcmp.eq.s32.totalorder %v9409_v5, %v13959_v50 }
 0xceb   :  { %8905 = vmatpush.bf16.msk.msra.mxu0 %vm8904_vm9, %v15160_v0  ;;  %vm5963_vm9 = vcmp.eq.s32.totalorder %v9412_v6, %v13959_v50 }
 0xced   :  { %8895 = vmatpush.bf16.msk.msrb.mxu3 %vm8894_vm5, %v15160_v0  ;;  %vm5679_vm5 = vcmp.eq.s32.totalorder %v9536_v22, %v13900_v38 }
 0xcee   :  { %vm8906_vm3 = vmpackc.low %vm5681_vm14, %vm5679_vm5 }
 0xcef   :  { %8907 = vmatpush.bf16.msk.msra.mxu0 %vm8906_vm3, %v15160_v0  ;;  %vm8939_vm5 = vmpackc.low %vm5963_vm9, %vm5961_vm0  ;;  %vm15209_vm3 = vcmask 1043456  }
 0xcf0   :  { %vm8914_vm14 = vmpackc.low %vm5729_vm11, %vm5727_vm12  ;;  %vm5719_vm12 = vcmp.eq.s32.totalorder %v9470_v16, %v13900_v38  ;;  %vm5721_vm11 = vcmp.eq.s32.totalorder %v9473_v17, %v13900_v38 }
 0xcf1   :  { %8897 = vmatpush.bf16.msk.msrb.mxu3 %vm8896_vm2, %v15160_v0  ;;  %vm5675_vm2 = vcmp.eq.s32.totalorder %v9574_v26, %v13900_v38  ;;  %vm8943_vm0 = vmpackc.low %vm5955_vm13, %vm5953_vm10  ;;  %vm5713_vm10 = vcmp.eq.s32.totalorder %v9550_v25, %v13900_v38 }
 0xcf2   :  { %vm8908_vm8 = vmpackc.low %vm5677_vm15, %vm5675_vm2  ;;  %vm5723_vm2 = vcmp.eq.s32.totalorder %v9427_v11, %v13900_v38  ;;  %vm5725_vm15 = vcmp.eq.s32.totalorder %v9430_v12, %v13900_v38 }
 0xcf3   :  { %8909 = vmatpush.bf16.msk.msra.mxu0 %vm8908_vm8, %v15160_v0  ;;  %vm5957_vm8 = vcmp.eq.s32.totalorder %v9421_v9, %v13959_v50  ;;  %vm8918_vm9 = vmpackc.low %vm5721_vm11, %vm5719_vm12  ;;  %vm5941_vm12 = vcmp.eq.s32.totalorder %v9574_v26, %v13959_v50  ;;  %vm5943_vm11 = vcmp.eq.s32.totalorder %v9577_v27, %v13959_v50 }
 0xcf4   :  { %5847 = vmatmul.bf16.vlgmr.msrb.gmra.mxu3 %v9735_v44  ;;  %vm8941_vm1 = vmpackc.low %vm5959_vm7, %vm5957_vm8  ;;  %vm5945_vm7 = vcmp.eq.s32.totalorder %v9536_v22, %v13959_v50 }
 0xcf7   :  { %8911 = vmatpush.bf16.msk.msra.mxu0 %vm8910_vm6, %v15160_v0  ;;  %vm8916_vm6 = vmpackc.low %vm5725_vm15, %vm5723_vm2  ;;  %vm5717_vm2 = vcmp.eq.s32.totalorder %v9512_v21, %v13900_v38 }
 0xcfb   :  { %8913 = vmatpush.bf16.msk.msra.mxu0 %vm8912_vm4, %v15160_v0  ;;  %vm15210_vm4 = vcmask 64512  }
 0xcfe   :  { %5860 = vmatmul.bf16.vlgmr.msra.gmra.mxu0 %v9728_v43 }
 0xcff   :  { %8940 = vmatpush.bf16.msk.msrb.mxu0 %vm8939_vm5, %v15160_v0  ;;  %vm5949_vm5 = vcmp.eq.s32.totalorder %v9492_v18, %v13959_v50 }
 0xd03   :  { %8942 = vmatpush.bf16.msk.msrb.mxu0 %vm8941_vm1, %v15160_v0  ;;  %vm5947_vm1 = vcmp.eq.s32.totalorder %v9539_v23, %v13959_v50 }
 0xd04   :  { %vm8947_vm13 = vmpackc.low %vm5947_vm1, %vm5945_vm7 }
 0xd07   :  { %8944 = vmatpush.bf16.msk.msrb.mxu0 %vm8943_vm0, %v15160_v0  ;;  %vm5707_vm0 = vcmp.eq.s32.totalorder %v9585_v28, %v13900_v38 }
 0xd37   :  { %v5386_v57 = vpop.f32.mrf.mxu3 }
 0xd38   :  { %v13913_v3 = vadd.f32 %v5386_v57, %v13714_v46 }
 0xd3f   :  { %v13944_v46 = vpop.f32.mrf.mxu3 }
 0xd40   :  { %15208 = vst [vmem:[#allocation27_spill] sm:$0xff] %v13944_v46 }
 0xd4d   :  { %v13950_v41 = vpop.f32.mrf.mxu2 }
 0xd51   :  { %v5639_v61 = vpop.f32.mrf.mxu0 }
 0xd52   :  { %v13947_v56 = vadd.f32 %v5639_v61, %v13778_v51 }
 0xd57   :  { %v5607_v57 = vpop.f32.mrf.mxu3 }
 0xd58   :  { %v5608_v46 = vadd.f32 %v5607_v57, %v5594_v59  ;;  %v5837_v59 = vpop.f32.mrf.mxu2 }
 0xd59   :  { %v587_v59 = vadd.f32 %v10313_v1, %v10355_v58  ;;  %v14110_v58 = vpop.f32.mrf.mxu0 }
 0xd5a   :  { %v5615_v51 = vpack.c.bf16 %v5608_v46, %v5608_v46 }
 0xd5c   :  { %v5628_v61 = vsel %vm15209_vm3, %v5615_v51, 0  ;;  %vm5715_vm3 = vcmp.eq.s32.totalorder %v9509_v20, %v13900_v38 }
 0xd5d   :  { %5651 = vmatpush.bf16.msrb.mxu1 %v5628_v61  ;;  %vm8920_vm8 = vmpackc.low %vm5717_vm2, %vm5715_vm3  ;;  %vm5937_vm3 = vcmp.eq.s32.totalorder %v9612_v30, %v13959_v50  ;;  %vm5939_vm2 = vcmp.eq.s32.totalorder %v9615_v31, %v13959_v50 }
 0xd5e   :  { %vm8951_vm7 = vmpackc.low %vm5939_vm2, %vm5937_vm3  ;;  %vm5989_vm3 = vcmp.eq.s32.totalorder %v9427_v11, %v13959_v50  ;;  %vm5991_vm2 = vcmp.eq.s32.totalorder %v9430_v12, %v13959_v50 }
 0xd5f   :  { %v5609_v46 = vpop.f32.mrf.mxu3 }
 0xd60   :  { %8864 = vmatmul.msk.bf16.vlgmr.msrb.gmra.mxu1 %vm15210_vm4, %v13853_v13  ;;  %v855_v46 = vadd.f32 %v10528_v62, %v587_v59 }
 0xd61   :  { %8915 = vmatpush.bf16.msk.msra.mxu1 %vm8914_vm14, %v15160_v0  ;;  %vm5951_vm14 = vcmp.eq.s32.totalorder %v9495_v19, %v13959_v50 }
 0xd62   :  { %vm8945_vm15 = vmpackc.low %vm5951_vm14, %vm5949_vm5 }
 0xd63   :  { %8946 = vmatpush.bf16.msk.msrb.mxu0 %vm8945_vm15, %v15160_v0  ;;  %vm8949_vm5 = vmpackc.low %vm5943_vm11, %vm5941_vm12  ;;  %vm5703_vm15 = vcmp.eq.s32.totalorder %v9623_v32, %v13900_v38  ;;  %vm5993_vm11 = vcmp.eq.s32.totalorder %v9415_v7, %v13959_v50 }
 0xd65   :  { %8917 = vmatpush.bf16.msk.msra.mxu1 %vm8916_vm6, %v15160_v0  ;;  %vm5711_vm6 = vcmp.eq.s32.totalorder %v9547_v24, %v13900_v38 }
 0xd66   :  { %vm8922_vm4 = vmpackc.low %vm5713_vm10, %vm5711_vm6  ;;  %vm5933_vm6 = vcmp.eq.s32.totalorder %v9402_v2, %v13959_v50  ;;  %vm5935_vm10 = vcmp.eq.s32.totalorder %v9650_v34, %v13959_v50 }
 0xd67   :  { %8948 = vmatpush.bf16.msk.msrb.mxu0 %vm8947_vm13, %v15160_v0  ;;  %vm5699_vm13 = vcmp.eq.s32.totalorder %v9658_v35, %v13900_v38  ;;  %vm8953_vm12 = vmpackc.low %vm5935_vm10, %vm5933_vm6  ;;  %vm5981_vm10 = vcmp.eq.s32.totalorder %v9509_v20, %v13959_v50 }
 0xd69   :  { %8919 = vmatpush.bf16.msk.msra.mxu1 %vm8918_vm9, %v15160_v0  ;;  %vm5709_vm9 = vcmp.eq.s32.totalorder %v9588_v29, %v13900_v38 }
 0xd6a   :  { %vm8924_vm14 = vmpackc.low %vm5709_vm9, %vm5707_vm0  ;;  %vm5995_vm0 = vcmp.eq.s32.totalorder %v9418_v8, %v13959_v50 }
 0xd6b   :  { %8950 = vmatpush.bf16.msk.msrb.mxu0 %vm8949_vm5, %v15160_v0  ;;  %vm8955_vm5 = vmpackc.low %vm5995_vm0, %vm5993_vm11  ;;  %vm5979_vm11 = vcmp.eq.s32.totalorder %v9550_v25, %v13959_v50 }
 0xd6d   :  { %8921 = vmatpush.bf16.msk.msra.mxu1 %vm8920_vm8, %v15160_v0  ;;  %vm5705_vm8 = vcmp.eq.s32.totalorder %v9626_v33, %v13900_v38 }
 0xd6e   :  { %vm8926_vm1 = vmpackc.low %vm5705_vm8, %vm5703_vm15  ;;  %vm15212_vm8 = vcmask 64512  }
 0xd6f   :  { %8952 = vmatpush.bf16.msk.msrb.mxu0 %vm8951_vm7, %v15160_v0  ;;  %vm8957_vm15 = vmpackc.low %vm5991_vm2, %vm5989_vm3  ;;  %vm5985_vm7 = vcmp.eq.s32.totalorder %v9470_v16, %v13959_v50  ;;  %vm5969_vm3 = vcmp.eq.s32.totalorder %v9623_v32, %v13959_v50  ;;  %vm5971_vm2 = vcmp.eq.s32.totalorder %v9626_v33, %v13959_v50 }
 0xd71   :  { %8923 = vmatpush.bf16.msk.msra.mxu1 %vm8922_vm4, %v15160_v0  ;;  %vm5701_vm4 = vcmp.eq.s32.totalorder %v9661_v36, %v13900_v38  ;;  %v14052_v38 = vld [vmem:[%s15064_s2 + $0xa8] sm:$0xff] }
 0xd72   :  { %vm8928_vm9 = vmpackc.low %vm5701_vm4, %vm5699_vm13  ;;  %vm5983_vm13 = vcmp.eq.s32.totalorder %v9512_v21, %v13959_v50 }
 0xd73   :  { %8954 = vmatpush.bf16.msk.msrb.mxu0 %vm8953_vm12, %v15160_v0  ;;  %vm8961_vm4 = vmpackc.low %vm5983_vm13, %vm5981_vm10  ;;  %vm5977_vm12 = vcmp.eq.s32.totalorder %v9547_v24, %v13959_v50 }
 0xd74   :  { %vm8963_vm0 = vmpackc.low %vm5979_vm11, %vm5977_vm12 }
 0xd75   :  { %8925 = vmatpush.bf16.msk.msra.mxu1 %vm8924_vm14, %v15160_v0  ;;  %vm15211_vm14 = vcmask 1043456  }
 0xd76   :  { %6101 = vmatmul.bf16.vlgmr.msrb.gmra.mxu0 %v9728_v43 }
 0xd77   :  { %v5848_v13 = vpop.f32.mrf.mxu3 }
 0xd78   :  { %v5849_v57 = vadd.f32 %v5848_v13, %v13950_v41  ;;  %v1122_v13 = vadd.f32 %v10760_v54, %v855_v46 }
 0xd79   :  { %8927 = vmatpush.bf16.msk.msra.mxu1 %vm8926_vm1, %v15160_v0  ;;  %vm5987_vm1 = vcmp.eq.s32.totalorder %v9473_v17, %v13959_v50 }
 0xd7a   :  { %v5881_v51 = vpack.c.bf16 %v5849_v57, %v5849_v57  ;;  %vm8959_vm6 = vmpackc.low %vm5987_vm1, %vm5985_vm7  ;;  %vm5967_vm7 = vcmp.eq.s32.totalorder %v9661_v36, %v13959_v50  ;;  %v1389_v57 = vadd.f32 %v10959_v4, %v1122_v13 }
 0xd7c   :  { %v5892_v61 = vsel %vm15211_vm14, %v5881_v51, 0  ;;  %v14102_v51 = vperm.slane %v13956_v42, 1  ;;  %v5861_v42 = vpop.f32.mrf.mxu0 }
 0xd7d   :  { %8929 = vmatpush.bf16.msk.msra.mxu1 %vm8928_vm9, %v15160_v0  ;;  %5904 = vmatpush.bf16.msra.mxu2 %v5892_v61  ;;  %vm5973_vm9 = vcmp.eq.s32.totalorder %v9585_v28, %v13959_v50 }
 0xd7e   :  { %vm5964_vm10 = vcmp.eq.s32.totalorder %v9412_v6, %v14102_v51  ;;  %vm5960_vm12 = vcmp.eq.s32.totalorder %v9424_v10, %v14102_v51 }
 0xd7f   :  { %v5850_v41 = vpop.f32.mrf.mxu3 }
 0xd80   :  { %5873 = vmatmul.bf16.vlgmr.msra.gmra.mxu1 %v9735_v44  ;;  %8936 = vmatmul.msk.bf16.vlgmr.msra.gmra.mxu2 %vm15212_vm8, %v14052_v38  ;;  %vm5965_vm8 = vcmp.eq.s32.totalorder %v9658_v35, %v13959_v50 }
 0xd81   :  { %8956 = vmatpush.bf16.msk.msrb.mxu1 %vm8955_vm5, %v15160_v0  ;;  %vm5975_vm5 = vcmp.eq.s32.totalorder %v9588_v29, %v13959_v50  ;;  %vm8969_vm1 = vmpackc.low %vm5967_vm7, %vm5965_vm8  ;;  %v1656_v50 = vadd.f32 %v11158_v63, %v1389_v57  ;;  %vm5948_vm8 = vcmp.eq.s32.totalorder %v9539_v23, %v14102_v51 }
 0xd82   :  { %vm8965_vm14 = vmpackc.low %vm5975_vm5, %vm5973_vm9  ;;  %vm5956_vm9 = vcmp.eq.s32.totalorder %v9467_v15, %v14102_v51 }
 0xd83   :  { %v1923_v1 = vadd.f32 %v11357_v45, %v1656_v50  ;;  %v14172_v50 = vld [vmem:[%s15062_s0 + $0x2e] sm:$0x3] }
 0xd84   :  { %v5863_v46 = vpop.f32.mrf.mxu0 }
 0xd85   :  { %8958 = vmatpush.bf16.msk.msrb.mxu1 %vm8957_vm15, %v15160_v0  ;;  %vm8967_vm15 = vmpackc.low %vm5971_vm2, %vm5969_vm3  ;;  %v2190_v62 = vadd.f32 %v11556_v39, %v1923_v1  ;;  %vm5952_vm3 = vcmp.eq.s32.totalorder %v9495_v19, %v14102_v51 }
 0xd87   :  { %v2457_v54 = vadd.f32 %v11755_v60, %v2190_v62  ;;  %v14175_v62 = vperm.slane %v14172_v50, 0 }
 0xd89   :  { %8960 = vmatpush.bf16.msk.msrb.mxu1 %vm8959_vm6, %v15160_v0  ;;  %vm5962_vm6 = vcmp.eq.s32.totalorder %v9409_v5, %v14102_v51  ;;  %v2724_v4 = vadd.f32 %v11954_v47, %v2457_v54 }
 0xd8a   :  { %vm8971_vm13 = vmpackc.low %vm5964_vm10, %vm5962_vm6  ;;  %vm5944_vm6 = vcmp.eq.s32.totalorder %v9577_v27, %v14102_v51 }
 0xd8b   :  { %8972 = vmatpush.bf16.msk.msrb.mxu2 %vm8971_vm13, %v15160_v0  ;;  %v2991_v63 = vadd.f32 %v12153_v53, %v2724_v4  ;;  %vm5938_vm13 = vcmp.eq.s32.totalorder %v9612_v30, %v14102_v51 }
 0xd8d   :  { %8962 = vmatpush.bf16.msk.msrb.mxu1 %vm8961_vm4, %v15160_v0  ;;  %v3258_v61 = vadd.f32 %v12352_v55, %v2991_v63  ;;  %vm5958_vm4 = vcmp.eq.s32.totalorder %v9421_v9, %v14102_v51  ;;  %v15213_v55 = vld [vmem:[#allocation23_spill] sm:$0xff] }
 0xd8e   :  { %vm8973_vm11 = vmpackc.low %vm5960_vm12, %vm5958_vm4  ;;  %vm5940_vm4 = vcmp.eq.s32.totalorder %v9615_v31, %v14102_v51 }
 0xd8f   :  { %v3525_v41 = vadd.f32 %v12551_v40, %v3258_v61  ;;  %8974 = vmatpush.bf16.msk.msrb.mxu2 %vm8973_vm11, %v15160_v0  ;;  %vm8983_vm12 = vmpackc.low %vm5940_vm4, %vm5938_vm13  ;;  %vm5934_vm11 = vcmp.eq.s32.totalorder %v9402_v2, %v14102_v51  ;;  %vm6226_vm13 = vcmp.eq.s32.totalorder %v9424_v10, %v14175_v62 }
 0xd91   :  { %8964 = vmatpush.bf16.msk.msrb.mxu1 %vm8963_vm0, %v15160_v0  ;;  %v3792_v59 = vadd.f32 %v12750_v48, %v3525_v41  ;;  %vm5954_vm0 = vcmp.eq.s32.totalorder %v9464_v14, %v14102_v51  ;;  %v15214_v48 = vld [vmem:[#allocation25_spill] sm:$0xff] }
 0xd92   :  { %vm8975_vm5 = vmpackc.low %vm5956_vm9, %vm5954_vm0  ;;  %vm5936_vm0 = vcmp.eq.s32.totalorder %v9650_v34, %v14102_v51 }
 0xd93   :  { %v4059_v45 = vadd.f32 %v12949_v49, %v3792_v59  ;;  %8976 = vmatpush.bf16.msk.msrb.mxu2 %vm8975_vm5, %v15160_v0  ;;  %vm8985_vm9 = vmpackc.low %vm5936_vm0, %vm5934_vm11  ;;  %vm5994_vm5 = vcmp.eq.s32.totalorder %v9415_v7, %v14102_v51  ;;  %vm6220_vm11 = vcmp.eq.s32.totalorder %v9464_v14, %v14175_v62  ;;  %vm6222_vm0 = vcmp.eq.s32.totalorder %v9467_v15, %v14175_v62 }
 0xd95   :  { %8966 = vmatpush.bf16.msk.msrb.mxu1 %vm8965_vm14, %v15160_v0  ;;  %v4326_v39 = vadd.f32 %v13148_v52, %v4059_v45  ;;  %vm5950_vm14 = vcmp.eq.s32.totalorder %v9492_v18, %v14102_v51  ;;  %v15215_v52 = vld [vmem:[#allocation27_spill] sm:$0xff] }
 0xd96   :  { %vm8977_vm2 = vmpackc.low %vm5952_vm3, %vm5950_vm14  ;;  %vm5996_vm14 = vcmp.eq.s32.totalorder %v9418_v8, %v14102_v51  ;;  %vm6228_vm3 = vcmp.eq.s32.totalorder %v9409_v5, %v14175_v62 }
 0xd97   :  { %v4593_v47 = vadd.f32 %v13347_v37, %v4326_v39  ;;  %8978 = vmatpush.bf16.msk.msrb.mxu2 %vm8977_vm2, %v15160_v0  ;;  %vm6230_vm2 = vcmp.eq.s32.totalorder %v9412_v6, %v14175_v62 }
 0xd99   :  { %8968 = vmatpush.bf16.msk.msrb.mxu1 %vm8967_vm15, %v15160_v0  ;;  %v4860_v40 = vadd.f32 %v15213_v55, %v4593_v47  ;;  %vm5946_vm15 = vcmp.eq.s32.totalorder %v9536_v22, %v14102_v51  ;;  %v14318_v55 = vperm.slane %v14172_v50, 1 }
 0xd9a   :  { %vm8979_vm7 = vmpackc.low %vm5948_vm8, %vm5946_vm15 }
 0xd9b   :  { %v5127_v49 = vadd.f32 %v15214_v48, %v4860_v40  ;;  %8980 = vmatpush.bf16.msk.msrb.mxu2 %vm8979_vm7, %v15160_v0  ;;  %vm9012_vm15 = vmpackc.low %vm6230_vm2, %vm6228_vm3  ;;  %vm15216_vm7 = vcmask 1043456  }
 0xd9c   :  { %vm8987_vm8 = vmpackc.low %vm5996_vm14, %vm5994_vm5  ;;  %vm5986_vm5 = vcmp.eq.s32.totalorder %v9470_v16, %v14102_v51  ;;  %vm5988_vm14 = vcmp.eq.s32.totalorder %v9473_v17, %v14102_v51 }
 0xd9d   :  { %8970 = vmatpush.bf16.msk.msrb.mxu1 %vm8969_vm1, %v15160_v0  ;;  %v5394_v37 = vadd.f32 %v15215_v52, %v5127_v49  ;;  %vm5942_vm1 = vcmp.eq.s32.totalorder %v9574_v26, %v14102_v51  ;;  %vm9016_vm3 = vmpackc.low %vm6222_vm0, %vm6220_vm11  ;;  %vm5980_vm11 = vcmp.eq.s32.totalorder %v9550_v25, %v14102_v51 }
 0xd9e   :  { %vm8981_vm10 = vmpackc.low %vm5944_vm6, %vm5942_vm1  ;;  %vm5990_vm1 = vcmp.eq.s32.totalorder %v9427_v11, %v14102_v51  ;;  %vm5992_vm6 = vcmp.eq.s32.totalorder %v9430_v12, %v14102_v51 }
 0xd9f   :  { %8982 = vmatpush.bf16.msk.msrb.mxu2 %vm8981_vm10, %v15160_v0  ;;  %vm6224_vm10 = vcmp.eq.s32.totalorder %v9421_v9, %v14175_v62  ;;  %vm8991_vm2 = vmpackc.low %vm5988_vm14, %vm5986_vm5  ;;  %vm6208_vm5 = vcmp.eq.s32.totalorder %v9574_v26, %v14175_v62  ;;  %vm6210_vm14 = vcmp.eq.s32.totalorder %v9577_v27, %v14175_v62 }
 0xda0   :  { %6114 = vmatmul.bf16.vlgmr.msrb.gmra.mxu1 %v9735_v44  ;;  %vm9014_vm4 = vmpackc.low %vm6226_vm13, %vm6224_vm10  ;;  %vm6212_vm13 = vcmp.eq.s32.totalorder %v9536_v22, %v14175_v62 }
 0xda3   :  { %8984 = vmatpush.bf16.msk.msrb.mxu2 %vm8983_vm12, %v15160_v0  ;;  %vm8989_vm12 = vmpackc.low %vm5992_vm6, %vm5990_vm1  ;;  %vm5984_vm1 = vcmp.eq.s32.totalorder %v9512_v21, %v14102_v51 }
 0xda7   :  { %8986 = vmatpush.bf16.msk.msrb.mxu2 %vm8985_vm9, %v15160_v0  ;;  %vm15217_vm9 = vcmask 64512  }
 0xdaa   :  { %6127 = vmatmul.bf16.vlgmr.msrb.gmra.mxu2 %v9728_v43 }
 0xdab   :  { %9013 = vmatpush.bf16.msk.msra.mxu2 %vm9012_vm15, %v15160_v0  ;;  %vm6216_vm15 = vcmp.eq.s32.totalorder %v9492_v18, %v14175_v62 }
 0xdaf   :  { %9015 = vmatpush.bf16.msk.msra.mxu2 %vm9014_vm4, %v15160_v0  ;;  %vm6214_vm4 = vcmp.eq.s32.totalorder %v9539_v23, %v14175_v62 }
 0xdb0   :  { %vm9020_vm0 = vmpackc.low %vm6214_vm4, %vm6212_vm13 }
 0xdb3   :  { %9017 = vmatpush.bf16.msk.msra.mxu2 %vm9016_vm3, %v15160_v0  ;;  %vm5974_vm3 = vcmp.eq.s32.totalorder %v9585_v28, %v14102_v51 }
 0xddd   :  { %v5653_v60 = vpop.f32.mrf.mxu1 }
 0xdde   :  { %v14129_v53 = vadd.f32 %v5653_v60, %v13913_v3 }
 0xde5   :  { %v5655_v3 = vpop.f32.mrf.mxu1 }
 0xde6   :  { %v14144_v13 = vadd.f32 %v5655_v3, %v5394_v37 }
 0xdf3   :  { %v14166_v57 = vpop.f32.mrf.mxu0 }
 0xdfb   :  { %v6104_v61 = vpop.f32.mrf.mxu0 }
 0xdfd   :  { %v5874_v1 = vpop.f32.mrf.mxu1 }
 0xdfe   :  { %v5875_v54 = vadd.f32 %v5874_v1, %v5861_v42 }
 0xe00   :  { %v5882_v4 = vpack.c.bf16 %v5875_v54, %v5875_v54 }
 0xe02   :  { %v5895_v63 = vsel %vm15216_vm7, %v5882_v4, 0  ;;  %vm5982_vm7 = vcmp.eq.s32.totalorder %v9509_v20, %v14102_v51 }
 0xe03   :  { %v5906_v42 = vpop.f32.mrf.mxu2  ;;  %5918 = vmatpush.bf16.msra.mxu3 %v5895_v63  ;;  %vm8993_vm10 = vmpackc.low %vm5984_vm1, %vm5982_vm7  ;;  %vm6204_vm7 = vcmp.eq.s32.totalorder %v9612_v30, %v14175_v62  ;;  %vm6206_vm1 = vcmp.eq.s32.totalorder %v9615_v31, %v14175_v62 }
 0xe04   :  { %v14196_v41 = vadd.f32 %v5906_v42, %v13947_v56  ;;  %vm9024_vm13 = vmpackc.low %vm6206_vm1, %vm6204_vm7  ;;  %vm6256_vm7 = vcmp.eq.s32.totalorder %v9427_v11, %v14175_v62  ;;  %vm6258_vm1 = vcmp.eq.s32.totalorder %v9430_v12, %v14175_v62 }
 0xe05   :  { %v5876_v59 = vpop.f32.mrf.mxu1 }
 0xe06   :  { %8937 = vmatmul.msk.bf16.vlgmr.msra.gmra.mxu3 %vm15217_vm9, %v14052_v38 }
 0xe07   :  { %8988 = vmatpush.bf16.msk.msrb.mxu3 %vm8987_vm8, %v15160_v0  ;;  %vm6218_vm8 = vcmp.eq.s32.totalorder %v9495_v19, %v14175_v62 }
 0xe08   :  { %vm9018_vm6 = vmpackc.low %vm6218_vm8, %vm6216_vm15 }
 0xe09   :  { %9019 = vmatpush.bf16.msk.msra.mxu2 %vm9018_vm6, %v15160_v0  ;;  %vm9022_vm15 = vmpackc.low %vm6210_vm14, %vm6208_vm5  ;;  %vm5970_vm6 = vcmp.eq.s32.totalorder %v9623_v32, %v14102_v51  ;;  %vm6260_vm14 = vcmp.eq.s32.totalorder %v9415_v7, %v14175_v62 }
 0xe0b   :  { %8990 = vmatpush.bf16.msk.msrb.mxu3 %vm8989_vm12, %v15160_v0  ;;  %vm5978_vm12 = vcmp.eq.s32.totalorder %v9547_v24, %v14102_v51  ;;  %v14315_v60 = vpop.f32.mrf.mxu2 }
 0xe0c   :  { %vm8995_vm9 = vmpackc.low %vm5980_vm11, %vm5978_vm12  ;;  %vm6200_vm12 = vcmp.eq.s32.totalorder %v9402_v2, %v14175_v62  ;;  %vm6202_vm11 = vcmp.eq.s32.totalorder %v9650_v34, %v14175_v62 }
 0xe0d   :  { %9021 = vmatpush.bf16.msk.msra.mxu2 %vm9020_vm0, %v15160_v0  ;;  %vm5966_vm0 = vcmp.eq.s32.totalorder %v9658_v35, %v14102_v51  ;;  %vm9026_vm5 = vmpackc.low %vm6202_vm11, %vm6200_vm12  ;;  %vm6248_vm11 = vcmp.eq.s32.totalorder %v9509_v20, %v14175_v62 }
 0xe0f   :  { %8992 = vmatpush.bf16.msk.msrb.mxu3 %vm8991_vm2, %v15160_v0  ;;  %vm5976_vm2 = vcmp.eq.s32.totalorder %v9588_v29, %v14102_v51 }
 0xe10   :  { %vm8997_vm8 = vmpackc.low %vm5976_vm2, %vm5974_vm3  ;;  %vm6262_vm3 = vcmp.eq.s32.totalorder %v9418_v8, %v14175_v62 }
 0xe11   :  { %9023 = vmatpush.bf16.msk.msra.mxu2 %vm9022_vm15, %v15160_v0  ;;  %vm9028_vm15 = vmpackc.low %vm6262_vm3, %vm6260_vm14  ;;  %vm6246_vm14 = vcmp.eq.s32.totalorder %v9550_v25, %v14175_v62 }
 0xe13   :  { %8994 = vmatpush.bf16.msk.msrb.mxu3 %vm8993_vm10, %v15160_v0  ;;  %vm5972_vm10 = vcmp.eq.s32.totalorder %v9626_v33, %v14102_v51 }
 0xe14   :  { %vm8999_vm4 = vmpackc.low %vm5972_vm10, %vm5970_vm6  ;;  %vm15219_vm10 = vcmask 64512  }
 0xe15   :  { %9025 = vmatpush.bf16.msk.msra.mxu2 %vm9024_vm13, %v15160_v0  ;;  %vm9030_vm6 = vmpackc.low %vm6258_vm1, %vm6256_vm7  ;;  %vm6252_vm13 = vcmp.eq.s32.totalorder %v9470_v16, %v14175_v62  ;;  %vm6236_vm7 = vcmp.eq.s32.totalorder %v9623_v32, %v14175_v62  ;;  %vm6238_vm1 = vcmp.eq.s32.totalorder %v9626_v33, %v14175_v62 }
 0xe17   :  { %8996 = vmatpush.bf16.msk.msrb.mxu3 %vm8995_vm9, %v15160_v0  ;;  %vm5968_vm9 = vcmp.eq.s32.totalorder %v9661_v36, %v14102_v51  ;;  %v14271_v51 = vld [vmem:[%s15064_s2 + $0xb0] sm:$0xff] }
 0xe18   :  { %vm9001_vm2 = vmpackc.low %vm5968_vm9, %vm5966_vm0  ;;  %vm6250_vm0 = vcmp.eq.s32.totalorder %v9512_v21, %v14175_v62 }
 0xe19   :  { %9027 = vmatpush.bf16.msk.msra.mxu2 %vm9026_vm5, %v15160_v0  ;;  %vm9034_vm9 = vmpackc.low %vm6250_vm0, %vm6248_vm11  ;;  %vm6244_vm5 = vcmp.eq.s32.totalorder %v9547_v24, %v14175_v62  ;;  %vm6231_vm11 = vcmp.eq.s32.totalorder %v9412_v6, %v14318_v55 }
 0xe1a   :  { %vm9036_vm3 = vmpackc.low %vm6246_vm14, %vm6244_vm5  ;;  %vm6227_vm5 = vcmp.eq.s32.totalorder %v9424_v10, %v14318_v55 }
 0xe1b   :  { %8998 = vmatpush.bf16.msk.msrb.mxu3 %vm8997_vm8, %v15160_v0  ;;  %vm15218_vm8 = vcmask 1043456  }
 0xe1c   :  { %6368 = vmatmul.bf16.vlgmr.msra.gmra.mxu2 %v9728_v43 }
 0xe1d   :  { %v6115_v56 = vpop.f32.mrf.mxu1 }
 0xe1e   :  { %v6116_v38 = vadd.f32 %v6115_v56, %v14166_v57  ;;  %v14375_v57 = vld [vmem:[%s15062_s0 + $0x30] sm:$0x3] }
 0xe1f   :  { %9000 = vmatpush.bf16.msk.msrb.mxu3 %vm8999_vm4, %v15160_v0  ;;  %vm6254_vm4 = vcmp.eq.s32.totalorder %v9473_v17, %v14175_v62  ;;  %v14378_v1 = vperm.slane %v14375_v57, 0 }
 0xe20   :  { %v6148_v45 = vpack.c.bf16 %v6116_v38, %v6116_v38  ;;  %vm9032_vm12 = vmpackc.low %vm6254_vm4, %vm6252_vm13  ;;  %vm6234_vm13 = vcmp.eq.s32.totalorder %v9661_v36, %v14175_v62  ;;  %v14471_v38 = vld [vmem:[%s15064_s2 + $0xb8] sm:$0xff] }
 0xe22   :  { %v6159_v46 = vsel %vm15218_vm8, %v6148_v45, 0 }
 0xe23   :  { %9002 = vmatpush.bf16.msk.msrb.mxu3 %vm9001_vm2, %v15160_v0  ;;  %6171 = vmatpush.bf16.msra.mxu0 %v6159_v46  ;;  %vm6240_vm2 = vcmp.eq.s32.totalorder %v9585_v28, %v14175_v62  ;;  %v14516_v46 = vperm.slane %v14375_v57, 1 }
 0xe25   :  { %v6117_v39 = vpop.f32.mrf.mxu1 }
 0xe26   :  { %6140 = vmatmul.bf16.vlgmr.msrb.gmra.mxu3 %v9735_v44  ;;  %9009 = vmatmul.msk.bf16.vlgmr.msra.gmra.mxu0 %vm15219_vm10, %v14271_v51  ;;  %vm6232_vm10 = vcmp.eq.s32.totalorder %v9658_v35, %v14175_v62 }
 0xe27   :  { %9029 = vmatpush.bf16.msk.msra.mxu3 %vm9028_vm15, %v15160_v0  ;;  %vm6242_vm15 = vcmp.eq.s32.totalorder %v9588_v29, %v14175_v62  ;;  %vm9042_vm4 = vmpackc.low %vm6234_vm13, %vm6232_vm10  ;;  %vm6215_vm10 = vcmp.eq.s32.totalorder %v9539_v23, %v14318_v55 }
 0xe28   :  { %vm9038_vm8 = vmpackc.low %vm6242_vm15, %vm6240_vm2  ;;  %vm6223_vm2 = vcmp.eq.s32.totalorder %v9467_v15, %v14318_v55 }
 0xe2b   :  { %9031 = vmatpush.bf16.msk.msra.mxu3 %vm9030_vm6, %v15160_v0  ;;  %vm9040_vm6 = vmpackc.low %vm6238_vm1, %vm6236_vm7  ;;  %vm6219_vm7 = vcmp.eq.s32.totalorder %v9495_v19, %v14318_v55 }
 0xe2d   :  { %v6128_v47 = vpop.f32.mrf.mxu2 }
 0xe2f   :  { %9033 = vmatpush.bf16.msk.msra.mxu3 %vm9032_vm12, %v15160_v0  ;;  %vm6229_vm12 = vcmp.eq.s32.totalorder %v9409_v5, %v14318_v55 }
 0xe30   :  { %vm9044_vm0 = vmpackc.low %vm6231_vm11, %vm6229_vm12  ;;  %vm6211_vm12 = vcmp.eq.s32.totalorder %v9577_v27, %v14318_v55 }
 0xe31   :  { %9045 = vmatpush.bf16.msk.msrb.mxu0 %vm9044_vm0, %v15160_v0  ;;  %vm6205_vm0 = vcmp.eq.s32.totalorder %v9612_v30, %v14318_v55 }
 0xe33   :  { %9035 = vmatpush.bf16.msk.msra.mxu3 %vm9034_vm9, %v15160_v0  ;;  %vm6225_vm9 = vcmp.eq.s32.totalorder %v9421_v9, %v14318_v55 }
 0xe34   :  { %vm9046_vm14 = vmpackc.low %vm6227_vm5, %vm6225_vm9  ;;  %vm6207_vm9 = vcmp.eq.s32.totalorder %v9615_v31, %v14318_v55 }
 0xe35   :  { %v6130_v40 = vpop.f32.mrf.mxu2  ;;  %9047 = vmatpush.bf16.msk.msrb.mxu0 %vm9046_vm14, %v15160_v0  ;;  %vm9056_vm5 = vmpackc.low %vm6207_vm9, %vm6205_vm0  ;;  %vm6201_vm14 = vcmp.eq.s32.totalorder %v9402_v2, %v14318_v55  ;;  %vm6493_vm0 = vcmp.eq.s32.totalorder %v9424_v10, %v14378_v1 }
 0xe37   :  { %9037 = vmatpush.bf16.msk.msra.mxu3 %vm9036_vm3, %v15160_v0  ;;  %vm6221_vm3 = vcmp.eq.s32.totalorder %v9464_v14, %v14318_v55 }
 0xe38   :  { %vm9048_vm15 = vmpackc.low %vm6223_vm2, %vm6221_vm3  ;;  %vm6203_vm3 = vcmp.eq.s32.totalorder %v9650_v34, %v14318_v55 }
 0xe39   :  { %9049 = vmatpush.bf16.msk.msrb.mxu0 %vm9048_vm15, %v15160_v0  ;;  %vm9058_vm2 = vmpackc.low %vm6203_vm3, %vm6201_vm14  ;;  %vm6261_vm15 = vcmp.eq.s32.totalorder %v9415_v7, %v14318_v55  ;;  %vm6487_vm14 = vcmp.eq.s32.totalorder %v9464_v14, %v14378_v1  ;;  %vm6489_vm3 = vcmp.eq.s32.totalorder %v9467_v15, %v14378_v1 }
 0xe3b   :  { %9039 = vmatpush.bf16.msk.msra.mxu3 %vm9038_vm8, %v15160_v0  ;;  %vm6217_vm8 = vcmp.eq.s32.totalorder %v9492_v18, %v14318_v55 }
 0xe3c   :  { %vm9050_vm1 = vmpackc.low %vm6219_vm7, %vm6217_vm8  ;;  %vm6263_vm8 = vcmp.eq.s32.totalorder %v9418_v8, %v14318_v55  ;;  %vm6495_vm7 = vcmp.eq.s32.totalorder %v9409_v5, %v14378_v1 }
 0xe3d   :  { %9051 = vmatpush.bf16.msk.msrb.mxu0 %vm9050_vm1, %v15160_v0  ;;  %vm6497_vm1 = vcmp.eq.s32.totalorder %v9412_v6, %v14378_v1 }
 0xe3f   :  { %9041 = vmatpush.bf16.msk.msra.mxu3 %vm9040_vm6, %v15160_v0  ;;  %vm6213_vm6 = vcmp.eq.s32.totalorder %v9536_v22, %v14318_v55 }
 0xe40   :  { %vm9052_vm13 = vmpackc.low %vm6215_vm10, %vm6213_vm6 }
 0xe41   :  { %9053 = vmatpush.bf16.msk.msrb.mxu0 %vm9052_vm13, %v15160_v0  ;;  %vm9085_vm6 = vmpackc.low %vm6497_vm1, %vm6495_vm7  ;;  %vm15220_vm13 = vcmask 1043456  }
 0xe42   :  { %vm9060_vm10 = vmpackc.low %vm6263_vm8, %vm6261_vm15  ;;  %vm6253_vm15 = vcmp.eq.s32.totalorder %v9470_v16, %v14318_v55  ;;  %vm6255_vm8 = vcmp.eq.s32.totalorder %v9473_v17, %v14318_v55 }
 0xe43   :  { %9043 = vmatpush.bf16.msk.msra.mxu3 %vm9042_vm4, %v15160_v0  ;;  %vm6209_vm4 = vcmp.eq.s32.totalorder %v9574_v26, %v14318_v55  ;;  %vm9089_vm7 = vmpackc.low %vm6489_vm3, %vm6487_vm14  ;;  %vm6247_vm14 = vcmp.eq.s32.totalorder %v9550_v25, %v14318_v55 }
 0xe44   :  { %vm9054_vm11 = vmpackc.low %vm6211_vm12, %vm6209_vm4  ;;  %vm6257_vm4 = vcmp.eq.s32.totalorder %v9427_v11, %v14318_v55  ;;  %vm6259_vm12 = vcmp.eq.s32.totalorder %v9430_v12, %v14318_v55 }
 0xe45   :  { %9055 = vmatpush.bf16.msk.msrb.mxu0 %vm9054_vm11, %v15160_v0  ;;  %vm6491_vm11 = vcmp.eq.s32.totalorder %v9421_v9, %v14378_v1  ;;  %vm9064_vm1 = vmpackc.low %vm6255_vm8, %vm6253_vm15  ;;  %vm6475_vm15 = vcmp.eq.s32.totalorder %v9574_v26, %v14378_v1  ;;  %vm6477_vm8 = vcmp.eq.s32.totalorder %v9577_v27, %v14378_v1 }
 0xe46   :  { %6381 = vmatmul.bf16.vlgmr.msra.gmra.mxu3 %v9735_v44  ;;  %vm9087_vm9 = vmpackc.low %vm6493_vm0, %vm6491_vm11  ;;  %vm6479_vm0 = vcmp.eq.s32.totalorder %v9536_v22, %v14378_v1 }
 0xe49   :  { %9057 = vmatpush.bf16.msk.msrb.mxu0 %vm9056_vm5, %v15160_v0  ;;  %vm9062_vm5 = vmpackc.low %vm6259_vm12, %vm6257_vm4  ;;  %vm6251_vm4 = vcmp.eq.s32.totalorder %v9512_v21, %v14318_v55 }
 0xe4d   :  { %9059 = vmatpush.bf16.msk.msrb.mxu0 %vm9058_vm2, %v15160_v0  ;;  %vm15221_vm2 = vcmask 64512  }
 0xe50   :  { %6394 = vmatmul.bf16.vlgmr.msrb.gmra.mxu0 %v9728_v43 }
 0xe51   :  { %9086 = vmatpush.bf16.msk.msra.mxu0 %vm9085_vm6, %v15160_v0  ;;  %vm6483_vm6 = vcmp.eq.s32.totalorder %v9492_v18, %v14378_v1 }
 0xe55   :  { %9088 = vmatpush.bf16.msk.msra.mxu0 %vm9087_vm9, %v15160_v0  ;;  %vm6481_vm9 = vcmp.eq.s32.totalorder %v9539_v23, %v14378_v1 }
 0xe56   :  { %vm9093_vm3 = vmpackc.low %vm6481_vm9, %vm6479_vm0 }
 0xe59   :  { %9090 = vmatpush.bf16.msk.msra.mxu0 %vm9089_vm7, %v15160_v0  ;;  %vm6241_vm7 = vcmp.eq.s32.totalorder %v9585_v28, %v14318_v55 }
 0xe89   :  { %v5920_v48 = vpop.f32.mrf.mxu3 }
 0xe8a   :  { %v14331_v49 = vadd.f32 %v5920_v48, %v14129_v53 }
 0xe91   :  { %v5922_v52 = vpop.f32.mrf.mxu3 }
 0xe92   :  { %v14348_v53 = vadd.f32 %v5922_v52, %v14144_v13 }
 0xe9f   :  { %v14369_v13 = vpop.f32.mrf.mxu2 }
 0xea3   :  { %v6173_v37 = vpop.f32.mrf.mxu0 }
 0xea4   :  { %v14366_v3 = vadd.f32 %v6173_v37, %v14196_v41 }
 0xea7   :  { %v6371_v63 = vpop.f32.mrf.mxu2 }
 0xea9   :  { %v6141_v50 = vpop.f32.mrf.mxu3 }
 0xeaa   :  { %v6142_v62 = vadd.f32 %v6141_v50, %v6128_v47 }
 0xeac   :  { %v6149_v54 = vpack.c.bf16 %v6142_v62, %v6142_v62 }
 0xeae   :  { %v6162_v4 = vsel %vm15220_vm13, %v6149_v54, 0  ;;  %vm6249_vm13 = vcmp.eq.s32.totalorder %v9509_v20, %v14318_v55 }
 0xeaf   :  { %6185 = vmatpush.bf16.msra.mxu1 %v6162_v4  ;;  %vm9066_vm11 = vmpackc.low %vm6251_vm4, %vm6249_vm13  ;;  %vm6471_vm13 = vcmp.eq.s32.totalorder %v9612_v30, %v14378_v1  ;;  %vm6473_vm4 = vcmp.eq.s32.totalorder %v9615_v31, %v14378_v1 }
 0xeb0   :  { %vm9097_vm0 = vmpackc.low %vm6473_vm4, %vm6471_vm13  ;;  %vm6523_vm13 = vcmp.eq.s32.totalorder %v9427_v11, %v14378_v1  ;;  %vm6525_vm4 = vcmp.eq.s32.totalorder %v9430_v12, %v14378_v1 }
 0xeb1   :  { %v6143_v42 = vpop.f32.mrf.mxu3 }
 0xeb2   :  { %9010 = vmatmul.msk.bf16.vlgmr.msra.gmra.mxu1 %vm15221_vm2, %v14271_v51  ;;  %v14522_v51 = vpop.f32.mrf.mxu0 }
 0xeb3   :  { %9061 = vmatpush.bf16.msk.msrb.mxu1 %vm9060_vm10, %v15160_v0  ;;  %vm6485_vm10 = vcmp.eq.s32.totalorder %v9495_v19, %v14378_v1 }
 0xeb4   :  { %vm9091_vm12 = vmpackc.low %vm6485_vm10, %vm6483_vm6 }
 0xeb5   :  { %9092 = vmatpush.bf16.msk.msra.mxu0 %vm9091_vm12, %v15160_v0  ;;  %vm9095_vm6 = vmpackc.low %vm6477_vm8, %vm6475_vm15  ;;  %vm6237_vm12 = vcmp.eq.s32.totalorder %v9623_v32, %v14318_v55  ;;  %vm6527_vm8 = vcmp.eq.s32.totalorder %v9415_v7, %v14378_v1 }
 0xeb7   :  { %9063 = vmatpush.bf16.msk.msrb.mxu1 %vm9062_vm5, %v15160_v0  ;;  %vm6245_vm5 = vcmp.eq.s32.totalorder %v9547_v24, %v14318_v55 }
 0xeb8   :  { %vm9068_vm2 = vmpackc.low %vm6247_vm14, %vm6245_vm5  ;;  %vm6467_vm5 = vcmp.eq.s32.totalorder %v9402_v2, %v14378_v1  ;;  %vm6469_vm14 = vcmp.eq.s32.totalorder %v9650_v34, %v14378_v1 }
 0xeb9   :  { %9094 = vmatpush.bf16.msk.msra.mxu0 %vm9093_vm3, %v15160_v0  ;;  %vm6233_vm3 = vcmp.eq.s32.totalorder %v9658_v35, %v14318_v55  ;;  %vm9099_vm15 = vmpackc.low %vm6469_vm14, %vm6467_vm5  ;;  %vm6515_vm14 = vcmp.eq.s32.totalorder %v9509_v20, %v14378_v1 }
 0xebb   :  { %9065 = vmatpush.bf16.msk.msrb.mxu1 %vm9064_vm1, %v15160_v0  ;;  %vm6243_vm1 = vcmp.eq.s32.totalorder %v9588_v29, %v14318_v55 }
 0xebc   :  { %vm9070_vm10 = vmpackc.low %vm6243_vm1, %vm6241_vm7  ;;  %vm6529_vm7 = vcmp.eq.s32.totalorder %v9418_v8, %v14378_v1 }
 0xebd   :  { %9096 = vmatpush.bf16.msk.msra.mxu0 %vm9095_vm6, %v15160_v0  ;;  %vm9101_vm6 = vmpackc.low %vm6529_vm7, %vm6527_vm8  ;;  %vm6513_vm8 = vcmp.eq.s32.totalorder %v9550_v25, %v14378_v1 }
 0xebf   :  { %9067 = vmatpush.bf16.msk.msrb.mxu1 %vm9066_vm11, %v15160_v0  ;;  %vm6239_vm11 = vcmp.eq.s32.totalorder %v9626_v33, %v14318_v55 }
 0xec0   :  { %vm9072_vm9 = vmpackc.low %vm6239_vm11, %vm6237_vm12  ;;  %vm15223_vm11 = vcmask 64512  }
 0xec1   :  { %9098 = vmatpush.bf16.msk.msra.mxu0 %vm9097_vm0, %v15160_v0  ;;  %vm9103_vm12 = vmpackc.low %vm6525_vm4, %vm6523_vm13  ;;  %vm6519_vm0 = vcmp.eq.s32.totalorder %v9470_v16, %v14378_v1  ;;  %vm6503_vm13 = vcmp.eq.s32.totalorder %v9623_v32, %v14378_v1  ;;  %vm6505_vm4 = vcmp.eq.s32.totalorder %v9626_v33, %v14378_v1 }
 0xec3   :  { %9069 = vmatpush.bf16.msk.msrb.mxu1 %vm9068_vm2, %v15160_v0  ;;  %vm6235_vm2 = vcmp.eq.s32.totalorder %v9661_v36, %v14318_v55 }
 0xec4   :  { %vm9074_vm1 = vmpackc.low %vm6235_vm2, %vm6233_vm3  ;;  %vm6517_vm3 = vcmp.eq.s32.totalorder %v9512_v21, %v14378_v1 }
 0xec5   :  { %9100 = vmatpush.bf16.msk.msra.mxu0 %vm9099_vm15, %v15160_v0  ;;  %vm9107_vm2 = vmpackc.low %vm6517_vm3, %vm6515_vm14  ;;  %vm6511_vm15 = vcmp.eq.s32.totalorder %v9547_v24, %v14378_v1  ;;  %vm6498_vm14 = vcmp.eq.s32.totalorder %v9412_v6, %v14516_v46 }
 0xec6   :  { %vm9109_vm7 = vmpackc.low %vm6513_vm8, %vm6511_vm15  ;;  %vm6494_vm15 = vcmp.eq.s32.totalorder %v9424_v10, %v14516_v46 }
 0xec7   :  { %9071 = vmatpush.bf16.msk.msrb.mxu1 %vm9070_vm10, %v15160_v0  ;;  %vm15222_vm10 = vcmask 1043456  }
 0xec8   :  { %6635 = vmatmul.bf16.vlgmr.msra.gmra.mxu0 %v9728_v43 }
 0xec9   :  { %v6382_v61 = vpop.f32.mrf.mxu3 }
 0xeca   :  { %v6383_v41 = vadd.f32 %v6382_v61, %v14369_v13 }
 0xecb   :  { %9073 = vmatpush.bf16.msk.msrb.mxu1 %vm9072_vm9, %v15160_v0  ;;  %vm6521_vm9 = vcmp.eq.s32.totalorder %v9473_v17, %v14378_v1 }
 0xecc   :  { %v6415_v59 = vpack.c.bf16 %v6383_v41, %v6383_v41  ;;  %vm9105_vm5 = vmpackc.low %vm6521_vm9, %vm6519_vm0  ;;  %vm6501_vm0 = vcmp.eq.s32.totalorder %v9661_v36, %v14378_v1 }
 0xecd   :  { %v6395_v39 = vpop.f32.mrf.mxu0 }
 0xece   :  { %v6426_v56 = vsel %vm15222_vm10, %v6415_v59, 0  ;;  %v14671_v59 = vld [vmem:[%s15064_s2 + $0xc0] sm:$0xff] }
 0xecf   :  { %9075 = vmatpush.bf16.msk.msrb.mxu1 %vm9074_vm1, %v15160_v0  ;;  %6438 = vmatpush.bf16.msrb.mxu2 %v6426_v56  ;;  %vm6507_vm1 = vcmp.eq.s32.totalorder %v9585_v28, %v14378_v1 }
 0xed1   :  { %v6384_v45 = vpop.f32.mrf.mxu3 }
 0xed2   :  { %6407 = vmatmul.bf16.vlgmr.msrb.gmra.mxu1 %v9735_v44  ;;  %9082 = vmatmul.msk.bf16.vlgmr.msrb.gmra.mxu2 %vm15223_vm11, %v14471_v38  ;;  %vm6499_vm11 = vcmp.eq.s32.totalorder %v9658_v35, %v14378_v1 }
 0xed3   :  { %9102 = vmatpush.bf16.msk.msra.mxu1 %vm9101_vm6, %v15160_v0  ;;  %vm6509_vm6 = vcmp.eq.s32.totalorder %v9588_v29, %v14378_v1  ;;  %vm9115_vm9 = vmpackc.low %vm6501_vm0, %vm6499_vm11  ;;  %vm6482_vm11 = vcmp.eq.s32.totalorder %v9539_v23, %v14516_v46 }
 0xed4   :  { %vm9111_vm10 = vmpackc.low %vm6509_vm6, %vm6507_vm1  ;;  %vm6490_vm1 = vcmp.eq.s32.totalorder %v9467_v15, %v14516_v46 }
 0xed5   :  { %v6397_v47 = vpop.f32.mrf.mxu0 }
 0xed7   :  { %9104 = vmatpush.bf16.msk.msra.mxu1 %vm9103_vm12, %v15160_v0  ;;  %vm9113_vm12 = vmpackc.low %vm6505_vm4, %vm6503_vm13  ;;  %vm6486_vm13 = vcmp.eq.s32.totalorder %v9495_v19, %v14516_v46 }
 0xedb   :  { %9106 = vmatpush.bf16.msk.msra.mxu1 %vm9105_vm5, %v15160_v0  ;;  %vm6496_vm5 = vcmp.eq.s32.totalorder %v9409_v5, %v14516_v46 }
 0xedc   :  { %vm9117_vm3 = vmpackc.low %vm6498_vm14, %vm6496_vm5  ;;  %vm6478_vm5 = vcmp.eq.s32.totalorder %v9577_v27, %v14516_v46 }
 0xedd   :  { %9118 = vmatpush.bf16.msk.msra.mxu2 %vm9117_vm3, %v15160_v0  ;;  %vm6472_vm3 = vcmp.eq.s32.totalorder %v9612_v30, %v14516_v46 }
 0xedf   :  { %9108 = vmatpush.bf16.msk.msra.mxu1 %vm9107_vm2, %v15160_v0  ;;  %vm6492_vm2 = vcmp.eq.s32.totalorder %v9421_v9, %v14516_v46 }
 0xee0   :  { %vm9119_vm8 = vmpackc.low %vm6494_vm15, %vm6492_vm2  ;;  %vm6474_vm2 = vcmp.eq.s32.totalorder %v9615_v31, %v14516_v46 }
 0xee1   :  { %9120 = vmatpush.bf16.msk.msra.mxu2 %vm9119_vm8, %v15160_v0  ;;  %vm9129_vm15 = vmpackc.low %vm6474_vm2, %vm6472_vm3  ;;  %vm6468_vm8 = vcmp.eq.s32.totalorder %v9402_v2, %v14516_v46 }
 0xee3   :  { %9110 = vmatpush.bf16.msk.msra.mxu1 %vm9109_vm7, %v15160_v0  ;;  %vm6488_vm7 = vcmp.eq.s32.totalorder %v9464_v14, %v14516_v46 }
 0xee4   :  { %vm9121_vm6 = vmpackc.low %vm6490_vm1, %vm6488_vm7  ;;  %vm6470_vm7 = vcmp.eq.s32.totalorder %v9650_v34, %v14516_v46 }
 0xee5   :  { %9122 = vmatpush.bf16.msk.msra.mxu2 %vm9121_vm6, %v15160_v0  ;;  %vm9131_vm1 = vmpackc.low %vm6470_vm7, %vm6468_vm8  ;;  %vm6528_vm6 = vcmp.eq.s32.totalorder %v9415_v7, %v14516_v46 }
 0xee7   :  { %9112 = vmatpush.bf16.msk.msra.mxu1 %vm9111_vm10, %v15160_v0  ;;  %vm6484_vm10 = vcmp.eq.s32.totalorder %v9492_v18, %v14516_v46 }
 0xee8   :  { %vm9123_vm4 = vmpackc.low %vm6486_vm13, %vm6484_vm10  ;;  %vm6530_vm10 = vcmp.eq.s32.totalorder %v9418_v8, %v14516_v46 }
 0xee9   :  { %9124 = vmatpush.bf16.msk.msra.mxu2 %vm9123_vm4, %v15160_v0 }
 0xeeb   :  { %9114 = vmatpush.bf16.msk.msra.mxu1 %vm9113_vm12, %v15160_v0  ;;  %vm6480_vm12 = vcmp.eq.s32.totalorder %v9536_v22, %v14516_v46 }
 0xeec   :  { %vm9125_vm0 = vmpackc.low %vm6482_vm11, %vm6480_vm12 }
 0xeed   :  { %9126 = vmatpush.bf16.msk.msra.mxu2 %vm9125_vm0, %v15160_v0  ;;  %vm9133_vm11 = vmpackc.low %vm6530_vm10, %vm6528_vm6  ;;  %vm15224_vm0 = vcmask 1043456   ;;  %vm6520_vm6 = vcmp.eq.s32.totalorder %v9470_v16, %v14516_v46  ;;  %vm6522_vm10 = vcmp.eq.s32.totalorder %v9473_v17, %v14516_v46 }
 0xeef   :  { %9116 = vmatpush.bf16.msk.msra.mxu1 %vm9115_vm9, %v15160_v0  ;;  %vm6476_vm9 = vcmp.eq.s32.totalorder %v9574_v26, %v14516_v46 }
 0xef0   :  { %vm9127_vm14 = vmpackc.low %vm6478_vm5, %vm6476_vm9  ;;  %vm6524_vm9 = vcmp.eq.s32.totalorder %v9427_v11, %v14516_v46  ;;  %vm6526_vm5 = vcmp.eq.s32.totalorder %v9430_v12, %v14516_v46 }
 0xef1   :  { %9128 = vmatpush.bf16.msk.msra.mxu2 %vm9127_vm14, %v15160_v0 }
 0xef2   :  { %6648 = vmatmul.bf16.vlgmr.msra.gmra.mxu1 %v9735_v44 }
 0xef5   :  { %9130 = vmatpush.bf16.msk.msra.mxu2 %vm9129_vm15, %v15160_v0  ;;  %vm9135_vm15 = vmpackc.low %vm6526_vm5, %vm6524_vm9  ;;  %vm6518_vm9 = vcmp.eq.s32.totalorder %v9512_v21, %v14516_v46 }
 0xef9   :  { %9132 = vmatpush.bf16.msk.msra.mxu2 %vm9131_vm1, %v15160_v0  ;;  %vm15225_vm1 = vcmask 64512  }
 0xefc   :  { %6661 = vmatmul.bf16.vlgmr.msra.gmra.mxu2 %v9728_v43 }
 0xf2f   :  { %v6187_v55 = vpop.f32.mrf.mxu1 }
 0xf30   :  { %v14531_v40 = vadd.f32 %v6187_v55, %v14331_v49 }
 0xf37   :  { %v6189_v48 = vpop.f32.mrf.mxu1 }
 0xf38   :  { %v14544_v49 = vadd.f32 %v6189_v48, %v14348_v53  ;;  %v14572_v53 = vld [vmem:[%s15062_s0 + $0x32] sm:$0x3] }
 0xf39   :  { %v14575_v13 = vperm.slane %v14572_v53, 0 }
 0xf3b   :  { %vm6762_vm13 = vcmp.eq.s32.totalorder %v9409_v5, %v14575_v13  ;;  %vm6764_vm4 = vcmp.eq.s32.totalorder %v9412_v6, %v14575_v13  ;;  %vm6758_vm14 = vcmp.eq.s32.totalorder %v9421_v9, %v14575_v13  ;;  %vm6760_vm3 = vcmp.eq.s32.totalorder %v9424_v10, %v14575_v13 }
 0xf3c   :  { %vm9158_vm12 = vmpackc.low %vm6764_vm4, %vm6762_vm13  ;;  %vm6754_vm8 = vcmp.eq.s32.totalorder %v9464_v14, %v14575_v13  ;;  %vm6756_vm7 = vcmp.eq.s32.totalorder %v9467_v15, %v14575_v13 }
 0xf3d   :  { %9159 = vmatpush.bf16.msk.msrb.mxu2 %vm9158_vm12, %v15160_v0  ;;  %vm9160_vm2 = vmpackc.low %vm6760_vm3, %vm6758_vm14  ;;  %vm6750_vm12 = vcmp.eq.s32.totalorder %v9492_v18, %v14575_v13  ;;  %vm6746_vm3 = vcmp.eq.s32.totalorder %v9536_v22, %v14575_v13 }
 0xf3e   :  { %vm9162_vm13 = vmpackc.low %vm6756_vm7, %vm6754_vm8  ;;  %vm6514_vm8 = vcmp.eq.s32.totalorder %v9550_v25, %v14516_v46 }
 0xf3f   :  { %vm9137_vm4 = vmpackc.low %vm6522_vm10, %vm6520_vm6  ;;  %vm6742_vm6 = vcmp.eq.s32.totalorder %v9574_v26, %v14575_v13  ;;  %vm6744_vm10 = vcmp.eq.s32.totalorder %v9577_v27, %v14575_v13 }
 0xf41   :  { %9161 = vmatpush.bf16.msk.msrb.mxu2 %vm9160_vm2, %v15160_v0  ;;  %vm6748_vm2 = vcmp.eq.s32.totalorder %v9539_v23, %v14575_v13 }
 0xf42   :  { %vm9166_vm7 = vmpackc.low %vm6748_vm2, %vm6746_vm3 }
 0xf45   :  { %v14566_v52 = vpop.f32.mrf.mxu0  ;;  %9163 = vmatpush.bf16.msk.msrb.mxu2 %vm9162_vm13, %v15160_v0  ;;  %vm6508_vm13 = vcmp.eq.s32.totalorder %v9585_v28, %v14516_v46 }
 0xf4d   :  { %v6638_v54 = vpop.f32.mrf.mxu0 }
 0xf4f   :  { %v6408_v37 = vpop.f32.mrf.mxu1 }
 0xf50   :  { %v6409_v57 = vadd.f32 %v6408_v37, %v6395_v39  ;;  %v14775_v37 = vld [vmem:[%s15062_s0 + $0x34] sm:$0x3] }
 0xf52   :  { %v6416_v50 = vpack.c.bf16 %v6409_v57, %v6409_v57  ;;  %v14778_v57 = vperm.slane %v14775_v37, 0 }
 0xf54   :  { %v6429_v1 = vsel %vm15224_vm0, %v6416_v50, 0  ;;  %vm6516_vm0 = vcmp.eq.s32.totalorder %v9509_v20, %v14516_v46 }
 0xf55   :  { %v6440_v62 = vpop.f32.mrf.mxu2  ;;  %6452 = vmatpush.bf16.msrb.mxu3 %v6429_v1  ;;  %vm9139_vm14 = vmpackc.low %vm6518_vm9, %vm6516_vm0  ;;  %vm6738_vm0 = vcmp.eq.s32.totalorder %v9612_v30, %v14575_v13  ;;  %vm6740_vm9 = vcmp.eq.s32.totalorder %v9615_v31, %v14575_v13 }
 0xf56   :  { %v14596_v4 = vadd.f32 %v6440_v62, %v14366_v3  ;;  %vm9170_vm3 = vmpackc.low %vm6740_vm9, %vm6738_vm0  ;;  %vm6790_vm0 = vcmp.eq.s32.totalorder %v9427_v11, %v14575_v13  ;;  %vm6792_vm9 = vcmp.eq.s32.totalorder %v9430_v12, %v14575_v13 }
 0xf57   :  { %v6410_v63 = vpop.f32.mrf.mxu1 }
 0xf58   :  { %9083 = vmatmul.msk.bf16.vlgmr.msrb.gmra.mxu3 %vm15225_vm1, %v14471_v38 }
 0xf59   :  { %9134 = vmatpush.bf16.msk.msra.mxu3 %vm9133_vm11, %v15160_v0  ;;  %vm6752_vm11 = vcmp.eq.s32.totalorder %v9495_v19, %v14575_v13 }
 0xf5a   :  { %vm9164_vm5 = vmpackc.low %vm6752_vm11, %vm6750_vm12 }
 0xf5b   :  { %9165 = vmatpush.bf16.msk.msrb.mxu2 %vm9164_vm5, %v15160_v0  ;;  %vm9168_vm12 = vmpackc.low %vm6744_vm10, %vm6742_vm6  ;;  %vm6504_vm5 = vcmp.eq.s32.totalorder %v9623_v32, %v14516_v46  ;;  %vm6794_vm10 = vcmp.eq.s32.totalorder %v9415_v7, %v14575_v13 }
 0xf5d   :  { %9136 = vmatpush.bf16.msk.msra.mxu3 %vm9135_vm15, %v15160_v0  ;;  %vm6512_vm15 = vcmp.eq.s32.totalorder %v9547_v24, %v14516_v46  ;;  %v14715_v38 = vpop.f32.mrf.mxu2 }
 0xf5e   :  { %vm9141_vm1 = vmpackc.low %vm6514_vm8, %vm6512_vm15  ;;  %vm6734_vm15 = vcmp.eq.s32.totalorder %v9402_v2, %v14575_v13  ;;  %vm6736_vm8 = vcmp.eq.s32.totalorder %v9650_v34, %v14575_v13 }
 0xf5f   :  { %9167 = vmatpush.bf16.msk.msrb.mxu2 %vm9166_vm7, %v15160_v0  ;;  %vm6500_vm7 = vcmp.eq.s32.totalorder %v9658_v35, %v14516_v46  ;;  %vm9172_vm6 = vmpackc.low %vm6736_vm8, %vm6734_vm15  ;;  %vm6782_vm8 = vcmp.eq.s32.totalorder %v9509_v20, %v14575_v13 }
 0xf61   :  { %9138 = vmatpush.bf16.msk.msra.mxu3 %vm9137_vm4, %v15160_v0  ;;  %vm6510_vm4 = vcmp.eq.s32.totalorder %v9588_v29, %v14516_v46 }
 0xf62   :  { %vm9143_vm11 = vmpackc.low %vm6510_vm4, %vm6508_vm13  ;;  %vm6796_vm13 = vcmp.eq.s32.totalorder %v9418_v8, %v14575_v13 }
 0xf63   :  { %9169 = vmatpush.bf16.msk.msrb.mxu2 %vm9168_vm12, %v15160_v0  ;;  %vm9174_vm12 = vmpackc.low %vm6796_vm13, %vm6794_vm10  ;;  %vm6780_vm10 = vcmp.eq.s32.totalorder %v9550_v25, %v14575_v13 }
 0xf65   :  { %9140 = vmatpush.bf16.msk.msra.mxu3 %vm9139_vm14, %v15160_v0  ;;  %vm6506_vm14 = vcmp.eq.s32.totalorder %v9626_v33, %v14516_v46 }
 0xf66   :  { %vm9145_vm2 = vmpackc.low %vm6506_vm14, %vm6504_vm5  ;;  %vm15227_vm14 = vcmask 64512  }
 0xf67   :  { %9171 = vmatpush.bf16.msk.msrb.mxu2 %vm9170_vm3, %v15160_v0  ;;  %vm9176_vm5 = vmpackc.low %vm6792_vm9, %vm6790_vm0  ;;  %vm6786_vm3 = vcmp.eq.s32.totalorder %v9470_v16, %v14575_v13  ;;  %vm6770_vm0 = vcmp.eq.s32.totalorder %v9623_v32, %v14575_v13  ;;  %vm6772_vm9 = vcmp.eq.s32.totalorder %v9626_v33, %v14575_v13 }
 0xf69   :  { %9142 = vmatpush.bf16.msk.msra.mxu3 %vm9141_vm1, %v15160_v0  ;;  %vm6502_vm1 = vcmp.eq.s32.totalorder %v9661_v36, %v14516_v46  ;;  %v14718_v46 = vperm.slane %v14572_v53, 1 }
 0xf6a   :  { %vm9147_vm4 = vmpackc.low %vm6502_vm1, %vm6500_vm7  ;;  %vm6784_vm7 = vcmp.eq.s32.totalorder %v9512_v21, %v14575_v13 }
 0xf6b   :  { %9173 = vmatpush.bf16.msk.msrb.mxu2 %vm9172_vm6, %v15160_v0  ;;  %vm9180_vm1 = vmpackc.low %vm6784_vm7, %vm6782_vm8  ;;  %vm6778_vm6 = vcmp.eq.s32.totalorder %v9547_v24, %v14575_v13  ;;  %vm6765_vm8 = vcmp.eq.s32.totalorder %v9412_v6, %v14718_v46 }
 0xf6c   :  { %vm9182_vm13 = vmpackc.low %vm6780_vm10, %vm6778_vm6  ;;  %vm6761_vm6 = vcmp.eq.s32.totalorder %v9424_v10, %v14718_v46 }
 0xf6d   :  { %9144 = vmatpush.bf16.msk.msra.mxu3 %vm9143_vm11, %v15160_v0  ;;  %vm15226_vm11 = vcmask 1043456  }
 0xf6e   :  { %6902 = vmatmul.bf16.vlgmr.msrb.gmra.mxu2 %v9728_v43 }
 0xf6f   :  { %v6649_v3 = vpop.f32.mrf.mxu1 }
 0xf70   :  { %v6650_v42 = vadd.f32 %v6649_v3, %v14566_v52 }
 0xf71   :  { %9146 = vmatpush.bf16.msk.msra.mxu3 %vm9145_vm2, %v15160_v0  ;;  %vm6788_vm2 = vcmp.eq.s32.totalorder %v9473_v17, %v14575_v13 }
 0xf72   :  { %v6682_v61 = vpack.c.bf16 %v6650_v42, %v6650_v42  ;;  %vm9178_vm15 = vmpackc.low %vm6788_vm2, %vm6786_vm3  ;;  %vm6768_vm3 = vcmp.eq.s32.totalorder %v9661_v36, %v14575_v13 }
 0xf74   :  { %v6693_v41 = vsel %vm15226_vm11, %v6682_v61, 0 }
 0xf75   :  { %9148 = vmatpush.bf16.msk.msra.mxu3 %vm9147_vm4, %v15160_v0  ;;  %6705 = vmatpush.bf16.msrb.mxu0 %v6693_v41  ;;  %vm6774_vm4 = vcmp.eq.s32.totalorder %v9585_v28, %v14575_v13  ;;  %v14871_v41 = vld [vmem:[%s15064_s2 + $0xc8] sm:$0xff] }
 0xf77   :  { %v6651_v56 = vpop.f32.mrf.mxu1 }
 0xf78   :  { %6674 = vmatmul.bf16.vlgmr.msra.gmra.mxu3 %v9735_v44  ;;  %9155 = vmatmul.msk.bf16.vlgmr.msrb.gmra.mxu0 %vm15227_vm14, %v14671_v59  ;;  %vm6766_vm14 = vcmp.eq.s32.totalorder %v9658_v35, %v14575_v13  ;;  %v14916_v56 = vperm.slane %v14775_v37, 1 }
 0xf79   :  { %9175 = vmatpush.bf16.msk.msrb.mxu3 %vm9174_vm12, %v15160_v0  ;;  %vm6776_vm12 = vcmp.eq.s32.totalorder %v9588_v29, %v14575_v13  ;;  %vm9188_vm2 = vmpackc.low %vm6768_vm3, %vm6766_vm14  ;;  %vm6749_vm14 = vcmp.eq.s32.totalorder %v9539_v23, %v14718_v46 }
 0xf7a   :  { %vm9184_vm11 = vmpackc.low %vm6776_vm12, %vm6774_vm4  ;;  %vm6757_vm4 = vcmp.eq.s32.totalorder %v9467_v15, %v14718_v46 }
 0xf7d   :  { %9177 = vmatpush.bf16.msk.msrb.mxu3 %vm9176_vm5, %v15160_v0  ;;  %vm9186_vm5 = vmpackc.low %vm6772_vm9, %vm6770_vm0  ;;  %vm6753_vm0 = vcmp.eq.s32.totalorder %v9495_v19, %v14718_v46 }
 0xf7f   :  { %v6662_v45 = vpop.f32.mrf.mxu2 }
 0xf81   :  { %9179 = vmatpush.bf16.msk.msrb.mxu3 %vm9178_vm15, %v15160_v0  ;;  %vm6763_vm15 = vcmp.eq.s32.totalorder %v9409_v5, %v14718_v46 }
 0xf82   :  { %vm9190_vm7 = vmpackc.low %vm6765_vm8, %vm6763_vm15  ;;  %vm6745_vm15 = vcmp.eq.s32.totalorder %v9577_v27, %v14718_v46 }
 0xf83   :  { %9191 = vmatpush.bf16.msk.msra.mxu0 %vm9190_vm7, %v15160_v0  ;;  %vm6739_vm7 = vcmp.eq.s32.totalorder %v9612_v30, %v14718_v46 }
 0xf85   :  { %9181 = vmatpush.bf16.msk.msrb.mxu3 %vm9180_vm1, %v15160_v0  ;;  %vm6759_vm1 = vcmp.eq.s32.totalorder %v9421_v9, %v14718_v46 }
 0xf86   :  { %vm9192_vm10 = vmpackc.low %vm6761_vm6, %vm6759_vm1  ;;  %vm6741_vm1 = vcmp.eq.s32.totalorder %v9615_v31, %v14718_v46 }
 0xf87   :  { %v6664_v39 = vpop.f32.mrf.mxu2  ;;  %9193 = vmatpush.bf16.msk.msra.mxu0 %vm9192_vm10, %v15160_v0  ;;  %vm9202_vm6 = vmpackc.low %vm6741_vm1, %vm6739_vm7  ;;  %vm6735_vm10 = vcmp.eq.s32.totalorder %v9402_v2, %v14718_v46  ;;  %vm7027_vm7 = vcmp.eq.s32.totalorder %v9424_v10, %v14778_v57 }
 0xf89   :  { %9183 = vmatpush.bf16.msk.msrb.mxu3 %vm9182_vm13, %v15160_v0  ;;  %vm6755_vm13 = vcmp.eq.s32.totalorder %v9464_v14, %v14718_v46 }
 0xf8a   :  { %vm9194_vm12 = vmpackc.low %vm6757_vm4, %vm6755_vm13  ;;  %vm6737_vm13 = vcmp.eq.s32.totalorder %v9650_v34, %v14718_v46 }
 0xf8b   :  { %9195 = vmatpush.bf16.msk.msra.mxu0 %vm9194_vm12, %v15160_v0  ;;  %vm9204_vm4 = vmpackc.low %vm6737_vm13, %vm6735_vm10  ;;  %vm6795_vm12 = vcmp.eq.s32.totalorder %v9415_v7, %v14718_v46  ;;  %vm7021_vm10 = vcmp.eq.s32.totalorder %v9464_v14, %v14778_v57  ;;  %vm7023_vm13 = vcmp.eq.s32.totalorder %v9467_v15, %v14778_v57 }
 0xf8d   :  { %9185 = vmatpush.bf16.msk.msrb.mxu3 %vm9184_vm11, %v15160_v0  ;;  %vm6751_vm11 = vcmp.eq.s32.totalorder %v9492_v18, %v14718_v46 }
 0xf8e   :  { %vm9196_vm9 = vmpackc.low %vm6753_vm0, %vm6751_vm11  ;;  %vm6797_vm11 = vcmp.eq.s32.totalorder %v9418_v8, %v14718_v46  ;;  %vm7029_vm0 = vcmp.eq.s32.totalorder %v9409_v5, %v14778_v57 }
 0xf8f   :  { %9197 = vmatpush.bf16.msk.msra.mxu0 %vm9196_vm9, %v15160_v0  ;;  %vm7031_vm9 = vcmp.eq.s32.totalorder %v9412_v6, %v14778_v57 }
 0xf91   :  { %9187 = vmatpush.bf16.msk.msrb.mxu3 %vm9186_vm5, %v15160_v0  ;;  %vm6747_vm5 = vcmp.eq.s32.totalorder %v9536_v22, %v14718_v46 }
 0xf92   :  { %vm9198_vm3 = vmpackc.low %vm6749_vm14, %vm6747_vm5 }
 0xf93   :  { %9199 = vmatpush.bf16.msk.msra.mxu0 %vm9198_vm3, %v15160_v0  ;;  %vm9231_vm5 = vmpackc.low %vm7031_vm9, %vm7029_vm0  ;;  %vm15228_vm3 = vcmask 1043456  }
 0xf94   :  { %vm9206_vm14 = vmpackc.low %vm6797_vm11, %vm6795_vm12  ;;  %vm6787_vm12 = vcmp.eq.s32.totalorder %v9470_v16, %v14718_v46  ;;  %vm6789_vm11 = vcmp.eq.s32.totalorder %v9473_v17, %v14718_v46 }
 0xf95   :  { %9189 = vmatpush.bf16.msk.msrb.mxu3 %vm9188_vm2, %v15160_v0  ;;  %vm6743_vm2 = vcmp.eq.s32.totalorder %v9574_v26, %v14718_v46  ;;  %vm9235_vm0 = vmpackc.low %vm7023_vm13, %vm7021_vm10  ;;  %vm6781_vm10 = vcmp.eq.s32.totalorder %v9550_v25, %v14718_v46 }
 0xf96   :  { %vm9200_vm8 = vmpackc.low %vm6745_vm15, %vm6743_vm2  ;;  %vm6791_vm2 = vcmp.eq.s32.totalorder %v9427_v11, %v14718_v46  ;;  %vm6793_vm15 = vcmp.eq.s32.totalorder %v9430_v12, %v14718_v46 }
 0xf97   :  { %9201 = vmatpush.bf16.msk.msra.mxu0 %vm9200_vm8, %v15160_v0  ;;  %vm7025_vm8 = vcmp.eq.s32.totalorder %v9421_v9, %v14778_v57  ;;  %vm9210_vm9 = vmpackc.low %vm6789_vm11, %vm6787_vm12  ;;  %vm7009_vm12 = vcmp.eq.s32.totalorder %v9574_v26, %v14778_v57  ;;  %vm7011_vm11 = vcmp.eq.s32.totalorder %v9577_v27, %v14778_v57 }
 0xf98   :  { %6915 = vmatmul.bf16.vlgmr.msrb.gmra.mxu3 %v9735_v44  ;;  %vm9233_vm1 = vmpackc.low %vm7027_vm7, %vm7025_vm8  ;;  %vm7013_vm7 = vcmp.eq.s32.totalorder %v9536_v22, %v14778_v57 }
 0xf9b   :  { %9203 = vmatpush.bf16.msk.msra.mxu0 %vm9202_vm6, %v15160_v0  ;;  %vm9208_vm6 = vmpackc.low %vm6793_vm15, %vm6791_vm2  ;;  %vm6785_vm2 = vcmp.eq.s32.totalorder %v9512_v21, %v14718_v46 }
 0xf9f   :  { %9205 = vmatpush.bf16.msk.msra.mxu0 %vm9204_vm4, %v15160_v0  ;;  %vm15229_vm4 = vcmask 64512  }
 0xfa2   :  { %6928 = vmatmul.bf16.vlgmr.msra.gmra.mxu0 %v9728_v43 }
 0xfa3   :  { %9232 = vmatpush.bf16.msk.msrb.mxu0 %vm9231_vm5, %v15160_v0  ;;  %vm7017_vm5 = vcmp.eq.s32.totalorder %v9492_v18, %v14778_v57 }
 0xfa7   :  { %9234 = vmatpush.bf16.msk.msrb.mxu0 %vm9233_vm1, %v15160_v0  ;;  %vm7015_vm1 = vcmp.eq.s32.totalorder %v9539_v23, %v14778_v57 }
 0xfa8   :  { %vm9239_vm13 = vmpackc.low %vm7015_vm1, %vm7013_vm7 }
 0xfab   :  { %9236 = vmatpush.bf16.msk.msrb.mxu0 %vm9235_vm0, %v15160_v0  ;;  %vm6775_vm0 = vcmp.eq.s32.totalorder %v9585_v28, %v14718_v46 }
 0xfdb   :  { %v6454_v47 = vpop.f32.mrf.mxu3 }
 0xfdc   :  { %v14731_v55 = vadd.f32 %v6454_v47, %v14531_v40 }
 0xfe3   :  { %v6456_v48 = vpop.f32.mrf.mxu3 }
 0xfe4   :  { %v14748_v40 = vadd.f32 %v6456_v48, %v14544_v49  ;;  %v15242_v48 = vld [vmem:[#allocation11_spill] sm:$0xff] }
 0xff1   :  { %v14769_v53 = vpop.f32.mrf.mxu2 }
 0xff5   :  { %v6707_v49 = vpop.f32.mrf.mxu0 }
 0xff6   :  { %v14766_v52 = vadd.f32 %v6707_v49, %v14596_v4  ;;  %v15243_v49 = vld [vmem:[#allocation12_spill] sm:$0xff] }
 0xff9   :  { %v6905_v54 = vpop.f32.mrf.mxu2 }
 0xffb   :  { %v6675_v13 = vpop.f32.mrf.mxu3 }
 0xffc   :  { %v6676_v50 = vadd.f32 %v6675_v13, %v6662_v45 }
 0xffd   :  { %v14922_v45 = vpop.f32.mrf.mxu0 }
 0xffe   :  { %v6683_v1 = vpack.c.bf16 %v6676_v50, %v6676_v50 }
0x1000   :  { %v6696_v62 = vsel %vm15228_vm3, %v6683_v1, 0  ;;  %vm6783_vm3 = vcmp.eq.s32.totalorder %v9509_v20, %v14718_v46  ;;  %v15246_v1 = vld [vmem:[#allocation15_spill] sm:$0xff] }
0x1001   :  { %6719 = vmatpush.bf16.msrb.mxu1 %v6696_v62  ;;  %vm9212_vm8 = vmpackc.low %vm6785_vm2, %vm6783_vm3  ;;  %vm7005_vm3 = vcmp.eq.s32.totalorder %v9612_v30, %v14778_v57  ;;  %vm7007_vm2 = vcmp.eq.s32.totalorder %v9615_v31, %v14778_v57 }
0x1002   :  { %vm9243_vm7 = vmpackc.low %vm7007_vm2, %vm7005_vm3  ;;  %vm7057_vm3 = vcmp.eq.s32.totalorder %v9427_v11, %v14778_v57  ;;  %vm7059_vm2 = vcmp.eq.s32.totalorder %v9430_v12, %v14778_v57 }
0x1003   :  { %v6677_v4 = vpop.f32.mrf.mxu3 }
0x1004   :  { %9156 = vmatmul.msk.bf16.vlgmr.msrb.gmra.mxu1 %vm15229_vm4, %v14671_v59 }
0x1005   :  { %9207 = vmatpush.bf16.msk.msra.mxu1 %vm9206_vm14, %v15160_v0  ;;  %vm7019_vm14 = vcmp.eq.s32.totalorder %v9495_v19, %v14778_v57 }
0x1006   :  { %vm9237_vm15 = vmpackc.low %vm7019_vm14, %vm7017_vm5 }
0x1007   :  { %9238 = vmatpush.bf16.msk.msrb.mxu0 %vm9237_vm15, %v15160_v0  ;;  %vm9241_vm5 = vmpackc.low %vm7011_vm11, %vm7009_vm12  ;;  %vm6771_vm15 = vcmp.eq.s32.totalorder %v9623_v32, %v14718_v46  ;;  %vm7061_vm11 = vcmp.eq.s32.totalorder %v9415_v7, %v14778_v57 }
0x1009   :  { %9209 = vmatpush.bf16.msk.msra.mxu1 %vm9208_vm6, %v15160_v0  ;;  %vm6779_vm6 = vcmp.eq.s32.totalorder %v9547_v24, %v14718_v46 }
0x100a   :  { %vm9214_vm4 = vmpackc.low %vm6781_vm10, %vm6779_vm6  ;;  %vm7001_vm6 = vcmp.eq.s32.totalorder %v9402_v2, %v14778_v57  ;;  %vm7003_vm10 = vcmp.eq.s32.totalorder %v9650_v34, %v14778_v57 }
0x100b   :  { %9240 = vmatpush.bf16.msk.msrb.mxu0 %vm9239_vm13, %v15160_v0  ;;  %vm6767_vm13 = vcmp.eq.s32.totalorder %v9658_v35, %v14718_v46  ;;  %vm9245_vm12 = vmpackc.low %vm7003_vm10, %vm7001_vm6  ;;  %vm7049_vm10 = vcmp.eq.s32.totalorder %v9509_v20, %v14778_v57 }
0x100d   :  { %9211 = vmatpush.bf16.msk.msra.mxu1 %vm9210_vm9, %v15160_v0  ;;  %vm6777_vm9 = vcmp.eq.s32.totalorder %v9588_v29, %v14718_v46 }
0x100e   :  { %vm9216_vm14 = vmpackc.low %vm6777_vm9, %vm6775_vm0  ;;  %vm7063_vm0 = vcmp.eq.s32.totalorder %v9418_v8, %v14778_v57 }
0x100f   :  { %9242 = vmatpush.bf16.msk.msrb.mxu0 %vm9241_vm5, %v15160_v0  ;;  %vm9247_vm5 = vmpackc.low %vm7063_vm0, %vm7061_vm11  ;;  %vm7047_vm11 = vcmp.eq.s32.totalorder %v9550_v25, %v14778_v57 }
0x1011   :  { %9213 = vmatpush.bf16.msk.msra.mxu1 %vm9212_vm8, %v15160_v0  ;;  %vm6773_vm8 = vcmp.eq.s32.totalorder %v9626_v33, %v14718_v46 }
0x1012   :  { %vm9218_vm1 = vmpackc.low %vm6773_vm8, %vm6771_vm15  ;;  %vm15231_vm8 = vcmask 64512  }
0x1013   :  { %9244 = vmatpush.bf16.msk.msrb.mxu0 %vm9243_vm7, %v15160_v0  ;;  %vm9249_vm15 = vmpackc.low %vm7059_vm2, %vm7057_vm3  ;;  %vm7053_vm7 = vcmp.eq.s32.totalorder %v9470_v16, %v14778_v57  ;;  %vm7037_vm3 = vcmp.eq.s32.totalorder %v9623_v32, %v14778_v57  ;;  %vm7039_vm2 = vcmp.eq.s32.totalorder %v9626_v33, %v14778_v57 }
0x1015   :  { %9215 = vmatpush.bf16.msk.msra.mxu1 %vm9214_vm4, %v15160_v0  ;;  %vm6769_vm4 = vcmp.eq.s32.totalorder %v9661_v36, %v14718_v46 }
0x1016   :  { %vm9220_vm9 = vmpackc.low %vm6769_vm4, %vm6767_vm13  ;;  %vm7051_vm13 = vcmp.eq.s32.totalorder %v9512_v21, %v14778_v57 }
0x1017   :  { %9246 = vmatpush.bf16.msk.msrb.mxu0 %vm9245_vm12, %v15160_v0  ;;  %vm9253_vm4 = vmpackc.low %vm7051_vm13, %vm7049_vm10  ;;  %vm7045_vm12 = vcmp.eq.s32.totalorder %v9547_v24, %v14778_v57  ;;  %vm7032_vm10 = vcmp.eq.s32.totalorder %v9412_v6, %v14916_v56 }
0x1018   :  { %vm9255_vm0 = vmpackc.low %vm7047_vm11, %vm7045_vm12  ;;  %vm7028_vm12 = vcmp.eq.s32.totalorder %v9424_v10, %v14916_v56 }
0x1019   :  { %9217 = vmatpush.bf16.msk.msra.mxu1 %vm9216_vm14, %v15160_v0  ;;  %vm15230_vm14 = vcmask 1043456  }
0x101a   :  { %7169 = vmatmul.bf16.vlgmr.msrb.gmra.mxu0 %v9728_v43 }
0x101b   :  { %v6916_v63 = vpop.f32.mrf.mxu3 }
0x101c   :  { %v6917_v3 = vadd.f32 %v6916_v63, %v14769_v53  ;;  %v15244_v53 = vld [vmem:[#allocation13_spill] sm:$0xff]  ;;  %v15247_v63 = vld [vmem:[#allocation16_spill] sm:$0xff] }
0x101d   :  { %9219 = vmatpush.bf16.msk.msra.mxu1 %vm9218_vm1, %v15160_v0  ;;  %vm7055_vm1 = vcmp.eq.s32.totalorder %v9473_v17, %v14778_v57 }
0x101e   :  { %v6949_v42 = vpack.c.bf16 %v6917_v3, %v6917_v3  ;;  %vm9251_vm6 = vmpackc.low %vm7055_vm1, %vm7053_vm7  ;;  %vm7035_vm7 = vcmp.eq.s32.totalorder %v9661_v36, %v14778_v57 }
0x101f   :  { %v6929_v46 = vpop.f32.mrf.mxu0 }
0x1020   :  { %v6960_v61 = vsel %vm15230_vm14, %v6949_v42, 0  ;;  %v15248_v42 = vld [vmem:[#allocation17_spill] sm:$0xff] }
0x1021   :  { %9221 = vmatpush.bf16.msk.msra.mxu1 %vm9220_vm9, %v15160_v0  ;;  %6972 = vmatpush.bf16.msra.mxu2 %v6960_v61  ;;  %vm7041_vm9 = vcmp.eq.s32.totalorder %v9585_v28, %v14778_v57 }
0x1023   :  { %v6918_v59 = vpop.f32.mrf.mxu3 }
0x1024   :  { %6941 = vmatmul.bf16.vlgmr.msra.gmra.mxu1 %v9735_v44  ;;  %9228 = vmatmul.msk.bf16.vlgmr.msra.gmra.mxu2 %vm15231_vm8, %v14871_v41  ;;  %vm7033_vm8 = vcmp.eq.s32.totalorder %v9658_v35, %v14778_v57 }
0x1025   :  { %9248 = vmatpush.bf16.msk.msrb.mxu1 %vm9247_vm5, %v15160_v0  ;;  %vm7043_vm5 = vcmp.eq.s32.totalorder %v9588_v29, %v14778_v57  ;;  %vm9261_vm1 = vmpackc.low %vm7035_vm7, %vm7033_vm8  ;;  %vm7016_vm8 = vcmp.eq.s32.totalorder %v9539_v23, %v14916_v56  ;;  %v15245_v57 = vld [vmem:[#allocation14_spill] sm:$0xff] }
0x1026   :  { %vm9257_vm14 = vmpackc.low %vm7043_vm5, %vm7041_vm9  ;;  %vm7024_vm9 = vcmp.eq.s32.totalorder %v9467_v15, %v14916_v56 }
0x1027   :  { %v6931_v39 = vpop.f32.mrf.mxu0 }
0x1029   :  { %9250 = vmatpush.bf16.msk.msrb.mxu1 %vm9249_vm15, %v15160_v0  ;;  %vm9259_vm15 = vmpackc.low %vm7039_vm2, %vm7037_vm3  ;;  %vm7020_vm3 = vcmp.eq.s32.totalorder %v9495_v19, %v14916_v56  ;;  %v7264_v19 = vld [vmem:[%s15065_s3] sm:$0xff] }
0x102d   :  { %9252 = vmatpush.bf16.msk.msrb.mxu1 %vm9251_vm6, %v15160_v0  ;;  %vm7030_vm6 = vcmp.eq.s32.totalorder %v9409_v5, %v14916_v56 }
0x102e   :  { %vm9263_vm13 = vmpackc.low %vm7032_vm10, %vm7030_vm6  ;;  %vm7012_vm6 = vcmp.eq.s32.totalorder %v9577_v27, %v14916_v56 }
0x102f   :  { %9264 = vmatpush.bf16.msk.msrb.mxu2 %vm9263_vm13, %v15160_v0  ;;  %vm7006_vm13 = vcmp.eq.s32.totalorder %v9612_v30, %v14916_v56 }
0x1031   :  { %9254 = vmatpush.bf16.msk.msrb.mxu1 %vm9253_vm4, %v15160_v0  ;;  %vm7026_vm4 = vcmp.eq.s32.totalorder %v9421_v9, %v14916_v56 }
0x1032   :  { %vm9265_vm11 = vmpackc.low %vm7028_vm12, %vm7026_vm4  ;;  %vm7008_vm4 = vcmp.eq.s32.totalorder %v9615_v31, %v14916_v56  ;;  %v15238_v31 = vld [vmem:[#allocation7_spill] sm:$0xff] }
0x1033   :  { %9266 = vmatpush.bf16.msk.msrb.mxu2 %vm9265_vm11, %v15160_v0  ;;  %vm9275_vm12 = vmpackc.low %vm7008_vm4, %vm7006_vm13  ;;  %vm7002_vm11 = vcmp.eq.s32.totalorder %v9402_v2, %v14916_v56  ;;  %vm7050_vm4 = vcmp.eq.s32.totalorder %v9509_v20, %v14916_v56 }
0x1035   :  { %9256 = vmatpush.bf16.msk.msrb.mxu1 %vm9255_vm0, %v15160_v0  ;;  %vm7022_vm0 = vcmp.eq.s32.totalorder %v9464_v14, %v14916_v56 }
0x1036   :  { %vm9267_vm5 = vmpackc.low %vm7024_vm9, %vm7022_vm0  ;;  %vm7004_vm0 = vcmp.eq.s32.totalorder %v9650_v34, %v14916_v56 }
0x1037   :  { %9268 = vmatpush.bf16.msk.msrb.mxu2 %vm9267_vm5, %v15160_v0  ;;  %vm9277_vm9 = vmpackc.low %vm7004_vm0, %vm7002_vm11  ;;  %vm7062_vm5 = vcmp.eq.s32.totalorder %v9415_v7, %v14916_v56  ;;  %v7280_v7 = vld [vmem:[%s15066_s4] sm:$0xff]  ;;  %vm7046_vm0 = vcmp.eq.s32.totalorder %v9547_v24, %v14916_v56  ;;  %v9329_v24 = vld [vmem:[%s15064_s2 + $0xd0] sm:$0xff]  ;;  %s9365_s2 = smov [#allocation2]  }
0x1038   :  { %s7321_s28 = sshll.u32 %s9365_s2, 4  ;;  %s7322_s28 = int_to_ptr.vmem [resolvable:$true] %s7321_s28 }
0x1039   :  { %9258 = vmatpush.bf16.msk.msrb.mxu1 %vm9257_vm14, %v15160_v0  ;;  %vm7018_vm14 = vcmp.eq.s32.totalorder %v9492_v18, %v14916_v56 }
0x103a   :  { %vm9269_vm2 = vmpackc.low %vm7020_vm3, %vm7018_vm14  ;;  %vm7064_vm14 = vcmp.eq.s32.totalorder %v9418_v8, %v14916_v56 }
0x103b   :  { %9270 = vmatpush.bf16.msk.msrb.mxu2 %vm9269_vm2, %v15160_v0  ;;  %vm9279_vm3 = vmpackc.low %vm7064_vm14, %vm7062_vm5  ;;  %vm15232_vm2 = vcmask 1043456   ;;  %vm7042_vm14 = vcmp.eq.s32.totalorder %v9585_v28, %v14916_v56  ;;  %v15236_v28 = vld [vmem:[#allocation6_spill] sm:$0xff] }
0x103d   :  { %9260 = vmatpush.bf16.msk.msrb.mxu1 %vm9259_vm15, %v15160_v0  ;;  %vm7014_vm15 = vcmp.eq.s32.totalorder %v9536_v22, %v14916_v56  ;;  %v9364_v22 = vmov 0  }
0x103e   :  { %vm9271_vm7 = vmpackc.low %vm7016_vm8, %vm7014_vm15  ;;  %vm7058_vm15 = vcmp.eq.s32.totalorder %v9427_v11, %v14916_v56  ;;  %vm7060_vm8 = vcmp.eq.s32.totalorder %v9430_v12, %v14916_v56  ;;  %9335 = vset.pattern.permute.xlu0 %v9364_v22  ;;  %9336 = vset.pattern.permute.xlu1 %v9364_v22  ;;  %v7265_v11 = vld [vmem:[%s15065_s3 + $0x8] sm:$0xff] }
0x103f   :  { %9272 = vmatpush.bf16.msk.msrb.mxu2 %vm9271_vm7, %v15160_v0  ;;  %vm9281_vm7 = vmpackc.low %vm7060_vm8, %vm7058_vm15  ;;  %7268 = vperm.xlu0 %9335, %v7264_v19   ;;  %v7281_v12 = vld [vmem:[%s15066_s4 + $0x8] sm:$0xff]  ;;  %vm7038_vm15 = vcmp.eq.s32.totalorder %v9623_v32, %v14916_v56  ;;  %vm7040_vm8 = vcmp.eq.s32.totalorder %v9626_v33, %v14916_v56  ;;  %v15239_v33 = vld [vmem:[#allocation8_spill] sm:$0xff] }
0x1040   :  { %7284 = vperm.xlu1 %9336, %v7280_v7   ;;  %v15254_v19 = vld [vmem:[#allocation24_spill] sm:$0xff] }
0x1041   :  { %9262 = vmatpush.bf16.msk.msrb.mxu1 %vm9261_vm1, %v15160_v0  ;;  %vm7010_vm1 = vcmp.eq.s32.totalorder %v9574_v26, %v14916_v56 }
0x1042   :  { %vm9273_vm10 = vmpackc.low %vm7012_vm6, %vm7010_vm1  ;;  %vm15233_vm1 = vcmask 64512   ;;  %vm7054_vm6 = vcmp.eq.s32.totalorder %v9470_v16, %v14916_v56 }
0x1043   :  { %9274 = vmatpush.bf16.msk.msrb.mxu2 %vm9273_vm10, %v15160_v0  ;;  %vm7056_vm10 = vcmp.eq.s32.totalorder %v9473_v17, %v14916_v56 }
0x1044   :  { %7182 = vmatmul.bf16.vlgmr.msrb.gmra.mxu1 %v9735_v44  ;;  %vm9283_vm13 = vmpackc.low %vm7056_vm10, %vm7054_vm6  ;;  %vm7036_vm6 = vcmp.eq.s32.totalorder %v9661_v36, %v14916_v56 }
0x1047   :  { %9276 = vmatpush.bf16.msk.msrb.mxu2 %vm9275_vm12, %v15160_v0  ;;  %vm7052_vm12 = vcmp.eq.s32.totalorder %v9512_v21, %v14916_v56  ;;  %7273 = vperm.xlu0 %9335, %v7265_v11  }
0x1048   :  { %vm9285_vm11 = vmpackc.low %vm7052_vm12, %vm7050_vm4  ;;  %7289 = vperm.xlu1 %9336, %v7281_v12   ;;  %vm15235_vm4 = vcmask 64512  }
0x104b   :  { %9278 = vmatpush.bf16.msk.msrb.mxu2 %vm9277_vm9, %v15160_v0  ;;  %vm7048_vm9 = vcmp.eq.s32.totalorder %v9550_v25, %v14916_v56 }
0x104c   :  { %vm9287_vm5 = vmpackc.low %vm7048_vm9, %vm7046_vm0 }
0x104e   :  { %7195 = vmatmul.bf16.vlgmr.msrb.gmra.mxu2 %v9728_v43 }
0x1081   :  { %v6721_v47 = vpop.f32.mrf.mxu1 }
0x1082   :  { %v14931_v5 = vadd.f32 %v6721_v47, %v14731_v55  ;;  %v15241_v55 = vld [vmem:[#allocation10_spill] sm:$0xff] }
0x1089   :  { %v6723_v6 = vpop.f32.mrf.mxu1 }
0x108a   :  { %v14944_v9 = vadd.f32 %v6723_v6, %v14748_v40  ;;  %v15251_v6 = vld [vmem:[#allocation20_spill] sm:$0xff] }
0x1097   :  { %v7170_v10 = vpop.f32.mrf.mxu0 }
0x109f   :  { %v7172_v8 = vpop.f32.mrf.mxu0 }
0x10a1   :  { %v6942_v14 = vpop.f32.mrf.mxu1 }
0x10a2   :  { %v6943_v15 = vadd.f32 %v6942_v14, %v6929_v46  ;;  %v15252_v14 = vld [vmem:[#allocation21_spill] sm:$0xff] }
0x10a4   :  { %v6950_v18 = vpack.c.bf16 %v6943_v15, %v6943_v15 }
0x10a6   :  { %v6963_v2 = vsel %vm15232_vm2, %v6950_v18, 0  ;;  %v15253_v18 = vld [vmem:[#allocation22_spill] sm:$0xff] }
0x10a7   :  { %6986 = vmatpush.bf16.msra.mxu3 %v6963_v2  ;;  %v6974_v26 = vpop.f32.mrf.mxu2 }
0x10a8   :  { %v6993_v12 = vadd.f32 %v6974_v26, %v14766_v52 }
0x10a9   :  { %v6944_v23 = vpop.f32.mrf.mxu1 }
0x10aa   :  { %9229 = vmatmul.msk.bf16.vlgmr.msra.gmra.mxu3 %vm15233_vm1, %v14871_v41  ;;  %vm7034_vm1 = vcmp.eq.s32.totalorder %v9658_v35, %v14916_v56  ;;  %v15240_v35 = vld [vmem:[#allocation9_spill] sm:$0xff]  ;;  %v15249_v41 = vld [vmem:[#allocation18_spill] sm:$0xff] }
0x10ab   :  { %9280 = vmatpush.bf16.msk.msrb.mxu3 %vm9279_vm3, %v15160_v0  ;;  %vm7044_vm3 = vcmp.eq.s32.totalorder %v9588_v29, %v14916_v56  ;;  %vm9293_vm10 = vmpackc.low %vm7036_vm6, %vm7034_vm1  ;;  %v15237_v29 = vld [vmem:[#allocation5_spill] sm:$0xff]  ;;  %v15250_v56 = vld [vmem:[#allocation19_spill] sm:$0xff] }
0x10ac   :  { %vm9289_vm2 = vmpackc.low %vm7044_vm3, %vm7042_vm14  ;;  %v573_v30 = vadd.f32 %v15237_v29, %v15236_v28 }
0x10ae   :  { %v854_v32 = vadd.f32 %v15238_v31, %v573_v30 }
0x10af   :  { %9282 = vmatpush.bf16.msk.msrb.mxu3 %vm9281_vm7, %v15160_v0  ;;  %vm9291_vm7 = vmpackc.low %vm7040_vm8, %vm7038_vm15  ;;  %v6976_v27 = vpop.f32.mrf.mxu2 }
0x10b0   :  { %v1121_v34 = vadd.f32 %v15239_v33, %v854_v32 }
0x10b1   :  { %v7269_v23 = vpop.permute.xlu0 %7268 }
0x10b2   :  { %v1388_v36 = vadd.f32 %v15240_v35, %v1121_v34 }
0x10b3   :  { %9284 = vmatpush.bf16.msk.msrb.mxu3 %vm9283_vm13, %v15160_v0  ;;  %vm15234_vm13 = vcmask 1043456  }
0x10b4   :  { %vm15256_vm12 = vmmov %vm15234_vm13 }
0x10b7   :  { %9286 = vmatpush.bf16.msk.msrb.mxu3 %vm9285_vm11, %v15160_v0  ;;  %vm15257_vm11 = vmmov %vm15235_vm4 }
0x10b9   :  { %v7274_v34 = vpop.permute.xlu0 %7273 }
0x10bb   :  { %9288 = vmatpush.bf16.msk.msrb.mxu3 %vm9287_vm5, %v15160_v0 }
0x10bf   :  { %9290 = vmatpush.bf16.msk.msrb.mxu3 %vm9289_vm2, %v15160_v0 }
0x10c1   :  { %v7183_v16 = vpop.f32.mrf.mxu1 }
0x10c2   :  { %v7184_v17 = vadd.f32 %v7183_v16, %v7170_v10 }
0x10c3   :  { %9292 = vmatpush.bf16.msk.msrb.mxu3 %vm9291_vm7, %v15160_v0 }
0x10c4   :  { %v7216_v20 = vpack.c.bf16 %v7184_v17, %v7184_v17  ;;  %v7285_v17 = vpop.permute.xlu1 %7284 }
0x10c6   :  { %v7227_v21 = vsel %vm15234_vm13, %v7216_v20, 0 }
0x10c7   :  { %9294 = vmatpush.bf16.msk.msrb.mxu3 %vm9293_vm10, %v15160_v0  ;;  %7239 = vmatpush.bf16.msra.mxu0 %v7227_v21  ;;  %v1655_v0 = vadd.f32 %v15241_v55, %v1388_v36 }
0x10c9   :  { %v7185_v25 = vpop.f32.mrf.mxu1  ;;  %v1922_v40 = vadd.f32 %v15242_v48, %v1655_v0 }
0x10ca   :  { %7208 = vmatmul.bf16.vlgmr.msrb.gmra.mxu3 %v9735_v44  ;;  %9301 = vmatmul.msk.bf16.vlgmr.msra.gmra.mxu0 %vm15235_vm4, %v9329_v24 }
0x10cb   :  { %v2189_v44 = vadd.f32 %v15243_v49, %v1922_v40 }
0x10cc   :  { %v7290_v26 = vpop.permute.xlu1 %7289 }
0x10cd   :  { %v2456_v37 = vadd.f32 %v15244_v53, %v2189_v44 }
0x10cf   :  { %v2723_v50 = vadd.f32 %v15245_v57, %v2456_v37 }
0x10d1   :  { %v7196_v43 = vpop.f32.mrf.mxu2  ;;  %v2990_v62 = vadd.f32 %v15246_v1, %v2723_v50 }
0x10d3   :  { %v3257_v3 = vadd.f32 %v15247_v63, %v2990_v62 }
0x10d5   :  { %v3524_v61 = vadd.f32 %v15248_v42, %v3257_v3 }
0x10d7   :  { %v3791_v59 = vadd.f32 %v15249_v41, %v3524_v61 }
0x10d9   :  { %v7198_v13 = vpop.f32.mrf.mxu2  ;;  %v4058_v46 = vadd.f32 %v15250_v56, %v3791_v59 }
0x10db   :  { %v4325_v10 = vadd.f32 %v15251_v6, %v4058_v46 }
0x10dd   :  { %v4592_v15 = vadd.f32 %v15252_v14, %v4325_v10 }
0x10df   :  { %v4859_v2 = vadd.f32 %v15253_v18, %v4592_v15 }
0x10e1   :  { %v5126_v7 = vadd.f32 %v15254_v19, %v4859_v2 }
0x112d   :  { %v6988_v54 = vpop.f32.mrf.mxu3 }
0x112e   :  { %v6994_v4 = vadd.f32 %v6988_v54, %v14931_v5  ;;  %v15255_v5 = vld [vmem:[#allocation26_spill] sm:$0xff] }
0x112f   :  { %v5393_v8 = vadd.f32 %v15255_v5, %v5126_v7 }
0x1131   :  { %v5660_v22 = vadd.f32 %v14110_v58, %v5393_v8 }
0x1133   :  { %v5927_v11 = vadd.f32 %v14315_v60, %v5660_v22 }
0x1135   :  { %v6990_v39 = vpop.f32.mrf.mxu3 }
0x1136   :  { %v6996_v47 = vadd.f32 %v6990_v39, %v14944_v9  ;;  %v6194_v9 = vadd.f32 %v14522_v51, %v5927_v11 }
0x1138   :  { %v6461_v21 = vadd.f32 %v14715_v38, %v6194_v9 }
0x113a   :  { %v6728_v28 = vadd.f32 %v14922_v45, %v6461_v21  ;;  %v15258_v45 = vlaneseq }
0x113c   :  { %v6995_v31 = vadd.f32 %v6976_v27, %v6728_v28  ;;  %v7302_v27 = vand.u32 127, %v15258_v45 }
0x113e   :  { %v7303_v48 = vadd.s32 128, %v7302_v27 }
0x1140   :  { %vm7308_vm0 = vcmp.lt.s32.totalorder %v7303_v48, 160 }
0x1147   :  { %v7241_v16 = vpop.f32.mrf.mxu0 }
0x1148   :  { %v7260_v20 = vadd.f32 %v7241_v16, %v6993_v12 }
0x114a   :  { %v7276_v25 = vmul.f32 %v7269_v23, %v7260_v20 }
0x114c   :  { %v7292_v29 = vadd.f32 %v7285_v17, %v7276_v25 }
0x114d   :  { %v7209_v30 = vpop.f32.mrf.mxu3 }
0x114e   :  { %v7296_v32 = vmax.f32 %v7292_v29, 0.0  ;;  %v7210_v58 = vadd.f32 %v7209_v30, %v7196_v43 }
0x114f   :  { %v7243_v33 = vpop.f32.mrf.mxu0 }
0x1150   :  { %7313 = vst [vmem:[#allocation2] sm:$0xff] %v7296_v32  ;;  %v7217_v60 = vpack.c.bf16 %v7210_v58, %v7210_v58  ;;  %v7262_v52 = vadd.f32 %v7243_v33, %v6995_v31 }
0x1152   :  { %v7230_v35 = vsel %vm15256_vm12, %v7217_v60, 0  ;;  %v7278_v51 = vmul.f32 %v7274_v34, %v7262_v52 }
0x1153   :  { %7253 = vmatpush.bf16.msra.mxu1 %v7230_v35 }
0x1154   :  { %v7294_v36 = vadd.f32 %v7290_v26, %v7278_v51 }
0x1155   :  { %v7211_v38 = vpop.f32.mrf.mxu3 }
0x1156   :  { %v7298_v55 = vmax.f32 %v7294_v36, 0.0  ;;  %9302 = vmatmul.msk.bf16.vlgmr.msra.gmra.mxu1 %vm15257_vm11, %v9329_v24 }
0x1158   :  { %7315 = vst [vmem:[#allocation2 + $0x10] sm:$0xff] %v7298_v55 }
0x11d3   :  { %v7255_v0 = vpop.f32.mrf.mxu1 }
0x11d4   :  { %v7261_v43 = vadd.f32 %v7255_v0, %v6994_v4 }
0x11d6   :  { %v7277_v40 = vmul.f32 %v7269_v23, %v7261_v43 }
0x11d8   :  { %v7293_v49 = vadd.f32 %v7285_v17, %v7277_v40 }
0x11da   :  { %v7297_v44 = vmax.f32 %v7293_v49, 0.0 }
0x11db   :  { %v7257_v53 = vpop.f32.mrf.mxu1 }
0x11dc   :  { %v7310_v37 = vsel %vm7308_vm0, %v7297_v44, 0.0  ;;  %v7263_v13 = vadd.f32 %v7257_v53, %v6996_v47 }
0x11dd   :  { %7314 = vst [vmem:[#allocation2 + $0x8] sm:$0xff] %v7310_v37 }
0x11de   :  { %v7279_v57 = vmul.f32 %v7274_v34, %v7263_v13 }
0x11e0   :  { %v7295_v24 = vadd.f32 %v7290_v26, %v7279_v57 }
0x11e2   :  { %v7299_v50 = vmax.f32 %v7295_v24, 0.0 }
0x11e4   :  { %v7312_v1 = vsel %vm7308_vm0, %v7299_v50, 0.0 }
0x11e5   :  { %7316 = vst [vmem:[#allocation2 + $0x18] sm:$0xff] %v7312_v1 }
0x11e6   :  { %7329 = dma.vmem_to_hbm [thread:$0]  %s7322_s28, 512, %s7324_s6, [#allocation3], %s9366_s7, %s9366_s7, %s9367_s8  }
0x11e7   :  { %9361 = dma.done.wait [#allocation3], 512  }
0x11e8   :  { %9362 = vsyncadd [#allocation3], 4294966784 }
0x11e9   :  { %7334 = vsyncpa [#allocation3], 1 }

</bundles_post_ra>
